<compile_context>
chip_gen: v5e
topology: v5e:2x2
jax: 0.10.0
libtpu: 0.0.40
codegen_flags: <defaults>
</compile_context>

<pallas_src>
import functools

import numpy as np
import jax
import jax.numpy as jnp
from jax.experimental import pallas as pl
from jax.experimental.pallas import tpu as pltpu

_COMPILER_PARAMS_CLS = getattr(pltpu, "CompilerParams", None)
_VMEM_LIMIT_BYTES = 32 * 1024 * 1024   # v7x-safe scoped budget (64 MiB physical)


def _mosaic_params(**kw):
    if _COMPILER_PARAMS_CLS is None:
        return None
    return _COMPILER_PARAMS_CLS(vmem_limit_bytes=_VMEM_LIMIT_BYTES, **kw)


def _bspec(block_shape, index_map, single_buffered=False):
    """BlockSpec helper; grid-invariant operands get Buffered(1)."""
    if single_buffered and hasattr(pl, "Buffered"):
        try:
            return pl.BlockSpec(block_shape, index_map,
                                pipeline_mode=pl.Buffered(1))
        except TypeError:
            pass
    return pl.BlockSpec(block_shape, index_map)


def _leaky(x, slope):
    return jnp.where(x >= 0.0, x, jnp.float32(slope) * x)


# ----------------------------------------------------------------------------
# Pallas kernels
# ----------------------------------------------------------------------------
def _enc_conv_kernel(y_ref, w_ref, b_ref, o_ref, *, kc, slope):
    """Fused stride-2 conv + bias + LeakyReLU for one (branch, batch) image.

    y_ref : (H2, W2, 4*ic) bf16  space-to-depth of the zero-padded NHWC input
    w_ref : (kc*kc, oc, 4*ic) bf16  per-tap weights (stride folded into channels)
    b_ref : (1, oc) f32
    o_ref : (oh, ow, oc) bf16
    """
    oh, ow, oc = o_ref.shape
    acc = jnp.zeros((oh, ow, oc), jnp.float32)
    for a in range(kc):
        for b in range(kc):
            tap = y_ref[a:a + oh, b:b + ow, :]                 # (oh, ow, 4ic)
            w_t = jnp.broadcast_to(w_ref[a * kc + b],
                                   (oh,) + w_ref.shape[1:])    # (oh, oc, 4ic)
            acc = acc + jnp.einsum("hwk,hnk->hwn", tap, w_t,
                                   preferred_element_type=jnp.float32)
    acc = _leaky(acc + b_ref[...], slope)
    o_ref[...] = acc.astype(o_ref.dtype)


def _dec_conv_kernel(x_ref, s_ref, w_ref, b_ref, o_ref, vp_ref, *,
                     kc, pad_v, starts, slope):
    """Fused skip-add + nearest-2x-upsample + stride-1 conv + bias + LeakyReLU.

    x_ref, s_ref : (hv, wv, c) bf16  low-res input and skip connection
    w_ref        : (4, kc*kc, oc2, c) bf16  per-output-parity collapsed weights
    b_ref        : (1, 1, oc2) f32
    o_ref        : (hv, wv, 4*oc2) bf16  four parity planes stacked on lanes
    vp_ref       : VMEM scratch (hv+2*pad_v, wv+2*pad_v, c)
    """
    hv, wv, cin = x_ref.shape
    oc2 = o_ref.shape[-1] // 4
    # skip connection fused in; zero-padded low-res sum lives only in VMEM
    vp_ref[...] = jnp.zeros(vp_ref.shape, vp_ref.dtype)
    vp_ref[pad_v:pad_v + hv, pad_v:pad_v + wv, :] = (
        x_ref[...] + s_ref[...]).astype(vp_ref.dtype)
    for cls in range(4):                       # output parity (row, col)
        pr, ps = cls // 2, cls % 2
        r0 = starts[pr] + pad_v
        c0 = starts[ps] + pad_v
        acc = jnp.zeros((hv, wv, oc2), jnp.float32)
        for a in range(kc):
            for b in range(kc):
                tap = vp_ref[r0 + a:r0 + a + hv, c0 + b:c0 + b + wv, :]
                w_t = jnp.broadcast_to(w_ref[cls, a * kc + b], (hv, oc2, cin))
                acc = acc + jnp.einsum("hwk,hnk->hwn", tap, w_t,
                                       preferred_element_type=jnp.float32)
        acc = _leaky(acc + b_ref[...], slope)
        o_ref[:, :, cls * oc2:(cls + 1) * oc2] = acc.astype(o_ref.dtype)


def _bottleneck_kernel(x_ref, w1_ref, b1_ref, w2_ref, b2_ref, o_ref):
    # encoder_linear -> decoder_linear fused; latent never leaves VMEM.
    lat = jnp.dot(x_ref[...], w1_ref[...], preferred_element_type=jnp.float32)
    lat = (lat + b1_ref[...]).astype(w2_ref.dtype)     # bf16 latent (policy)
    out = jnp.dot(lat, w2_ref[...], preferred_element_type=jnp.float32)
    o_ref[...] = (out + b2_ref[...]).astype(o_ref.dtype)


# ----------------------------------------------------------------------------
# Pallas wrappers
# ----------------------------------------------------------------------------
def encoder_level(ys, we, be, kc, slope):
    """ys: (2, b, H2, W2, 4ic) bf16 branch-stacked space-to-depth input."""
    _, b, H2, W2, C4 = ys.shape
    oc = we.shape[2]
    oh, ow = H2 - (kc - 1), W2 - (kc - 1)
    return pl.pallas_call(
        functools.partial(_enc_conv_kernel, kc=kc, slope=slope),
        out_shape=jax.ShapeDtypeStruct((2, b, oh, ow, oc), ys.dtype),
        grid=(2, b),                                   # branch x batch, parallel
        in_specs=[
            pl.BlockSpec((None, None, H2, W2, C4),
                         lambda br, bi: (br, bi, 0, 0, 0)),
            pl.BlockSpec((None, kc * kc, oc, C4), lambda br, bi: (br, 0, 0, 0)),
            pl.BlockSpec((None, 1, oc), lambda br, bi: (br, 0, 0)),
        ],
        out_specs=pl.BlockSpec((None, None, oh, ow, oc),
                               lambda br, bi: (br, bi, 0, 0, 0)),
        compiler_params=_mosaic_params(
            dimension_semantics=("parallel", "parallel")),
    )(ys, we, be)


def decoder_level(x, skip, wc, bias, kc, pad_v, starts, slope):
    b, hv, wv, c = x.shape
    oc2 = bias.shape[-1]
    planes = pl.pallas_call(
        functools.partial(_dec_conv_kernel, kc=kc, pad_v=pad_v, starts=starts,
                          slope=slope),
        out_shape=jax.ShapeDtypeStruct((b, hv, wv, 4 * oc2), x.dtype),
        grid=(b,),
        in_specs=[
            pl.BlockSpec((None, hv, wv, c), lambda i: (i, 0, 0, 0)),
            pl.BlockSpec((None, hv, wv, c), lambda i: (i, 0, 0, 0)),
            _bspec((4, kc * kc, oc2, c), lambda i: (0, 0, 0, 0),
                   single_buffered=True),
            _bspec((1, 1, oc2), lambda i: (0, 0, 0), single_buffered=True),
        ],
        out_specs=pl.BlockSpec((None, hv, wv, 4 * oc2), lambda i: (i, 0, 0, 0)),
        scratch_shapes=[pltpu.VMEM((hv + 2 * pad_v, wv + 2 * pad_v, c), x.dtype)],
        compiler_params=_mosaic_params(dimension_semantics=("parallel",)),
    )(x, skip, wc, bias)
    # depth-to-space of the four parity planes -> (b, 2hv, 2wv, oc2); 1x glue.
    planes = planes.reshape(b, hv, wv, 2, 2, oc2)
    planes = jnp.transpose(planes, (0, 1, 3, 2, 4, 5))
    return planes.reshape(b, 2 * hv, 2 * wv, oc2)


def bottleneck(enc, w1, b1, w2, b2):
    M, K1 = enc.shape
    L = w1.shape[1]
    N = w2.shape[1]
    # TODO(synk): for production sizes, tile K1 over an "arbitrary" grid axis
    # with a pl.when-initialized f32 accumulator; at these shapes one block fits.
    return pl.pallas_call(
        _bottleneck_kernel,
        out_shape=jax.ShapeDtypeStruct((M, N), enc.dtype),
        grid=(1,),
        in_specs=[
            pl.BlockSpec((M, K1), lambda i: (0, 0)),
            pl.BlockSpec((K1, L), lambda i: (0, 0)),
            pl.BlockSpec((1, L), lambda i: (0, 0)),
            pl.BlockSpec((L, N), lambda i: (0, 0)),
            pl.BlockSpec((1, N), lambda i: (0, 0)),
        ],
        out_specs=pl.BlockSpec((M, N), lambda i: (0, 0)),
        compiler_params=_mosaic_params(dimension_semantics=("arbitrary",)),
    )(enc, w1, b1, w2, b2)


# ----------------------------------------------------------------------------
# XLA glue: 1x-traffic pad + space-to-depth (replaces the k^2 HBM im2col)
# ----------------------------------------------------------------------------
def _pad_space_to_depth(x, p):
    """(..., H, W, C) -> (..., (H+2p)//2, (W+2p)//2, 4C), sub-pixel (dh, dw, c)."""
    lead = x.shape[:-3]
    h, w, c = x.shape[-3:]
    xp = jnp.pad(x, [(0, 0)] * len(lead) + [(p, p), (p, p), (0, 0)])
    H, W = h + 2 * p, w + 2 * p
    xp = xp.reshape(lead + (H // 2, 2, W // 2, 2, c))
    nl = len(lead)
    xp = jnp.transpose(xp, tuple(range(nl)) + (nl, nl + 2, nl + 1, nl + 3, nl + 4))
    return xp.reshape(lead + (H // 2, W // 2, 4 * c))


# ----------------------------------------------------------------------------
# Deterministic synthetic parameters, pre-folded into the kernel layouts.
# ----------------------------------------------------------------------------
def _enc_conv_params(key, oc, ic, k):
    """Stride-2 conv weights re-folded for the space-to-depth formulation."""
    kc = (k + 1) // 2
    kw_, kb_ = jax.random.split(key)
    w = jax.random.normal(kw_, (oc, ic, k, k), jnp.float32) / np.sqrt(ic * k * k)
    b = jax.random.normal(kb_, (oc,), jnp.float32) * 0.01
    w_np = np.asarray(w)
    w2 = np.zeros((kc * kc, oc, 4 * ic), np.float32)
    for a in range(kc):
        for bb in range(kc):
            for di in range(2):
                for dj in range(2):
                    i, j = 2 * a + di, 2 * bb + dj
                    if i < k and j < k:
                        sub = (di * 2 + dj) * ic
                        w2[a * kc + bb, :, sub:sub + ic] = w_np[:, :, i, j]
    return jnp.asarray(w2, jnp.bfloat16), jnp.asarray(b).reshape(1, oc)


def _dec_conv_params(key, oc2, ic, k):
    """Stride-1 conv weights collapsed per output-parity class so the kernel
    consumes the NON-upsampled low-res input directly (fused nearest-2x)."""
    p = k // 2
    kc = (k + 1) // 2
    pad_v = (p + 1) // 2
    kw_, kb_ = jax.random.split(key)
    w = jax.random.normal(kw_, (oc2, ic, k, k), jnp.float32) / np.sqrt(ic * k * k)
    b = jax.random.normal(kb_, (oc2,), jnp.float32) * 0.01
    w_np = np.asarray(w)
    deltas = {rho: [(rho + i - p) // 2 for i in range(k)] for rho in (0, 1)}
    starts = tuple(min(deltas[rho]) for rho in (0, 1))
    wc = np.zeros((4, kc * kc, oc2, ic), np.float32)
    for cls in range(4):
        pr, ps = cls // 2, cls % 2
        for i in range(k):
            a = deltas[pr][i] - starts[pr]
            for j in range(k):
                bb = deltas[ps][j] - starts[ps]
                wc[cls, a * kc + bb] += w_np[:, :, i, j]
    return (jnp.asarray(wc, jnp.bfloat16),
            jnp.asarray(b).reshape(1, 1, oc2), kc, pad_v, starts)


def _linear_params_torch(key, out_f, in_f):
    kw_, kb_ = jax.random.split(key)
    w = jax.random.normal(kw_, (out_f, in_f), jnp.float32) / np.sqrt(in_f)
    b = jax.random.normal(kb_, (out_f,), jnp.float32) * 0.01
    return np.asarray(w), np.asarray(b)


# ----------------------------------------------------------------------------
# CustomJointNet (JAX / Pallas port)
# ----------------------------------------------------------------------------
class CustomJointNet:
    """Public API: NCHW float32 in/out.  Internal: NHWC bf16, f32 accumulation."""

    def __init__(self, key, in_dim, latent_dim, width, height, slope,
                 encoder_kernel_list, decoder_kernel_list):
        self.slope = float(slope)
        cur, w_, h_ = in_dim, width, height
        keys = jax.random.split(key, 2 * len(encoder_kernel_list) + 2
                                + len(decoder_kernel_list))
        ki = 0
        self.enc_levels = []
        for k in encoder_kernel_list:
            ws, bs = _enc_conv_params(keys[ki], cur * 2, cur, k); ki += 1
            wc, bc = _enc_conv_params(keys[ki], cur * 2, cur, k); ki += 1
            self.enc_levels.append((jnp.stack([ws, wc]), jnp.stack([bs, bc]),
                                    k, (k + 1) // 2))
            cur *= 2; w_ //= 2; h_ //= 2

        chw = cur * w_ * h_
        # Fold the torch .view(b,-1) NCHW flatten into the Linear weights at init:
        # the bottleneck consumes / produces NHWC-flattened vectors directly.
        perm = np.transpose(np.arange(chw).reshape(cur, h_, w_),
                            (1, 2, 0)).reshape(-1)
        w1, b1 = _linear_params_torch(keys[ki], latent_dim, 2 * chw); ki += 1
        w2, b2 = _linear_params_torch(keys[ki], chw, latent_dim); ki += 1
        w1t = w1.T                                         # (2chw, latent)
        w1t = np.concatenate([w1t[:chw][perm], w1t[chw:][perm]], axis=0)
        w2t = w2.T[:, perm]                                # (latent, chw) NHWC
        b2p = b2[perm]
        self.enc_linear = (jnp.asarray(w1t, jnp.bfloat16),
                           jnp.asarray(b1, jnp.float32).reshape(1, latent_dim))
        self.dec_linear = (jnp.asarray(w2t, jnp.bfloat16),
                           jnp.asarray(b2p, jnp.float32).reshape(1, chw))
        self._bottleneck_hwc = (h_, w_, cur)

        self.dec_levels = []
        for k in decoder_kernel_list:
            params = _dec_conv_params(keys[ki], cur // 2, cur, k); ki += 1
            self.dec_levels.append(params)
            cur //= 2; w_ *= 2; h_ *= 2

    def __call__(self, style_input, content_input):
        # NCHW f32 -> branch-stacked NHWC bf16 (single transpose at the boundary)
        sc = jnp.stack([style_input, content_input], axis=0)
        sc = jnp.transpose(sc, (0, 1, 3, 4, 2)).astype(jnp.bfloat16)

        skips = []
        for we, be, k, kc in self.enc_levels:
            ys = _pad_space_to_depth(sc, k // 2)
            sc = encoder_level(ys, we, be, kc, self.slope)
            skips.append(sc[1])           # content-branch outputs feed decoder

        h_, w_, c_ = self._bottleneck_hwc
        b = sc.shape[1]
        enc = jnp.concatenate([sc[0].reshape(b, -1), sc[1].reshape(b, -1)],
                              axis=-1)
        dec = bottleneck(enc, self.enc_linear[0], self.enc_linear[1],
                         self.dec_linear[0], self.dec_linear[1])
        out = dec.reshape(b, h_, w_, c_)      # already NHWC-ordered (weights permuted)

        for i, (wc_, bias, kcd, pad_v, starts) in enumerate(self.dec_levels):
            out = decoder_level(out, skips[-1 - i], wc_, bias, kcd, pad_v,
                                starts, self.slope)

        return jnp.transpose(out, (0, 3, 1, 2)).astype(jnp.float32)


if __name__ == "__main__":
    key = jax.random.PRNGKey(0)
    kp, ks, kc = jax.random.split(key, 3)
    net = CustomJointNet(kp, in_dim=4, latent_dim=32, width=16, height=16,
                         slope=0.2, encoder_kernel_list=[3, 3],
                         decoder_kernel_list=[3, 3])
    style = jax.random.normal(ks, (2, 4, 16, 16), jnp.float32)
    content = jax.random.normal(kc, (2, 4, 16, 16), jnp.float32)

    forward = jax.jit(lambda s, c: net(s, c))
    out = forward(style, content)
    jax.block_until_ready(out)
    assert out.shape == (2, 4, 16, 16), out.shape
    assert out.dtype == jnp.float32
    print("KERNEL_OK")
</pallas_src>

<mosaic_0001>
module attributes {stable_mosaic.version = 11 : i64} {
  func.func @_enc_conv_kernel(%arg0: i32, %arg1: i32, %arg2: memref<1x1x9x9x16xbf16, #tpu.memory_space<vmem>>, %arg3: memref<1x4x8x16xbf16, #tpu.memory_space<vmem>>, %arg4: memref<1x1x8xf32, #tpu.memory_space<vmem>>, %arg5: memref<1x1x8x8x8xbf16, #tpu.memory_space<vmem>>) attributes {dimension_semantics = [#tpu.dimension_semantics<parallel>, #tpu.dimension_semantics<parallel>], iteration_bounds = array<i64: 2, 2>, scalar_prefetch = 0 : i64, scratch_operands = 0 : i64, tpu.core_type = #tpu.core_type<tc>, window_params = [{transform_indices = @transform_0, window_bounds = array<i64: 1, 1, 9, 9, 16>}, {transform_indices = @transform_1, window_bounds = array<i64: 1, 4, 8, 16>}, {transform_indices = @transform_2, window_bounds = array<i64: 1, 1, 8>}, {transform_indices = @transform_3, window_bounds = array<i64: 1, 1, 8, 8, 8>}]} {
    %cst = arith.constant 0.000000e+00 : f32
    %0 = vector.broadcast %cst : f32 to vector<8x8x8xf32>
    %c0 = arith.constant 0 : index
    %c0_0 = arith.constant 0 : index
    %c0_1 = arith.constant 0 : index
    %c0_2 = arith.constant 0 : index
    %c0_3 = arith.constant 0 : index
    %1 = vector.load %arg2[%c0, %c0_0, %c0_1, %c0_2, %c0_3] : memref<1x1x9x9x16xbf16, #tpu.memory_space<vmem>>, vector<1x1x8x8x16xbf16>
    %2 = vector.shape_cast %1 : vector<1x1x8x8x16xbf16> to vector<8x8x16xbf16>
    %c0_4 = arith.constant 0 : index
    %c0_5 = arith.constant 0 : index
    %c0_6 = arith.constant 0 : index
    %c0_7 = arith.constant 0 : index
    %3 = vector.load %arg3[%c0_4, %c0_5, %c0_6, %c0_7] : memref<1x4x8x16xbf16, #tpu.memory_space<vmem>>, vector<1x1x8x16xbf16>
    %4 = vector.shape_cast %3 : vector<1x1x8x16xbf16> to vector<8x16xbf16>
    %5 = vector.shape_cast %4 : vector<8x16xbf16> to vector<1x8x16xbf16>
    %6 = vector.broadcast %5 : vector<1x8x16xbf16> to vector<8x8x16xbf16>
    "tpu.trace_start"() <{level = 10 : i32, message = "hwk,hnk->hwn"}> : () -> ()
    %cst_8 = arith.constant dense<0.000000e+00> : vector<8x8x8xf32>
    %7 = tpu.matmul %2, %6, %cst_8 {dimension_numbers = #tpu.dot_dimension_numbers<[2], [2], [1], [1], [0, 0, 0, 1, 1, 1], [0], [0]>} : vector<8x8x16xbf16>, vector<8x8x16xbf16>, vector<8x8x8xf32> -> vector<8x8x8xf32>
    "tpu.trace_stop"() : () -> ()
    %8 = arith.addf %0, %7 : vector<8x8x8xf32>
    %c0_9 = arith.constant 0 : index
    %c0_10 = arith.constant 0 : index
    %c0_11 = arith.constant 0 : index
    %c1 = arith.constant 1 : index
    %c0_12 = arith.constant 0 : index
    %9 = vector.load %arg2[%c0_9, %c0_10, %c0_11, %c1, %c0_12] : memref<1x1x9x9x16xbf16, #tpu.memory_space<vmem>>, vector<1x1x8x8x16xbf16>
    %10 = vector.shape_cast %9 : vector<1x1x8x8x16xbf16> to vector<8x8x16xbf16>
    %c0_13 = arith.constant 0 : index
    %c1_14 = arith.constant 1 : index
    %c0_15 = arith.constant 0 : index
    %c0_16 = arith.constant 0 : index
    %11 = vector.load %arg3[%c0_13, %c1_14, %c0_15, %c0_16] : memref<1x4x8x16xbf16, #tpu.memory_space<vmem>>, vector<1x1x8x16xbf16>
    %12 = vector.shape_cast %11 : vector<1x1x8x16xbf16> to vector<8x16xbf16>
    %13 = vector.shape_cast %12 : vector<8x16xbf16> to vector<1x8x16xbf16>
    %14 = vector.broadcast %13 : vector<1x8x16xbf16> to vector<8x8x16xbf16>
    "tpu.trace_start"() <{level = 10 : i32, message = "hwk,hnk->hwn"}> : () -> ()
    %cst_17 = arith.constant dense<0.000000e+00> : vector<8x8x8xf32>
    %15 = tpu.matmul %10, %14, %cst_17 {dimension_numbers = #tpu.dot_dimension_numbers<[2], [2], [1], [1], [0, 0, 0, 1, 1, 1], [0], [0]>} : vector<8x8x16xbf16>, vector<8x8x16xbf16>, vector<8x8x8xf32> -> vector<8x8x8xf32>
    "tpu.trace_stop"() : () -> ()
    %16 = arith.addf %8, %15 : vector<8x8x8xf32>
    %c0_18 = arith.constant 0 : index
    %c0_19 = arith.constant 0 : index
    %c1_20 = arith.constant 1 : index
    %c0_21 = arith.constant 0 : index
    %c0_22 = arith.constant 0 : index
    %17 = vector.load %arg2[%c0_18, %c0_19, %c1_20, %c0_21, %c0_22] : memref<1x1x9x9x16xbf16, #tpu.memory_space<vmem>>, vector<1x1x8x8x16xbf16>
    %18 = vector.shape_cast %17 : vector<1x1x8x8x16xbf16> to vector<8x8x16xbf16>
    %c0_23 = arith.constant 0 : index
    %c2 = arith.constant 2 : index
    %c0_24 = arith.constant 0 : index
    %c0_25 = arith.constant 0 : index
    %19 = vector.load %arg3[%c0_23, %c2, %c0_24, %c0_25] : memref<1x4x8x16xbf16, #tpu.memory_space<vmem>>, vector<1x1x8x16xbf16>
    %20 = vector.shape_cast %19 : vector<1x1x8x16xbf16> to vector<8x16xbf16>
    %21 = vector.shape_cast %20 : vector<8x16xbf16> to vector<1x8x16xbf16>
    %22 = vector.broadcast %21 : vector<1x8x16xbf16> to vector<8x8x16xbf16>
    "tpu.trace_start"() <{level = 10 : i32, message = "hwk,hnk->hwn"}> : () -> ()
    %cst_26 = arith.constant dense<0.000000e+00> : vector<8x8x8xf32>
    %23 = tpu.matmul %18, %22, %cst_26 {dimension_numbers = #tpu.dot_dimension_numbers<[2], [2], [1], [1], [0, 0, 0, 1, 1, 1], [0], [0]>} : vector<8x8x16xbf16>, vector<8x8x16xbf16>, vector<8x8x8xf32> -> vector<8x8x8xf32>
    "tpu.trace_stop"() : () -> ()
    %24 = arith.addf %16, %23 : vector<8x8x8xf32>
    %c0_27 = arith.constant 0 : index
    %c0_28 = arith.constant 0 : index
    %c1_29 = arith.constant 1 : index
    %c1_30 = arith.constant 1 : index
    %c0_31 = arith.constant 0 : index
    %25 = vector.load %arg2[%c0_27, %c0_28, %c1_29, %c1_30, %c0_31] : memref<1x1x9x9x16xbf16, #tpu.memory_space<vmem>>, vector<1x1x8x8x16xbf16>
    %26 = vector.shape_cast %25 : vector<1x1x8x8x16xbf16> to vector<8x8x16xbf16>
    %c0_32 = arith.constant 0 : index
    %c3 = arith.constant 3 : index
    %c0_33 = arith.constant 0 : index
    %c0_34 = arith.constant 0 : index
    %27 = vector.load %arg3[%c0_32, %c3, %c0_33, %c0_34] : memref<1x4x8x16xbf16, #tpu.memory_space<vmem>>, vector<1x1x8x16xbf16>
    %28 = vector.shape_cast %27 : vector<1x1x8x16xbf16> to vector<8x16xbf16>
    %29 = vector.shape_cast %28 : vector<8x16xbf16> to vector<1x8x16xbf16>
    %30 = vector.broadcast %29 : vector<1x8x16xbf16> to vector<8x8x16xbf16>
    "tpu.trace_start"() <{level = 10 : i32, message = "hwk,hnk->hwn"}> : () -> ()
    %cst_35 = arith.constant dense<0.000000e+00> : vector<8x8x8xf32>
    %31 = tpu.matmul %26, %30, %cst_35 {dimension_numbers = #tpu.dot_dimension_numbers<[2], [2], [1], [1], [0, 0, 0, 1, 1, 1], [0], [0]>} : vector<8x8x16xbf16>, vector<8x8x16xbf16>, vector<8x8x8xf32> -> vector<8x8x8xf32>
    "tpu.trace_stop"() : () -> ()
    %32 = arith.addf %24, %31 : vector<8x8x8xf32>
    %c0_36 = arith.constant 0 : index
    %c0_37 = arith.constant 0 : index
    %c0_38 = arith.constant 0 : index
    %33 = vector.load %arg4[%c0_36, %c0_37, %c0_38] : memref<1x1x8xf32, #tpu.memory_space<vmem>>, vector<1x1x8xf32>
    %34 = vector.shape_cast %33 : vector<1x1x8xf32> to vector<1x8xf32>
    %35 = vector.shape_cast %34 : vector<1x8xf32> to vector<1x1x8xf32>
    %36 = vector.broadcast %35 : vector<1x1x8xf32> to vector<8x8x8xf32>
    %37 = arith.addf %32, %36 : vector<8x8x8xf32>
    %cst_39 = arith.constant 0.000000e+00 : f32
    %38 = vector.broadcast %cst_39 : f32 to vector<8x8x8xf32>
    %39 = arith.cmpf oge, %37, %38 : vector<8x8x8xf32>
    %cst_40 = arith.constant 2.000000e-01 : f32
    %40 = vector.broadcast %cst_40 : f32 to vector<8x8x8xf32>
    %41 = arith.mulf %40, %37 : vector<8x8x8xf32>
    %42 = arith.select %39, %37, %41 : vector<8x8x8xi1>, vector<8x8x8xf32>
    %43 = arith.truncf %42 : vector<8x8x8xf32> to vector<8x8x8xbf16>
    %c0_41 = arith.constant 0 : index
    %c0_42 = arith.constant 0 : index
    %c0_43 = arith.constant 0 : index
    %c0_44 = arith.constant 0 : index
    %c0_45 = arith.constant 0 : index
    %44 = vector.load %arg5[%c0_41, %c0_42, %c0_43, %c0_44, %c0_45] : memref<1x1x8x8x8xbf16, #tpu.memory_space<vmem>>, vector<1x1x8x8x8xbf16>
    %45 = vector.shape_cast %44 : vector<1x1x8x8x8xbf16> to vector<8x8x8xbf16>
    %46 = vector.shape_cast %43 : vector<8x8x8xbf16> to vector<1x1x8x8x8xbf16>
    tpu.vector_store %arg5[%c0_41, %c0_42, %c0_43, %c0_44, %c0_45], %46 {strides = array<i32>} : memref<1x1x8x8x8xbf16, #tpu.memory_space<vmem>>, vector<1x1x8x8x8xbf16>,
    return
  }
  func.func @transform_0(%arg0: i32, %arg1: i32) -> (i32, i32, i32, i32, i32) {
    %c0_i32 = arith.constant 0 : i32
    %c0_i32_0 = arith.constant 0 : i32
    %c0_i32_1 = arith.constant 0 : i32
    %c0_i32_2 = arith.constant 0 : i32
    return %arg0, %arg1, %c0_i32, %c0_i32_0, %c0_i32_1 : i32, i32, i32, i32, i32
  }
  func.func @transform_1(%arg0: i32, %arg1: i32) -> (i32, i32, i32, i32) {
    %c0_i32 = arith.constant 0 : i32
    %c0_i32_0 = arith.constant 0 : i32
    %c0_i32_1 = arith.constant 0 : i32
    %c0_i32_2 = arith.constant 0 : i32
    return %arg0, %c0_i32, %c0_i32_0, %c0_i32_1 : i32, i32, i32, i32
  }
  func.func @transform_2(%arg0: i32, %arg1: i32) -> (i32, i32, i32) {
    %c0_i32 = arith.constant 0 : i32
    %c0_i32_0 = arith.constant 0 : i32
    %c0_i32_1 = arith.constant 0 : i32
    return %arg0, %c0_i32, %c0_i32_0 : i32, i32, i32
  }
  func.func @transform_3(%arg0: i32, %arg1: i32) -> (i32, i32, i32, i32, i32) {
    %c0_i32 = arith.constant 0 : i32
    %c0_i32_0 = arith.constant 0 : i32
    %c0_i32_1 = arith.constant 0 : i32
    %c0_i32_2 = arith.constant 0 : i32
    return %arg0, %arg1, %c0_i32, %c0_i32_0, %c0_i32_1 : i32, i32, i32, i32, i32
  }
}

module attributes {stable_mosaic.version = 11 : i64} {
  func.func @_enc_conv_kernel(%arg0: i32, %arg1: i32, %arg2: memref<1x1x5x5x32xbf16, #tpu.memory_space<vmem>>, %arg3: memref<1x4x16x32xbf16, #tpu.memory_space<vmem>>, %arg4: memref<1x1x16xf32, #tpu.memory_space<vmem>>, %arg5: memref<1x1x4x4x16xbf16, #tpu.memory_space<vmem>>) attributes {dimension_semantics = [#tpu.dimension_semantics<parallel>, #tpu.dimension_semantics<parallel>], iteration_bounds = array<i64: 2, 2>, scalar_prefetch = 0 : i64, scratch_operands = 0 : i64, tpu.core_type = #tpu.core_type<tc>, window_params = [{transform_indices = @transform_0, window_bounds = array<i64: 1, 1, 5, 5, 32>}, {transform_indices = @transform_1, window_bounds = array<i64: 1, 4, 16, 32>}, {transform_indices = @transform_2, window_bounds = array<i64: 1, 1, 16>}, {transform_indices = @transform_3, window_bounds = array<i64: 1, 1, 4, 4, 16>}]} {
    %cst = arith.constant 0.000000e+00 : f32
    %0 = vector.broadcast %cst : f32 to vector<4x4x16xf32>
    %c0 = arith.constant 0 : index
    %c0_0 = arith.constant 0 : index
    %c0_1 = arith.constant 0 : index
    %c0_2 = arith.constant 0 : index
    %c0_3 = arith.constant 0 : index
    %1 = vector.load %arg2[%c0, %c0_0, %c0_1, %c0_2, %c0_3] : memref<1x1x5x5x32xbf16, #tpu.memory_space<vmem>>, vector<1x1x4x4x32xbf16>
    %2 = vector.shape_cast %1 : vector<1x1x4x4x32xbf16> to vector<4x4x32xbf16>
    %c0_4 = arith.constant 0 : index
    %c0_5 = arith.constant 0 : index
    %c0_6 = arith.constant 0 : index
    %c0_7 = arith.constant 0 : index
    %3 = vector.load %arg3[%c0_4, %c0_5, %c0_6, %c0_7] : memref<1x4x16x32xbf16, #tpu.memory_space<vmem>>, vector<1x1x16x32xbf16>
    %4 = vector.shape_cast %3 : vector<1x1x16x32xbf16> to vector<16x32xbf16>
    %5 = vector.shape_cast %4 : vector<16x32xbf16> to vector<1x16x32xbf16>
    %6 = vector.broadcast %5 : vector<1x16x32xbf16> to vector<4x16x32xbf16>
    "tpu.trace_start"() <{level = 10 : i32, message = "hwk,hnk->hwn"}> : () -> ()
    %cst_8 = arith.constant dense<0.000000e+00> : vector<4x4x16xf32>
    %7 = tpu.matmul %2, %6, %cst_8 {dimension_numbers = #tpu.dot_dimension_numbers<[2], [2], [1], [1], [0, 0, 0, 1, 1, 1], [0], [0]>} : vector<4x4x32xbf16>, vector<4x16x32xbf16>, vector<4x4x16xf32> -> vector<4x4x16xf32>
    "tpu.trace_stop"() : () -> ()
    %8 = arith.addf %0, %7 : vector<4x4x16xf32>
    %c0_9 = arith.constant 0 : index
    %c0_10 = arith.constant 0 : index
    %c0_11 = arith.constant 0 : index
    %c1 = arith.constant 1 : index
    %c0_12 = arith.constant 0 : index
    %9 = vector.load %arg2[%c0_9, %c0_10, %c0_11, %c1, %c0_12] : memref<1x1x5x5x32xbf16, #tpu.memory_space<vmem>>, vector<1x1x4x4x32xbf16>
    %10 = vector.shape_cast %9 : vector<1x1x4x4x32xbf16> to vector<4x4x32xbf16>
    %c0_13 = arith.constant 0 : index
    %c1_14 = arith.constant 1 : index
    %c0_15 = arith.constant 0 : index
    %c0_16 = arith.constant 0 : index
    %11 = vector.load %arg3[%c0_13, %c1_14, %c0_15, %c0_16] : memref<1x4x16x32xbf16, #tpu.memory_space<vmem>>, vector<1x1x16x32xbf16>
    %12 = vector.shape_cast %11 : vector<1x1x16x32xbf16> to vector<16x32xbf16>
    %13 = vector.shape_cast %12 : vector<16x32xbf16> to vector<1x16x32xbf16>
    %14 = vector.broadcast %13 : vector<1x16x32xbf16> to vector<4x16x32xbf16>
    "tpu.trace_start"() <{level = 10 : i32, message = "hwk,hnk->hwn"}> : () -> ()
    %cst_17 = arith.constant dense<0.000000e+00> : vector<4x4x16xf32>
    %15 = tpu.matmul %10, %14, %cst_17 {dimension_numbers = #tpu.dot_dimension_numbers<[2], [2], [1], [1], [0, 0, 0, 1, 1, 1], [0], [0]>} : vector<4x4x32xbf16>, vector<4x16x32xbf16>, vector<4x4x16xf32> -> vector<4x4x16xf32>
    "tpu.trace_stop"() : () -> ()
    %16 = arith.addf %8, %15 : vector<4x4x16xf32>
    %c0_18 = arith.constant 0 : index
    %c0_19 = arith.constant 0 : index
    %c1_20 = arith.constant 1 : index
    %c0_21 = arith.constant 0 : index
    %c0_22 = arith.constant 0 : index
    %17 = vector.load %arg2[%c0_18, %c0_19, %c1_20, %c0_21, %c0_22] : memref<1x1x5x5x32xbf16, #tpu.memory_space<vmem>>, vector<1x1x4x4x32xbf16>
    %18 = vector.shape_cast %17 : vector<1x1x4x4x32xbf16> to vector<4x4x32xbf16>
    %c0_23 = arith.constant 0 : index
    %c2 = arith.constant 2 : index
    %c0_24 = arith.constant 0 : index
    %c0_25 = arith.constant 0 : index
    %19 = vector.load %arg3[%c0_23, %c2, %c0_24, %c0_25] : memref<1x4x16x32xbf16, #tpu.memory_space<vmem>>, vector<1x1x16x32xbf16>
    %20 = vector.shape_cast %19 : vector<1x1x16x32xbf16> to vector<16x32xbf16>
    %21 = vector.shape_cast %20 : vector<16x32xbf16> to vector<1x16x32xbf16>
    %22 = vector.broadcast %21 : vector<1x16x32xbf16> to vector<4x16x32xbf16>
    "tpu.trace_start"() <{level = 10 : i32, message = "hwk,hnk->hwn"}> : () -> ()
    %cst_26 = arith.constant dense<0.000000e+00> : vector<4x4x16xf32>
    %23 = tpu.matmul %18, %22, %cst_26 {dimension_numbers = #tpu.dot_dimension_numbers<[2], [2], [1], [1], [0, 0, 0, 1, 1, 1], [0], [0]>} : vector<4x4x32xbf16>, vector<4x16x32xbf16>, vector<4x4x16xf32> -> vector<4x4x16xf32>
    "tpu.trace_stop"() : () -> ()
    %24 = arith.addf %16, %23 : vector<4x4x16xf32>
    %c0_27 = arith.constant 0 : index
    %c0_28 = arith.constant 0 : index
    %c1_29 = arith.constant 1 : index
    %c1_30 = arith.constant 1 : index
    %c0_31 = arith.constant 0 : index
    %25 = vector.load %arg2[%c0_27, %c0_28, %c1_29, %c1_30, %c0_31] : memref<1x1x5x5x32xbf16, #tpu.memory_space<vmem>>, vector<1x1x4x4x32xbf16>
    %26 = vector.shape_cast %25 : vector<1x1x4x4x32xbf16> to vector<4x4x32xbf16>
    %c0_32 = arith.constant 0 : index
    %c3 = arith.constant 3 : index
    %c0_33 = arith.constant 0 : index
    %c0_34 = arith.constant 0 : index
    %27 = vector.load %arg3[%c0_32, %c3, %c0_33, %c0_34] : memref<1x4x16x32xbf16, #tpu.memory_space<vmem>>, vector<1x1x16x32xbf16>
    %28 = vector.shape_cast %27 : vector<1x1x16x32xbf16> to vector<16x32xbf16>
    %29 = vector.shape_cast %28 : vector<16x32xbf16> to vector<1x16x32xbf16>
    %30 = vector.broadcast %29 : vector<1x16x32xbf16> to vector<4x16x32xbf16>
    "tpu.trace_start"() <{level = 10 : i32, message = "hwk,hnk->hwn"}> : () -> ()
    %cst_35 = arith.constant dense<0.000000e+00> : vector<4x4x16xf32>
    %31 = tpu.matmul %26, %30, %cst_35 {dimension_numbers = #tpu.dot_dimension_numbers<[2], [2], [1], [1], [0, 0, 0, 1, 1, 1], [0], [0]>} : vector<4x4x32xbf16>, vector<4x16x32xbf16>, vector<4x4x16xf32> -> vector<4x4x16xf32>
    "tpu.trace_stop"() : () -> ()
    %32 = arith.addf %24, %31 : vector<4x4x16xf32>
    %c0_36 = arith.constant 0 : index
    %c0_37 = arith.constant 0 : index
    %c0_38 = arith.constant 0 : index
    %33 = vector.load %arg4[%c0_36, %c0_37, %c0_38] : memref<1x1x16xf32, #tpu.memory_space<vmem>>, vector<1x1x16xf32>
    %34 = vector.shape_cast %33 : vector<1x1x16xf32> to vector<1x16xf32>
    %35 = vector.shape_cast %34 : vector<1x16xf32> to vector<1x1x16xf32>
    %36 = vector.broadcast %35 : vector<1x1x16xf32> to vector<4x4x16xf32>
    %37 = arith.addf %32, %36 : vector<4x4x16xf32>
    %cst_39 = arith.constant 0.000000e+00 : f32
    %38 = vector.broadcast %cst_39 : f32 to vector<4x4x16xf32>
    %39 = arith.cmpf oge, %37, %38 : vector<4x4x16xf32>
    %cst_40 = arith.constant 2.000000e-01 : f32
    %40 = vector.broadcast %cst_40 : f32 to vector<4x4x16xf32>
    %41 = arith.mulf %40, %37 : vector<4x4x16xf32>
    %42 = arith.select %39, %37, %41 : vector<4x4x16xi1>, vector<4x4x16xf32>
    %43 = arith.truncf %42 : vector<4x4x16xf32> to vector<4x4x16xbf16>
    %c0_41 = arith.constant 0 : index
    %c0_42 = arith.constant 0 : index
    %c0_43 = arith.constant 0 : index
    %c0_44 = arith.constant 0 : index
    %c0_45 = arith.constant 0 : index
    %44 = vector.load %arg5[%c0_41, %c0_42, %c0_43, %c0_44, %c0_45] : memref<1x1x4x4x16xbf16, #tpu.memory_space<vmem>>, vector<1x1x4x4x16xbf16>
    %45 = vector.shape_cast %44 : vector<1x1x4x4x16xbf16> to vector<4x4x16xbf16>
    %46 = vector.shape_cast %43 : vector<4x4x16xbf16> to vector<1x1x4x4x16xbf16>
    tpu.vector_store %arg5[%c0_41, %c0_42, %c0_43, %c0_44, %c0_45], %46 {strides = array<i32>} : memref<1x1x4x4x16xbf16, #tpu.memory_space<vmem>>, vector<1x1x4x4x16xbf16>,
    return
  }
  func.func @transform_0(%arg0: i32, %arg1: i32) -> (i32, i32, i32, i32, i32) {
    %c0_i32 = arith.constant 0 : i32
    %c0_i32_0 = arith.constant 0 : i32
    %c0_i32_1 = arith.constant 0 : i32
    %c0_i32_2 = arith.constant 0 : i32
    return %arg0, %arg1, %c0_i32, %c0_i32_0, %c0_i32_1 : i32, i32, i32, i32, i32
  }
  func.func @transform_1(%arg0: i32, %arg1: i32) -> (i32, i32, i32, i32) {
    %c0_i32 = arith.constant 0 : i32
    %c0_i32_0 = arith.constant 0 : i32
    %c0_i32_1 = arith.constant 0 : i32
    %c0_i32_2 = arith.constant 0 : i32
    return %arg0, %c0_i32, %c0_i32_0, %c0_i32_1 : i32, i32, i32, i32
  }
  func.func @transform_2(%arg0: i32, %arg1: i32) -> (i32, i32, i32) {
    %c0_i32 = arith.constant 0 : i32
    %c0_i32_0 = arith.constant 0 : i32
    %c0_i32_1 = arith.constant 0 : i32
    return %arg0, %c0_i32, %c0_i32_0 : i32, i32, i32
  }
  func.func @transform_3(%arg0: i32, %arg1: i32) -> (i32, i32, i32, i32, i32) {
    %c0_i32 = arith.constant 0 : i32
    %c0_i32_0 = arith.constant 0 : i32
    %c0_i32_1 = arith.constant 0 : i32
    %c0_i32_2 = arith.constant 0 : i32
    return %arg0, %arg1, %c0_i32, %c0_i32_0, %c0_i32_1 : i32, i32, i32, i32, i32
  }
}

module attributes {stable_mosaic.version = 11 : i64} {
  func.func @_dec_conv_kernel(%arg0: i32, %arg1: memref<1x4x4x16xbf16, #tpu.memory_space<vmem>>, %arg2: memref<1x4x4x16xbf16, #tpu.memory_space<vmem>>, %arg3: memref<4x4x8x16xbf16, #tpu.memory_space<vmem>>, %arg4: memref<1x1x8xf32, #tpu.memory_space<vmem>>, %arg5: memref<1x4x4x32xbf16, #tpu.memory_space<vmem>>, %arg6: memref<6x6x16xbf16, #tpu.memory_space<vmem>>) attributes {dimension_semantics = [#tpu.dimension_semantics<parallel>], iteration_bounds = array<i64: 2>, scalar_prefetch = 0 : i64, scratch_operands = 1 : i64, tpu.core_type = #tpu.core_type<tc>, window_params = [{transform_indices = @transform_0, window_bounds = array<i64: 1, 4, 4, 16>}, {transform_indices = @transform_1, window_bounds = array<i64: 1, 4, 4, 16>}, {pipeline_mode = #tpu.pipeline_mode<synchronous>, transform_indices = @transform_2, window_bounds = array<i64: 4, 4, 8, 16>}, {pipeline_mode = #tpu.pipeline_mode<synchronous>, transform_indices = @transform_3, window_bounds = array<i64: 1, 1, 8>}, {transform_indices = @transform_4, window_bounds = array<i64: 1, 4, 4, 32>}]} {
    %cst = arith.constant 0.000000e+00 : bf16
    %0 = vector.broadcast %cst : bf16 to vector<6x6x16xbf16>
    %c0 = arith.constant 0 : index
    %c0_0 = arith.constant 0 : index
    %c0_1 = arith.constant 0 : index
    %1 = vector.load %arg6[%c0, %c0_0, %c0_1] : memref<6x6x16xbf16, #tpu.memory_space<vmem>>, vector<6x6x16xbf16>
    tpu.vector_store %arg6[%c0, %c0_0, %c0_1], %0 {strides = array<i32>} : memref<6x6x16xbf16, #tpu.memory_space<vmem>>, vector<6x6x16xbf16>,
    %c0_2 = arith.constant 0 : index
    %c0_3 = arith.constant 0 : index
    %c0_4 = arith.constant 0 : index
    %c0_5 = arith.constant 0 : index
    %2 = vector.load %arg1[%c0_2, %c0_3, %c0_4, %c0_5] : memref<1x4x4x16xbf16, #tpu.memory_space<vmem>>, vector<1x4x4x16xbf16>
    %3 = vector.shape_cast %2 : vector<1x4x4x16xbf16> to vector<4x4x16xbf16>
    %c0_6 = arith.constant 0 : index
    %c0_7 = arith.constant 0 : index
    %c0_8 = arith.constant 0 : index
    %c0_9 = arith.constant 0 : index
    %4 = vector.load %arg2[%c0_6, %c0_7, %c0_8, %c0_9] : memref<1x4x4x16xbf16, #tpu.memory_space<vmem>>, vector<1x4x4x16xbf16>
    %5 = vector.shape_cast %4 : vector<1x4x4x16xbf16> to vector<4x4x16xbf16>
    %6 = arith.addf %3, %5 : vector<4x4x16xbf16>
    %c1 = arith.constant 1 : index
    %c1_10 = arith.constant 1 : index
    %c0_11 = arith.constant 0 : index
    %7 = vector.load %arg6[%c1, %c1_10, %c0_11] : memref<6x6x16xbf16, #tpu.memory_space<vmem>>, vector<4x4x16xbf16>
    tpu.vector_store %arg6[%c1, %c1_10, %c0_11], %6 {strides = array<i32>} : memref<6x6x16xbf16, #tpu.memory_space<vmem>>, vector<4x4x16xbf16>,
    %cst_12 = arith.constant 0.000000e+00 : f32
    %8 = vector.broadcast %cst_12 : f32 to vector<4x4x8xf32>
    %c0_13 = arith.constant 0 : index
    %c0_14 = arith.constant 0 : index
    %c0_15 = arith.constant 0 : index
    %9 = vector.load %arg6[%c0_13, %c0_14, %c0_15] : memref<6x6x16xbf16, #tpu.memory_space<vmem>>, vector<4x4x16xbf16>
    %c0_16 = arith.constant 0 : index
    %c0_17 = arith.constant 0 : index
    %c0_18 = arith.constant 0 : index
    %c0_19 = arith.constant 0 : index
    %10 = vector.load %arg3[%c0_16, %c0_17, %c0_18, %c0_19] : memref<4x4x8x16xbf16, #tpu.memory_space<vmem>>, vector<1x1x8x16xbf16>
    %11 = vector.shape_cast %10 : vector<1x1x8x16xbf16> to vector<8x16xbf16>
    %12 = vector.shape_cast %11 : vector<8x16xbf16> to vector<1x8x16xbf16>
    %13 = vector.broadcast %12 : vector<1x8x16xbf16> to vector<4x8x16xbf16>
    "tpu.trace_start"() <{level = 10 : i32, message = "hwk,hnk->hwn"}> : () -> ()
    %cst_20 = arith.constant dense<0.000000e+00> : vector<4x4x8xf32>
    %14 = tpu.matmul %9, %13, %cst_20 {dimension_numbers = #tpu.dot_dimension_numbers<[2], [2], [1], [1], [0, 0, 0, 1, 1, 1], [0], [0]>} : vector<4x4x16xbf16>, vector<4x8x16xbf16>, vector<4x4x8xf32> -> vector<4x4x8xf32>
    "tpu.trace_stop"() : () -> ()
    %15 = arith.addf %8, %14 : vector<4x4x8xf32>
    %c0_21 = arith.constant 0 : index
    %c1_22 = arith.constant 1 : index
    %c0_23 = arith.constant 0 : index
    %16 = vector.load %arg6[%c0_21, %c1_22, %c0_23] : memref<6x6x16xbf16, #tpu.memory_space<vmem>>, vector<4x4x16xbf16>
    %c0_24 = arith.constant 0 : index
    %c1_25 = arith.constant 1 : index
    %c0_26 = arith.constant 0 : index
    %c0_27 = arith.constant 0 : index
    %17 = vector.load %arg3[%c0_24, %c1_25, %c0_26, %c0_27] : memref<4x4x8x16xbf16, #tpu.memory_space<vmem>>, vector<1x1x8x16xbf16>
    %18 = vector.shape_cast %17 : vector<1x1x8x16xbf16> to vector<8x16xbf16>
    %19 = vector.shape_cast %18 : vector<8x16xbf16> to vector<1x8x16xbf16>
    %20 = vector.broadcast %19 : vector<1x8x16xbf16> to vector<4x8x16xbf16>
    "tpu.trace_start"() <{level = 10 : i32, message = "hwk,hnk->hwn"}> : () -> ()
    %cst_28 = arith.constant dense<0.000000e+00> : vector<4x4x8xf32>
    %21 = tpu.matmul %16, %20, %cst_28 {dimension_numbers = #tpu.dot_dimension_numbers<[2], [2], [1], [1], [0, 0, 0, 1, 1, 1], [0], [0]>} : vector<4x4x16xbf16>, vector<4x8x16xbf16>, vector<4x4x8xf32> -> vector<4x4x8xf32>
    "tpu.trace_stop"() : () -> ()
    %22 = arith.addf %15, %21 : vector<4x4x8xf32>
    %c1_29 = arith.constant 1 : index
    %c0_30 = arith.constant 0 : index
    %c0_31 = arith.constant 0 : index
    %23 = vector.load %arg6[%c1_29, %c0_30, %c0_31] : memref<6x6x16xbf16, #tpu.memory_space<vmem>>, vector<4x4x16xbf16>
    %c0_32 = arith.constant 0 : index
    %c2 = arith.constant 2 : index
    %c0_33 = arith.constant 0 : index
    %c0_34 = arith.constant 0 : index
    %24 = vector.load %arg3[%c0_32, %c2, %c0_33, %c0_34] : memref<4x4x8x16xbf16, #tpu.memory_space<vmem>>, vector<1x1x8x16xbf16>
    %25 = vector.shape_cast %24 : vector<1x1x8x16xbf16> to vector<8x16xbf16>
    %26 = vector.shape_cast %25 : vector<8x16xbf16> to vector<1x8x16xbf16>
    %27 = vector.broadcast %26 : vector<1x8x16xbf16> to vector<4x8x16xbf16>
    "tpu.trace_start"() <{level = 10 : i32, message = "hwk,hnk->hwn"}> : () -> ()
    %cst_35 = arith.constant dense<0.000000e+00> : vector<4x4x8xf32>
    %28 = tpu.matmul %23, %27, %cst_35 {dimension_numbers = #tpu.dot_dimension_numbers<[2], [2], [1], [1], [0, 0, 0, 1, 1, 1], [0], [0]>} : vector<4x4x16xbf16>, vector<4x8x16xbf16>, vector<4x4x8xf32> -> vector<4x4x8xf32>
    "tpu.trace_stop"() : () -> ()
    %29 = arith.addf %22, %28 : vector<4x4x8xf32>
    %c1_36 = arith.constant 1 : index
    %c1_37 = arith.constant 1 : index
    %c0_38 = arith.constant 0 : index
    %30 = vector.load %arg6[%c1_36, %c1_37, %c0_38] : memref<6x6x16xbf16, #tpu.memory_space<vmem>>, vector<4x4x16xbf16>
    %c0_39 = arith.constant 0 : index
    %c3 = arith.constant 3 : index
    %c0_40 = arith.constant 0 : index
    %c0_41 = arith.constant 0 : index
    %31 = vector.load %arg3[%c0_39, %c3, %c0_40, %c0_41] : memref<4x4x8x16xbf16, #tpu.memory_space<vmem>>, vector<1x1x8x16xbf16>
    %32 = vector.shape_cast %31 : vector<1x1x8x16xbf16> to vector<8x16xbf16>
    %33 = vector.shape_cast %32 : vector<8x16xbf16> to vector<1x8x16xbf16>
    %34 = vector.broadcast %33 : vector<1x8x16xbf16> to vector<4x8x16xbf16>
    "tpu.trace_start"() <{level = 10 : i32, message = "hwk,hnk->hwn"}> : () -> ()
    %cst_42 = arith.constant dense<0.000000e+00> : vector<4x4x8xf32>
    %35 = tpu.matmul %30, %34, %cst_42 {dimension_numbers = #tpu.dot_dimension_numbers<[2], [2], [1], [1], [0, 0, 0, 1, 1, 1], [0], [0]>} : vector<4x4x16xbf16>, vector<4x8x16xbf16>, vector<4x4x8xf32> -> vector<4x4x8xf32>
    "tpu.trace_stop"() : () -> ()
    %36 = arith.addf %29, %35 : vector<4x4x8xf32>
    %c0_43 = arith.constant 0 : index
    %c0_44 = arith.constant 0 : index
    %c0_45 = arith.constant 0 : index
    %37 = vector.load %arg4[%c0_43, %c0_44, %c0_45] : memref<1x1x8xf32, #tpu.memory_space<vmem>>, vector<1x1x8xf32>
    %38 = vector.broadcast %37 : vector<1x1x8xf32> to vector<4x4x8xf32>
    %39 = arith.addf %36, %38 : vector<4x4x8xf32>
    %cst_46 = arith.constant 0.000000e+00 : f32
    %40 = vector.broadcast %cst_46 : f32 to vector<4x4x8xf32>
    %41 = arith.cmpf oge, %39, %40 : vector<4x4x8xf32>
    %cst_47 = arith.constant 2.000000e-01 : f32
    %42 = vector.broadcast %cst_47 : f32 to vector<4x4x8xf32>
    %43 = arith.mulf %42, %39 : vector<4x4x8xf32>
    %44 = arith.select %41, %39, %43 : vector<4x4x8xi1>, vector<4x4x8xf32>
    %45 = arith.truncf %44 : vector<4x4x8xf32> to vector<4x4x8xbf16>
    %c0_48 = arith.constant 0 : index
    %c0_49 = arith.constant 0 : index
    %c0_50 = arith.constant 0 : index
    %c0_51 = arith.constant 0 : index
    %46 = vector.load %arg5[%c0_48, %c0_49, %c0_50, %c0_51] : memref<1x4x4x32xbf16, #tpu.memory_space<vmem>>, vector<1x4x4x8xbf16>
    %47 = vector.shape_cast %46 : vector<1x4x4x8xbf16> to vector<4x4x8xbf16>
    %48 = vector.shape_cast %45 : vector<4x4x8xbf16> to vector<1x4x4x8xbf16>
    tpu.vector_store %arg5[%c0_48, %c0_49, %c0_50, %c0_51], %48 {strides = array<i32>} : memref<1x4x4x32xbf16, #tpu.memory_space<vmem>>, vector<1x4x4x8xbf16>,
    %cst_52 = arith.constant 0.000000e+00 : f32
    %49 = vector.broadcast %cst_52 : f32 to vector<4x4x8xf32>
    %c0_53 = arith.constant 0 : index
    %c1_54 = arith.constant 1 : index
    %c0_55 = arith.constant 0 : index
    %50 = vector.load %arg6[%c0_53, %c1_54, %c0_55] : memref<6x6x16xbf16, #tpu.memory_space<vmem>>, vector<4x4x16xbf16>
    %c1_56 = arith.constant 1 : index
    %c0_57 = arith.constant 0 : index
    %c0_58 = arith.constant 0 : index
    %c0_59 = arith.constant 0 : index
    %51 = vector.load %arg3[%c1_56, %c0_57, %c0_58, %c0_59] : memref<4x4x8x16xbf16, #tpu.memory_space<vmem>>, vector<1x1x8x16xbf16>
    %52 = vector.shape_cast %51 : vector<1x1x8x16xbf16> to vector<8x16xbf16>
    %53 = vector.shape_cast %52 : vector<8x16xbf16> to vector<1x8x16xbf16>
    %54 = vector.broadcast %53 : vector<1x8x16xbf16> to vector<4x8x16xbf16>
    "tpu.trace_start"() <{level = 10 : i32, message = "hwk,hnk->hwn"}> : () -> ()
    %cst_60 = arith.constant dense<0.000000e+00> : vector<4x4x8xf32>
    %55 = tpu.matmul %50, %54, %cst_60 {dimension_numbers = #tpu.dot_dimension_numbers<[2], [2], [1], [1], [0, 0, 0, 1, 1, 1], [0], [0]>} : vector<4x4x16xbf16>, vector<4x8x16xbf16>, vector<4x4x8xf32> -> vector<4x4x8xf32>
    "tpu.trace_stop"() : () -> ()
    %56 = arith.addf %49, %55 : vector<4x4x8xf32>
    %c0_61 = arith.constant 0 : index
    %c2_62 = arith.constant 2 : index
    %c0_63 = arith.constant 0 : index
    %57 = vector.load %arg6[%c0_61, %c2_62, %c0_63] : memref<6x6x16xbf16, #tpu.memory_space<vmem>>, vector<4x4x16xbf16>
    %c1_64 = arith.constant 1 : index
    %c1_65 = arith.constant 1 : index
    %c0_66 = arith.constant 0 : index
    %c0_67 = arith.constant 0 : index
    %58 = vector.load %arg3[%c1_64, %c1_65, %c0_66, %c0_67] : memref<4x4x8x16xbf16, #tpu.memory_space<vmem>>, vector<1x1x8x16xbf16>
    %59 = vector.shape_cast %58 : vector<1x1x8x16xbf16> to vector<8x16xbf16>
    %60 = vector.shape_cast %59 : vector<8x16xbf16> to vector<1x8x16xbf16>
    %61 = vector.broadcast %60 : vector<1x8x16xbf16> to vector<4x8x16xbf16>
    "tpu.trace_start"() <{level = 10 : i32, message = "hwk,hnk->hwn"}> : () -> ()
    %cst_68 = arith.constant dense<0.000000e+00> : vector<4x4x8xf32>
    %62 = tpu.matmul %57, %61, %cst_68 {dimension_numbers = #tpu.dot_dimension_numbers<[2], [2], [1], [1], [0, 0, 0, 1, 1, 1], [0], [0]>} : vector<4x4x16xbf16>, vector<4x8x16xbf16>, vector<4x4x8xf32> -> vector<4x4x8xf32>
    "tpu.trace_stop"() : () -> ()
    %63 = arith.addf %56, %62 : vector<4x4x8xf32>
    %c1_69 = arith.constant 1 : index
    %c1_70 = arith.constant 1 : index
    %c0_71 = arith.constant 0 : index
    %64 = vector.load %arg6[%c1_69, %c1_70, %c0_71] : memref<6x6x16xbf16, #tpu.memory_space<vmem>>, vector<4x4x16xbf16>
    %c1_72 = arith.constant 1 : index
    %c2_73 = arith.constant 2 : index
    %c0_74 = arith.constant 0 : index
    %c0_75 = arith.constant 0 : index
    %65 = vector.load %arg3[%c1_72, %c2_73, %c0_74, %c0_75] : memref<4x4x8x16xbf16, #tpu.memory_space<vmem>>, vector<1x1x8x16xbf16>
    %66 = vector.shape_cast %65 : vector<1x1x8x16xbf16> to vector<8x16xbf16>
    %67 = vector.shape_cast %66 : vector<8x16xbf16> to vector<1x8x16xbf16>
    %68 = vector.broadcast %67 : vector<1x8x16xbf16> to vector<4x8x16xbf16>
    "tpu.trace_start"() <{level = 10 : i32, message = "hwk,hnk->hwn"}> : () -> ()
    %cst_76 = arith.constant dense<0.000000e+00> : vector<4x4x8xf32>
    %69 = tpu.matmul %64, %68, %cst_76 {dimension_numbers = #tpu.dot_dimension_numbers<[2], [2], [1], [1], [0, 0, 0, 1, 1, 1], [0], [0]>} : vector<4x4x16xbf16>, vector<4x8x16xbf16>, vector<4x4x8xf32> -> vector<4x4x8xf32>
    "tpu.trace_stop"() : () -> ()
    %70 = arith.addf %63, %69 : vector<4x4x8xf32>
    %c1_77 = arith.constant 1 : index
    %c2_78 = arith.constant 2 : index
    %c0_79 = arith.constant 0 : index
    %71 = vector.load %arg6[%c1_77, %c2_78, %c0_79] : memref<6x6x16xbf16, #tpu.memory_space<vmem>>, vector<4x4x16xbf16>
    %c1_80 = arith.constant 1 : index
    %c3_81 = arith.constant 3 : index
    %c0_82 = arith.constant 0 : index
    %c0_83 = arith.constant 0 : index
    %72 = vector.load %arg3[%c1_80, %c3_81, %c0_82, %c0_83] : memref<4x4x8x16xbf16, #tpu.memory_space<vmem>>, vector<1x1x8x16xbf16>
    %73 = vector.shape_cast %72 : vector<1x1x8x16xbf16> to vector<8x16xbf16>
    %74 = vector.shape_cast %73 : vector<8x16xbf16> to vector<1x8x16xbf16>
    %75 = vector.broadcast %74 : vector<1x8x16xbf16> to vector<4x8x16xbf16>
    "tpu.trace_start"() <{level = 10 : i32, message = "hwk,hnk->hwn"}> : () -> ()
    %cst_84 = arith.constant dense<0.000000e+00> : vector<4x4x8xf32>
    %76 = tpu.matmul %71, %75, %cst_84 {dimension_numbers = #tpu.dot_dimension_numbers<[2], [2], [1], [1], [0, 0, 0, 1, 1, 1], [0], [0]>} : vector<4x4x16xbf16>, vector<4x8x16xbf16>, vector<4x4x8xf32> -> vector<4x4x8xf32>
    "tpu.trace_stop"() : () -> ()
    %77 = arith.addf %70, %76 : vector<4x4x8xf32>
    %c0_85 = arith.constant 0 : index
    %c0_86 = arith.constant 0 : index
    %c0_87 = arith.constant 0 : index
    %78 = vector.load %arg4[%c0_85, %c0_86, %c0_87] : memref<1x1x8xf32, #tpu.memory_space<vmem>>, vector<1x1x8xf32>
    %79 = vector.broadcast %78 : vector<1x1x8xf32> to vector<4x4x8xf32>
    %80 = arith.addf %77, %79 : vector<4x4x8xf32>
    %cst_88 = arith.constant 0.000000e+00 : f32
    %81 = vector.broadcast %cst_88 : f32 to vector<4x4x8xf32>
    %82 = arith.cmpf oge, %80, %81 : vector<4x4x8xf32>
    %cst_89 = arith.constant 2.000000e-01 : f32
    %83 = vector.broadcast %cst_89 : f32 to vector<4x4x8xf32>
    %84 = arith.mulf %83, %80 : vector<4x4x8xf32>
    %85 = arith.select %82, %80, %84 : vector<4x4x8xi1>, vector<4x4x8xf32>
    %86 = arith.truncf %85 : vector<4x4x8xf32> to vector<4x4x8xbf16>
    %c0_90 = arith.constant 0 : index
    %c0_91 = arith.constant 0 : index
    %c0_92 = arith.constant 0 : index
    %c8 = arith.constant 8 : index
    %87 = vector.load %arg5[%c0_90, %c0_91, %c0_92, %c8] : memref<1x4x4x32xbf16, #tpu.memory_space<vmem>>, vector<1x4x4x8xbf16>
    %88 = vector.shape_cast %87 : vector<1x4x4x8xbf16> to vector<4x4x8xbf16>
    %89 = vector.shape_cast %86 : vector<4x4x8xbf16> to vector<1x4x4x8xbf16>
    tpu.vector_store %arg5[%c0_90, %c0_91, %c0_92, %c8], %89 {strides = array<i32>} : memref<1x4x4x32xbf16, #tpu.memory_space<vmem>>, vector<1x4x4x8xbf16>,
    %cst_93 = arith.constant 0.000000e+00 : f32
    %90 = vector.broadcast %cst_93 : f32 to vector<4x4x8xf32>
    %c1_94 = arith.constant 1 : index
    %c0_95 = arith.constant 0 : index
    %c0_96 = arith.constant 0 : index
    %91 = vector.load %arg6[%c1_94, %c0_95, %c0_96] : memref<6x6x16xbf16, #tpu.memory_space<vmem>>, vector<4x4x16xbf16>
    %c2_97 = arith.constant 2 : index
    %c0_98 = arith.constant 0 : index
    %c0_99 = arith.constant 0 : index
    %c0_100 = arith.constant 0 : index
    %92 = vector.load %arg3[%c2_97, %c0_98, %c0_99, %c0_100] : memref<4x4x8x16xbf16, #tpu.memory_space<vmem>>, vector<1x1x8x16xbf16>
    %93 = vector.shape_cast %92 : vector<1x1x8x16xbf16> to vector<8x16xbf16>
    %94 = vector.shape_cast %93 : vector<8x16xbf16> to vector<1x8x16xbf16>
    %95 = vector.broadcast %94 : vector<1x8x16xbf16> to vector<4x8x16xbf16>
    "tpu.trace_start"() <{level = 10 : i32, message = "hwk,hnk->hwn"}> : () -> ()
    %cst_101 = arith.constant dense<0.000000e+00> : vector<4x4x8xf32>
    %96 = tpu.matmul %91, %95, %cst_101 {dimension_numbers = #tpu.dot_dimension_numbers<[2], [2], [1], [1], [0, 0, 0, 1, 1, 1], [0], [0]>} : vector<4x4x16xbf16>, vector<4x8x16xbf16>, vector<4x4x8xf32> -> vector<4x4x8xf32>
    "tpu.trace_stop"() : () -> ()
    %97 = arith.addf %90, %96 : vector<4x4x8xf32>
    %c1_102 = arith.constant 1 : index
    %c1_103 = arith.constant 1 : index
    %c0_104 = arith.constant 0 : index
    %98 = vector.load %arg6[%c1_102, %c1_103, %c0_104] : memref<6x6x16xbf16, #tpu.memory_space<vmem>>, vector<4x4x16xbf16>
    %c2_105 = arith.constant 2 : index
    %c1_106 = arith.constant 1 : index
    %c0_107 = arith.constant 0 : index
    %c0_108 = arith.constant 0 : index
    %99 = vector.load %arg3[%c2_105, %c1_106, %c0_107, %c0_108] : memref<4x4x8x16xbf16, #tpu.memory_space<vmem>>, vector<1x1x8x16xbf16>
    %100 = vector.shape_cast %99 : vector<1x1x8x16xbf16> to vector<8x16xbf16>
    %101 = vector.shape_cast %100 : vector<8x16xbf16> to vector<1x8x16xbf16>
    %102 = vector.broadcast %101 : vector<1x8x16xbf16> to vector<4x8x16xbf16>
    "tpu.trace_start"() <{level = 10 : i32, message = "hwk,hnk->hwn"}> : () -> ()
    %cst_109 = arith.constant dense<0.000000e+00> : vector<4x4x8xf32>
    %103 = tpu.matmul %98, %102, %cst_109 {dimension_numbers = #tpu.dot_dimension_numbers<[2], [2], [1], [1], [0, 0, 0, 1, 1, 1], [0], [0]>} : vector<4x4x16xbf16>, vector<4x8x16xbf16>, vector<4x4x8xf32> -> vector<4x4x8xf32>
    "tpu.trace_stop"() : () -> ()
    %104 = arith.addf %97, %103 : vector<4x4x8xf32>
    %c2_110 = arith.constant 2 : index
    %c0_111 = arith.constant 0 : index
    %c0_112 = arith.constant 0 : index
    %105 = vector.load %arg6[%c2_110, %c0_111, %c0_112] : memref<6x6x16xbf16, #tpu.memory_space<vmem>>, vector<4x4x16xbf16>
    %c2_113 = arith.constant 2 : index
    %c2_114 = arith.constant 2 : index
    %c0_115 = arith.constant 0 : index
    %c0_116 = arith.constant 0 : index
    %106 = vector.load %arg3[%c2_113, %c2_114, %c0_115, %c0_116] : memref<4x4x8x16xbf16, #tpu.memory_space<vmem>>, vector<1x1x8x16xbf16>
    %107 = vector.shape_cast %106 : vector<1x1x8x16xbf16> to vector<8x16xbf16>
    %108 = vector.shape_cast %107 : vector<8x16xbf16> to vector<1x8x16xbf16>
    %109 = vector.broadcast %108 : vector<1x8x16xbf16> to vector<4x8x16xbf16>
    "tpu.trace_start"() <{level = 10 : i32, message = "hwk,hnk->hwn"}> : () -> ()
    %cst_117 = arith.constant dense<0.000000e+00> : vector<4x4x8xf32>
    %110 = tpu.matmul %105, %109, %cst_117 {dimension_numbers = #tpu.dot_dimension_numbers<[2], [2], [1], [1], [0, 0, 0, 1, 1, 1], [0], [0]>} : vector<4x4x16xbf16>, vector<4x8x16xbf16>, vector<4x4x8xf32> -> vector<4x4x8xf32>
    "tpu.trace_stop"() : () -> ()
    %111 = arith.addf %104, %110 : vector<4x4x8xf32>
    %c2_118 = arith.constant 2 : index
    %c1_119 = arith.constant 1 : index
    %c0_120 = arith.constant 0 : index
    %112 = vector.load %arg6[%c2_118, %c1_119, %c0_120] : memref<6x6x16xbf16, #tpu.memory_space<vmem>>, vector<4x4x16xbf16>
    %c2_121 = arith.constant 2 : index
    %c3_122 = arith.constant 3 : index
    %c0_123 = arith.constant 0 : index
    %c0_124 = arith.constant 0 : index
    %113 = vector.load %arg3[%c2_121, %c3_122, %c0_123, %c0_124] : memref<4x4x8x16xbf16, #tpu.memory_space<vmem>>, vector<1x1x8x16xbf16>
    %114 = vector.shape_cast %113 : vector<1x1x8x16xbf16> to vector<8x16xbf16>
    %115 = vector.shape_cast %114 : vector<8x16xbf16> to vector<1x8x16xbf16>
    %116 = vector.broadcast %115 : vector<1x8x16xbf16> to vector<4x8x16xbf16>
    "tpu.trace_start"() <{level = 10 : i32, message = "hwk,hnk->hwn"}> : () -> ()
    %cst_125 = arith.constant dense<0.000000e+00> : vector<4x4x8xf32>
    %117 = tpu.matmul %112, %116, %cst_125 {dimension_numbers = #tpu.dot_dimension_numbers<[2], [2], [1], [1], [0, 0, 0, 1, 1, 1], [0], [0]>} : vector<4x4x16xbf16>, vector<4x8x16xbf16>, vector<4x4x8xf32> -> vector<4x4x8xf32>
    "tpu.trace_stop"() : () -> ()
    %118 = arith.addf %111, %117 : vector<4x4x8xf32>
    %c0_126 = arith.constant 0 : index
    %c0_127 = arith.constant 0 : index
    %c0_128 = arith.constant 0 : index
    %119 = vector.load %arg4[%c0_126, %c0_127, %c0_128] : memref<1x1x8xf32, #tpu.memory_space<vmem>>, vector<1x1x8xf32>
    %120 = vector.broadcast %119 : vector<1x1x8xf32> to vector<4x4x8xf32>
    %121 = arith.addf %118, %120 : vector<4x4x8xf32>
    %cst_129 = arith.constant 0.000000e+00 : f32
    %122 = vector.broadcast %cst_129 : f32 to vector<4x4x8xf32>
    %123 = arith.cmpf oge, %121, %122 : vector<4x4x8xf32>
    %cst_130 = arith.constant 2.000000e-01 : f32
    %124 = vector.broadcast %cst_130 : f32 to vector<4x4x8xf32>
    %125 = arith.mulf %124, %121 : vector<4x4x8xf32>
    %126 = arith.select %123, %121, %125 : vector<4x4x8xi1>, vector<4x4x8xf32>
    %127 = arith.truncf %126 : vector<4x4x8xf32> to vector<4x4x8xbf16>
    %c0_131 = arith.constant 0 : index
    %c0_132 = arith.constant 0 : index
    %c0_133 = arith.constant 0 : index
    %c16 = arith.constant 16 : index
    %128 = vector.load %arg5[%c0_131, %c0_132, %c0_133, %c16] : memref<1x4x4x32xbf16, #tpu.memory_space<vmem>>, vector<1x4x4x8xbf16>
    %129 = vector.shape_cast %128 : vector<1x4x4x8xbf16> to vector<4x4x8xbf16>
    %130 = vector.shape_cast %127 : vector<4x4x8xbf16> to vector<1x4x4x8xbf16>
    tpu.vector_store %arg5[%c0_131, %c0_132, %c0_133, %c16], %130 {strides = array<i32>} : memref<1x4x4x32xbf16, #tpu.memory_space<vmem>>, vector<1x4x4x8xbf16>,
    %cst_134 = arith.constant 0.000000e+00 : f32
    %131 = vector.broadcast %cst_134 : f32 to vector<4x4x8xf32>
    %c1_135 = arith.constant 1 : index
    %c1_136 = arith.constant 1 : index
    %c0_137 = arith.constant 0 : index
    %132 = vector.load %arg6[%c1_135, %c1_136, %c0_137] : memref<6x6x16xbf16, #tpu.memory_space<vmem>>, vector<4x4x16xbf16>
    %c3_138 = arith.constant 3 : index
    %c0_139 = arith.constant 0 : index
    %c0_140 = arith.constant 0 : index
    %c0_141 = arith.constant 0 : index
    %133 = vector.load %arg3[%c3_138, %c0_139, %c0_140, %c0_141] : memref<4x4x8x16xbf16, #tpu.memory_space<vmem>>, vector<1x1x8x16xbf16>
    %134 = vector.shape_cast %133 : vector<1x1x8x16xbf16> to vector<8x16xbf16>
    %135 = vector.shape_cast %134 : vector<8x16xbf16> to vector<1x8x16xbf16>
    %136 = vector.broadcast %135 : vector<1x8x16xbf16> to vector<4x8x16xbf16>
    "tpu.trace_start"() <{level = 10 : i32, message = "hwk,hnk->hwn"}> : () -> ()
    %cst_142 = arith.constant dense<0.000000e+00> : vector<4x4x8xf32>
    %137 = tpu.matmul %132, %136, %cst_142 {dimension_numbers = #tpu.dot_dimension_numbers<[2], [2], [1], [1], [0, 0, 0, 1, 1, 1], [0], [0]>} : vector<4x4x16xbf16>, vector<4x8x16xbf16>, vector<4x4x8xf32> -> vector<4x4x8xf32>
    "tpu.trace_stop"() : () -> ()
    %138 = arith.addf %131, %137 : vector<4x4x8xf32>
    %c1_143 = arith.constant 1 : index
    %c2_144 = arith.constant 2 : index
    %c0_145 = arith.constant 0 : index
    %139 = vector.load %arg6[%c1_143, %c2_144, %c0_145] : memref<6x6x16xbf16, #tpu.memory_space<vmem>>, vector<4x4x16xbf16>
    %c3_146 = arith.constant 3 : index
    %c1_147 = arith.constant 1 : index
    %c0_148 = arith.constant 0 : index
    %c0_149 = arith.constant 0 : index
    %140 = vector.load %arg3[%c3_146, %c1_147, %c0_148, %c0_149] : memref<4x4x8x16xbf16, #tpu.memory_space<vmem>>, vector<1x1x8x16xbf16>
    %141 = vector.shape_cast %140 : vector<1x1x8x16xbf16> to vector<8x16xbf16>
    %142 = vector.shape_cast %141 : vector<8x16xbf16> to vector<1x8x16xbf16>
    %143 = vector.broadcast %142 : vector<1x8x16xbf16> to vector<4x8x16xbf16>
    "tpu.trace_start"() <{level = 10 : i32, message = "hwk,hnk->hwn"}> : () -> ()
    %cst_150 = arith.constant dense<0.000000e+00> : vector<4x4x8xf32>
    %144 = tpu.matmul %139, %143, %cst_150 {dimension_numbers = #tpu.dot_dimension_numbers<[2], [2], [1], [1], [0, 0, 0, 1, 1, 1], [0], [0]>} : vector<4x4x16xbf16>, vector<4x8x16xbf16>, vector<4x4x8xf32> -> vector<4x4x8xf32>
    "tpu.trace_stop"() : () -> ()
    %145 = arith.addf %138, %144 : vector<4x4x8xf32>
    %c2_151 = arith.constant 2 : index
    %c1_152 = arith.constant 1 : index
    %c0_153 = arith.constant 0 : index
    %146 = vector.load %arg6[%c2_151, %c1_152, %c0_153] : memref<6x6x16xbf16, #tpu.memory_space<vmem>>, vector<4x4x16xbf16>
    %c3_154 = arith.constant 3 : index
    %c2_155 = arith.constant 2 : index
    %c0_156 = arith.constant 0 : index
    %c0_157 = arith.constant 0 : index
    %147 = vector.load %arg3[%c3_154, %c2_155, %c0_156, %c0_157] : memref<4x4x8x16xbf16, #tpu.memory_space<vmem>>, vector<1x1x8x16xbf16>
    %148 = vector.shape_cast %147 : vector<1x1x8x16xbf16> to vector<8x16xbf16>
    %149 = vector.shape_cast %148 : vector<8x16xbf16> to vector<1x8x16xbf16>
    %150 = vector.broadcast %149 : vector<1x8x16xbf16> to vector<4x8x16xbf16>
    "tpu.trace_start"() <{level = 10 : i32, message = "hwk,hnk->hwn"}> : () -> ()
    %cst_158 = arith.constant dense<0.000000e+00> : vector<4x4x8xf32>
    %151 = tpu.matmul %146, %150, %cst_158 {dimension_numbers = #tpu.dot_dimension_numbers<[2], [2], [1], [1], [0, 0, 0, 1, 1, 1], [0], [0]>} : vector<4x4x16xbf16>, vector<4x8x16xbf16>, vector<4x4x8xf32> -> vector<4x4x8xf32>
    "tpu.trace_stop"() : () -> ()
    %152 = arith.addf %145, %151 : vector<4x4x8xf32>
    %c2_159 = arith.constant 2 : index
    %c2_160 = arith.constant 2 : index
    %c0_161 = arith.constant 0 : index
    %153 = vector.load %arg6[%c2_159, %c2_160, %c0_161] : memref<6x6x16xbf16, #tpu.memory_space<vmem>>, vector<4x4x16xbf16>
    %c3_162 = arith.constant 3 : index
    %c3_163 = arith.constant 3 : index
    %c0_164 = arith.constant 0 : index
    %c0_165 = arith.constant 0 : index
    %154 = vector.load %arg3[%c3_162, %c3_163, %c0_164, %c0_165] : memref<4x4x8x16xbf16, #tpu.memory_space<vmem>>, vector<1x1x8x16xbf16>
    %155 = vector.shape_cast %154 : vector<1x1x8x16xbf16> to vector<8x16xbf16>
    %156 = vector.shape_cast %155 : vector<8x16xbf16> to vector<1x8x16xbf16>
    %157 = vector.broadcast %156 : vector<1x8x16xbf16> to vector<4x8x16xbf16>
    "tpu.trace_start"() <{level = 10 : i32, message = "hwk,hnk->hwn"}> : () -> ()
    %cst_166 = arith.constant dense<0.000000e+00> : vector<4x4x8xf32>
    %158 = tpu.matmul %153, %157, %cst_166 {dimension_numbers = #tpu.dot_dimension_numbers<[2], [2], [1], [1], [0, 0, 0, 1, 1, 1], [0], [0]>} : vector<4x4x16xbf16>, vector<4x8x16xbf16>, vector<4x4x8xf32> -> vector<4x4x8xf32>
    "tpu.trace_stop"() : () -> ()
    %159 = arith.addf %152, %158 : vector<4x4x8xf32>
    %c0_167 = arith.constant 0 : index
    %c0_168 = arith.constant 0 : index
    %c0_169 = arith.constant 0 : index
    %160 = vector.load %arg4[%c0_167, %c0_168, %c0_169] : memref<1x1x8xf32, #tpu.memory_space<vmem>>, vector<1x1x8xf32>
    %161 = vector.broadcast %160 : vector<1x1x8xf32> to vector<4x4x8xf32>
    %162 = arith.addf %159, %161 : vector<4x4x8xf32>
    %cst_170 = arith.constant 0.000000e+00 : f32
    %163 = vector.broadcast %cst_170 : f32 to vector<4x4x8xf32>
    %164 = arith.cmpf oge, %162, %163 : vector<4x4x8xf32>
    %cst_171 = arith.constant 2.000000e-01 : f32
    %165 = vector.broadcast %cst_171 : f32 to vector<4x4x8xf32>
    %166 = arith.mulf %165, %162 : vector<4x4x8xf32>
    %167 = arith.select %164, %162, %166 : vector<4x4x8xi1>, vector<4x4x8xf32>
    %168 = arith.truncf %167 : vector<4x4x8xf32> to vector<4x4x8xbf16>
    %c0_172 = arith.constant 0 : index
    %c0_173 = arith.constant 0 : index
    %c0_174 = arith.constant 0 : index
    %c24 = arith.constant 24 : index
    %169 = vector.load %arg5[%c0_172, %c0_173, %c0_174, %c24] : memref<1x4x4x32xbf16, #tpu.memory_space<vmem>>, vector<1x4x4x8xbf16>
    %170 = vector.shape_cast %169 : vector<1x4x4x8xbf16> to vector<4x4x8xbf16>
    %171 = vector.shape_cast %168 : vector<4x4x8xbf16> to vector<1x4x4x8xbf16>
    tpu.vector_store %arg5[%c0_172, %c0_173, %c0_174, %c24], %171 {strides = array<i32>} : memref<1x4x4x32xbf16, #tpu.memory_space<vmem>>, vector<1x4x4x8xbf16>,
    return
  }
  func.func @transform_0(%arg0: i32) -> (i32, i32, i32, i32) {
    %c0_i32 = arith.constant 0 : i32
    %c0_i32_0 = arith.constant 0 : i32
    %c0_i32_1 = arith.constant 0 : i32
    %c0_i32_2 = arith.constant 0 : i32
    return %arg0, %c0_i32, %c0_i32_0, %c0_i32_1 : i32, i32, i32, i32
  }
  func.func @transform_1(%arg0: i32) -> (i32, i32, i32, i32) {
    %c0_i32 = arith.constant 0 : i32
    %c0_i32_0 = arith.constant 0 : i32
    %c0_i32_1 = arith.constant 0 : i32
    %c0_i32_2 = arith.constant 0 : i32
    return %arg0, %c0_i32, %c0_i32_0, %c0_i32_1 : i32, i32, i32, i32
  }
  func.func @transform_2(%arg0: i32) -> (i32, i32, i32, i32) {
    %c0_i32 = arith.constant 0 : i32
    %c0_i32_0 = arith.constant 0 : i32
    %c0_i32_1 = arith.constant 0 : i32
    %c0_i32_2 = arith.constant 0 : i32
    %c0_i32_3 = arith.constant 0 : i32
    return %c0_i32, %c0_i32_0, %c0_i32_1, %c0_i32_2 : i32, i32, i32, i32
  }
  func.func @transform_3(%arg0: i32) -> (i32, i32, i32) {
    %c0_i32 = arith.constant 0 : i32
    %c0_i32_0 = arith.constant 0 : i32
    %c0_i32_1 = arith.constant 0 : i32
    %c0_i32_2 = arith.constant 0 : i32
    return %c0_i32, %c0_i32_0, %c0_i32_1 : i32, i32, i32
  }
  func.func @transform_4(%arg0: i32) -> (i32, i32, i32, i32) {
    %c0_i32 = arith.constant 0 : i32
    %c0_i32_0 = arith.constant 0 : i32
    %c0_i32_1 = arith.constant 0 : i32
    %c0_i32_2 = arith.constant 0 : i32
    return %arg0, %c0_i32, %c0_i32_0, %c0_i32_1 : i32, i32, i32, i32
  }
}

module attributes {stable_mosaic.version = 11 : i64} {
  func.func @_bottleneck_kernel(%arg0: i32, %arg1: memref<2x512xbf16, #tpu.memory_space<vmem>>, %arg2: memref<512x32xbf16, #tpu.memory_space<vmem>>, %arg3: memref<1x32xf32, #tpu.memory_space<vmem>>, %arg4: memref<32x256xbf16, #tpu.memory_space<vmem>>, %arg5: memref<1x256xf32, #tpu.memory_space<vmem>>, %arg6: memref<2x256xbf16, #tpu.memory_space<vmem>>) attributes {dimension_semantics = [#tpu.dimension_semantics<arbitrary>], iteration_bounds = array<i64: 1>, scalar_prefetch = 0 : i64, scratch_operands = 0 : i64, tpu.core_type = #tpu.core_type<tc>, window_params = [{pipeline_mode = #tpu.pipeline_mode<synchronous>, transform_indices = @transform_0, window_bounds = array<i64: 2, 512>}, {pipeline_mode = #tpu.pipeline_mode<synchronous>, transform_indices = @transform_1, window_bounds = array<i64: 512, 32>}, {pipeline_mode = #tpu.pipeline_mode<synchronous>, transform_indices = @transform_2, window_bounds = array<i64: 1, 32>}, {pipeline_mode = #tpu.pipeline_mode<synchronous>, transform_indices = @transform_3, window_bounds = array<i64: 32, 256>}, {pipeline_mode = #tpu.pipeline_mode<synchronous>, transform_indices = @transform_4, window_bounds = array<i64: 1, 256>}, {pipeline_mode = #tpu.pipeline_mode<synchronous>, transform_indices = @transform_5, window_bounds = array<i64: 2, 256>}]} {
    %c0 = arith.constant 0 : index
    %c0_0 = arith.constant 0 : index
    %0 = vector.load %arg1[%c0, %c0_0] : memref<2x512xbf16, #tpu.memory_space<vmem>>, vector<2x512xbf16>
    %c0_1 = arith.constant 0 : index
    %c0_2 = arith.constant 0 : index
    %1 = vector.load %arg2[%c0_1, %c0_2] : memref<512x32xbf16, #tpu.memory_space<vmem>>, vector<512x32xbf16>
    %cst = arith.constant dense<0.000000e+00> : vector<2x32xf32>
    %2 = tpu.matmul %0, %1, %cst {dimension_numbers = #tpu.dot_dimension_numbers<[1], [0], [0], [1], [0, 0, 1, 1], [], []>} : vector<2x512xbf16>, vector<512x32xbf16>, vector<2x32xf32> -> vector<2x32xf32>
    %c0_3 = arith.constant 0 : index
    %c0_4 = arith.constant 0 : index
    %3 = vector.load %arg3[%c0_3, %c0_4] : memref<1x32xf32, #tpu.memory_space<vmem>>, vector<1x32xf32>
    %4 = vector.broadcast %3 : vector<1x32xf32> to vector<2x32xf32>
    %5 = arith.addf %2, %4 : vector<2x32xf32>
    %6 = arith.truncf %5 : vector<2x32xf32> to vector<2x32xbf16>
    %c0_5 = arith.constant 0 : index
    %c0_6 = arith.constant 0 : index
    %7 = vector.load %arg4[%c0_5, %c0_6] : memref<32x256xbf16, #tpu.memory_space<vmem>>, vector<32x256xbf16>
    %cst_7 = arith.constant dense<0.000000e+00> : vector<2x256xf32>
    %8 = tpu.matmul %6, %7, %cst_7 {dimension_numbers = #tpu.dot_dimension_numbers<[1], [0], [0], [1], [0, 0, 1, 1], [], []>} : vector<2x32xbf16>, vector<32x256xbf16>, vector<2x256xf32> -> vector<2x256xf32>
    %c0_8 = arith.constant 0 : index
    %c0_9 = arith.constant 0 : index
    %9 = vector.load %arg5[%c0_8, %c0_9] : memref<1x256xf32, #tpu.memory_space<vmem>>, vector<1x256xf32>
    %10 = vector.broadcast %9 : vector<1x256xf32> to vector<2x256xf32>
    %11 = arith.addf %8, %10 : vector<2x256xf32>
    %12 = arith.truncf %11 : vector<2x256xf32> to vector<2x256xbf16>
    %c0_10 = arith.constant 0 : index
    %c0_11 = arith.constant 0 : index
    %13 = vector.load %arg6[%c0_10, %c0_11] : memref<2x256xbf16, #tpu.memory_space<vmem>>, vector<2x256xbf16>
    tpu.vector_store %arg6[%c0_10, %c0_11], %12 {strides = array<i32>} : memref<2x256xbf16, #tpu.memory_space<vmem>>, vector<2x256xbf16>,
    return
  }
  func.func @transform_0(%arg0: i32) -> (i32, i32) {
    %c0_i32 = arith.constant 0 : i32
    %c0_i32_0 = arith.constant 0 : i32
    %c0_i32_1 = arith.constant 0 : i32
    return %c0_i32, %c0_i32_0 : i32, i32
  }
  func.func @transform_1(%arg0: i32) -> (i32, i32) {
    %c0_i32 = arith.constant 0 : i32
    %c0_i32_0 = arith.constant 0 : i32
    %c0_i32_1 = arith.constant 0 : i32
    return %c0_i32, %c0_i32_0 : i32, i32
  }
  func.func @transform_2(%arg0: i32) -> (i32, i32) {
    %c0_i32 = arith.constant 0 : i32
    %c0_i32_0 = arith.constant 0 : i32
    %c0_i32_1 = arith.constant 0 : i32
    return %c0_i32, %c0_i32_0 : i32, i32
  }
  func.func @transform_3(%arg0: i32) -> (i32, i32) {
    %c0_i32 = arith.constant 0 : i32
    %c0_i32_0 = arith.constant 0 : i32
    %c0_i32_1 = arith.constant 0 : i32
    return %c0_i32, %c0_i32_0 : i32, i32
  }
  func.func @transform_4(%arg0: i32) -> (i32, i32) {
    %c0_i32 = arith.constant 0 : i32
    %c0_i32_0 = arith.constant 0 : i32
    %c0_i32_1 = arith.constant 0 : i32
    return %c0_i32, %c0_i32_0 : i32, i32
  }
  func.func @transform_5(%arg0: i32) -> (i32, i32) {
    %c0_i32 = arith.constant 0 : i32
    %c0_i32_0 = arith.constant 0 : i32
    %c0_i32_1 = arith.constant 0 : i32
    return %c0_i32, %c0_i32_0 : i32, i32
  }
}

module attributes {stable_mosaic.version = 11 : i64} {
  func.func @_dec_conv_kernel(%arg0: i32, %arg1: memref<1x8x8x8xbf16, #tpu.memory_space<vmem>>, %arg2: memref<1x8x8x8xbf16, #tpu.memory_space<vmem>>, %arg3: memref<4x4x4x8xbf16, #tpu.memory_space<vmem>>, %arg4: memref<1x1x4xf32, #tpu.memory_space<vmem>>, %arg5: memref<1x8x8x16xbf16, #tpu.memory_space<vmem>>, %arg6: memref<10x10x8xbf16, #tpu.memory_space<vmem>>) attributes {dimension_semantics = [#tpu.dimension_semantics<parallel>], iteration_bounds = array<i64: 2>, scalar_prefetch = 0 : i64, scratch_operands = 1 : i64, tpu.core_type = #tpu.core_type<tc>, window_params = [{transform_indices = @transform_0, window_bounds = array<i64: 1, 8, 8, 8>}, {transform_indices = @transform_1, window_bounds = array<i64: 1, 8, 8, 8>}, {pipeline_mode = #tpu.pipeline_mode<synchronous>, transform_indices = @transform_2, window_bounds = array<i64: 4, 4, 4, 8>}, {pipeline_mode = #tpu.pipeline_mode<synchronous>, transform_indices = @transform_3, window_bounds = array<i64: 1, 1, 4>}, {transform_indices = @transform_4, window_bounds = array<i64: 1, 8, 8, 16>}]} {
    %cst = arith.constant 0.000000e+00 : bf16
    %0 = vector.broadcast %cst : bf16 to vector<10x10x8xbf16>
    %c0 = arith.constant 0 : index
    %c0_0 = arith.constant 0 : index
    %c0_1 = arith.constant 0 : index
    %1 = vector.load %arg6[%c0, %c0_0, %c0_1] : memref<10x10x8xbf16, #tpu.memory_space<vmem>>, vector<10x10x8xbf16>
    tpu.vector_store %arg6[%c0, %c0_0, %c0_1], %0 {strides = array<i32>} : memref<10x10x8xbf16, #tpu.memory_space<vmem>>, vector<10x10x8xbf16>,
    %c0_2 = arith.constant 0 : index
    %c0_3 = arith.constant 0 : index
    %c0_4 = arith.constant 0 : index
    %c0_5 = arith.constant 0 : index
    %2 = vector.load %arg1[%c0_2, %c0_3, %c0_4, %c0_5] : memref<1x8x8x8xbf16, #tpu.memory_space<vmem>>, vector<1x8x8x8xbf16>
    %3 = vector.shape_cast %2 : vector<1x8x8x8xbf16> to vector<8x8x8xbf16>
    %c0_6 = arith.constant 0 : index
    %c0_7 = arith.constant 0 : index
    %c0_8 = arith.constant 0 : index
    %c0_9 = arith.constant 0 : index
    %4 = vector.load %arg2[%c0_6, %c0_7, %c0_8, %c0_9] : memref<1x8x8x8xbf16, #tpu.memory_space<vmem>>, vector<1x8x8x8xbf16>
    %5 = vector.shape_cast %4 : vector<1x8x8x8xbf16> to vector<8x8x8xbf16>
    %6 = arith.addf %3, %5 : vector<8x8x8xbf16>
    %c1 = arith.constant 1 : index
    %c1_10 = arith.constant 1 : index
    %c0_11 = arith.constant 0 : index
    %7 = vector.load %arg6[%c1, %c1_10, %c0_11] : memref<10x10x8xbf16, #tpu.memory_space<vmem>>, vector<8x8x8xbf16>
    tpu.vector_store %arg6[%c1, %c1_10, %c0_11], %6 {strides = array<i32>} : memref<10x10x8xbf16, #tpu.memory_space<vmem>>, vector<8x8x8xbf16>,
    %cst_12 = arith.constant 0.000000e+00 : f32
    %8 = vector.broadcast %cst_12 : f32 to vector<8x8x4xf32>
    %c0_13 = arith.constant 0 : index
    %c0_14 = arith.constant 0 : index
    %c0_15 = arith.constant 0 : index
    %9 = vector.load %arg6[%c0_13, %c0_14, %c0_15] : memref<10x10x8xbf16, #tpu.memory_space<vmem>>, vector<8x8x8xbf16>
    %c0_16 = arith.constant 0 : index
    %c0_17 = arith.constant 0 : index
    %c0_18 = arith.constant 0 : index
    %c0_19 = arith.constant 0 : index
    %10 = vector.load %arg3[%c0_16, %c0_17, %c0_18, %c0_19] : memref<4x4x4x8xbf16, #tpu.memory_space<vmem>>, vector<1x1x4x8xbf16>
    %11 = vector.shape_cast %10 : vector<1x1x4x8xbf16> to vector<4x8xbf16>
    %12 = vector.shape_cast %11 : vector<4x8xbf16> to vector<1x4x8xbf16>
    %13 = vector.broadcast %12 : vector<1x4x8xbf16> to vector<8x4x8xbf16>
    "tpu.trace_start"() <{level = 10 : i32, message = "hwk,hnk->hwn"}> : () -> ()
    %cst_20 = arith.constant dense<0.000000e+00> : vector<8x8x4xf32>
    %14 = tpu.matmul %9, %13, %cst_20 {dimension_numbers = #tpu.dot_dimension_numbers<[2], [2], [1], [1], [0, 0, 0, 1, 1, 1], [0], [0]>} : vector<8x8x8xbf16>, vector<8x4x8xbf16>, vector<8x8x4xf32> -> vector<8x8x4xf32>
    "tpu.trace_stop"() : () -> ()
    %15 = arith.addf %8, %14 : vector<8x8x4xf32>
    %c0_21 = arith.constant 0 : index
    %c1_22 = arith.constant 1 : index
    %c0_23 = arith.constant 0 : index
    %16 = vector.load %arg6[%c0_21, %c1_22, %c0_23] : memref<10x10x8xbf16, #tpu.memory_space<vmem>>, vector<8x8x8xbf16>
    %c0_24 = arith.constant 0 : index
    %c1_25 = arith.constant 1 : index
    %c0_26 = arith.constant 0 : index
    %c0_27 = arith.constant 0 : index
    %17 = vector.load %arg3[%c0_24, %c1_25, %c0_26, %c0_27] : memref<4x4x4x8xbf16, #tpu.memory_space<vmem>>, vector<1x1x4x8xbf16>
    %18 = vector.shape_cast %17 : vector<1x1x4x8xbf16> to vector<4x8xbf16>
    %19 = vector.shape_cast %18 : vector<4x8xbf16> to vector<1x4x8xbf16>
    %20 = vector.broadcast %19 : vector<1x4x8xbf16> to vector<8x4x8xbf16>
    "tpu.trace_start"() <{level = 10 : i32, message = "hwk,hnk->hwn"}> : () -> ()
    %cst_28 = arith.constant dense<0.000000e+00> : vector<8x8x4xf32>
    %21 = tpu.matmul %16, %20, %cst_28 {dimension_numbers = #tpu.dot_dimension_numbers<[2], [2], [1], [1], [0, 0, 0, 1, 1, 1], [0], [0]>} : vector<8x8x8xbf16>, vector<8x4x8xbf16>, vector<8x8x4xf32> -> vector<8x8x4xf32>
    "tpu.trace_stop"() : () -> ()
    %22 = arith.addf %15, %21 : vector<8x8x4xf32>
    %c1_29 = arith.constant 1 : index
    %c0_30 = arith.constant 0 : index
    %c0_31 = arith.constant 0 : index
    %23 = vector.load %arg6[%c1_29, %c0_30, %c0_31] : memref<10x10x8xbf16, #tpu.memory_space<vmem>>, vector<8x8x8xbf16>
    %c0_32 = arith.constant 0 : index
    %c2 = arith.constant 2 : index
    %c0_33 = arith.constant 0 : index
    %c0_34 = arith.constant 0 : index
    %24 = vector.load %arg3[%c0_32, %c2, %c0_33, %c0_34] : memref<4x4x4x8xbf16, #tpu.memory_space<vmem>>, vector<1x1x4x8xbf16>
    %25 = vector.shape_cast %24 : vector<1x1x4x8xbf16> to vector<4x8xbf16>
    %26 = vector.shape_cast %25 : vector<4x8xbf16> to vector<1x4x8xbf16>
    %27 = vector.broadcast %26 : vector<1x4x8xbf16> to vector<8x4x8xbf16>
    "tpu.trace_start"() <{level = 10 : i32, message = "hwk,hnk->hwn"}> : () -> ()
    %cst_35 = arith.constant dense<0.000000e+00> : vector<8x8x4xf32>
    %28 = tpu.matmul %23, %27, %cst_35 {dimension_numbers = #tpu.dot_dimension_numbers<[2], [2], [1], [1], [0, 0, 0, 1, 1, 1], [0], [0]>} : vector<8x8x8xbf16>, vector<8x4x8xbf16>, vector<8x8x4xf32> -> vector<8x8x4xf32>
    "tpu.trace_stop"() : () -> ()
    %29 = arith.addf %22, %28 : vector<8x8x4xf32>
    %c1_36 = arith.constant 1 : index
    %c1_37 = arith.constant 1 : index
    %c0_38 = arith.constant 0 : index
    %30 = vector.load %arg6[%c1_36, %c1_37, %c0_38] : memref<10x10x8xbf16, #tpu.memory_space<vmem>>, vector<8x8x8xbf16>
    %c0_39 = arith.constant 0 : index
    %c3 = arith.constant 3 : index
    %c0_40 = arith.constant 0 : index
    %c0_41 = arith.constant 0 : index
    %31 = vector.load %arg3[%c0_39, %c3, %c0_40, %c0_41] : memref<4x4x4x8xbf16, #tpu.memory_space<vmem>>, vector<1x1x4x8xbf16>
    %32 = vector.shape_cast %31 : vector<1x1x4x8xbf16> to vector<4x8xbf16>
    %33 = vector.shape_cast %32 : vector<4x8xbf16> to vector<1x4x8xbf16>
    %34 = vector.broadcast %33 : vector<1x4x8xbf16> to vector<8x4x8xbf16>
    "tpu.trace_start"() <{level = 10 : i32, message = "hwk,hnk->hwn"}> : () -> ()
    %cst_42 = arith.constant dense<0.000000e+00> : vector<8x8x4xf32>
    %35 = tpu.matmul %30, %34, %cst_42 {dimension_numbers = #tpu.dot_dimension_numbers<[2], [2], [1], [1], [0, 0, 0, 1, 1, 1], [0], [0]>} : vector<8x8x8xbf16>, vector<8x4x8xbf16>, vector<8x8x4xf32> -> vector<8x8x4xf32>
    "tpu.trace_stop"() : () -> ()
    %36 = arith.addf %29, %35 : vector<8x8x4xf32>
    %c0_43 = arith.constant 0 : index
    %c0_44 = arith.constant 0 : index
    %c0_45 = arith.constant 0 : index
    %37 = vector.load %arg4[%c0_43, %c0_44, %c0_45] : memref<1x1x4xf32, #tpu.memory_space<vmem>>, vector<1x1x4xf32>
    %38 = vector.broadcast %37 : vector<1x1x4xf32> to vector<8x8x4xf32>
    %39 = arith.addf %36, %38 : vector<8x8x4xf32>
    %cst_46 = arith.constant 0.000000e+00 : f32
    %40 = vector.broadcast %cst_46 : f32 to vector<8x8x4xf32>
    %41 = arith.cmpf oge, %39, %40 : vector<8x8x4xf32>
    %cst_47 = arith.constant 2.000000e-01 : f32
    %42 = vector.broadcast %cst_47 : f32 to vector<8x8x4xf32>
    %43 = arith.mulf %42, %39 : vector<8x8x4xf32>
    %44 = arith.select %41, %39, %43 : vector<8x8x4xi1>, vector<8x8x4xf32>
    %45 = arith.truncf %44 : vector<8x8x4xf32> to vector<8x8x4xbf16>
    %c0_48 = arith.constant 0 : index
    %c0_49 = arith.constant 0 : index
    %c0_50 = arith.constant 0 : index
    %c0_51 = arith.constant 0 : index
    %46 = vector.load %arg5[%c0_48, %c0_49, %c0_50, %c0_51] : memref<1x8x8x16xbf16, #tpu.memory_space<vmem>>, vector<1x8x8x4xbf16>
    %47 = vector.shape_cast %46 : vector<1x8x8x4xbf16> to vector<8x8x4xbf16>
    %48 = vector.shape_cast %45 : vector<8x8x4xbf16> to vector<1x8x8x4xbf16>
    tpu.vector_store %arg5[%c0_48, %c0_49, %c0_50, %c0_51], %48 {strides = array<i32>} : memref<1x8x8x16xbf16, #tpu.memory_space<vmem>>, vector<1x8x8x4xbf16>,
    %cst_52 = arith.constant 0.000000e+00 : f32
    %49 = vector.broadcast %cst_52 : f32 to vector<8x8x4xf32>
    %c0_53 = arith.constant 0 : index
    %c1_54 = arith.constant 1 : index
    %c0_55 = arith.constant 0 : index
    %50 = vector.load %arg6[%c0_53, %c1_54, %c0_55] : memref<10x10x8xbf16, #tpu.memory_space<vmem>>, vector<8x8x8xbf16>
    %c1_56 = arith.constant 1 : index
    %c0_57 = arith.constant 0 : index
    %c0_58 = arith.constant 0 : index
    %c0_59 = arith.constant 0 : index
    %51 = vector.load %arg3[%c1_56, %c0_57, %c0_58, %c0_59] : memref<4x4x4x8xbf16, #tpu.memory_space<vmem>>, vector<1x1x4x8xbf16>
    %52 = vector.shape_cast %51 : vector<1x1x4x8xbf16> to vector<4x8xbf16>
    %53 = vector.shape_cast %52 : vector<4x8xbf16> to vector<1x4x8xbf16>
    %54 = vector.broadcast %53 : vector<1x4x8xbf16> to vector<8x4x8xbf16>
    "tpu.trace_start"() <{level = 10 : i32, message = "hwk,hnk->hwn"}> : () -> ()
    %cst_60 = arith.constant dense<0.000000e+00> : vector<8x8x4xf32>
    %55 = tpu.matmul %50, %54, %cst_60 {dimension_numbers = #tpu.dot_dimension_numbers<[2], [2], [1], [1], [0, 0, 0, 1, 1, 1], [0], [0]>} : vector<8x8x8xbf16>, vector<8x4x8xbf16>, vector<8x8x4xf32> -> vector<8x8x4xf32>
    "tpu.trace_stop"() : () -> ()
    %56 = arith.addf %49, %55 : vector<8x8x4xf32>
    %c0_61 = arith.constant 0 : index
    %c2_62 = arith.constant 2 : index
    %c0_63 = arith.constant 0 : index
    %57 = vector.load %arg6[%c0_61, %c2_62, %c0_63] : memref<10x10x8xbf16, #tpu.memory_space<vmem>>, vector<8x8x8xbf16>
    %c1_64 = arith.constant 1 : index
    %c1_65 = arith.constant 1 : index
    %c0_66 = arith.constant 0 : index
    %c0_67 = arith.constant 0 : index
    %58 = vector.load %arg3[%c1_64, %c1_65, %c0_66, %c0_67] : memref<4x4x4x8xbf16, #tpu.memory_space<vmem>>, vector<1x1x4x8xbf16>
    %59 = vector.shape_cast %58 : vector<1x1x4x8xbf16> to vector<4x8xbf16>
    %60 = vector.shape_cast %59 : vector<4x8xbf16> to vector<1x4x8xbf16>
    %61 = vector.broadcast %60 : vector<1x4x8xbf16> to vector<8x4x8xbf16>
    "tpu.trace_start"() <{level = 10 : i32, message = "hwk,hnk->hwn"}> : () -> ()
    %cst_68 = arith.constant dense<0.000000e+00> : vector<8x8x4xf32>
    %62 = tpu.matmul %57, %61, %cst_68 {dimension_numbers = #tpu.dot_dimension_numbers<[2], [2], [1], [1], [0, 0, 0, 1, 1, 1], [0], [0]>} : vector<8x8x8xbf16>, vector<8x4x8xbf16>, vector<8x8x4xf32> -> vector<8x8x4xf32>
    "tpu.trace_stop"() : () -> ()
    %63 = arith.addf %56, %62 : vector<8x8x4xf32>
    %c1_69 = arith.constant 1 : index
    %c1_70 = arith.constant 1 : index
    %c0_71 = arith.constant 0 : index
    %64 = vector.load %arg6[%c1_69, %c1_70, %c0_71] : memref<10x10x8xbf16, #tpu.memory_space<vmem>>, vector<8x8x8xbf16>
    %c1_72 = arith.constant 1 : index
    %c2_73 = arith.constant 2 : index
    %c0_74 = arith.constant 0 : index
    %c0_75 = arith.constant 0 : index
    %65 = vector.load %arg3[%c1_72, %c2_73, %c0_74, %c0_75] : memref<4x4x4x8xbf16, #tpu.memory_space<vmem>>, vector<1x1x4x8xbf16>
    %66 = vector.shape_cast %65 : vector<1x1x4x8xbf16> to vector<4x8xbf16>
    %67 = vector.shape_cast %66 : vector<4x8xbf16> to vector<1x4x8xbf16>
    %68 = vector.broadcast %67 : vector<1x4x8xbf16> to vector<8x4x8xbf16>
    "tpu.trace_start"() <{level = 10 : i32, message = "hwk,hnk->hwn"}> : () -> ()
    %cst_76 = arith.constant dense<0.000000e+00> : vector<8x8x4xf32>
    %69 = tpu.matmul %64, %68, %cst_76 {dimension_numbers = #tpu.dot_dimension_numbers<[2], [2], [1], [1], [0, 0, 0, 1, 1, 1], [0], [0]>} : vector<8x8x8xbf16>, vector<8x4x8xbf16>, vector<8x8x4xf32> -> vector<8x8x4xf32>
    "tpu.trace_stop"() : () -> ()
    %70 = arith.addf %63, %69 : vector<8x8x4xf32>
    %c1_77 = arith.constant 1 : index
    %c2_78 = arith.constant 2 : index
    %c0_79 = arith.constant 0 : index
    %71 = vector.load %arg6[%c1_77, %c2_78, %c0_79] : memref<10x10x8xbf16, #tpu.memory_space<vmem>>, vector<8x8x8xbf16>
    %c1_80 = arith.constant 1 : index
    %c3_81 = arith.constant 3 : index
    %c0_82 = arith.constant 0 : index
    %c0_83 = arith.constant 0 : index
    %72 = vector.load %arg3[%c1_80, %c3_81, %c0_82, %c0_83] : memref<4x4x4x8xbf16, #tpu.memory_space<vmem>>, vector<1x1x4x8xbf16>
    %73 = vector.shape_cast %72 : vector<1x1x4x8xbf16> to vector<4x8xbf16>
    %74 = vector.shape_cast %73 : vector<4x8xbf16> to vector<1x4x8xbf16>
    %75 = vector.broadcast %74 : vector<1x4x8xbf16> to vector<8x4x8xbf16>
    "tpu.trace_start"() <{level = 10 : i32, message = "hwk,hnk->hwn"}> : () -> ()
    %cst_84 = arith.constant dense<0.000000e+00> : vector<8x8x4xf32>
    %76 = tpu.matmul %71, %75, %cst_84 {dimension_numbers = #tpu.dot_dimension_numbers<[2], [2], [1], [1], [0, 0, 0, 1, 1, 1], [0], [0]>} : vector<8x8x8xbf16>, vector<8x4x8xbf16>, vector<8x8x4xf32> -> vector<8x8x4xf32>
    "tpu.trace_stop"() : () -> ()
    %77 = arith.addf %70, %76 : vector<8x8x4xf32>
    %c0_85 = arith.constant 0 : index
    %c0_86 = arith.constant 0 : index
    %c0_87 = arith.constant 0 : index
    %78 = vector.load %arg4[%c0_85, %c0_86, %c0_87] : memref<1x1x4xf32, #tpu.memory_space<vmem>>, vector<1x1x4xf32>
    %79 = vector.broadcast %78 : vector<1x1x4xf32> to vector<8x8x4xf32>
    %80 = arith.addf %77, %79 : vector<8x8x4xf32>
    %cst_88 = arith.constant 0.000000e+00 : f32
    %81 = vector.broadcast %cst_88 : f32 to vector<8x8x4xf32>
    %82 = arith.cmpf oge, %80, %81 : vector<8x8x4xf32>
    %cst_89 = arith.constant 2.000000e-01 : f32
    %83 = vector.broadcast %cst_89 : f32 to vector<8x8x4xf32>
    %84 = arith.mulf %83, %80 : vector<8x8x4xf32>
    %85 = arith.select %82, %80, %84 : vector<8x8x4xi1>, vector<8x8x4xf32>
    %86 = arith.truncf %85 : vector<8x8x4xf32> to vector<8x8x4xbf16>
    %c0_90 = arith.constant 0 : index
    %c0_91 = arith.constant 0 : index
    %c0_92 = arith.constant 0 : index
    %c4 = arith.constant 4 : index
    %87 = vector.load %arg5[%c0_90, %c0_91, %c0_92, %c4] : memref<1x8x8x16xbf16, #tpu.memory_space<vmem>>, vector<1x8x8x4xbf16>
    %88 = vector.shape_cast %87 : vector<1x8x8x4xbf16> to vector<8x8x4xbf16>
    %89 = vector.shape_cast %86 : vector<8x8x4xbf16> to vector<1x8x8x4xbf16>
    tpu.vector_store %arg5[%c0_90, %c0_91, %c0_92, %c4], %89 {strides = array<i32>} : memref<1x8x8x16xbf16, #tpu.memory_space<vmem>>, vector<1x8x8x4xbf16>,
    %cst_93 = arith.constant 0.000000e+00 : f32
    %90 = vector.broadcast %cst_93 : f32 to vector<8x8x4xf32>
    %c1_94 = arith.constant 1 : index
    %c0_95 = arith.constant 0 : index
    %c0_96 = arith.constant 0 : index
    %91 = vector.load %arg6[%c1_94, %c0_95, %c0_96] : memref<10x10x8xbf16, #tpu.memory_space<vmem>>, vector<8x8x8xbf16>
    %c2_97 = arith.constant 2 : index
    %c0_98 = arith.constant 0 : index
    %c0_99 = arith.constant 0 : index
    %c0_100 = arith.constant 0 : index
    %92 = vector.load %arg3[%c2_97, %c0_98, %c0_99, %c0_100] : memref<4x4x4x8xbf16, #tpu.memory_space<vmem>>, vector<1x1x4x8xbf16>
    %93 = vector.shape_cast %92 : vector<1x1x4x8xbf16> to vector<4x8xbf16>
    %94 = vector.shape_cast %93 : vector<4x8xbf16> to vector<1x4x8xbf16>
    %95 = vector.broadcast %94 : vector<1x4x8xbf16> to vector<8x4x8xbf16>
    "tpu.trace_start"() <{level = 10 : i32, message = "hwk,hnk->hwn"}> : () -> ()
    %cst_101 = arith.constant dense<0.000000e+00> : vector<8x8x4xf32>
    %96 = tpu.matmul %91, %95, %cst_101 {dimension_numbers = #tpu.dot_dimension_numbers<[2], [2], [1], [1], [0, 0, 0, 1, 1, 1], [0], [0]>} : vector<8x8x8xbf16>, vector<8x4x8xbf16>, vector<8x8x4xf32> -> vector<8x8x4xf32>
    "tpu.trace_stop"() : () -> ()
    %97 = arith.addf %90, %96 : vector<8x8x4xf32>
    %c1_102 = arith.constant 1 : index
    %c1_103 = arith.constant 1 : index
    %c0_104 = arith.constant 0 : index
    %98 = vector.load %arg6[%c1_102, %c1_103, %c0_104] : memref<10x10x8xbf16, #tpu.memory_space<vmem>>, vector<8x8x8xbf16>
    %c2_105 = arith.constant 2 : index
    %c1_106 = arith.constant 1 : index
    %c0_107 = arith.constant 0 : index
    %c0_108 = arith.constant 0 : index
    %99 = vector.load %arg3[%c2_105, %c1_106, %c0_107, %c0_108] : memref<4x4x4x8xbf16, #tpu.memory_space<vmem>>, vector<1x1x4x8xbf16>
    %100 = vector.shape_cast %99 : vector<1x1x4x8xbf16> to vector<4x8xbf16>
    %101 = vector.shape_cast %100 : vector<4x8xbf16> to vector<1x4x8xbf16>
    %102 = vector.broadcast %101 : vector<1x4x8xbf16> to vector<8x4x8xbf16>
    "tpu.trace_start"() <{level = 10 : i32, message = "hwk,hnk->hwn"}> : () -> ()
    %cst_109 = arith.constant dense<0.000000e+00> : vector<8x8x4xf32>
    %103 = tpu.matmul %98, %102, %cst_109 {dimension_numbers = #tpu.dot_dimension_numbers<[2], [2], [1], [1], [0, 0, 0, 1, 1, 1], [0], [0]>} : vector<8x8x8xbf16>, vector<8x4x8xbf16>, vector<8x8x4xf32> -> vector<8x8x4xf32>
    "tpu.trace_stop"() : () -> ()
    %104 = arith.addf %97, %103 : vector<8x8x4xf32>
    %c2_110 = arith.constant 2 : index
    %c0_111 = arith.constant 0 : index
    %c0_112 = arith.constant 0 : index
    %105 = vector.load %arg6[%c2_110, %c0_111, %c0_112] : memref<10x10x8xbf16, #tpu.memory_space<vmem>>, vector<8x8x8xbf16>
    %c2_113 = arith.constant 2 : index
    %c2_114 = arith.constant 2 : index
    %c0_115 = arith.constant 0 : index
    %c0_116 = arith.constant 0 : index
    %106 = vector.load %arg3[%c2_113, %c2_114, %c0_115, %c0_116] : memref<4x4x4x8xbf16, #tpu.memory_space<vmem>>, vector<1x1x4x8xbf16>
    %107 = vector.shape_cast %106 : vector<1x1x4x8xbf16> to vector<4x8xbf16>
    %108 = vector.shape_cast %107 : vector<4x8xbf16> to vector<1x4x8xbf16>
    %109 = vector.broadcast %108 : vector<1x4x8xbf16> to vector<8x4x8xbf16>
    "tpu.trace_start"() <{level = 10 : i32, message = "hwk,hnk->hwn"}> : () -> ()
    %cst_117 = arith.constant dense<0.000000e+00> : vector<8x8x4xf32>
    %110 = tpu.matmul %105, %109, %cst_117 {dimension_numbers = #tpu.dot_dimension_numbers<[2], [2], [1], [1], [0, 0, 0, 1, 1, 1], [0], [0]>} : vector<8x8x8xbf16>, vector<8x4x8xbf16>, vector<8x8x4xf32> -> vector<8x8x4xf32>
    "tpu.trace_stop"() : () -> ()
    %111 = arith.addf %104, %110 : vector<8x8x4xf32>
    %c2_118 = arith.constant 2 : index
    %c1_119 = arith.constant 1 : index
    %c0_120 = arith.constant 0 : index
    %112 = vector.load %arg6[%c2_118, %c1_119, %c0_120] : memref<10x10x8xbf16, #tpu.memory_space<vmem>>, vector<8x8x8xbf16>
    %c2_121 = arith.constant 2 : index
    %c3_122 = arith.constant 3 : index
    %c0_123 = arith.constant 0 : index
    %c0_124 = arith.constant 0 : index
    %113 = vector.load %arg3[%c2_121, %c3_122, %c0_123, %c0_124] : memref<4x4x4x8xbf16, #tpu.memory_space<vmem>>, vector<1x1x4x8xbf16>
    %114 = vector.shape_cast %113 : vector<1x1x4x8xbf16> to vector<4x8xbf16>
    %115 = vector.shape_cast %114 : vector<4x8xbf16> to vector<1x4x8xbf16>
    %116 = vector.broadcast %115 : vector<1x4x8xbf16> to vector<8x4x8xbf16>
    "tpu.trace_start"() <{level = 10 : i32, message = "hwk,hnk->hwn"}> : () -> ()
    %cst_125 = arith.constant dense<0.000000e+00> : vector<8x8x4xf32>
    %117 = tpu.matmul %112, %116, %cst_125 {dimension_numbers = #tpu.dot_dimension_numbers<[2], [2], [1], [1], [0, 0, 0, 1, 1, 1], [0], [0]>} : vector<8x8x8xbf16>, vector<8x4x8xbf16>, vector<8x8x4xf32> -> vector<8x8x4xf32>
    "tpu.trace_stop"() : () -> ()
    %118 = arith.addf %111, %117 : vector<8x8x4xf32>
    %c0_126 = arith.constant 0 : index
    %c0_127 = arith.constant 0 : index
    %c0_128 = arith.constant 0 : index
    %119 = vector.load %arg4[%c0_126, %c0_127, %c0_128] : memref<1x1x4xf32, #tpu.memory_space<vmem>>, vector<1x1x4xf32>
    %120 = vector.broadcast %119 : vector<1x1x4xf32> to vector<8x8x4xf32>
    %121 = arith.addf %118, %120 : vector<8x8x4xf32>
    %cst_129 = arith.constant 0.000000e+00 : f32
    %122 = vector.broadcast %cst_129 : f32 to vector<8x8x4xf32>
    %123 = arith.cmpf oge, %121, %122 : vector<8x8x4xf32>
    %cst_130 = arith.constant 2.000000e-01 : f32
    %124 = vector.broadcast %cst_130 : f32 to vector<8x8x4xf32>
    %125 = arith.mulf %124, %121 : vector<8x8x4xf32>
    %126 = arith.select %123, %121, %125 : vector<8x8x4xi1>, vector<8x8x4xf32>
    %127 = arith.truncf %126 : vector<8x8x4xf32> to vector<8x8x4xbf16>
    %c0_131 = arith.constant 0 : index
    %c0_132 = arith.constant 0 : index
    %c0_133 = arith.constant 0 : index
    %c8 = arith.constant 8 : index
    %128 = vector.load %arg5[%c0_131, %c0_132, %c0_133, %c8] : memref<1x8x8x16xbf16, #tpu.memory_space<vmem>>, vector<1x8x8x4xbf16>
    %129 = vector.shape_cast %128 : vector<1x8x8x4xbf16> to vector<8x8x4xbf16>
    %130 = vector.shape_cast %127 : vector<8x8x4xbf16> to vector<1x8x8x4xbf16>
    tpu.vector_store %arg5[%c0_131, %c0_132, %c0_133, %c8], %130 {strides = array<i32>} : memref<1x8x8x16xbf16, #tpu.memory_space<vmem>>, vector<1x8x8x4xbf16>,
    %cst_134 = arith.constant 0.000000e+00 : f32
    %131 = vector.broadcast %cst_134 : f32 to vector<8x8x4xf32>
    %c1_135 = arith.constant 1 : index
    %c1_136 = arith.constant 1 : index
    %c0_137 = arith.constant 0 : index
    %132 = vector.load %arg6[%c1_135, %c1_136, %c0_137] : memref<10x10x8xbf16, #tpu.memory_space<vmem>>, vector<8x8x8xbf16>
    %c3_138 = arith.constant 3 : index
    %c0_139 = arith.constant 0 : index
    %c0_140 = arith.constant 0 : index
    %c0_141 = arith.constant 0 : index
    %133 = vector.load %arg3[%c3_138, %c0_139, %c0_140, %c0_141] : memref<4x4x4x8xbf16, #tpu.memory_space<vmem>>, vector<1x1x4x8xbf16>
    %134 = vector.shape_cast %133 : vector<1x1x4x8xbf16> to vector<4x8xbf16>
    %135 = vector.shape_cast %134 : vector<4x8xbf16> to vector<1x4x8xbf16>
    %136 = vector.broadcast %135 : vector<1x4x8xbf16> to vector<8x4x8xbf16>
    "tpu.trace_start"() <{level = 10 : i32, message = "hwk,hnk->hwn"}> : () -> ()
    %cst_142 = arith.constant dense<0.000000e+00> : vector<8x8x4xf32>
    %137 = tpu.matmul %132, %136, %cst_142 {dimension_numbers = #tpu.dot_dimension_numbers<[2], [2], [1], [1], [0, 0, 0, 1, 1, 1], [0], [0]>} : vector<8x8x8xbf16>, vector<8x4x8xbf16>, vector<8x8x4xf32> -> vector<8x8x4xf32>
    "tpu.trace_stop"() : () -> ()
    %138 = arith.addf %131, %137 : vector<8x8x4xf32>
    %c1_143 = arith.constant 1 : index
    %c2_144 = arith.constant 2 : index
    %c0_145 = arith.constant 0 : index
    %139 = vector.load %arg6[%c1_143, %c2_144, %c0_145] : memref<10x10x8xbf16, #tpu.memory_space<vmem>>, vector<8x8x8xbf16>
    %c3_146 = arith.constant 3 : index
    %c1_147 = arith.constant 1 : index
    %c0_148 = arith.constant 0 : index
    %c0_149 = arith.constant 0 : index
    %140 = vector.load %arg3[%c3_146, %c1_147, %c0_148, %c0_149] : memref<4x4x4x8xbf16, #tpu.memory_space<vmem>>, vector<1x1x4x8xbf16>
    %141 = vector.shape_cast %140 : vector<1x1x4x8xbf16> to vector<4x8xbf16>
    %142 = vector.shape_cast %141 : vector<4x8xbf16> to vector<1x4x8xbf16>
    %143 = vector.broadcast %142 : vector<1x4x8xbf16> to vector<8x4x8xbf16>
    "tpu.trace_start"() <{level = 10 : i32, message = "hwk,hnk->hwn"}> : () -> ()
    %cst_150 = arith.constant dense<0.000000e+00> : vector<8x8x4xf32>
    %144 = tpu.matmul %139, %143, %cst_150 {dimension_numbers = #tpu.dot_dimension_numbers<[2], [2], [1], [1], [0, 0, 0, 1, 1, 1], [0], [0]>} : vector<8x8x8xbf16>, vector<8x4x8xbf16>, vector<8x8x4xf32> -> vector<8x8x4xf32>
    "tpu.trace_stop"() : () -> ()
    %145 = arith.addf %138, %144 : vector<8x8x4xf32>
    %c2_151 = arith.constant 2 : index
    %c1_152 = arith.constant 1 : index
    %c0_153 = arith.constant 0 : index
    %146 = vector.load %arg6[%c2_151, %c1_152, %c0_153] : memref<10x10x8xbf16, #tpu.memory_space<vmem>>, vector<8x8x8xbf16>
    %c3_154 = arith.constant 3 : index
    %c2_155 = arith.constant 2 : index
    %c0_156 = arith.constant 0 : index
    %c0_157 = arith.constant 0 : index
    %147 = vector.load %arg3[%c3_154, %c2_155, %c0_156, %c0_157] : memref<4x4x4x8xbf16, #tpu.memory_space<vmem>>, vector<1x1x4x8xbf16>
    %148 = vector.shape_cast %147 : vector<1x1x4x8xbf16> to vector<4x8xbf16>
    %149 = vector.shape_cast %148 : vector<4x8xbf16> to vector<1x4x8xbf16>
    %150 = vector.broadcast %149 : vector<1x4x8xbf16> to vector<8x4x8xbf16>
    "tpu.trace_start"() <{level = 10 : i32, message = "hwk,hnk->hwn"}> : () -> ()
    %cst_158 = arith.constant dense<0.000000e+00> : vector<8x8x4xf32>
    %151 = tpu.matmul %146, %150, %cst_158 {dimension_numbers = #tpu.dot_dimension_numbers<[2], [2], [1], [1], [0, 0, 0, 1, 1, 1], [0], [0]>} : vector<8x8x8xbf16>, vector<8x4x8xbf16>, vector<8x8x4xf32> -> vector<8x8x4xf32>
    "tpu.trace_stop"() : () -> ()
    %152 = arith.addf %145, %151 : vector<8x8x4xf32>
    %c2_159 = arith.constant 2 : index
    %c2_160 = arith.constant 2 : index
    %c0_161 = arith.constant 0 : index
    %153 = vector.load %arg6[%c2_159, %c2_160, %c0_161] : memref<10x10x8xbf16, #tpu.memory_space<vmem>>, vector<8x8x8xbf16>
    %c3_162 = arith.constant 3 : index
    %c3_163 = arith.constant 3 : index
    %c0_164 = arith.constant 0 : index
    %c0_165 = arith.constant 0 : index
    %154 = vector.load %arg3[%c3_162, %c3_163, %c0_164, %c0_165] : memref<4x4x4x8xbf16, #tpu.memory_space<vmem>>, vector<1x1x4x8xbf16>
    %155 = vector.shape_cast %154 : vector<1x1x4x8xbf16> to vector<4x8xbf16>
    %156 = vector.shape_cast %155 : vector<4x8xbf16> to vector<1x4x8xbf16>
    %157 = vector.broadcast %156 : vector<1x4x8xbf16> to vector<8x4x8xbf16>
    "tpu.trace_start"() <{level = 10 : i32, message = "hwk,hnk->hwn"}> : () -> ()
    %cst_166 = arith.constant dense<0.000000e+00> : vector<8x8x4xf32>
    %158 = tpu.matmul %153, %157, %cst_166 {dimension_numbers = #tpu.dot_dimension_numbers<[2], [2], [1], [1], [0, 0, 0, 1, 1, 1], [0], [0]>} : vector<8x8x8xbf16>, vector<8x4x8xbf16>, vector<8x8x4xf32> -> vector<8x8x4xf32>
    "tpu.trace_stop"() : () -> ()
    %159 = arith.addf %152, %158 : vector<8x8x4xf32>
    %c0_167 = arith.constant 0 : index
    %c0_168 = arith.constant 0 : index
    %c0_169 = arith.constant 0 : index
    %160 = vector.load %arg4[%c0_167, %c0_168, %c0_169] : memref<1x1x4xf32, #tpu.memory_space<vmem>>, vector<1x1x4xf32>
    %161 = vector.broadcast %160 : vector<1x1x4xf32> to vector<8x8x4xf32>
    %162 = arith.addf %159, %161 : vector<8x8x4xf32>
    %cst_170 = arith.constant 0.000000e+00 : f32
    %163 = vector.broadcast %cst_170 : f32 to vector<8x8x4xf32>
    %164 = arith.cmpf oge, %162, %163 : vector<8x8x4xf32>
    %cst_171 = arith.constant 2.000000e-01 : f32
    %165 = vector.broadcast %cst_171 : f32 to vector<8x8x4xf32>
    %166 = arith.mulf %165, %162 : vector<8x8x4xf32>
    %167 = arith.select %164, %162, %166 : vector<8x8x4xi1>, vector<8x8x4xf32>
    %168 = arith.truncf %167 : vector<8x8x4xf32> to vector<8x8x4xbf16>
    %c0_172 = arith.constant 0 : index
    %c0_173 = arith.constant 0 : index
    %c0_174 = arith.constant 0 : index
    %c12 = arith.constant 12 : index
    %169 = vector.load %arg5[%c0_172, %c0_173, %c0_174, %c12] : memref<1x8x8x16xbf16, #tpu.memory_space<vmem>>, vector<1x8x8x4xbf16>
    %170 = vector.shape_cast %169 : vector<1x8x8x4xbf16> to vector<8x8x4xbf16>
    %171 = vector.shape_cast %168 : vector<8x8x4xbf16> to vector<1x8x8x4xbf16>
    tpu.vector_store %arg5[%c0_172, %c0_173, %c0_174, %c12], %171 {strides = array<i32>} : memref<1x8x8x16xbf16, #tpu.memory_space<vmem>>, vector<1x8x8x4xbf16>,
    return
  }
  func.func @transform_0(%arg0: i32) -> (i32, i32, i32, i32) {
    %c0_i32 = arith.constant 0 : i32
    %c0_i32_0 = arith.constant 0 : i32
    %c0_i32_1 = arith.constant 0 : i32
    %c0_i32_2 = arith.constant 0 : i32
    return %arg0, %c0_i32, %c0_i32_0, %c0_i32_1 : i32, i32, i32, i32
  }
  func.func @transform_1(%arg0: i32) -> (i32, i32, i32, i32) {
    %c0_i32 = arith.constant 0 : i32
    %c0_i32_0 = arith.constant 0 : i32
    %c0_i32_1 = arith.constant 0 : i32
    %c0_i32_2 = arith.constant 0 : i32
    return %arg0, %c0_i32, %c0_i32_0, %c0_i32_1 : i32, i32, i32, i32
  }
  func.func @transform_2(%arg0: i32) -> (i32, i32, i32, i32) {
    %c0_i32 = arith.constant 0 : i32
    %c0_i32_0 = arith.constant 0 : i32
    %c0_i32_1 = arith.constant 0 : i32
    %c0_i32_2 = arith.constant 0 : i32
    %c0_i32_3 = arith.constant 0 : i32
    return %c0_i32, %c0_i32_0, %c0_i32_1, %c0_i32_2 : i32, i32, i32, i32
  }
  func.func @transform_3(%arg0: i32) -> (i32, i32, i32) {
    %c0_i32 = arith.constant 0 : i32
    %c0_i32_0 = arith.constant 0 : i32
    %c0_i32_1 = arith.constant 0 : i32
    %c0_i32_2 = arith.constant 0 : i32
    return %c0_i32, %c0_i32_0, %c0_i32_1 : i32, i32, i32
  }
  func.func @transform_4(%arg0: i32) -> (i32, i32, i32, i32) {
    %c0_i32 = arith.constant 0 : i32
    %c0_i32_0 = arith.constant 0 : i32
    %c0_i32_1 = arith.constant 0 : i32
    %c0_i32_2 = arith.constant 0 : i32
    return %arg0, %c0_i32, %c0_i32_0, %c0_i32_1 : i32, i32, i32, i32
  }
}

</mosaic_0001>

<bundles_post_ra>
// kernel: _lambda_.5
= control target key start
LH: loop header
LB: loop body
LE: loop exit
PB: predicated region body
PF: predicated region fallthrough
CT: control target
= control target key end

     0   :  { %s1456_s12 = smov 0   ;;  %s1458_s13 = smov 0   ;;  %s1673_s0 = inlined_call_operand.vmem [shape: bf16[2,2,9,9,16], index: 0, kind: input, shape index: {}]   ;;  %s1674_s1 = inlined_call_operand.vmem [shape: bf16[2,4,8,16], index: 1, kind: input, shape index: {}]   ;;  %s1675_s2 = inlined_call_operand.vmem [shape: f32[2,1,8], index: 2, kind: input, shape index: {}]   ;;  %s1676_s3 = inlined_call_operand.vmem [shape: bf16[2,2,8,8,8], index: 3, kind: output, shape index: {}]  }
   0x1   :  { %s1460_s14 = smov 0   ;;  %s1462_s15 = smov 0  }
   0x2   :  { %s1464_s16 = smov 0  }
   0x3 LB: > { %s22_s17 = sadd.s32 1, %s1426_s14  ;;  %s25_s18 = sadd.s32 1, %s1430_s15  ;;  %s1434_s16 = sphi %s1464_s16, %s13_s16   ;;  %s1430_s15 = sphi %s1462_s15, %s1680_s15   ;;  %s1426_s14 = sphi %s1460_s14, %s1679_s14   ;;  %s1422_s13 = sphi %s1458_s13, %s1678_s13   ;;  %s1418_s12 = sphi %s1456_s12, %s1677_s12  }
   0x4   : > { %p23_p0 = scmp.ge.s32.totalorder %s22_s17, 2  ;;  %p1204_p1 = scmp.ge.s32.totalorder %s1434_s16, 1 }
   0x5   : > { %p175_p2 = scmp.lt.s32.totalorder %s1434_s16, 5 }
   0x6   : > { %s1682_s17 = smov (%p23_p0, %s22_s17), 0  ;;  %s1684_s18 = smov (!%p23_p0, %s25_s18), %s1430_s15 }
   0x7   : > { %p176_p3 = pnand %p1204_p1, %p175_p2  ;;  %p27_p4 = scmp.ge.s32.totalorder %s1684_s18, 2 }
   0x8   : > { %p215_p5 = scmp.lt.s32.totalorder (!%p176_p3), %s1422_s13, 1  ;;  %p217_p6 = scmp.lt.s32.totalorder (!%p176_p3), %s1418_s12, 1 }
   0x9   : > { %s1686_s18 = smov (%p27_p4, %s1684_s18), 0  ;;  %179 = sbr.rel (%p176_p3) target bundleno = 286 (0x11e), region = 32 }
   0xe   : > { %s1688_s13 = smov (!%p215_p5, %s1422_s13), 1  ;;  %s1690_s12 = smov (!%p217_p6, %s1418_s12), 1  ;;  %vm281_vm0 = vcmask 130048   ;;  %vm1075_vm3 = vcmask 60416  }
   0xf   : > { %s1354_s19 = smul.u32 36, %s1688_s13  ;;  %s1336_s20 = sshll.u32 %s1688_s13, 4 }
  0x10   : > { %s1353_s21 = smul.u32 18, %s1690_s12  ;;  %s1493_s24 = scalar_lea.vmem %s1674_s1, %s1336_s20 }
  0x11   : > { %s231_s27 = scalar_lea.vmem %s1675_s2, %s1688_s13  ;;  %s1208_s28 = sshll.u32 %s1690_s12, 3  ;;  %v1211_v0 = vld [vmem:[%s1493_s24 + $0x4] sm:$0xf]  ;;  %v250_v16 = vld [vmem:[%s1493_s24] sm:$0xf] }
  0x12   : > { %s221_s29 = sadd.s32 %s1354_s19, %s1353_s21  ;;  %s1500_s30 = sadd.s32 %s1336_s20, %s1208_s28  ;;  %v286_v1 = vsel %vm281_vm0, %v1211_v0, 0  ;;  %v501_v38 = vsel %vm281_vm0, %v250_v16, 0  ;;  %v1268_v60 = vld [vmem:[%s1493_s24 + $0x8] sm:$0xf] }
  0x13   : > { %s1205_s4 = sshll.u32 %s221_s29, 2  ;;  %295 = vmatpush.bf16.xpose.msra.mxu0 %v286_v1  ;;  %323 = vmatpush.bf16.xpose.msra.mxu1 %v286_v1  ;;  %s1210_s10 = sshll.u32 %s1500_s30, 2 }
  0x14   : > { %s1506_s7 = scalar_lea.vmem %s1673_s0, %s1205_s4  ;;  %351 = vmatpush.bf16.xpose.msra.mxu2 %v286_v1  ;;  %379 = vmatpush.bf16.xpose.msra.mxu3 %v286_v1  ;;  %s1625_s13 = scalar_lea.vmem %s1676_s3, %s1210_s10 }
  0x15   : > { %v1214_v2 = vld [vmem:[%s1506_s7] sm:$0xf]  ;;  %v1337_v3 = vld [vmem:[%s1506_s7] sm:$0x10]  ;;  %v1219_v4 = vld [vmem:[%s1506_s7 + $0x8] sm:$0xf] }
  0x16   : > { %v1215_v5 = vor.u32 %v1337_v3, %v1214_v2  ;;  %v1338_v6 = vld [vmem:[%s1506_s7 + $0x8] sm:$0x10]  ;;  %v1224_v7 = vld [vmem:[%s1506_s7 + $0x10] sm:$0xf]  ;;  %v1339_v8 = vld [vmem:[%s1506_s7 + $0x10] sm:$0x10] }
  0x17   : > { %v1220_v9 = vor.u32 %v1338_v6, %v1219_v4  ;;  %v1225_v10 = vor.u32 %v1339_v8, %v1224_v7  ;;  %v1229_v11 = vld [vmem:[%s1506_s7 + $0x18] sm:$0xf]  ;;  %v1340_v12 = vld [vmem:[%s1506_s7 + $0x18] sm:$0x10]  ;;  %v1234_v21 = vld [vmem:[%s1506_s7 + $0x20] sm:$0xf] }
  0x18   : > { %v275_v13 = vshrl.u32 %v1215_v5, 16  ;;  %v277_v14 = vshll.u32 %v1215_v5, 16  ;;  %v1230_v15 = vor.u32 %v1340_v12, %v1229_v11  ;;  %v1341_v25 = vld [vmem:[%s1506_s7 + $0x20] sm:$0x10]  ;;  %v1239_v28 = vld [vmem:[%s1506_s7 + $0x28] sm:$0xf] }
  0x19   : > { %v307_v17 = vshrl.u32 %v1220_v9, 16  ;;  %v309_v18 = vshll.u32 %v1220_v9, 16  ;;  %v335_v19 = vshrl.u32 %v1225_v10, 16  ;;  %v337_v20 = vshll.u32 %v1225_v10, 16  ;;  %v1342_v29 = vld [vmem:[%s1506_s7 + $0x28] sm:$0x10] }
  0x1a   : > { %v279_v22 = vrot.slane %v277_v14, 1  ;;  %v363_v23 = vshrl.u32 %v1230_v15, 16  ;;  %v365_v24 = vshll.u32 %v1230_v15, 16  ;;  %v1244_v32 = vld [vmem:[%s1506_s7 + $0x30] sm:$0xf]  ;;  %v1235_v40 = vor.u32 %v1341_v25, %v1234_v21 }
  0x1b   : > { %407 = vmatpush.bf16.xpose.msrb.mxu0 %v286_v1  ;;  %435 = vmatpush.bf16.xpose.msrb.mxu1 %v286_v1  ;;  %v311_v26 = vrot.slane %v309_v18, 1  ;;  %v339_v27 = vrot.slane %v337_v20, 1  ;;  %v1343_v33 = vld [vmem:[%s1506_s7 + $0x30] sm:$0x10]  ;;  %v1249_v36 = vld [vmem:[%s1506_s7 + $0x38] sm:$0xf]  ;;  %v1240_v41 = vor.u32 %v1342_v29, %v1239_v28 }
  0x1c   : > { %463 = vmatpush.bf16.xpose.msrb.mxu2 %v286_v1  ;;  %491 = vmatpush.bf16.xpose.msrb.mxu3 %v286_v1  ;;  %v280_v30 = vor.u32 %v279_v22, %v275_v13  ;;  %v367_v31 = vrot.slane %v365_v24, 1  ;;  %v1344_v37 = vld [vmem:[%s1506_s7 + $0x38] sm:$0x10]  ;;  %v1245_v42 = vor.u32 %v1343_v33, %v1244_v32  ;;  %v393_v44 = vshll.u32 %v1235_v40, 16  ;;  %v242_v61 = vld [vmem:[%s1506_s7] sm:$0xf] }
  0x1d   : > { %v312_v34 = vor.u32 %v311_v26, %v307_v17  ;;  %v340_v35 = vor.u32 %v339_v27, %v335_v19  ;;  %v1250_v43 = vor.u32 %v1344_v37, %v1249_v36  ;;  %v421_v45 = vshll.u32 %v1240_v41, 16  ;;  %v243_v62 = vld [vmem:[%s1506_s7 + $0x8] sm:$0xf]  ;;  %v244_v63 = vld [vmem:[%s1506_s7 + $0x10] sm:$0xf] }
  0x1e   : > { %1216 = vmatmul.msk.bf16.vlgmr.msra.gmra.mxu0 %vm281_vm0, %v280_v30  ;;  %v368_v39 = vor.u32 %v367_v31, %v363_v23  ;;  %v449_v46 = vshll.u32 %v1245_v42, 16  ;;  %v391_v48 = vshrl.u32 %v1235_v40, 16  ;;  %v395_v49 = vrot.slane %v393_v44, 1  ;;  %v245_v0 = vld [vmem:[%s1506_s7 + $0x18] sm:$0xf] }
  0x1f   : > { %1221 = vmatmul.msk.bf16.vlgmr.msra.gmra.mxu1 %vm281_vm0, %v312_v34  ;;  %1226 = vmatmul.msk.bf16.vlgmr.msra.gmra.mxu2 %vm281_vm0, %v340_v35  ;;  %v477_v47 = vshll.u32 %v1250_v43, 16  ;;  %v419_v50 = vshrl.u32 %v1240_v41, 16  ;;  %v423_v51 = vrot.slane %v421_v45, 1  ;;  %v447_v52 = vshrl.u32 %v1245_v42, 16  ;;  %v246_v2 = vld [vmem:[%s1506_s7 + $0x20] sm:$0xf] }
  0x20   : > { %1231 = vmatmul.msk.bf16.vlgmr.msra.gmra.mxu3 %vm281_vm0, %v368_v39  ;;  %v451_v53 = vrot.slane %v449_v46, 1  ;;  %v475_v54 = vshrl.u32 %v1250_v43, 16  ;;  %v396_v56 = vor.u32 %v395_v49, %v391_v48  ;;  %v643_v1 = vsel %vm281_vm0, %v1268_v60, 0  ;;  %v247_v3 = vld [vmem:[%s1506_s7 + $0x28] sm:$0xf] }
  0x21   : > { %v479_v55 = vrot.slane %v477_v47, 1  ;;  %v424_v57 = vor.u32 %v423_v51, %v419_v50  ;;  %v248_v4 = vld [vmem:[%s1506_s7 + $0x30] sm:$0xf]  ;;  %v249_v5 = vld [vmem:[%s1506_s7 + $0x38] sm:$0xf] }
  0x22   : > { %v452_v58 = vor.u32 %v451_v53, %v447_v52  ;;  %v1293_v6 = vld [vmem:[%s1493_s24 + $0xc] sm:$0xf]  ;;  %v1260_v7 = vld [vmem:[%s1506_s7 + $0x8] sm:$0xf]  ;;  %v1261_v8 = vld [vmem:[%s1506_s7 + $0x10] sm:$0xf] }
  0x23   : > { %510 = vmatpush.bf16.xpose.msra.mxu0 %v501_v38  ;;  %526 = vmatpush.bf16.xpose.msra.mxu1 %v501_v38  ;;  %v480_v59 = vor.u32 %v479_v55, %v475_v54  ;;  %v1262_v9 = vld [vmem:[%s1506_s7 + $0x18] sm:$0xf]  ;;  %v1263_v10 = vld [vmem:[%s1506_s7 + $0x20] sm:$0xf]  ;;  %v812_v11 = vsel %vm281_vm0, %v1293_v6, 0 }
  0x24   : > { %542 = vmatpush.bf16.xpose.msra.mxu2 %v501_v38  ;;  %558 = vmatpush.bf16.xpose.msra.mxu3 %v501_v38  ;;  %v1264_v12 = vld [vmem:[%s1506_s7 + $0x28] sm:$0xf]  ;;  %v1265_v13 = vld [vmem:[%s1506_s7 + $0x30] sm:$0xf]  ;;  %v1266_v14 = vld [vmem:[%s1506_s7 + $0x38] sm:$0xf] }
  0x25   : > { %v1296_v15 = vld [vmem:[%s1506_s7 + $0x8] sm:$0xf]  ;;  %v1345_v16 = vld [vmem:[%s1506_s7 + $0x8] sm:$0x10]  ;;  %v1301_v17 = vld [vmem:[%s1506_s7 + $0x10] sm:$0xf] }
  0x26   : > { %v1346_v18 = vld [vmem:[%s1506_s7 + $0x10] sm:$0x10]  ;;  %v1306_v19 = vld [vmem:[%s1506_s7 + $0x18] sm:$0xf]  ;;  %v1347_v20 = vld [vmem:[%s1506_s7 + $0x18] sm:$0x10]  ;;  %v1297_v24 = vor.u32 %v1345_v16, %v1296_v15 }
  0x27   : > { %v1267_v21 = vld [vmem:[%s1506_s7 + $0x40] sm:$0xf]  ;;  %v1348_v23 = vld [vmem:[%s1506_s7 + $0x20] sm:$0x10]  ;;  %v1302_v25 = vor.u32 %v1346_v18, %v1301_v17  ;;  %v1307_v26 = vor.u32 %v1347_v20, %v1306_v19  ;;  %v1316_v43 = vld [vmem:[%s1506_s7 + $0x28] sm:$0xf] }
  0x28   : > { %v1311_v22 = vld [vmem:[%s1506_s7 + $0x20] sm:$0xf]  ;;  %v804_v28 = vshll.u32 %v1297_v24, 16  ;;  %v802_v32 = vshrl.u32 %v1297_v24, 16  ;;  %v1349_v44 = vld [vmem:[%s1506_s7 + $0x28] sm:$0x10] }
  0x29   : > { %v1312_v27 = vor.u32 %v1348_v23, %v1311_v22  ;;  %v835_v29 = vshll.u32 %v1302_v25, 16  ;;  %v863_v30 = vshll.u32 %v1307_v26, 16  ;;  %v833_v34 = vshrl.u32 %v1302_v25, 16  ;;  %v1321_v45 = vld [vmem:[%s1506_s7 + $0x30] sm:$0xf] }
  0x2a   : > { %v806_v33 = vrot.slane %v804_v28, 1  ;;  %v861_v36 = vshrl.u32 %v1307_v26, 16  ;;  %v1350_v47 = vld [vmem:[%s1506_s7 + $0x30] sm:$0x10]  ;;  %v1326_v48 = vld [vmem:[%s1506_s7 + $0x38] sm:$0xf]  ;;  %v1317_v52 = vor.u32 %v1349_v44, %v1316_v43 }
  0x2b   : > { %v891_v31 = vshll.u32 %v1312_v27, 16  ;;  %v837_v35 = vrot.slane %v835_v29, 1  ;;  %v865_v37 = vrot.slane %v863_v30, 1  ;;  %v1351_v49 = vld [vmem:[%s1506_s7 + $0x38] sm:$0x10]  ;;  %v1322_v53 = vor.u32 %v1350_v47, %v1321_v45 }
  0x2c   : > { %v807_v40 = vor.u32 %v806_v33, %v802_v32  ;;  %v1331_v50 = vld [vmem:[%s1506_s7 + $0x40] sm:$0xf]  ;;  %v1352_v51 = vld [vmem:[%s1506_s7 + $0x40] sm:$0x10]  ;;  %v1327_v54 = vor.u32 %v1351_v49, %v1326_v48  ;;  %v917_v60 = vshrl.u32 %v1317_v52, 16 }
  0x2d   : > { %v893_v39 = vrot.slane %v891_v31, 1  ;;  %v838_v41 = vor.u32 %v837_v35, %v833_v34  ;;  %v866_v42 = vor.u32 %v865_v37, %v861_v36  ;;  %v1332_v55 = vor.u32 %v1352_v51, %v1331_v50 }
  0x2e   : > { %1236 = vmatmul.msk.bf16.vlgmr.msrb.gmra.mxu0 %vm281_vm0, %v396_v56  ;;  %v919_v56 = vshll.u32 %v1317_v52, 16 }
  0x2f   : > { %1241 = vmatmul.msk.bf16.vlgmr.msrb.gmra.mxu1 %vm281_vm0, %v424_v57  ;;  %1246 = vmatmul.msk.bf16.vlgmr.msrb.gmra.mxu2 %vm281_vm0, %v452_v58  ;;  %v947_v57 = vshll.u32 %v1322_v53, 16  ;;  %v975_v58 = vshll.u32 %v1327_v54, 16 }
  0x30   : > { %1251 = vmatmul.msk.bf16.vlgmr.msrb.gmra.mxu3 %vm281_vm0, %v480_v59  ;;  %606 = vmatpush.bf16.xpose.msrb.mxu2 %v501_v38  ;;  %v1003_v59 = vshll.u32 %v1332_v55, 16 }
  0x31   : > { %622 = vmatpush.bf16.xpose.msrb.mxu3 %v501_v38  ;;  %574 = vmatpush.bf16.xpose.msrb.mxu0 %v501_v38 }
  0x32   : > { %590 = vmatpush.bf16.xpose.msrb.mxu1 %v501_v38  ;;  %v889_v38 = vshrl.u32 %v1312_v27, 16 }
  0x34   : > { %v894_v46 = vor.u32 %v893_v39, %v889_v38 }
  0x3e   : > { %1252 = vmatmul.msk.bf16.vlgmr.msra.gmra.mxu0 %vm281_vm0, %v242_v61  ;;  %v921_v61 = vrot.slane %v919_v56, 1  ;;  %v1617_v56 = vld [vmem:[%s231_s27] ss:$0 sm:$0xff] }
  0x3f   : > { %1253 = vmatmul.msk.bf16.vlgmr.msra.gmra.mxu1 %vm281_vm0, %v243_v62  ;;  %1254 = vmatmul.msk.bf16.vlgmr.msra.gmra.mxu2 %vm281_vm0, %v244_v63  ;;  %v945_v62 = vshrl.u32 %v1322_v53, 16  ;;  %v949_v63 = vrot.slane %v947_v57, 1 }
  0x40   : > { %1255 = vmatmul.msk.bf16.vlgmr.msra.gmra.mxu3 %vm281_vm0, %v245_v0  ;;  %684 = vmatpush.bf16.xpose.msra.mxu2 %v643_v1  ;;  %v973_v0 = vshrl.u32 %v1327_v54, 16 }
  0x41   : > { %700 = vmatpush.bf16.xpose.msra.mxu3 %v643_v1  ;;  %652 = vmatpush.bf16.xpose.msra.mxu0 %v643_v1 }
  0x42   : > { %668 = vmatpush.bf16.xpose.msra.mxu1 %v643_v1 }
  0x4e   : > { %1256 = vmatmul.msk.bf16.vlgmr.msrb.gmra.mxu0 %vm281_vm0, %v246_v2  ;;  %v1001_v2 = vshrl.u32 %v1332_v55, 16 }
  0x4f   : > { %1257 = vmatmul.msk.bf16.vlgmr.msrb.gmra.mxu1 %vm281_vm0, %v247_v3  ;;  %1258 = vmatmul.msk.bf16.vlgmr.msrb.gmra.mxu2 %vm281_vm0, %v248_v4  ;;  %v1005_v3 = vrot.slane %v1003_v59, 1  ;;  %v922_v4 = vor.u32 %v921_v61, %v917_v60 }
  0x50   : > { %1259 = vmatmul.msk.bf16.vlgmr.msrb.gmra.mxu3 %vm281_vm0, %v249_v5  ;;  %748 = vmatpush.bf16.xpose.msrb.mxu2 %v643_v1  ;;  %v950_v5 = vor.u32 %v949_v63, %v945_v62 }
  0x51   : > { %764 = vmatpush.bf16.xpose.msrb.mxu3 %v643_v1  ;;  %716 = vmatpush.bf16.xpose.msrb.mxu0 %v643_v1 }
  0x52   : > { %732 = vmatpush.bf16.xpose.msrb.mxu1 %v643_v1  ;;  %v977_v1 = vrot.slane %v975_v58, 1 }
  0x54   : > { %v978_v6 = vor.u32 %v977_v1, %v973_v0 }
  0x5e   : > { %1269 = vmatmul.msk.bf16.vlgmr.msra.gmra.mxu0 %vm281_vm0, %v1260_v7  ;;  %v1006_v7 = vor.u32 %v1005_v3, %v1001_v2 }
  0x5f   : > { %1270 = vmatmul.msk.bf16.vlgmr.msra.gmra.mxu1 %vm281_vm0, %v1261_v8  ;;  %1271 = vmatmul.msk.bf16.vlgmr.msra.gmra.mxu2 %vm281_vm0, %v1262_v9 }
  0x60   : > { %1272 = vmatmul.msk.bf16.vlgmr.msra.gmra.mxu3 %vm281_vm0, %v1263_v10  ;;  %877 = vmatpush.bf16.xpose.msra.mxu2 %v812_v11 }
  0x61   : > { %905 = vmatpush.bf16.xpose.msra.mxu3 %v812_v11  ;;  %821 = vmatpush.bf16.xpose.msra.mxu0 %v812_v11 }
  0x62   : > { %849 = vmatpush.bf16.xpose.msra.mxu1 %v812_v11 }
  0x6e   : > { %1273 = vmatmul.msk.bf16.vlgmr.msrb.gmra.mxu0 %vm281_vm0, %v1264_v12 }
  0x6f   : > { %1274 = vmatmul.msk.bf16.vlgmr.msrb.gmra.mxu1 %vm281_vm0, %v1265_v13  ;;  %1275 = vmatmul.msk.bf16.vlgmr.msrb.gmra.mxu2 %vm281_vm0, %v1266_v14 }
  0x70   : > { %1276 = vmatmul.msk.bf16.vlgmr.msrb.gmra.mxu3 %vm281_vm0, %v1267_v21  ;;  %989 = vmatpush.bf16.xpose.msrb.mxu2 %v812_v11 }
  0x71   : > { %1017 = vmatpush.bf16.xpose.msrb.mxu3 %v812_v11  ;;  %933 = vmatpush.bf16.xpose.msrb.mxu0 %v812_v11 }
  0x72   : > { %961 = vmatpush.bf16.xpose.msrb.mxu1 %v812_v11 }
  0x7e   : > { %1298 = vmatmul.msk.bf16.vlgmr.msra.gmra.mxu0 %vm281_vm0, %v807_v40 }
  0x7f   : > { %1303 = vmatmul.msk.bf16.vlgmr.msra.gmra.mxu1 %vm281_vm0, %v838_v41  ;;  %1308 = vmatmul.msk.bf16.vlgmr.msra.gmra.mxu2 %vm281_vm0, %v866_v42 }
  0x80   : > { %1313 = vmatmul.msk.bf16.vlgmr.msra.gmra.mxu3 %vm281_vm0, %v894_v46 }
  0x8e   : > { %1318 = vmatmul.msk.bf16.vlgmr.msrb.gmra.mxu0 %vm281_vm0, %v922_v4 }
  0x8f   : > { %1323 = vmatmul.msk.bf16.vlgmr.msrb.gmra.mxu1 %vm281_vm0, %v950_v5  ;;  %1328 = vmatmul.msk.bf16.vlgmr.msrb.gmra.mxu2 %vm281_vm0, %v978_v6 }
  0x90   : > { %1333 = vmatmul.msk.bf16.vlgmr.msrb.gmra.mxu3 %vm281_vm0, %v1006_v7 }
  0x9b   : > { %v297_v8 = vpop.f32.mrf.mxu0 }
  0x9c   : > { %v325_v9 = vpop.f32.mrf.mxu1 }
  0xa2   : > { %v353_v10 = vpop.f32.mrf.mxu2 }
  0xa3   : > { %v381_v11 = vpop.f32.mrf.mxu3  ;;  %v299_v12 = vpop.f32.mrf.mxu0 }
  0xa4   : > { %v327_v13 = vpop.f32.mrf.mxu1 }
  0xaa   : > { %v355_v14 = vpop.f32.mrf.mxu2 }
  0xab   : > { %v383_v15 = vpop.f32.mrf.mxu3  ;;  %v1594_v16 = vpop.f32.mrf.mxu0 }
  0xac   : > { %v1596_v17 = vpop.f32.mrf.mxu1 }
  0xb2   : > { %v1598_v18 = vpop.f32.mrf.mxu2 }
  0xb3   : > { %v1600_v19 = vpop.f32.mrf.mxu3  ;;  %v411_v20 = vpop.f32.mrf.mxu0 }
  0xb4   : > { %v439_v21 = vpop.f32.mrf.mxu1 }
  0xba   : > { %v467_v22 = vpop.f32.mrf.mxu2 }
  0xbb   : > { %v495_v23 = vpop.f32.mrf.mxu3  ;;  %v512_v24 = vpop.f32.mrf.mxu0 }
  0xbc   : > { %v528_v25 = vpop.f32.mrf.mxu1  ;;  %v513_v54 = vadd.f32 %v512_v24, %v297_v8 }
  0xbd   : > { %v529_v55 = vadd.f32 %v528_v25, %v325_v9 }
  0xc2   : > { %v544_v26 = vpop.f32.mrf.mxu2 }
  0xc3   : > { %v560_v27 = vpop.f32.mrf.mxu3  ;;  %v514_v28 = vpop.f32.mrf.mxu0  ;;  %v545_v2 = vadd.f32 %v544_v26, %v353_v10 }
  0xc4   : > { %v530_v29 = vpop.f32.mrf.mxu1  ;;  %v561_v4 = vadd.f32 %v560_v27, %v381_v11 }
  0xca   : > { %v546_v30 = vpop.f32.mrf.mxu2 }
  0xcb   : > { %v562_v31 = vpop.f32.mrf.mxu3  ;;  %v576_v32 = vpop.f32.mrf.mxu0 }
  0xcc   : > { %v1602_v33 = vpop.f32.mrf.mxu1  ;;  %v577_v26 = vadd.f32 %v576_v32, %v1594_v16 }
  0xcd   : > { %v593_v28 = vadd.f32 %v1602_v33, %v1596_v17 }
  0xd2   : > { %v1604_v34 = vpop.f32.mrf.mxu2 }
  0xd3   : > { %v1606_v35 = vpop.f32.mrf.mxu3  ;;  %v578_v36 = vpop.f32.mrf.mxu0  ;;  %v609_v17 = vadd.f32 %v1604_v34, %v1598_v18 }
  0xd4   : > { %v594_v37 = vpop.f32.mrf.mxu1 }
  0xda   : > { %v610_v38 = vpop.f32.mrf.mxu2 }
  0xdb   : > { %v626_v39 = vpop.f32.mrf.mxu3  ;;  %v654_v40 = vpop.f32.mrf.mxu0 }
  0xdc   : > { %v670_v41 = vpop.f32.mrf.mxu1  ;;  %v770_v57 = vadd.f32 %v654_v40, %v513_v54 }
  0xdd   : > { %v771_v59 = vadd.f32 %v670_v41, %v529_v55 }
  0xe2   : > { %v686_v42 = vpop.f32.mrf.mxu2 }
  0xe3   : > { %v702_v43 = vpop.f32.mrf.mxu3  ;;  %v656_v44 = vpop.f32.mrf.mxu0  ;;  %v772_v6 = vadd.f32 %v686_v42, %v545_v2 }
  0xe4   : > { %v672_v45 = vpop.f32.mrf.mxu1  ;;  %v773_v8 = vadd.f32 %v702_v43, %v561_v4  ;;  %v625_v44 = vadd.f32 %v1606_v35, %v1600_v19 }
  0xea   : > { %v688_v46 = vpop.f32.mrf.mxu2 }
  0xeb   : > { %v704_v47 = vpop.f32.mrf.mxu3  ;;  %v718_v48 = vpop.f32.mrf.mxu0 }
  0xec   : > { %v734_v49 = vpop.f32.mrf.mxu1  ;;  %v774_v30 = vadd.f32 %v718_v48, %v577_v26 }
  0xed   : > { %v775_v38 = vadd.f32 %v734_v49, %v593_v28 }
  0xf2   : > { %v1608_v50 = vpop.f32.mrf.mxu2 }
  0xf3   : > { %v1610_v51 = vpop.f32.mrf.mxu3  ;;  %v720_v52 = vpop.f32.mrf.mxu0  ;;  %v776_v46 = vadd.f32 %v1608_v50, %v609_v17 }
  0xf4   : > { %v736_v53 = vpop.f32.mrf.mxu1  ;;  %v777_v48 = vadd.f32 %v1610_v51, %v625_v44 }
  0xfa   : > { %v752_v58 = vpop.f32.mrf.mxu2 }
  0xfb   : > { %v768_v60 = vpop.f32.mrf.mxu3  ;;  %v823_v61 = vpop.f32.mrf.mxu0 }
  0xfc   : > { %v1023_v62 = vadd.f32 %v823_v61, %v770_v57  ;;  %v851_v63 = vpop.f32.mrf.mxu1 }
  0xfd   : > { %v1024_v0 = vadd.f32 %v851_v63, %v771_v59 }
  0xfe   : > { %v1035_v1 = vadd.f32 %v1617_v56, %v1023_v62 }
  0xff   : > { %v1036_v3 = vadd.f32 %v1617_v56, %v1024_v0 }
 0x100   : > { %vm1043_vm1 = vcmp.ge.f32.partialorder %v1035_v1, 0.0  ;;  %v1051_v5 = vmul.f32 0.2, %v1035_v1 }
 0x101   : > { %vm1044_vm2 = vcmp.ge.f32.partialorder %v1036_v3, 0.0  ;;  %v1052_v7 = vmul.f32 0.2, %v1036_v3 }
 0x102   : > { %v1059_v9 = vsel %vm1043_vm1, %v1035_v1, %v1051_v5  ;;  %v879_v12 = vpop.f32.mrf.mxu2 }
 0x103   : > { %v1067_v10 = vpack.c.bf16 %v1059_v9, %v1059_v9  ;;  %v1060_v13 = vsel %vm1044_vm2, %v1036_v3, %v1052_v7  ;;  %v1025_v14 = vadd.f32 %v879_v12, %v772_v6  ;;  %v907_v11 = vpop.f32.mrf.mxu3  ;;  %v825_v15 = vpop.f32.mrf.mxu0 }
 0x104   : > { %v1068_v20 = vpack.c.bf16 %v1060_v13, %v1060_v13  ;;  %v1026_v21 = vadd.f32 %v907_v11, %v773_v8  ;;  %v853_v22 = vpop.f32.mrf.mxu1 }
 0x105   : > { %1076 = vst.msk [vmem:[%s1625_s13] sm:$0xf] %vm1075_vm3, %v1067_v10  ;;  %v1037_v23 = vadd.f32 %v1617_v56, %v1025_v14 }
 0x106   : > { %1077 = vst.msk [vmem:[%s1625_s13 + $0x4] sm:$0xf] %vm1075_vm3, %v1068_v20  ;;  %v1038_v24 = vadd.f32 %v1617_v56, %v1026_v21 }
 0x107   : > { %vm1045_vm4 = vcmp.ge.f32.partialorder %v1037_v23, 0.0  ;;  %v1053_v25 = vmul.f32 0.2, %v1037_v23 }
 0x108   : > { %vm1046_vm5 = vcmp.ge.f32.partialorder %v1038_v24, 0.0  ;;  %v1054_v27 = vmul.f32 0.2, %v1038_v24 }
 0x109   : > { %v1061_v29 = vsel %vm1045_vm4, %v1037_v23, %v1053_v25 }
 0x10a   : > { %v1069_v31 = vpack.c.bf16 %v1061_v29, %v1061_v29  ;;  %v1062_v36 = vsel %vm1046_vm5, %v1038_v24, %v1054_v27  ;;  %v881_v37 = vpop.f32.mrf.mxu2 }
 0x10b   : > { %v1070_v39 = vpack.c.bf16 %v1062_v36, %v1062_v36  ;;  %v909_v40 = vpop.f32.mrf.mxu3  ;;  %v935_v41 = vpop.f32.mrf.mxu0 }
 0x10c   : > { %1078 = vst.msk [vmem:[%s1625_s13 + $0x8] sm:$0xf] %vm1075_vm3, %v1069_v31  ;;  %v1027_v42 = vadd.f32 %v935_v41, %v774_v30  ;;  %v963_v43 = vpop.f32.mrf.mxu1 }
 0x10d   : > { %1079 = vst.msk [vmem:[%s1625_s13 + $0xc] sm:$0xf] %vm1075_vm3, %v1070_v39  ;;  %v1028_v16 = vadd.f32 %v963_v43, %v775_v38 }
 0x10e   : > { %v1039_v32 = vadd.f32 %v1617_v56, %v1027_v42 }
 0x10f   : > { %v1040_v33 = vadd.f32 %v1617_v56, %v1028_v16 }
 0x110   : > { %vm1047_vm6 = vcmp.ge.f32.partialorder %v1039_v32, 0.0  ;;  %v1055_v45 = vmul.f32 0.2, %v1039_v32 }
 0x111   : > { %vm1048_vm7 = vcmp.ge.f32.partialorder %v1040_v33, 0.0  ;;  %v1056_v47 = vmul.f32 0.2, %v1040_v33 }
 0x112   : > { %v1063_v49 = vsel %vm1047_vm6, %v1039_v32, %v1055_v45  ;;  %v991_v52 = vpop.f32.mrf.mxu2 }
 0x113   : > { %v1071_v53 = vpack.c.bf16 %v1063_v49, %v1063_v49  ;;  %v1064_v54 = vsel %vm1048_vm7, %v1040_v33, %v1056_v47  ;;  %v1029_v18 = vadd.f32 %v991_v52, %v776_v46  ;;  %v1019_v34 = vpop.f32.mrf.mxu3  ;;  %v937_v55 = vpop.f32.mrf.mxu0 }
 0x114   : > { %v1072_v57 = vpack.c.bf16 %v1064_v54, %v1064_v54  ;;  %v1030_v58 = vadd.f32 %v1019_v34, %v777_v48  ;;  %v965_v19 = vpop.f32.mrf.mxu1 }
 0x115   : > { %1080 = vst.msk [vmem:[%s1625_s13 + $0x10] sm:$0xf] %vm1075_vm3, %v1071_v53  ;;  %v1041_v35 = vadd.f32 %v1617_v56, %v1029_v18 }
 0x116   : > { %1081 = vst.msk [vmem:[%s1625_s13 + $0x14] sm:$0xf] %vm1075_vm3, %v1072_v57  ;;  %v1042_v50 = vadd.f32 %v1617_v56, %v1030_v58 }
 0x117   : > { %vm1049_vm8 = vcmp.ge.f32.partialorder %v1041_v35, 0.0  ;;  %v1057_v51 = vmul.f32 0.2, %v1041_v35 }
 0x118   : > { %vm1050_vm9 = vcmp.ge.f32.partialorder %v1042_v50, 0.0  ;;  %v1058_v59 = vmul.f32 0.2, %v1042_v50 }
 0x119   : > { %v1065_v60 = vsel %vm1049_vm8, %v1041_v35, %v1057_v51 }
 0x11a   : > { %v1073_v61 = vpack.c.bf16 %v1065_v60, %v1065_v60  ;;  %v1066_v62 = vsel %vm1050_vm9, %v1042_v50, %v1058_v59  ;;  %v993_v63 = vpop.f32.mrf.mxu2 }
 0x11b   : > { %v1074_v0 = vpack.c.bf16 %v1066_v62, %v1066_v62  ;;  %v1021_v1 = vpop.f32.mrf.mxu3 }
 0x11c   : > { %1082 = vst.msk [vmem:[%s1625_s13 + $0x18] sm:$0xf] %vm1075_vm3, %v1073_v61 }
 0x11d   : > { %1083 = vst.msk [vmem:[%s1625_s13 + $0x1c] sm:$0xf] %vm1075_vm3, %v1074_v0 }
 0x11e PF: > { %s13_s16 = sadd.s32 1, %s1434_s16   ;;  %s1677_s12 = smov %s1426_s14 }
 0x11f   : > { %p10_p7 = scmp.ge.s32.totalorder %s13_s16, 6   ;;  %s1678_s13 = smov %s1430_s15 }
 0x120   : > { %s1679_s14 = smov %s1682_s17  ;;  %s1680_s15 = smov %s1686_s18 }
 0x121   :  { %12 = sbr.rel (!%p10_p7) target bundleno = 3 (0x3), region = 72 }

// kernel: squeeze.7
= control target key start
LH: loop header
LB: loop body
LE: loop exit
PB: predicated region body
PF: predicated region fallthrough
CT: control target
= control target key end

     0   :  { %vm137_vm0 = vcmask 1042433   ;;  %vm141_vm1 = vcmask 1043459   ;;  %s169_s14 = smov 6  ;;  %s152_s15 = smov 6  ;;  %vm126_vm2 = vcmask 1043458   ;;  %vm128_vm3 = vcmask 130048   ;;  %s332_s0 = inlined_call_operand.vmem [shape: bf16[1,2,4,4,16], index: 0, kind: input, shape index: {}]   ;;  %s333_s1 = inlined_call_operand.vmem [shape: bf16[2,256], index: 1, kind: output, shape index: {}]  }
   0x1   :  { %v265_v0 = vld [vmem:[%s332_s0 + $0xe] sm:$0x3]  ;;  %v267_v1 = vld [vmem:[%s332_s0 + $0x6] sm:$0xff]   ;;  %v271_v2 = vld [vmem:[%s332_s0 + $0x2] sm:$0xf]   ;;  %s186_s16 = smov 6 }
   0x2   :  { %v15_v3 = vunpack.c.l.bf16 %v265_v0  ;;  %v45_v4 = vunpack.c.h.bf16 %v267_v1  ;;  %v75_v5 = vunpack.c.l.bf16 %v267_v1  ;;  %v105_v6 = vunpack.c.l.bf16 %v271_v2  ;;  %v118_v7 = vld [vmem:[%s332_s0] sm:$0x3]  ;;  %s135_s0 = smov 6  ;;  %s280_s17 = smov 112  }
   0x3   :  { %v119_v8 = vunpack.c.l.bf16 %v118_v7  ;;  %s203_s18 = smov 6  ;;  %s220_s19 = smov 6  ;;  %vm145_vm4 = vcmask 1048448   ;;  %vm162_vm5 = vcmask 917248   ;;  %vm179_vm6 = vcmask 786048  }
   0x4   :  { %18 = vst [vmem:[#allocation1 + $0x38] sm:$0xf] %v15_v3  ;;  %s281_s20 = smov 80   ;;  %s122_s21 = smov 3  ;;  %vm196_vm7 = vcmask 654848   ;;  %vm213_vm8 = vcmask 523648  }
   0x5   :  { %48 = vst [vmem:[#allocation1 + $0x28] sm:$0xf] %v45_v4  ;;  %s124_s22 = smov 12  ;;  %s237_s23 = smov 6  ;;  %vm230_vm9 = vcmask 392448   ;;  %vm247_vm10 = vcmask 261248  }
   0x6   :  { %78 = vst [vmem:[#allocation1 + $0x18] sm:$0xf] %v75_v5  ;;  %s282_s24 = smov 48   ;;  %s283_s25 = smov 96  }
   0x7   :  { %108 = vst [vmem:[#allocation1 + $0x8] sm:$0xf] %v105_v6  ;;  %s284_s26 = smov 64   ;;  %s285_s27 = smov 32  }
   0x8   :  { %33 = vst [vmem:[#allocation1 + $0x2c] sm:$0xf0] %v45_v4  ;;  %s286_s28 = smov 16  }
   0x9   :  { %63 = vst [vmem:[#allocation1 + $0x1c] sm:$0xf0] %v75_v5 }
   0xa   :  { %93 = vst [vmem:[#allocation1 + $0xc] sm:$0xf0] %v105_v6 }
   0xb   :  { %121 = vst [vmem:[#allocation1] sm:$0xf] %v119_v8  ;;  %v140_v9 = vld [vmem:[#allocation1 + $0x38] sm:$0x8]   ;;  %v174_v10 = vld [vmem:[#allocation1 + $0x36] sm:$0x8]  }
   0xc   :  { %v157_v24 = vld [vmem:[#allocation1 + $0x37] sm:$0x8]   ;;  %v191_v28 = vld [vmem:[#allocation1 + $0x35] sm:$0x8]  }
   0xe   :  { %v133_v11 = vld [vmem:[#allocation1 + $0xb] sm:$0x1]   ;;  %v167_v13 = vld [vmem:[#allocation1 + $0x9] sm:$0x1]   ;;  %v150_v18 = vld [vmem:[#allocation1 + $0xa] sm:$0x1]  }
   0xf   :  { %v136_v12 = vld [vmem:[#allocation1 + $0x3b] ss:$-16 sm:%s135_s0]   ;;  %v170_v15 = vld [vmem:[#allocation1 + $0x39] ss:$-16 sm:%s169_s14]   ;;  %v153_v19 = vld [vmem:[#allocation1 + $0x3a] ss:$-16 sm:%s152_s15]  }
  0x10   :  { %v138_v14 = vsel %vm137_vm0, %v136_v12, %v133_v11  ;;  %v172_v17 = vsel %vm137_vm0, %v170_v15, %v167_v13  ;;  %v184_v21 = vld [vmem:[#allocation1 + $0x8] sm:$0x1]   ;;  %v155_v23 = vsel %vm137_vm0, %v153_v19, %v150_v18  ;;  %v208_v26 = vld [vmem:[#allocation1 + $0x30] sm:$0x8]   ;;  %v225_v42 = vld [vmem:[#allocation1 + $0x2f] sm:$0x8]  }
  0x11   :  { %v142_v16 = vsel %vm141_vm1, %v140_v9, %v138_v14  ;;  %v176_v20 = vsel %vm141_vm1, %v174_v10, %v172_v17  ;;  %v187_v22 = vld [vmem:[#allocation1 + $0x38] ss:$-16 sm:%s186_s16]   ;;  %v159_v33 = vsel %vm141_vm1, %v157_v24, %v155_v23  ;;  %v242_v44 = vld [vmem:[#allocation1 + $0x2e] sm:$0x8]  }
  0x12   :  { %143 = vrot.lane.b32.xlu0 %v142_v16, %s280_s17  ;;  %177 = vrot.lane.b32.xlu1 %v176_v20, %s281_s20  ;;  %v201_v25 = vld [vmem:[#allocation1 + $0x3] sm:$0x1]   ;;  %v189_v27 = vsel %vm137_vm0, %v187_v22, %v184_v21  ;;  %v123_v31 = vld [vmem:[#allocation1] ss:$16 sm:%s122_s21]   ;;  %v218_v35 = vld [vmem:[#allocation1 + $0x2] sm:$0x1]  }
  0x13   :  { %v204_v29 = vld [vmem:[#allocation1 + $0x33] ss:$-16 sm:%s203_s18]   ;;  %v125_v32 = vld [vmem:[#allocation1] ss:$16 sm:%s124_s22]   ;;  %v221_v36 = vld [vmem:[#allocation1 + $0x32] ss:$-16 sm:%s220_s19]   ;;  %v193_v38 = vsel %vm141_vm1, %v191_v28, %v189_v27 }
  0x14   :  { %v206_v30 = vsel %vm137_vm0, %v204_v29, %v201_v25  ;;  %v127_v37 = vsel %vm126_vm2, %v125_v32, %v123_v31  ;;  %v235_v39 = vld [vmem:[#allocation1 + $0x1] sm:$0x1]   ;;  %v223_v41 = vsel %vm137_vm0, %v221_v36, %v218_v35 }
  0x15   :  { %v210_v34 = vsel %vm141_vm1, %v208_v26, %v206_v30  ;;  %129 = vst.msk [vmem:[#allocation0] ss:$8 sm:$0x3] %vm128_vm3, %v127_v37   ;;  %v238_v40 = vld [vmem:[#allocation1 + $0x31] ss:$-16 sm:%s237_s23]   ;;  %v227_v45 = vsel %vm141_vm1, %v225_v42, %v223_v41 }
  0x16   :  { %211 = vrot.lane.b32.xlu2 %v210_v34, %s282_s24  ;;  %131 = vst.msk [vmem:[#allocation0 - $0xf] ss:$8 sm:$0xc] %vm128_vm3, %v127_v37   ;;  %v240_v43 = vsel %vm137_vm0, %v238_v40, %v235_v39 }
  0x17   :  { %v244_v46 = vsel %vm141_vm1, %v242_v44, %v240_v43 }
  0x1a   :  { %160 = vrot.lane.b32.xlu0 %v159_v33, %s283_s25  ;;  %194 = vrot.lane.b32.xlu1 %v193_v38, %s284_s26 }
  0x1e   :  { %228 = vrot.lane.b32.xlu2 %v227_v45, %s285_s27 }
  0x22   :  { %245 = vrot.lane.b32.xlu0 %v244_v46, %s286_s28 }
  0x70   :  { %v212_v47 = vpop.permute.xlu2 %211  }
  0x78   :  { %v229_v48 = vpop.permute.xlu2 %228  }
  0x84   :  { %v144_v49 = vpop.permute.xlu0 %143   ;;  %v178_v50 = vpop.permute.xlu1 %177  }
  0x85   :  { %146 = vst.msk [vmem:[#allocation0] sm:$0x3] %vm145_vm4, %v144_v49  }
  0x86   :  { %148 = vst.msk [vmem:[#allocation0 + $0x6] sm:$0xc] %vm145_vm4, %v144_v49  }
  0x8c   :  { %v161_v51 = vpop.permute.xlu0 %160   ;;  %v195_v52 = vpop.permute.xlu1 %194  }
  0x8d   :  { %163 = vst.msk [vmem:[#allocation0] sm:$0x3] %vm162_vm5, %v161_v51  }
  0x8e   :  { %165 = vst.msk [vmem:[#allocation0 + $0x6] sm:$0xc] %vm162_vm5, %v161_v51  }
  0x8f   :  { %180 = vst.msk [vmem:[#allocation0] sm:$0x3] %vm179_vm6, %v178_v50  }
  0x90   :  { %182 = vst.msk [vmem:[#allocation0 + $0x6] sm:$0xc] %vm179_vm6, %v178_v50  }
  0x91   :  { %197 = vst.msk [vmem:[#allocation0] sm:$0x3] %vm196_vm7, %v195_v52  }
  0x92   :  { %199 = vst.msk [vmem:[#allocation0 + $0x6] sm:$0xc] %vm196_vm7, %v195_v52  }
  0x93   :  { %214 = vst.msk [vmem:[#allocation0] sm:$0x3] %vm213_vm8, %v212_v47  }
  0x94   :  { %216 = vst.msk [vmem:[#allocation0 + $0x6] sm:$0xc] %vm213_vm8, %v212_v47   ;;  %v246_v53 = vpop.permute.xlu0 %245  }
  0x95   :  { %231 = vst.msk [vmem:[#allocation0] sm:$0x3] %vm230_vm9, %v229_v48  }
  0x96   :  { %233 = vst.msk [vmem:[#allocation0 + $0x6] sm:$0xc] %vm230_vm9, %v229_v48  }
  0x97   :  { %248 = vst.msk [vmem:[#allocation0] sm:$0x3] %vm247_vm10, %v246_v53  }
  0x98   :  { %250 = vst.msk [vmem:[#allocation0 + $0x6] sm:$0xc] %vm247_vm10, %v246_v53  }
  0x9e   :  { %v253_v54 = vld [vmem:[#allocation0] sm:$0x3] }
  0x9f   :  { %v254_v55 = vpack.c.bf16 0.0, %v253_v54  ;;  %v259_v56 = vld [vmem:[#allocation0 + $0x8] sm:$0x3] }
  0xa0   :  { %v260_v57 = vpack.c.bf16 0.0, %v259_v56 }
  0xa1   :  { %257 = vst [vmem:[%s333_s1] sm:$0x1] %v254_v55 }
  0xa2   :  { %272 = vst [vmem:[%s333_s1 + $0x1] sm:$0x1] %v260_v57 }

// kernel: _lambda_.6
= control target key start
LH: loop header
LB: loop body
LE: loop exit
PB: predicated region body
PF: predicated region fallthrough
CT: control target
= control target key end

     0   :  { %s959_s12 = smov 0   ;;  %s961_s13 = smov 0   ;;  %s1082_s0 = inlined_call_operand.vmem [shape: bf16[2,2,5,5,32], index: 0, kind: input, shape index: {}]   ;;  %s1083_s1 = inlined_call_operand.vmem [shape: bf16[2,4,16,32], index: 1, kind: input, shape index: {}]   ;;  %s1084_s2 = inlined_call_operand.vmem [shape: f32[2,1,16], index: 2, kind: input, shape index: {}]   ;;  %s1085_s3 = inlined_call_operand.vmem [shape: bf16[2,2,4,4,16], index: 3, kind: output, shape index: {}]  }
   0x1   :  { %s963_s14 = smov 0   ;;  %s965_s15 = smov 0  }
   0x2   :  { %s967_s16 = smov 0  }
   0x3 LB: > { %s22_s17 = sadd.s32 1, %s929_s14  ;;  %s25_s18 = sadd.s32 1, %s933_s15  ;;  %s937_s16 = sphi %s967_s16, %s13_s16   ;;  %s933_s15 = sphi %s965_s15, %s1089_s15   ;;  %s929_s14 = sphi %s963_s14, %s1088_s14   ;;  %s925_s13 = sphi %s961_s13, %s1087_s13   ;;  %s921_s12 = sphi %s959_s12, %s1086_s12  }
   0x4   : > { %p23_p0 = scmp.ge.s32.totalorder %s22_s17, 2  ;;  %p796_p1 = scmp.ge.s32.totalorder %s937_s16, 1 }
   0x5   : > { %p175_p2 = scmp.lt.s32.totalorder %s937_s16, 5 }
   0x6   : > { %s1091_s17 = smov (%p23_p0, %s22_s17), 0  ;;  %s1093_s18 = smov (!%p23_p0, %s25_s18), %s933_s15 }
   0x7   : > { %p176_p3 = pnand %p796_p1, %p175_p2  ;;  %p27_p4 = scmp.ge.s32.totalorder %s1093_s18, 2 }
   0x8   : > { %p215_p5 = scmp.lt.s32.totalorder (!%p176_p3), %s925_s13, 1  ;;  %p217_p6 = scmp.lt.s32.totalorder (!%p176_p3), %s921_s12, 1 }
   0x9   : > { %s1095_s18 = smov (%p27_p4, %s1093_s18), 0  ;;  %179 = sbr.rel (%p176_p3) target bundleno = 224 (0xe0), region = 32 }
   0xe   : > { %s1097_s13 = smov (!%p215_p5, %s925_s13), 1  ;;  %s1099_s12 = smov (!%p217_p6, %s921_s12), 1  ;;  %vm270_vm0 = vcmask 261120   ;;  %vm671_vm3 = vcmask 123904  }
   0xf   : > { %s857_s19 = smul.u32 10, %s1097_s13  ;;  %s851_s20 = sshll.u32 %s1097_s13, 5 }
  0x10   : > { %s856_s21 = smul.u32 5, %s1099_s12  ;;  %s999_s24 = scalar_lea.vmem %s1083_s1, %s851_s20 }
  0x11   : > { %v853_v0 = vld [vmem:[%s999_s24 + $0x8] sm:$0xff]  ;;  %v852_v1 = vld [vmem:[%s999_s24] sm:$0xff]  ;;  %v854_v24 = vld [vmem:[%s999_s24 + $0x10] sm:$0xff]  ;;  %s231_s5 = scalar_lea.vmem %s1084_s2, %s1097_s13  ;;  %s800_s6 = sshll.u32 %s1099_s12, 2 }
  0x12   : > { %s221_s25 = sadd.s32 %s857_s19, %s856_s21  ;;  %v275_v2 = vsel %vm270_vm0, %v853_v0, 0  ;;  %v377_v3 = vsel %vm270_vm0, %v852_v1, 0  ;;  %v457_v33 = vsel %vm270_vm0, %v854_v24, 0  ;;  %v855_v34 = vld [vmem:[%s999_s24 + $0x18] sm:$0xff]  ;;  %s801_s7 = sshll.u32 %s1097_s13, 3 }
  0x13   : > { %s797_s26 = sshll.u32 %s221_s25, 2  ;;  %284 = vmatpush.bf16.xpose.msra.mxu0 %v275_v2  ;;  %310 = vmatpush.bf16.xpose.msra.mxu1 %v275_v2  ;;  %v550_v39 = vsel %vm270_vm0, %v855_v34, 0  ;;  %s1048_s8 = sadd.s32 %s801_s7, %s800_s6 }
  0x14   : > { %s1008_s29 = scalar_lea.vmem %s1082_s0, %s797_s26  ;;  %336 = vmatpush.bf16.xpose.msra.mxu2 %v275_v2  ;;  %362 = vmatpush.bf16.xpose.msra.mxu3 %v275_v2  ;;  %s802_s11 = sshll.u32 %s1048_s8, 1 }
  0x15   : > { %v248_v4 = vld [vmem:[%s1008_s29] sm:$0x7]  ;;  %v249_v5 = vld [vmem:[%s1008_s29 + $0x4] sm:$0x7]  ;;  %v250_v6 = vld [vmem:[%s1008_s29 + $0x8] sm:$0x7]  ;;  %s240_s13 = scalar_lea.vmem %s1085_s3, %s802_s11 }
  0x16   : > { %v256_v7 = vunpack.c.l.b16 %v248_v4  ;;  %v291_v8 = vunpack.c.l.b16 %v249_v5  ;;  %v317_v9 = vunpack.c.l.b16 %v250_v6  ;;  %v251_v10 = vld [vmem:[%s1008_s29 + $0xc] sm:$0x7]  ;;  %v242_v35 = vld [vmem:[%s1008_s29] sm:$0x3]  ;;  %v243_v36 = vld [vmem:[%s1008_s29 + $0x4] sm:$0x3] }
  0x17   : > { %v343_v11 = vunpack.c.l.b16 %v251_v10  ;;  %v244_v37 = vld [vmem:[%s1008_s29 + $0x8] sm:$0x3]  ;;  %v245_v38 = vld [vmem:[%s1008_s29 + $0xc] sm:$0x3]  ;;  %v835_v40 = vld [vmem:[%s1008_s29 + $0x4] sm:$0x7] }
  0x18   : > { %v257_v12 = vpack.c.b16 %v256_v7, %v256_v7  ;;  %v292_v13 = vpack.c.b16 %v291_v8, %v291_v8  ;;  %v318_v14 = vpack.c.b16 %v317_v9, %v317_v9  ;;  %v836_v41 = vld [vmem:[%s1008_s29 + $0x8] sm:$0x7]  ;;  %v837_v42 = vld [vmem:[%s1008_s29 + $0xc] sm:$0x7]  ;;  %v838_v43 = vld [vmem:[%s1008_s29 + $0x10] sm:$0x7]  ;;  %v532_v44 = vunpack.c.l.b16 %v835_v40 }
  0x19   : > { %v344_v15 = vpack.c.b16 %v343_v11, %v343_v11  ;;  %v566_v45 = vunpack.c.l.b16 %v836_v41  ;;  %v821_v46 = vld [vmem:[%s1008_s29 + $0x4] sm:$0x3]  ;;  %v822_v47 = vld [vmem:[%s1008_s29 + $0x8] sm:$0x3]  ;;  %v592_v48 = vunpack.c.l.b16 %v837_v42  ;;  %v618_v49 = vunpack.c.l.b16 %v838_v43  ;;  %v823_v50 = vld [vmem:[%s1008_s29 + $0xc] sm:$0x3] }
  0x1a   : > { %v259_v16 = vshrl.u32 %v257_v12, 16  ;;  %v261_v17 = vshll.u32 %v257_v12, 16  ;;  %v294_v18 = vshrl.u32 %v292_v13, 16  ;;  %v296_v19 = vshll.u32 %v292_v13, 16  ;;  %v824_v51 = vld [vmem:[%s1008_s29 + $0x10] sm:$0x3] }
  0x1b   : > { %386 = vmatpush.bf16.xpose.msrb.mxu0 %v377_v3  ;;  %402 = vmatpush.bf16.xpose.msrb.mxu1 %v377_v3  ;;  %v320_v20 = vshrl.u32 %v318_v14, 16  ;;  %v322_v21 = vshll.u32 %v318_v14, 16  ;;  %v346_v22 = vshrl.u32 %v344_v15, 16  ;;  %v348_v23 = vshll.u32 %v344_v15, 16 }
  0x1c   : > { %418 = vmatpush.bf16.xpose.msrb.mxu2 %v377_v3  ;;  %434 = vmatpush.bf16.xpose.msrb.mxu3 %v377_v3  ;;  %v263_v25 = vrot.slane %v261_v17, 1  ;;  %v298_v26 = vrot.slane %v296_v19, 1  ;;  %v533_v52 = vpack.c.b16 %v532_v44, %v532_v44  ;;  %v567_v53 = vpack.c.b16 %v566_v45, %v566_v45 }
  0x1d   : > { %v324_v27 = vrot.slane %v322_v21, 1  ;;  %v350_v28 = vrot.slane %v348_v23, 1  ;;  %v593_v54 = vpack.c.b16 %v592_v48, %v592_v48  ;;  %v619_v55 = vpack.c.b16 %v618_v49, %v618_v49 }
  0x1e   : > { %v264_v29 = vor.u32 %v263_v25, %v259_v16  ;;  %v299_v30 = vor.u32 %v298_v26, %v294_v18  ;;  %v537_v56 = vshll.u32 %v533_v52, 16  ;;  %v571_v57 = vshll.u32 %v567_v53, 16 }
  0x1f   : > { %v325_v31 = vor.u32 %v324_v27, %v320_v20  ;;  %v351_v32 = vor.u32 %v350_v28, %v346_v22  ;;  %v597_v58 = vshll.u32 %v593_v54, 16  ;;  %v623_v59 = vshll.u32 %v619_v55, 16 }
  0x20   : > { %809 = vmatmul.msk.bf16.vlgmr.msra.gmra.mxu0 %vm270_vm0, %v264_v29  ;;  %810 = vmatmul.msk.bf16.vlgmr.msra.gmra.mxu1 %vm270_vm0, %v299_v30  ;;  %v535_v60 = vshrl.u32 %v533_v52, 16  ;;  %v539_v61 = vrot.slane %v537_v56, 1  ;;  %v569_v62 = vshrl.u32 %v567_v53, 16  ;;  %v573_v63 = vrot.slane %v571_v57, 1 }
  0x21   : > { %811 = vmatmul.msk.bf16.vlgmr.msra.gmra.mxu2 %vm270_vm0, %v325_v31  ;;  %812 = vmatmul.msk.bf16.vlgmr.msra.gmra.mxu3 %vm270_vm0, %v351_v32  ;;  %v595_v0 = vshrl.u32 %v593_v54, 16  ;;  %v599_v1 = vrot.slane %v597_v58, 1  ;;  %v621_v2 = vshrl.u32 %v619_v55, 16  ;;  %v625_v3 = vrot.slane %v623_v59, 1 }
  0x22   : > { %v540_v4 = vor.u32 %v539_v61, %v535_v60  ;;  %v574_v5 = vor.u32 %v573_v63, %v569_v62 }
  0x23   : > { %466 = vmatpush.bf16.xpose.msra.mxu0 %v457_v33  ;;  %482 = vmatpush.bf16.xpose.msra.mxu1 %v457_v33  ;;  %v600_v6 = vor.u32 %v599_v1, %v595_v0  ;;  %v626_v7 = vor.u32 %v625_v3, %v621_v2 }
  0x24   : > { %498 = vmatpush.bf16.xpose.msra.mxu2 %v457_v33  ;;  %514 = vmatpush.bf16.xpose.msra.mxu3 %v457_v33 }
  0x30   : > { %817 = vmatmul.msk.bf16.vlgmr.msrb.gmra.mxu0 %vm270_vm0, %v242_v35  ;;  %818 = vmatmul.msk.bf16.vlgmr.msrb.gmra.mxu1 %vm270_vm0, %v243_v36  ;;  %v898_v36 = vld [vmem:[%s231_s5] ss:$0 sm:$0xff] }
  0x31   : > { %819 = vmatmul.msk.bf16.vlgmr.msrb.gmra.mxu2 %vm270_vm0, %v244_v37  ;;  %820 = vmatmul.msk.bf16.vlgmr.msrb.gmra.mxu3 %vm270_vm0, %v245_v38 }
  0x32   : > { %611 = vmatpush.bf16.xpose.msrb.mxu2 %v550_v39  ;;  %637 = vmatpush.bf16.xpose.msrb.mxu3 %v550_v39 }
  0x33   : > { %559 = vmatpush.bf16.xpose.msrb.mxu0 %v550_v39  ;;  %585 = vmatpush.bf16.xpose.msrb.mxu1 %v550_v39 }
  0x40   : > { %831 = vmatmul.msk.bf16.vlgmr.msra.gmra.mxu0 %vm270_vm0, %v821_v46  ;;  %832 = vmatmul.msk.bf16.vlgmr.msra.gmra.mxu1 %vm270_vm0, %v822_v47 }
  0x41   : > { %833 = vmatmul.msk.bf16.vlgmr.msra.gmra.mxu2 %vm270_vm0, %v823_v50  ;;  %834 = vmatmul.msk.bf16.vlgmr.msra.gmra.mxu3 %vm270_vm0, %v824_v51 }
  0x50   : > { %845 = vmatmul.msk.bf16.vlgmr.msrb.gmra.mxu0 %vm270_vm0, %v540_v4  ;;  %846 = vmatmul.msk.bf16.vlgmr.msrb.gmra.mxu1 %vm270_vm0, %v574_v5 }
  0x51   : > { %847 = vmatmul.msk.bf16.vlgmr.msrb.gmra.mxu2 %vm270_vm0, %v600_v6  ;;  %848 = vmatmul.msk.bf16.vlgmr.msrb.gmra.mxu3 %vm270_vm0, %v626_v7 }
  0x9d   : > { %v286_v8 = vpop.f32.mrf.mxu0  ;;  %v312_v9 = vpop.f32.mrf.mxu1 }
  0xa4   : > { %v338_v10 = vpop.f32.mrf.mxu2  ;;  %v364_v11 = vpop.f32.mrf.mxu3 }
  0xa5   : > { %v288_v12 = vpop.f32.mrf.mxu0  ;;  %v314_v13 = vpop.f32.mrf.mxu1 }
  0xac   : > { %v340_v14 = vpop.f32.mrf.mxu2  ;;  %v366_v15 = vpop.f32.mrf.mxu3 }
  0xad   : > { %v388_v16 = vpop.f32.mrf.mxu0  ;;  %v404_v17 = vpop.f32.mrf.mxu1 }
  0xae   : > { %v389_v30 = vadd.f32 %v388_v16, %v286_v8  ;;  %v405_v31 = vadd.f32 %v404_v17, %v312_v9 }
  0xb4   : > { %v420_v18 = vpop.f32.mrf.mxu2  ;;  %v436_v19 = vpop.f32.mrf.mxu3 }
  0xb5   : > { %v390_v20 = vpop.f32.mrf.mxu0  ;;  %v406_v21 = vpop.f32.mrf.mxu1  ;;  %v421_v43 = vadd.f32 %v420_v18, %v338_v10  ;;  %v437_v44 = vadd.f32 %v436_v19, %v364_v11 }
  0xbc   : > { %v422_v22 = vpop.f32.mrf.mxu2  ;;  %v438_v23 = vpop.f32.mrf.mxu3 }
  0xbd   : > { %v468_v24 = vpop.f32.mrf.mxu0  ;;  %v484_v25 = vpop.f32.mrf.mxu1 }
  0xbe   : > { %v520_v32 = vadd.f32 %v468_v24, %v389_v30  ;;  %v521_v33 = vadd.f32 %v484_v25, %v405_v31 }
  0xc4   : > { %v500_v26 = vpop.f32.mrf.mxu2  ;;  %v516_v27 = vpop.f32.mrf.mxu3 }
  0xc5   : > { %v470_v28 = vpop.f32.mrf.mxu0  ;;  %v486_v29 = vpop.f32.mrf.mxu1  ;;  %v522_v47 = vadd.f32 %v500_v26, %v421_v43  ;;  %v523_v48 = vadd.f32 %v516_v27, %v437_v44 }
  0xcc   : > { %v502_v34 = vpop.f32.mrf.mxu2  ;;  %v518_v35 = vpop.f32.mrf.mxu3 }
  0xcd   : > { %v561_v37 = vpop.f32.mrf.mxu0  ;;  %v587_v38 = vpop.f32.mrf.mxu1 }
  0xce   : > { %v643_v39 = vadd.f32 %v561_v37, %v520_v32  ;;  %v644_v40 = vadd.f32 %v587_v38, %v521_v33 }
  0xd0   : > { %v651_v41 = vadd.f32 %v898_v36, %v643_v39  ;;  %v652_v42 = vadd.f32 %v898_v36, %v644_v40 }
  0xd2   : > { %vm655_vm1 = vcmp.ge.f32.partialorder %v651_v41, 0.0  ;;  %v659_v45 = vmul.f32 0.2, %v651_v41  ;;  %vm656_vm2 = vcmp.ge.f32.partialorder %v652_v42, 0.0  ;;  %v660_v46 = vmul.f32 0.2, %v652_v42 }
  0xd4   : > { %v663_v49 = vsel %vm655_vm1, %v651_v41, %v659_v45  ;;  %v664_v50 = vsel %vm656_vm2, %v652_v42, %v660_v46  ;;  %v613_v51 = vpop.f32.mrf.mxu2  ;;  %v639_v52 = vpop.f32.mrf.mxu3 }
  0xd5   : > { %v667_v53 = vpack.c.bf16 %v663_v49, %v663_v49  ;;  %v668_v54 = vpack.c.bf16 %v664_v50, %v664_v50  ;;  %v645_v55 = vadd.f32 %v613_v51, %v522_v47  ;;  %v646_v56 = vadd.f32 %v639_v52, %v523_v48  ;;  %v563_v57 = vpop.f32.mrf.mxu0  ;;  %v589_v58 = vpop.f32.mrf.mxu1 }
  0xd7   : > { %672 = vst.msk [vmem:[%s240_s13] sm:$0x3] %vm671_vm3, %v667_v53  ;;  %v653_v59 = vadd.f32 %v898_v36, %v645_v55  ;;  %v654_v60 = vadd.f32 %v898_v36, %v646_v56 }
  0xd8   : > { %673 = vst.msk [vmem:[%s240_s13 + $0x2] sm:$0x3] %vm671_vm3, %v668_v54 }
  0xd9   : > { %vm657_vm4 = vcmp.ge.f32.partialorder %v653_v59, 0.0  ;;  %v661_v61 = vmul.f32 0.2, %v653_v59  ;;  %vm658_vm5 = vcmp.ge.f32.partialorder %v654_v60, 0.0  ;;  %v662_v62 = vmul.f32 0.2, %v654_v60 }
  0xdb   : > { %v665_v63 = vsel %vm657_vm4, %v653_v59, %v661_v61  ;;  %v666_v0 = vsel %vm658_vm5, %v654_v60, %v662_v62 }
  0xdc   : > { %v669_v1 = vpack.c.bf16 %v665_v63, %v665_v63  ;;  %v670_v2 = vpack.c.bf16 %v666_v0, %v666_v0  ;;  %v615_v3 = vpop.f32.mrf.mxu2  ;;  %v641_v4 = vpop.f32.mrf.mxu3 }
  0xde   : > { %674 = vst.msk [vmem:[%s240_s13 + $0x4] sm:$0x3] %vm671_vm3, %v669_v1 }
  0xdf   : > { %675 = vst.msk [vmem:[%s240_s13 + $0x6] sm:$0x3] %vm671_vm3, %v670_v2 }
  0xe0 PF: > { %s13_s16 = sadd.s32 1, %s937_s16   ;;  %s1086_s12 = smov %s929_s14 }
  0xe1   : > { %p10_p7 = scmp.ge.s32.totalorder %s13_s16, 6   ;;  %s1087_s13 = smov %s933_s15 }
  0xe2   : > { %s1088_s14 = smov %s1091_s17  ;;  %s1089_s15 = smov %s1095_s18 }
  0xe3   :  { %12 = sbr.rel (!%p10_p7) target bundleno = 3 (0x3), region = 72 }

// kernel: _lambda_.7
= control target key start
LH: loop header
LB: loop body
LE: loop exit
PB: predicated region body
PF: predicated region fallthrough
CT: control target
= control target key end

     0   :  { %vm375_vm0 = vcmask 261120   ;;  %vm408_vm1 = vcmask 1040384   ;;  %s763_s1 = inlined_call_operand.vmem [shape: bf16[512,32], index: 1, kind: input, shape index: {}]   ;;  %s764_s0 = inlined_call_operand.vmem [shape: bf16[2,512], index: 0, kind: input, shape index: {}]   ;;  %s765_s2 = inlined_call_operand.vmem [shape: f32[1,32], index: 2, kind: input, shape index: {}]   ;;  %s766_s3 = inlined_call_operand.vmem [shape: bf16[32,256], index: 3, kind: input, shape index: {}]   ;;  %s767_s4 = inlined_call_operand.vmem [shape: f32[1,256], index: 4, kind: input, shape index: {}]   ;;  %s768_s5 = inlined_call_operand.vmem [shape: bf16[2,256], index: 5, kind: output, shape index: {}]  }
   0x1   :  { %v571_v0 = vld [vmem:[%s763_s1 + $0x38] sm:$0xff]  ;;  %v570_v4 = vld [vmem:[%s763_s1 + $0x30] sm:$0xff]  ;;  %v569_v8 = vld [vmem:[%s763_s1 + $0x28] sm:$0xff] }
   0x2   :  { %v579_v1 = vld [vmem:[%s763_s1 + $0x78] sm:$0xff]  ;;  %292 = vmatpush.bf16.msra.mxu0 %v571_v0  ;;  %v578_v5 = vld [vmem:[%s763_s1 + $0x70] sm:$0xff]  ;;  %v577_v9 = vld [vmem:[%s763_s1 + $0x68] sm:$0xff] }
   0x3   :  { %v587_v2 = vld [vmem:[%s763_s1 + $0xb8] sm:$0xff]  ;;  %305 = vmatpush.bf16.msra.mxu1 %v579_v1  ;;  %v586_v6 = vld [vmem:[%s763_s1 + $0xb0] sm:$0xff]  ;;  %v585_v10 = vld [vmem:[%s763_s1 + $0xa8] sm:$0xff] }
   0x4   :  { %v595_v3 = vld [vmem:[%s763_s1 + $0xf8] sm:$0xff]  ;;  %318 = vmatpush.bf16.msra.mxu2 %v587_v2  ;;  %v594_v7 = vld [vmem:[%s763_s1 + $0xf0] sm:$0xff]  ;;  %v593_v11 = vld [vmem:[%s763_s1 + $0xe8] sm:$0xff] }
   0x5   :  { %331 = vmatpush.bf16.msra.mxu3 %v595_v3  ;;  %v568_v12 = vld [vmem:[%s763_s1 + $0x20] sm:$0xff]  ;;  %v567_v17 = vld [vmem:[%s763_s1 + $0x18] sm:$0xff]  ;;  %v566_v21 = vld [vmem:[%s763_s1 + $0x10] sm:$0xff] }
   0x6   :  { %293 = vmatpush.bf16.msra.mxu0 %v570_v4  ;;  %v576_v13 = vld [vmem:[%s763_s1 + $0x60] sm:$0xff]  ;;  %v575_v18 = vld [vmem:[%s763_s1 + $0x58] sm:$0xff]  ;;  %v574_v22 = vld [vmem:[%s763_s1 + $0x50] sm:$0xff] }
   0x7   :  { %306 = vmatpush.bf16.msra.mxu1 %v578_v5  ;;  %v21_v14 = vld [vmem:[%s764_s0] sm:$0xf]  ;;  %v583_v19 = vld [vmem:[%s763_s1 + $0x98] sm:$0xff]  ;;  %v582_v23 = vld [vmem:[%s763_s1 + $0x90] sm:$0xff] }
   0x8   :  { %319 = vmatpush.bf16.msra.mxu2 %v586_v6  ;;  %v584_v15 = vld [vmem:[%s763_s1 + $0xa0] sm:$0xff]  ;;  %91 = vst [vmem:[#allocation1] ss:$9 sm:$0xff] %v21_v14  ;;  %v591_v20 = vld [vmem:[%s763_s1 + $0xd8] sm:$0xff]  ;;  %v590_v24 = vld [vmem:[%s763_s1 + $0xd0] sm:$0xff] }
   0x9   :  { %332 = vmatpush.bf16.msra.mxu3 %v594_v7  ;;  %v592_v16 = vld [vmem:[%s763_s1 + $0xe0] sm:$0xff]  ;;  %v565_v25 = vld [vmem:[%s763_s1 + $0x8] sm:$0xff]  ;;  %v556_v29 = vld [vmem:[%s766_s3 + $0x10] sm:$0xf] }
   0xa   :  { %294 = vmatpush.bf16.msra.mxu0 %v569_v8  ;;  %v573_v26 = vld [vmem:[%s763_s1 + $0x48] sm:$0xff]  ;;  %v599_v30 = vld [vmem:[%s766_s3 + $0x14] sm:$0xf0]  ;;  %v598_v31 = vld [vmem:[%s766_s3 + $0x14] sm:$0xf] }
   0xb   :  { %307 = vmatpush.bf16.msra.mxu1 %v577_v9  ;;  %v581_v27 = vld [vmem:[%s763_s1 + $0x88] sm:$0xff]  ;;  %v558_v32 = vld [vmem:[%s766_s3 + $0x18] sm:$0xf0]  ;;  %v564_v33 = vld [vmem:[%s763_s1] sm:$0xff]  ;;  %v557_v37 = vor.u32 %v599_v30, %v556_v29 }
   0xc   :  { %320 = vmatpush.bf16.msra.mxu2 %v585_v10  ;;  %v589_v28 = vld [vmem:[%s763_s1 + $0xc8] sm:$0xff]  ;;  %v572_v34 = vld [vmem:[%s763_s1 + $0x40] sm:$0xff]  ;;  %v561_v38 = vor.u32 %v598_v31, %v558_v32 }
   0xd   :  { %333 = vmatpush.bf16.msra.mxu3 %v593_v11  ;;  %v580_v35 = vld [vmem:[%s763_s1 + $0x80] sm:$0xff]  ;;  %v597_v44 = vld [vmem:[%s766_s3 + $0x4] sm:$0xf0]  ;;  %v550_v47 = vld [vmem:[%s766_s3 + $0x8] sm:$0xf0] }
   0xe   :  { %295 = vmatpush.bf16.msra.mxu0 %v568_v12  ;;  %v588_v36 = vld [vmem:[%s763_s1 + $0xc0] sm:$0xff] }
   0xf   :  { %308 = vmatpush.bf16.msra.mxu1 %v576_v13  ;;  %v92_v39 = vld [vmem:[#allocation1] sm:$0xff]  ;;  %v93_v40 = vld [vmem:[#allocation1 + $0x9] sm:$0xff]  ;;  %v94_v41 = vld [vmem:[#allocation1 + $0x12] sm:$0xff] }
  0x10   :  { %321 = vmatpush.bf16.msra.mxu2 %v584_v15  ;;  %v95_v42 = vld [vmem:[#allocation1 + $0x1b] sm:$0xff]  ;;  %v596_v45 = vld [vmem:[%s766_s3 + $0x4] sm:$0xf] }
  0x11   :  { %334 = vmatpush.bf16.msra.mxu3 %v592_v16  ;;  %v548_v43 = vld [vmem:[%s766_s3] sm:$0xf]  ;;  %v553_v48 = vor.u32 %v596_v45, %v550_v47 }
  0x12   :  { %296 = vmatpush.bf16.msra.mxu0 %v567_v17  ;;  %v549_v46 = vor.u32 %v597_v44, %v548_v43  ;;  %v600_v49 = vld [vmem:[%s765_s2] ss:$0 sm:$0xff] }
  0x13   :  { %309 = vmatpush.bf16.msra.mxu1 %v575_v18  ;;  %v349_v63 = vld [vmem:[%s767_s4] sm:$0x3] }
  0x14   :  { %322 = vmatpush.bf16.msra.mxu2 %v583_v19  ;;  %v351_v0 = vperm.slane %v349_v63, 0  ;;  %v352_v1 = vperm.slane %v349_v63, 1 }
  0x15   :  { %335 = vmatpush.bf16.msra.mxu3 %v591_v20 }
  0x16   :  { %297 = vmatpush.bf16.msra.mxu0 %v566_v21 }
  0x17   :  { %310 = vmatpush.bf16.msra.mxu1 %v574_v22 }
  0x18   :  { %323 = vmatpush.bf16.msra.mxu2 %v582_v23 }
  0x19   :  { %336 = vmatpush.bf16.msra.mxu3 %v590_v24 }
  0x1a   :  { %298 = vmatpush.bf16.msra.mxu0 %v565_v25 }
  0x1b   :  { %311 = vmatpush.bf16.msra.mxu1 %v573_v26 }
  0x1c   :  { %324 = vmatpush.bf16.msra.mxu2 %v581_v27 }
  0x1d   :  { %337 = vmatpush.bf16.msra.mxu3 %v589_v28 }
  0x1e   :  { %299 = vmatpush.bf16.msra.mxu0 %v564_v33 }
  0x1f   :  { %312 = vmatpush.bf16.msra.mxu1 %v572_v34 }
  0x20   :  { %325 = vmatpush.bf16.msra.mxu2 %v580_v35 }
  0x21   :  { %338 = vmatpush.bf16.msra.mxu3 %v588_v36  ;;  %300 = vmatmul.bf16.vlgmr.msra.gmra.mxu0 %v92_v39 }
  0x22   :  { %385 = vmatpush.bf16.msrb.mxu0 %v557_v37  ;;  %313 = vmatmul.bf16.vlgmr.msra.gmra.mxu1 %v93_v40 }
  0x23   :  { %398 = vmatpush.bf16.msrb.mxu1 %v561_v38  ;;  %326 = vmatmul.bf16.vlgmr.msra.gmra.mxu2 %v94_v41 }
  0x24   :  { %339 = vmatmul.bf16.vlgmr.msra.gmra.mxu3 %v95_v42 }
  0x26   :  { %386 = vmatpush.bf16.msrb.mxu0 %v549_v46 }
  0x27   :  { %399 = vmatpush.bf16.msrb.mxu1 %v553_v48 }
  0x9e   :  { %v301_v50 = vpop.f32.mrf.mxu0 }
  0x9f   :  { %v314_v51 = vpop.f32.mrf.mxu1  ;;  %v302_v52 = vadd.f32 %v600_v49, %v301_v50 }
  0xa1   :  { %v315_v53 = vadd.f32 %v314_v51, %v302_v52 }
  0xa6   :  { %v327_v54 = vpop.f32.mrf.mxu2  ;;  %v303_v57 = vpop.f32.mrf.mxu0 }
  0xa7   :  { %v340_v55 = vpop.f32.mrf.mxu3  ;;  %v328_v56 = vadd.f32 %v327_v54, %v315_v53  ;;  %v316_v58 = vpop.f32.mrf.mxu1 }
  0xa9   :  { %v341_v59 = vadd.f32 %v340_v55, %v328_v56 }
  0xab   :  { %v344_v60 = vpack.c.bf16 %v341_v59, %v341_v59 }
  0xad   :  { %562 = vmatmul.msk.bf16.vlgmr.msrb.gmra.mxu0 %vm375_vm0, %v344_v60  ;;  %563 = vmatmul.msk.bf16.vlgmr.msrb.gmra.mxu1 %vm375_vm0, %v344_v60 }
  0xae   :  { %v329_v61 = vpop.f32.mrf.mxu2 }
  0xaf   :  { %v342_v62 = vpop.f32.mrf.mxu3 }
 0x12a   :  { %v388_v2 = vpop.f32.mrf.mxu0  ;;  %v401_v3 = vpop.f32.mrf.mxu1 }
 0x12b   :  { %v389_v4 = vadd.f32 %v388_v2, %v351_v0  ;;  %v402_v5 = vadd.f32 %v401_v3, %v352_v1 }
 0x12d   :  { %v405_v6 = vpack.c.bf16 %v402_v5, %v389_v4 }
 0x12f   :  { %v407_v7 = vrot.slane %v405_v6, 3 }
 0x131   :  { %v411_v8 = vsel %vm408_vm1, %v405_v6, %v407_v7 }
 0x132   :  { %413 = vst [vmem:[%s768_s5] sm:$0x3] %v411_v8  ;;  %v390_v9 = vpop.f32.mrf.mxu0  ;;  %v403_v10 = vpop.f32.mrf.mxu1 }

// kernel: _lambda_.8
= control target key start
LH: loop header
LB: loop body
LE: loop exit
PB: predicated region body
PF: predicated region fallthrough
CT: control target
= control target key end

     0   :  { %s2323_s15 = smov 0   ;;  %s2650_s0 = inlined_call_operand.vmem [shape: bf16[2,4,4,16], index: 0, kind: input, shape index: {}]   ;;  %s2651_s1 = inlined_call_operand.vmem [shape: bf16[2,4,4,16], index: 1, kind: input, shape index: {}]   ;;  %s2652_s2 = inlined_call_operand.vmem [shape: bf16[4,4,8,16], index: 2, kind: input, shape index: {}]   ;;  %s2653_s3 = inlined_call_operand.vmem [shape: f32[1,1,8], index: 3, kind: input, shape index: {}]   ;;  %s2654_s4 = inlined_call_operand.vmem [shape: bf16[2,4,4,32], index: 4, kind: output, shape index: {}]  }
   0x1 LB: > { %s2175_s16 = sadd.s32 4294967295, %s2292_s15   ;;  %p2179_p0 = scmp.ge.s32.totalorder %s2292_s15, 1  ;;  %s2292_s15 = sphi %s2323_s15, %s14_s15  }
   0x2   : > { %p172_p1 = scmp.lt.s32.totalorder %s2292_s15, 3 }
   0x4   : > { %p173_p2 = pnand %p2179_p0, %p172_p1 }
   0x5   : > { %p203_p3 = scmp.lt.s32.totalorder (!%p173_p2), %s2175_s16, 1  ;;  %s2295_s12 = smov (!%p173_p2), 8  }
   0x6   : > { %176 = sbr.rel (%p173_p2) target bundleno = 548 (0x224), region = 36  ;;  %s2297_s19 = smov (!%p173_p2), 24  }
   0xb   : > { %v2186_v0 = vld [vmem:[%s2652_s2 + $0x4] sm:$0xf]  ;;  %vm319_vm0 = vcmask 130048   ;;  %vm219_vm1 = vcmask 124928   ;;  %v2294_v2 = vmov 0   ;;  %s2658_s16 = smov (!%p203_p3, %s2175_s16), 1 }
   0xc   : > { %v324_v1 = vsel %vm319_vm0, %v2186_v0, 0  ;;  %220 = vst.msk [vmem:[#allocation2] sm:$0x7] %vm219_vm1, %v2294_v2  ;;  %v302_v3 = vld [vmem:[%s2652_s2] sm:$0xf]  ;;  %s2343_s21 = sshll.u32 %s2658_s16, 3 }
   0xd   : > { %333 = vmatpush.bf16.xpose.msra.mxu0 %v324_v1  ;;  %221 = vst.msk [vmem:[#allocation2 + $0x4] sm:$0x7] %vm219_vm1, %v2294_v2  ;;  %v421_v4 = vsel %vm319_vm0, %v302_v3, 0  ;;  %359 = vmatpush.bf16.xpose.msra.mxu1 %v324_v1  ;;  %s2350_s24 = scalar_lea.vmem %s2650_s0, %s2343_s21  ;;  %s2356_s27 = scalar_lea.vmem %s2651_s1, %s2343_s21  ;;  %vm284_vm2 = vsmask.f32 2306  ;;  %vm702_vm5 = vcmask 58368  }
   0xe   : > { %222 = vst.msk [vmem:[#allocation2 + $0x8] sm:$0x7] %vm219_vm1, %v2294_v2  ;;  %385 = vmatpush.bf16.xpose.msra.mxu2 %v324_v1  ;;  %411 = vmatpush.bf16.xpose.msra.mxu3 %v324_v1  ;;  %v226_v5 = vld [vmem:[%s2350_s24] sm:$0x3]  ;;  %v227_v9 = vld [vmem:[%s2350_s24 + $0x2] sm:$0x3]  ;;  %vm2369_vm3 = vmand %vm219_vm1, %vm284_vm2  ;;  %s2502_s6 = scalar_lea.vmem %s2654_s4, %s2343_s21 }
   0xf   : > { %223 = vst.msk [vmem:[#allocation2 + $0xc] sm:$0x7] %vm219_vm1, %v2294_v2  ;;  %v230_v6 = vld [vmem:[%s2356_s27] sm:$0x3]  ;;  %v234_v7 = vunpack.c.l.bf16 %v226_v5  ;;  %v231_v10 = vld [vmem:[%s2356_s27 + $0x2] sm:$0x3]  ;;  %v235_v13 = vunpack.c.l.bf16 %v227_v9 }
  0x10   : > { %224 = vst.msk [vmem:[#allocation2 + $0x10] sm:$0x7] %vm219_vm1, %v2294_v2  ;;  %v238_v8 = vunpack.c.l.bf16 %v230_v6  ;;  %v228_v11 = vld [vmem:[%s2350_s24 + $0x4] sm:$0x3]  ;;  %v239_v14 = vunpack.c.l.bf16 %v231_v10  ;;  %v2195_v32 = vld [vmem:[%s2652_s2 + $0x8] sm:$0xf] }
  0x11   : > { %225 = vst.msk [vmem:[#allocation2 + $0x14] sm:$0x7] %vm219_vm1, %v2294_v2  ;;  %v232_v15 = vld [vmem:[%s2356_s27 + $0x4] sm:$0x3]  ;;  %v236_v16 = vunpack.c.l.bf16 %v228_v11  ;;  %v494_v43 = vsel %vm319_vm0, %v2195_v32, 0  ;;  %vm1151_vm10 = vcmask 1041408  }
  0x12   : > { %v242_v18 = vadd.f32 %v238_v8, %v234_v7  ;;  %v240_v19 = vunpack.c.l.bf16 %v232_v15  ;;  %v243_v20 = vadd.f32 %v239_v14, %v235_v13  ;;  %v229_v48 = vld [vmem:[%s2350_s24 + $0x6] sm:$0x3]  ;;  %v2200_v2 = vld [vmem:[%s2652_s2 + $0xc] sm:$0xf]  ;;  %v2205_v35 = vld [vmem:[%s2652_s2 + $0x10] sm:$0xf] }
  0x13   : > { %v303_v12 = vld [vmem:[#allocation2] sm:$0x7]  ;;  %v233_v49 = vld [vmem:[%s2356_s27 + $0x6] sm:$0x3]  ;;  %v237_v52 = vunpack.c.l.bf16 %v229_v48  ;;  %v581_v13 = vsel %vm319_vm0, %v2200_v2, 0  ;;  %s2296_s16 = smov 16  }
  0x14   : > { %v310_v17 = vunpack.c.l.b16 %v303_v12  ;;  %v246_v22 = vpack.c.bf16 %v242_v18, %v242_v18  ;;  %v244_v23 = vadd.f32 %v240_v19, %v236_v16  ;;  %v247_v24 = vpack.c.bf16 %v243_v20, %v243_v20  ;;  %v286_v36 = vld [vmem:[#allocation2 + $0x4] sm:$0x7]  ;;  %v298_v7 = vld [vmem:[#allocation2] sm:$0x3] }
  0x15   : > { %430 = vmatpush.bf16.xpose.msrb.mxu0 %v421_v4  ;;  %446 = vmatpush.bf16.xpose.msrb.mxu1 %v421_v4  ;;  %v289_v42 = vld [vmem:[#allocation2 + $0x8] sm:$0x7]  ;;  %v241_v53 = vunpack.c.l.bf16 %v233_v49  ;;  %vm1180_vm2 = vcmask 123968  }
  0x16   : > { %462 = vmatpush.bf16.xpose.msrb.mxu2 %v421_v4  ;;  %478 = vmatpush.bf16.xpose.msrb.mxu3 %v421_v4  ;;  %v311_v21 = vpack.c.b16 %v310_v17, %v310_v17  ;;  %v251_v27 = vshrl.u32 %v246_v22, 16  ;;  %v254_v28 = vshll.u32 %v246_v22, 16  ;;  %v258_v29 = vshrl.u32 %v247_v24, 16  ;;  %v292_v47 = vld [vmem:[#allocation2 + $0xc] sm:$0x7] }
  0x17   : > { %v261_v30 = vshll.u32 %v247_v24, 16  ;;  %v248_v31 = vpack.c.bf16 %v244_v23, %v244_v23  ;;  %v245_v55 = vadd.f32 %v241_v53, %v237_v52  ;;  %v295_v6 = vld [vmem:[#allocation2 + $0x10] sm:$0x7]  ;;  %v2206_v24 = vld [vmem:[%s2652_s2 + $0x14] sm:$0xf] }
  0x18   : > { %v313_v25 = vshrl.u32 %v311_v21, 16  ;;  %v315_v26 = vshll.u32 %v311_v21, 16  ;;  %v253_v34 = vrot.slane %v251_v27, 7  ;;  %v260_v37 = vrot.slane %v258_v29, 7 }
  0x19   : > { %v265_v38 = vshrl.u32 %v248_v31, 16  ;;  %v268_v39 = vshll.u32 %v248_v31, 16  ;;  %v249_v56 = vpack.c.bf16 %v245_v55, %v245_v55  ;;  %v727_v27 = vsel %vm319_vm0, %v2206_v24, 0  ;;  %v707_v55 = vld [vmem:[#allocation2] sm:$0x7] }
  0x1a   : > { %v317_v33 = vrot.slane %v315_v26, 1  ;;  %v256_v41 = vor.u32 %v254_v28, %v253_v34  ;;  %v263_v44 = vor.u32 %v261_v30, %v260_v37 }
  0x1b   : > { %v267_v45 = vrot.slane %v265_v38, 7  ;;  %v272_v57 = vshrl.u32 %v249_v56, 16  ;;  %v275_v63 = vshll.u32 %v249_v56, 16 }
  0x1c   : > { %v318_v40 = vor.u32 %v317_v33, %v313_v25  ;;  %v287_v46 = vsel %vm2369_vm3, %v256_v41, %v286_v36  ;;  %v290_v50 = vsel %vm2369_vm3, %v263_v44, %v289_v42 }
  0x1d   : > { %288 = vst [vmem:[#allocation2 + $0x4] sm:$0x7] %v287_v46  ;;  %v270_v51 = vor.u32 %v268_v39, %v267_v45  ;;  %v274_v62 = vrot.slane %v272_v57, 7  ;;  %v816_v39 = vsel %vm319_vm0, %v2205_v35, 0  ;;  %v713_v45 = vld [vmem:[#allocation2] sm:$0x6] }
  0x1e   : > { %2187 = vmatmul.msk.bf16.vlgmr.msra.gmra.mxu0 %vm319_vm0, %v318_v40  ;;  %291 = vst [vmem:[#allocation2 + $0x8] sm:$0x7] %v290_v50  ;;  %v720_v49 = vunpack.c.l.b16 %v713_v45  ;;  %v2226_v45 = vld [vmem:[%s2652_s2 + $0x24] sm:$0xf] }
  0x1f   : > { %503 = vmatpush.bf16.xpose.msra.mxu0 %v494_v43  ;;  %v293_v54 = vsel %vm2369_vm3, %v270_v51, %v292_v47  ;;  %v277_v5 = vor.u32 %v275_v63, %v274_v62  ;;  %v803_v63 = vunpack.c.l.b16 %v707_v55 }
  0x20   : > { %294 = vst [vmem:[#allocation2 + $0xc] sm:$0x7] %v293_v54  ;;  %v721_v53 = vpack.c.b16 %v720_v49, %v720_v49 }
  0x21   : > { %v296_v15 = vsel %vm2369_vm3, %v277_v5, %v295_v6  ;;  %v804_v5 = vpack.c.b16 %v803_v63, %v803_v63 }
  0x22   : > { %297 = vst [vmem:[#allocation2 + $0x10] sm:$0x7] %v296_v15 }
  0x24   : > { %v304_v58 = vld [vmem:[#allocation2 + $0x4] sm:$0x7] }
  0x25   : > { %v340_v59 = vunpack.c.l.b16 %v304_v58  ;;  %v305_v60 = vld [vmem:[#allocation2 + $0x8] sm:$0x7]  ;;  %v561_v23 = vld [vmem:[#allocation2 + $0x4] sm:$0x7] }
  0x26   : > { %v366_v61 = vunpack.c.l.b16 %v305_v60  ;;  %v568_v25 = vunpack.c.l.b16 %v561_v23  ;;  %v484_v26 = vld [vmem:[#allocation2 + $0x4] sm:$0x3]  ;;  %v300_v30 = vld [vmem:[#allocation2 + $0x8] sm:$0x3]  ;;  %v722_v60 = vrot.slane %v721_v53, 1  ;;  %v1211_v53 = vsel %vm319_vm0, %v2226_v45, 0 }
  0x27   : > { %v341_v0 = vpack.c.b16 %v340_v59, %v340_v59  ;;  %v306_v1 = vld [vmem:[#allocation2 + $0xc] sm:$0x7]  ;;  %v299_v28 = vld [vmem:[#allocation2 + $0x4] sm:$0x3]  ;;  %v562_v37 = vld [vmem:[#allocation2 + $0x8] sm:$0x7] }
  0x28   : > { %v367_v3 = vpack.c.b16 %v366_v61, %v366_v61  ;;  %v392_v4 = vunpack.c.l.b16 %v306_v1  ;;  %v569_v29 = vpack.c.b16 %v568_v25, %v568_v25  ;;  %v301_v31 = vld [vmem:[#allocation2 + $0xc] sm:$0x3]  ;;  %v597_v40 = vunpack.c.l.b16 %v562_v37  ;;  %v485_v42 = vld [vmem:[#allocation2 + $0x8] sm:$0x3]  ;;  %v2215_v59 = vld [vmem:[%s2652_s2 + $0x18] sm:$0xf] }
  0x29   : > { %v343_v8 = vshrl.u32 %v341_v0, 16  ;;  %v345_v9 = vshll.u32 %v341_v0, 16  ;;  %v563_v38 = vld [vmem:[#allocation2 + $0xc] sm:$0x7]  ;;  %v564_v41 = vld [vmem:[#allocation2 + $0x10] sm:$0x7] }
  0x2a   : > { %v369_v10 = vshrl.u32 %v367_v3, 16  ;;  %v371_v11 = vshll.u32 %v367_v3, 16  ;;  %v393_v12 = vpack.c.b16 %v392_v4, %v392_v4  ;;  %v573_v32 = vshll.u32 %v569_v29, 16  ;;  %v486_v44 = vld [vmem:[#allocation2 + $0xc] sm:$0x3] }
  0x2b   : > { %v347_v14 = vrot.slane %v345_v9, 1  ;;  %v571_v33 = vshrl.u32 %v569_v29, 16  ;;  %v649_v46 = vunpack.c.l.b16 %v564_v41  ;;  %v487_v47 = vld [vmem:[#allocation2 + $0x10] sm:$0x3]  ;;  %v598_v48 = vpack.c.b16 %v597_v40, %v597_v40  ;;  %v715_v9 = vld [vmem:[#allocation2 + $0x8] sm:$0x6] }
  0x2c   : > { %v373_v16 = vrot.slane %v371_v11, 1  ;;  %v395_v17 = vshrl.u32 %v393_v12, 16  ;;  %v397_v18 = vshll.u32 %v393_v12, 16  ;;  %v575_v34 = vrot.slane %v573_v32, 1  ;;  %v716_v11 = vld [vmem:[#allocation2 + $0xc] sm:$0x6] }
  0x2d   : > { %v348_v19 = vor.u32 %v347_v14, %v343_v8  ;;  %v650_v51 = vpack.c.b16 %v649_v46, %v649_v46  ;;  %v602_v52 = vshll.u32 %v598_v48, 16  ;;  %v600_v57 = vshrl.u32 %v598_v48, 16  ;;  %v714_v8 = vld [vmem:[#allocation2 + $0x4] sm:$0x6]  ;;  %v709_v23 = vld [vmem:[#allocation2 + $0x8] sm:$0x7] }
  0x2e   : > { %2191 = vmatmul.msk.bf16.vlgmr.msrb.gmra.mxu0 %vm319_vm0, %v298_v7  ;;  %v374_v20 = vor.u32 %v373_v16, %v369_v10  ;;  %v399_v21 = vrot.slane %v397_v18, 1  ;;  %v576_v36 = vor.u32 %v575_v34, %v571_v33  ;;  %v929_v2 = vsel %vm319_vm0, %v2215_v59, 0  ;;  %v909_v15 = vld [vmem:[#allocation2 + $0x4] sm:$0x7]  ;;  %v2220_v18 = vld [vmem:[%s2652_s2 + $0x1c] sm:$0xf] }
  0x2f   : > { %590 = vmatpush.bf16.xpose.msrb.mxu0 %v581_v13  ;;  %2188 = vmatmul.msk.bf16.vlgmr.msra.gmra.mxu1 %vm319_vm0, %v348_v19  ;;  %v654_v56 = vshll.u32 %v650_v51, 16  ;;  %v604_v58 = vrot.slane %v602_v52, 1  ;;  %v652_v0 = vshrl.u32 %v650_v51, 16  ;;  %v808_v7 = vshll.u32 %v804_v5, 16  ;;  %v910_v49 = vld [vmem:[#allocation2 + $0x8] sm:$0x7] }
  0x30   : > { %2189 = vmatmul.msk.bf16.vlgmr.msra.gmra.mxu2 %vm319_vm0, %v374_v20  ;;  %v400_v22 = vor.u32 %v399_v21, %v395_v17  ;;  %519 = vmatpush.bf16.xpose.msra.mxu1 %v494_v43  ;;  %v743_v10 = vunpack.c.l.b16 %v714_v8  ;;  %v806_v12 = vshrl.u32 %v804_v5, 16  ;;  %v763_v14 = vunpack.c.l.b16 %v715_v9  ;;  %v1026_v59 = vld [vmem:[#allocation2 + $0x4] sm:$0x6]  ;;  %v2225_v9 = vld [vmem:[%s2652_s2 + $0x20] sm:$0xf] }
  0x31   : > { %535 = vmatpush.bf16.xpose.msra.mxu2 %v494_v43  ;;  %v656_v1 = vrot.slane %v654_v56, 1  ;;  %v605_v3 = vor.u32 %v604_v58, %v600_v57  ;;  %v783_v16 = vunpack.c.l.b16 %v716_v11  ;;  %v916_v21 = vunpack.c.l.b16 %v909_v15  ;;  %v912_v56 = vld [vmem:[#allocation2 + $0x10] sm:$0x7]  ;;  %v1191_v5 = vld [vmem:[#allocation2 + $0x4] sm:$0x7] }
  0x32   : > { %2190 = vmatmul.msk.bf16.vlgmr.msra.gmra.mxu3 %vm319_vm0, %v400_v22  ;;  %v744_v17 = vpack.c.b16 %v743_v10, %v743_v10  ;;  %v764_v20 = vpack.c.b16 %v763_v14, %v763_v14  ;;  %v708_v22 = vld [vmem:[#allocation2 + $0x4] sm:$0x7]  ;;  %v1040_v25 = vsel %vm319_vm0, %v2220_v18, 0  ;;  %v945_v55 = vunpack.c.l.b16 %v910_v49 }
  0x33   : > { %551 = vmatpush.bf16.xpose.msra.mxu3 %v494_v43  ;;  %v623_v43 = vunpack.c.l.b16 %v563_v38  ;;  %v657_v6 = vor.u32 %v656_v1, %v652_v0  ;;  %v784_v24 = vpack.c.b16 %v783_v16, %v783_v16  ;;  %v1033_v63 = vunpack.c.l.b16 %v1026_v59  ;;  %v1185_v59 = vld [vmem:[#allocation2 + $0x4] sm:$0x3] }
  0x34   : > { %v765_v29 = vrot.slane %v764_v20, 1  ;;  %v1308_v16 = vsel %vm319_vm0, %v2225_v9, 0 }
  0x35   : > { %v624_v50 = vpack.c.b16 %v623_v43, %v623_v43  ;;  %v785_v32 = vrot.slane %v784_v24, 1 }
  0x37   : > { %v628_v54 = vshll.u32 %v624_v50, 16  ;;  %v626_v61 = vshrl.u32 %v624_v50, 16  ;;  %v911_v50 = vld [vmem:[#allocation2 + $0xc] sm:$0x7] }
  0x38   : > { %v971_v58 = vunpack.c.l.b16 %v911_v50 }
  0x39   : > { %v630_v62 = vrot.slane %v628_v54, 1 }
  0x3a   : > { %v972_v0 = vpack.c.b16 %v971_v58, %v971_v58 }
  0x3b   : > { %v631_v4 = vor.u32 %v630_v62, %v626_v61  ;;  %v997_v61 = vunpack.c.l.b16 %v912_v56  ;;  %v946_v62 = vpack.c.b16 %v945_v55, %v945_v55  ;;  %v2240_v55 = vld [vmem:[%s2652_s2 + $0x2c] sm:$0xf] }
  0x3c   : > { %v974_v11 = vshrl.u32 %v972_v0, 16 }
  0x3d   : > { %v998_v1 = vpack.c.b16 %v997_v61, %v997_v61 }
  0x3e   : > { %2196 = vmatmul.msk.bf16.vlgmr.msra.gmra.mxu0 %vm319_vm0, %v484_v26  ;;  %v745_v26 = vrot.slane %v744_v17, 1 }
  0x3f   : > { %736 = vmatpush.bf16.xpose.msra.mxu0 %v727_v27  ;;  %2192 = vmatmul.msk.bf16.vlgmr.msrb.gmra.mxu1 %vm319_vm0, %v299_v28  ;;  %v710_v28 = vld [vmem:[#allocation2 + $0xc] sm:$0x7]  ;;  %v1000_v14 = vshrl.u32 %v998_v1, 16 }
  0x40   : > { %2193 = vmatmul.msk.bf16.vlgmr.msrb.gmra.mxu2 %vm319_vm0, %v300_v30  ;;  %616 = vmatpush.bf16.xpose.msrb.mxu1 %v581_v13  ;;  %v917_v30 = vpack.c.b16 %v916_v21, %v916_v21  ;;  %v884_v33 = vunpack.c.l.b16 %v710_v28 }
  0x41   : > { %642 = vmatpush.bf16.xpose.msrb.mxu2 %v581_v13 }
  0x42   : > { %2194 = vmatmul.msk.bf16.vlgmr.msrb.gmra.mxu3 %vm319_vm0, %v301_v31  ;;  %v858_v31 = vunpack.c.l.b16 %v709_v23  ;;  %v921_v35 = vshll.u32 %v917_v30, 16  ;;  %v885_v37 = vpack.c.b16 %v884_v33, %v884_v33  ;;  %v1028_v23 = vld [vmem:[#allocation2 + $0xc] sm:$0x6] }
  0x43   : > { %668 = vmatpush.bf16.xpose.msrb.mxu3 %v581_v13  ;;  %v810_v13 = vrot.slane %v808_v7, 1  ;;  %v948_v7 = vshrl.u32 %v946_v62, 16  ;;  %v1076_v28 = vunpack.c.l.b16 %v1028_v23 }
  0x44   : > { %v923_v40 = vrot.slane %v921_v35, 1  ;;  %v887_v51 = vshrl.u32 %v885_v37, 16 }
  0x45   : > { %v811_v19 = vor.u32 %v810_v13, %v806_v12  ;;  %v1198_v13 = vunpack.c.l.b16 %v1191_v5  ;;  %v1077_v33 = vpack.c.b16 %v1076_v28, %v1076_v28  ;;  %v2245_v28 = vld [vmem:[%s2652_s2 + $0x30] sm:$0xf] }
  0x4e   : > { %2201 = vmatmul.msk.bf16.vlgmr.msrb.gmra.mxu0 %vm319_vm0, %v576_v36  ;;  %v859_v36 = vpack.c.b16 %v858_v31, %v858_v31  ;;  %v2235_v31 = vld [vmem:[%s2652_s2 + $0x28] sm:$0xf] }
  0x4f   : > { %825 = vmatpush.bf16.xpose.msrb.mxu0 %v816_v39  ;;  %2197 = vmatmul.msk.bf16.vlgmr.msra.gmra.mxu1 %vm319_vm0, %v485_v42  ;;  %v889_v42 = vshll.u32 %v885_v37, 16 }
  0x50   : > { %2198 = vmatmul.msk.bf16.vlgmr.msra.gmra.mxu2 %vm319_vm0, %v486_v44  ;;  %756 = vmatpush.bf16.xpose.msra.mxu1 %v727_v27  ;;  %v863_v41 = vshll.u32 %v859_v36, 16 }
  0x51   : > { %776 = vmatpush.bf16.xpose.msra.mxu2 %v727_v27  ;;  %v891_v52 = vrot.slane %v889_v42, 1  ;;  %v1078_v42 = vrot.slane %v1077_v33, 1 }
  0x52   : > { %2199 = vmatmul.msk.bf16.vlgmr.msra.gmra.mxu3 %vm319_vm0, %v487_v47  ;;  %v861_v47 = vshrl.u32 %v859_v36, 16  ;;  %v865_v48 = vrot.slane %v863_v41, 1  ;;  %v1193_v36 = vld [vmem:[#allocation2 + $0xc] sm:$0x7]  ;;  %v1194_v41 = vld [vmem:[#allocation2 + $0x10] sm:$0x7] }
  0x53   : > { %796 = vmatpush.bf16.xpose.msra.mxu3 %v727_v27  ;;  %v832_v27 = vunpack.c.l.b16 %v708_v22  ;;  %v1027_v22 = vld [vmem:[#allocation2 + $0x8] sm:$0x6]  ;;  %v1279_v45 = vunpack.c.l.b16 %v1194_v41 }
  0x54   : > { %v866_v57 = vor.u32 %v865_v48, %v861_v47  ;;  %v1056_v24 = vunpack.c.l.b16 %v1027_v22 }
  0x55   : > { %v833_v34 = vpack.c.b16 %v832_v27, %v832_v27  ;;  %v1280_v49 = vpack.c.b16 %v1279_v45, %v1279_v45  ;;  %v1374_v45 = vld [vmem:[#allocation2 + $0x10] sm:$0x3] }
  0x57   : > { %v837_v38 = vshll.u32 %v833_v34, 16  ;;  %v835_v43 = vshrl.u32 %v833_v34, 16  ;;  %v1192_v34 = vld [vmem:[#allocation2 + $0x8] sm:$0x7] }
  0x59   : > { %v839_v44 = vrot.slane %v837_v38, 1  ;;  %v1382_v38 = vsel %vm319_vm0, %v2235_v31, 0 }
  0x5b   : > { %v840_v54 = vor.u32 %v839_v44, %v835_v43  ;;  %v1253_v43 = vunpack.c.l.b16 %v1193_v36  ;;  %v2492_v36 = vsel %vm319_vm0, %v2245_v28, 0 }
  0x5d   : > { %v1254_v47 = vpack.c.b16 %v1253_v43, %v1253_v43 }
  0x5e   : > { %2207 = vmatmul.msk.bf16.vlgmr.msra.gmra.mxu0 %vm319_vm0, %v722_v60  ;;  %v892_v60 = vor.u32 %v891_v52, %v887_v51  ;;  %v1284_v52 = vshll.u32 %v1280_v49, 16 }
  0x5f   : > { %938 = vmatpush.bf16.xpose.msra.mxu0 %v929_v2  ;;  %2202 = vmatmul.msk.bf16.vlgmr.msrb.gmra.mxu1 %vm319_vm0, %v605_v3  ;;  %v1034_v3 = vpack.c.b16 %v1033_v63, %v1033_v63  ;;  %v1258_v51 = vshll.u32 %v1254_v47, 16  ;;  %v1256_v56 = vshrl.u32 %v1254_v47, 16 }
  0x60   : > { %2203 = vmatmul.msk.bf16.vlgmr.msrb.gmra.mxu2 %vm319_vm0, %v631_v4  ;;  %851 = vmatpush.bf16.xpose.msrb.mxu1 %v816_v39  ;;  %v976_v4 = vshll.u32 %v972_v0, 16  ;;  %v1286_v61 = vrot.slane %v1284_v52, 1 }
  0x61   : > { %877 = vmatpush.bf16.xpose.msrb.mxu2 %v816_v39  ;;  %v1035_v10 = vrot.slane %v1034_v3, 1 }
  0x62   : > { %2204 = vmatmul.msk.bf16.vlgmr.msrb.gmra.mxu3 %vm319_vm0, %v657_v6  ;;  %v1002_v6 = vshll.u32 %v998_v1, 16  ;;  %v978_v12 = vrot.slane %v976_v4, 1 }
  0x63   : > { %903 = vmatpush.bf16.xpose.msrb.mxu3 %v816_v39  ;;  %v919_v39 = vshrl.u32 %v917_v30, 16  ;;  %v1057_v30 = vpack.c.b16 %v1056_v24, %v1056_v24 }
  0x64   : > { %v1004_v15 = vrot.slane %v1002_v6, 1  ;;  %v979_v18 = vor.u32 %v978_v12, %v974_v11  ;;  %v1372_v11 = vld [vmem:[#allocation2 + $0x8] sm:$0x3] }
  0x65   : > { %v924_v46 = vor.u32 %v923_v40, %v919_v39  ;;  %v1058_v39 = vrot.slane %v1057_v30, 1  ;;  %v1227_v40 = vunpack.c.l.b16 %v1192_v34  ;;  %v2489_v30 = vld [vmem:[%s2653_s3] ss:$0 sm:$0xff]  ;;  %v1451_v34 = vld [vmem:[#allocation2 + $0x10] sm:$0x7] }
  0x66   : > { %v1005_v20 = vor.u32 %v1004_v15, %v1000_v14  ;;  %v1186_v15 = vld [vmem:[#allocation2 + $0x8] sm:$0x3]  ;;  %v1511_v43 = vunpack.c.l.b16 %v1451_v34 }
  0x6e   : > { %2211 = vmatmul.msk.bf16.vlgmr.msrb.gmra.mxu0 %vm319_vm0, %v811_v19  ;;  %v1199_v19 = vpack.c.b16 %v1198_v13, %v1198_v13 }
  0x6f   : > { %1049 = vmatpush.bf16.xpose.msrb.mxu0 %v1040_v25  ;;  %2208 = vmatmul.msk.bf16.vlgmr.msra.gmra.mxu1 %vm319_vm0, %v745_v26 }
  0x70   : > { %2209 = vmatmul.msk.bf16.vlgmr.msra.gmra.mxu2 %vm319_vm0, %v765_v29  ;;  %964 = vmatpush.bf16.xpose.msra.mxu1 %v929_v2  ;;  %v1203_v21 = vshll.u32 %v1199_v19, 16  ;;  %v1201_v26 = vshrl.u32 %v1199_v19, 16  ;;  %v1188_v19 = vld [vmem:[#allocation2 + $0x10] sm:$0x3] }
  0x71   : > { %990 = vmatpush.bf16.xpose.msra.mxu2 %v929_v2 }
  0x72   : > { %2210 = vmatmul.msk.bf16.vlgmr.msra.gmra.mxu3 %vm319_vm0, %v785_v32  ;;  %v1205_v27 = vrot.slane %v1203_v21, 1 }
  0x73   : > { %1016 = vmatpush.bf16.xpose.msra.mxu3 %v929_v2  ;;  %v950_v2 = vshll.u32 %v946_v62, 16  ;;  %v1469_v62 = vsel %vm319_vm0, %v2240_v55, 0 }
  0x74   : > { %v1206_v32 = vor.u32 %v1205_v27, %v1201_v26 }
  0x75   : > { %v952_v8 = vrot.slane %v950_v2, 1 }
  0x77   : > { %v953_v17 = vor.u32 %v952_v8, %v948_v7  ;;  %v1449_v7 = vld [vmem:[#allocation2 + $0x8] sm:$0x7]  ;;  %v2246_v8 = vld [vmem:[%s2652_s2 + $0x34] sm:$0xf] }
  0x78   : > { %v1456_v9 = vunpack.c.l.b16 %v1449_v7  ;;  %v2469_v12 = vsel %vm319_vm0, %v2246_v8, 0  ;;  %v2255_v7 = vld [vmem:[%s2652_s2 + $0x38] sm:$0xf] }
  0x7e   : > { %2216 = vmatmul.msk.bf16.vlgmr.msra.gmra.mxu0 %vm319_vm0, %v924_v46  ;;  %v1228_v46 = vpack.c.b16 %v1227_v40, %v1227_v40 }
  0x7f   : > { %1220 = vmatpush.bf16.xpose.msra.mxu0 %v1211_v53  ;;  %2212 = vmatmul.msk.bf16.vlgmr.msrb.gmra.mxu1 %vm319_vm0, %v840_v54 }
  0x80   : > { %2213 = vmatmul.msk.bf16.vlgmr.msrb.gmra.mxu2 %vm319_vm0, %v866_v57  ;;  %1069 = vmatpush.bf16.xpose.msrb.mxu1 %v1040_v25  ;;  %v1232_v50 = vshll.u32 %v1228_v46, 16  ;;  %v1260_v57 = vrot.slane %v1258_v51, 1 }
  0x81   : > { %1089 = vmatpush.bf16.xpose.msrb.mxu2 %v1040_v25 }
  0x82   : > { %2214 = vmatmul.msk.bf16.vlgmr.msrb.gmra.mxu3 %vm319_vm0, %v892_v60  ;;  %v1234_v54 = vrot.slane %v1232_v50, 1  ;;  %v1282_v60 = vshrl.u32 %v1280_v49, 16  ;;  %v1261_v1 = vor.u32 %v1260_v57, %v1256_v56  ;;  %v1375_v49 = vld [vmem:[#allocation2 + $0x14] sm:$0x3] }
  0x83   : > { %1109 = vmatpush.bf16.xpose.msrb.mxu3 %v1040_v25  ;;  %v1029_v25 = vld [vmem:[#allocation2 + $0x10] sm:$0x6] }
  0x84   : > { %v1096_v29 = vunpack.c.l.b16 %v1029_v25  ;;  %v1287_v2 = vor.u32 %v1286_v61, %v1282_v60 }
  0x86   : > { %v1097_v37 = vpack.c.b16 %v1096_v29, %v1096_v29 }
  0x88   : > { %v1098_v44 = vrot.slane %v1097_v37, 1 }
  0x8e   : > { %2221 = vmatmul.msk.bf16.vlgmr.msrb.gmra.mxu0 %vm319_vm0, %v1035_v10 }
  0x8f   : > { %1317 = vmatpush.bf16.xpose.msrb.mxu0 %v1308_v16  ;;  %2217 = vmatmul.msk.bf16.vlgmr.msra.gmra.mxu1 %vm319_vm0, %v953_v17 }
  0x90   : > { %2218 = vmatmul.msk.bf16.vlgmr.msra.gmra.mxu2 %vm319_vm0, %v979_v18  ;;  %1246 = vmatpush.bf16.xpose.msra.mxu1 %v1211_v53  ;;  %v1187_v18 = vld [vmem:[#allocation2 + $0xc] sm:$0x3] }
  0x91   : > { %1272 = vmatpush.bf16.xpose.msra.mxu2 %v1211_v53 }
  0x92   : > { %2219 = vmatmul.msk.bf16.vlgmr.msra.gmra.mxu3 %vm319_vm0, %v1005_v20 }
  0x93   : > { %1298 = vmatpush.bf16.xpose.msra.mxu3 %v1211_v53  ;;  %v1230_v53 = vshrl.u32 %v1228_v46, 16  ;;  %v1637_v46 = vld [vmem:[#allocation2 + $0x4] sm:$0x6] }
  0x94   : > { %v1644_v52 = vunpack.c.l.b16 %v1637_v46 }
  0x95   : > { %v1235_v63 = vor.u32 %v1234_v54, %v1230_v53  ;;  %v1512_v53 = vpack.c.b16 %v1511_v43, %v1511_v43 }
  0x96   : > { %v1645_v60 = vpack.c.b16 %v1644_v52, %v1644_v52  ;;  %v2260_v52 = vld [vmem:[%s2652_s2 + $0x3c] sm:$0xf] }
  0x97   : > { %v1516_v61 = vshll.u32 %v1512_v53, 16 }
  0x98   : > { %v1646_v8 = vrot.slane %v1645_v60, 1 }
  0x9b   : > { %v2444_v35 = vpop.f32.mrf.mxu0 }
  0x9e   : > { %2227 = vmatmul.msk.bf16.vlgmr.msra.gmra.mxu0 %vm319_vm0, %v1206_v32  ;;  %v1450_v32 = vld [vmem:[#allocation2 + $0xc] sm:$0x7] }
  0x9f   : > { %1391 = vmatpush.bf16.xpose.msra.mxu0 %v1382_v38  ;;  %2222 = vmatmul.msk.bf16.vlgmr.msrb.gmra.mxu1 %vm319_vm0, %v1058_v39  ;;  %v1452_v39 = vld [vmem:[#allocation2 + $0x14] sm:$0x7] }
  0xa0   : > { %2223 = vmatmul.msk.bf16.vlgmr.msrb.gmra.mxu2 %vm319_vm0, %v1078_v42  ;;  %1333 = vmatpush.bf16.xpose.msrb.mxu1 %v1308_v16  ;;  %v1373_v42 = vld [vmem:[#allocation2 + $0xc] sm:$0x3] }
  0xa1   : > { %1349 = vmatpush.bf16.xpose.msrb.mxu2 %v1308_v16 }
  0xa2   : > { %2224 = vmatmul.msk.bf16.vlgmr.msrb.gmra.mxu3 %vm319_vm0, %v1098_v44 }
  0xa3   : > { %v337_v48 = vpop.f32.mrf.mxu0  ;;  %1365 = vmatpush.bf16.xpose.msrb.mxu3 %v1308_v16  ;;  %v1457_v16 = vpack.c.b16 %v1456_v9, %v1456_v9  ;;  %v1514_v9 = vshrl.u32 %v1512_v53, 16 }
  0xa4   : > { %v1537_v48 = vunpack.c.l.b16 %v1452_v39 }
  0xa5   : > { %v1461_v20 = vshll.u32 %v1457_v16, 16  ;;  %v1459_v25 = vshrl.u32 %v1457_v16, 16  ;;  %v2519_v16 = vsel %vm319_vm0, %v2255_v7, 0 }
  0xa6   : > { %v1538_v56 = vpack.c.b16 %v1537_v48, %v1537_v48 }
  0xa7   : > { %v1463_v26 = vrot.slane %v1461_v20, 1 }
  0xa9   : > { %v1464_v31 = vor.u32 %v1463_v26, %v1459_v25 }
  0xab   : > { %v432_v58 = vpop.f32.mrf.mxu0 }
  0xac   : > { %v2455_v0 = vpop.f32.mrf.mxu1  ;;  %v433_v23 = vadd.f32 %v432_v58, %v2444_v35 }
  0xae   : > { %2231 = vmatmul.msk.bf16.vlgmr.msrb.gmra.mxu0 %vm319_vm0, %v1185_v59 }
  0xaf   : > { %1478 = vmatpush.bf16.xpose.msrb.mxu0 %v1469_v62  ;;  %2228 = vmatmul.msk.bf16.vlgmr.msra.gmra.mxu1 %vm319_vm0, %v1235_v63 }
  0xb0   : > { %2229 = vmatmul.msk.bf16.vlgmr.msra.gmra.mxu2 %vm319_vm0, %v1261_v1  ;;  %1407 = vmatpush.bf16.xpose.msra.mxu1 %v1382_v38  ;;  %v1542_v1 = vshll.u32 %v1538_v56, 16 }
  0xb1   : > { %1423 = vmatpush.bf16.xpose.msra.mxu2 %v1382_v38 }
  0xb2   : > { %2230 = vmatmul.msk.bf16.vlgmr.msra.gmra.mxu3 %vm319_vm0, %v1287_v2 }
  0xb3   : > { %v434_v3 = vpop.f32.mrf.mxu0  ;;  %v2461_v4 = vpop.f32.mrf.mxu2  ;;  %1439 = vmatpush.bf16.xpose.msra.mxu3 %v1382_v38  ;;  %v1485_v38 = vunpack.c.l.b16 %v1450_v32 }
  0xb4   : > { %v363_v5 = vpop.f32.mrf.mxu1 }
  0xb5   : > { %v2463_v6 = vpop.f32.mrf.mxu3  ;;  %v1486_v50 = vpack.c.b16 %v1485_v38, %v1485_v38  ;;  %v1640_v38 = vld [vmem:[#allocation2 + $0x10] sm:$0x6] }
  0xb7   : > { %v1490_v58 = vshll.u32 %v1486_v50, 16  ;;  %v1488_v2 = vshrl.u32 %v1486_v50, 16 }
  0xb9   : > { %v1492_v3 = vrot.slane %v1490_v58, 1  ;;  %v1633_v58 = vld [vmem:[#allocation2 + $0xc] sm:$0x7] }
  0xbb   : > { %v505_v10 = vpop.f32.mrf.mxu0  ;;  %v389_v13 = vpop.f32.mrf.mxu2 }
  0xbc   : > { %v2471_v14 = vpop.f32.mrf.mxu1  ;;  %v557_v29 = vadd.f32 %v505_v10, %v433_v23  ;;  %v1518_v10 = vrot.slane %v1516_v61, 1  ;;  %v1540_v13 = vshrl.u32 %v1538_v56, 16  ;;  %v2544_v61 = vsel %vm319_vm0, %v2260_v52, 0 }
  0xbd   : > { %v415_v17 = vpop.f32.mrf.mxu3 }
  0xbe   : > { %2236 = vmatmul.msk.bf16.vlgmr.msra.gmra.mxu0 %vm319_vm0, %v1372_v11  ;;  %v449_v11 = vadd.f32 %v2471_v14, %v2455_v0  ;;  %v1519_v23 = vor.u32 %v1518_v10, %v1514_v9  ;;  %v1782_v9 = vunpack.c.l.b16 %v1633_v58 }
  0xbf   : > { %1660 = vmatpush.bf16.xpose.msra.mxu0 %v2469_v12  ;;  %2232 = vmatmul.msk.bf16.vlgmr.msrb.gmra.mxu1 %vm319_vm0, %v1186_v15  ;;  %v1544_v15 = vrot.slane %v1542_v1, 1 }
  0xc0   : > { %2233 = vmatmul.msk.bf16.vlgmr.msrb.gmra.mxu2 %vm319_vm0, %v1187_v18  ;;  %1504 = vmatpush.bf16.xpose.msrb.mxu1 %v1469_v62 }
  0xc1   : > { %1530 = vmatpush.bf16.xpose.msrb.mxu2 %v1469_v62  ;;  %v1545_v0 = vor.u32 %v1544_v15, %v1540_v13 }
  0xc2   : > { %2234 = vmatmul.msk.bf16.vlgmr.msrb.gmra.mxu3 %vm319_vm0, %v1188_v19  ;;  %v1493_v19 = vor.u32 %v1492_v3, %v1488_v2  ;;  %v1634_v3 = vld [vmem:[#allocation2 + $0x10] sm:$0x7] }
  0xc3   : > { %v507_v21 = vpop.f32.mrf.mxu0  ;;  %v2478_v22 = vpop.f32.mrf.mxu2  ;;  %1556 = vmatpush.bf16.xpose.msrb.mxu3 %v1469_v62  ;;  %v1631_v62 = vld [vmem:[#allocation2 + $0x4] sm:$0x7]  ;;  %v1808_v15 = vunpack.c.l.b16 %v1634_v3 }
  0xc4   : > { %v450_v24 = vpop.f32.mrf.mxu1  ;;  %v1727_v5 = vunpack.c.l.b16 %v1631_v62  ;;  %v465_v28 = vadd.f32 %v2478_v22, %v2461_v4 }
  0xc5   : > { %v2481_v27 = vpop.f32.mrf.mxu3 }
  0xc6   : > { %v1728_v20 = vpack.c.b16 %v1727_v5, %v1727_v5  ;;  %v481_v34 = vadd.f32 %v2481_v27, %v2463_v6  ;;  %v1833_v6 = vld [vmem:[#allocation2 + $0x8] sm:$0x7] }
  0xc8   : > { %v1732_v26 = vshll.u32 %v1728_v20, 16 }
  0xca   : > { %v1734_v39 = vrot.slane %v1732_v26, 1 }
  0xcb   : > { %v592_v33 = vpop.f32.mrf.mxu0  ;;  %v466_v37 = vpop.f32.mrf.mxu2 }
  0xcc   : > { %v674_v35 = vadd.f32 %v592_v33, %v557_v29  ;;  %v521_v41 = vpop.f32.mrf.mxu1  ;;  %v1638_v29 = vld [vmem:[#allocation2 + $0x8] sm:$0x6]  ;;  %v1730_v37 = vshrl.u32 %v1728_v20, 16 }
  0xcd   : > { %v482_v44 = vpop.f32.mrf.mxu3  ;;  %v558_v17 = vadd.f32 %v521_v41, %v449_v11 }
  0xce   : > { %v682_v40 = vadd.f32 %v2489_v30, %v674_v35  ;;  %2241 = vmatmul.msk.bf16.vlgmr.msrb.gmra.mxu0 %vm319_vm0, %v1464_v31  ;;  %v1639_v31 = vld [vmem:[#allocation2 + $0xc] sm:$0x6] }
  0xcf   : > { %1749 = vmatpush.bf16.xpose.msrb.mxu0 %v2492_v36  ;;  %2237 = vmatmul.msk.bf16.vlgmr.msra.gmra.mxu1 %vm319_vm0, %v1373_v42  ;;  %v1687_v41 = vunpack.c.l.b16 %v1639_v31 }
  0xd0   : > { %vm686_vm4 = vcmp.ge.f32.partialorder %v682_v40, 0.0  ;;  %v690_v47 = vmul.f32 0.2, %v682_v40  ;;  %2238 = vmatmul.msk.bf16.vlgmr.msra.gmra.mxu2 %vm319_vm0, %v1374_v45  ;;  %1680 = vmatpush.bf16.xpose.msra.mxu1 %v2469_v12 }
  0xd1   : > { %1700 = vmatpush.bf16.xpose.msra.mxu2 %v2469_v12 }
  0xd2   : > { %v694_v51 = vsel %vm686_vm4, %v682_v40, %v690_v47  ;;  %2239 = vmatmul.msk.bf16.vlgmr.msra.gmra.mxu3 %vm319_vm0, %v1375_v49  ;;  %v1667_v40 = vunpack.c.l.b16 %v1638_v29  ;;  %v1707_v47 = vunpack.c.l.b16 %v1640_v38  ;;  %v1735_v49 = vor.u32 %v1734_v39, %v1730_v37  ;;  %v1834_v37 = vld [vmem:[#allocation2 + $0xc] sm:$0x7] }
  0xd3   : > { %v698_v54 = vpack.c.bf16 %v694_v51, %v694_v51  ;;  %v594_v55 = vpop.f32.mrf.mxu0  ;;  %v537_v57 = vpop.f32.mrf.mxu2  ;;  %1720 = vmatpush.bf16.xpose.msra.mxu3 %v2469_v12  ;;  %v1688_v51 = vpack.c.b16 %v1687_v41, %v1687_v41 }
  0xd4   : > { %v523_v59 = vpop.f32.mrf.mxu1  ;;  %v559_v35 = vadd.f32 %v537_v57, %v465_v28  ;;  %v1668_v50 = vpack.c.b16 %v1667_v40, %v1667_v40  ;;  %v1632_v55 = vld [vmem:[#allocation2 + $0x8] sm:$0x7]  ;;  %v1708_v57 = vpack.c.b16 %v1707_v47, %v1707_v47 }
  0xd5   : > { %703 = vst.msk [vmem:[%s2502_s6] sm:$0x3] %vm702_vm5, %v698_v54  ;;  %v553_v63 = vpop.f32.mrf.mxu3  ;;  %v1840_v54 = vunpack.c.l.b16 %v1833_v6  ;;  %v1756_v2 = vunpack.c.l.b16 %v1632_v55  ;;  %v1689_v7 = vrot.slane %v1688_v51, 1  ;;  %v1950_v47 = vld [vmem:[#allocation2 + $0x8] sm:$0x6] }
  0xd6   : > { %v560_v42 = vadd.f32 %v553_v63, %v481_v34  ;;  %v1669_v1 = vrot.slane %v1668_v50, 1  ;;  %v1709_v13 = vrot.slane %v1708_v57, 1 }
  0xdb   : > { %v2516_v12 = vpop.f32.mrf.mxu0  ;;  %v539_v18 = vpop.f32.mrf.mxu2 }
  0xdc   : > { %v618_v21 = vpop.f32.mrf.mxu1 }
  0xdd   : > { %v555_v24 = vpop.f32.mrf.mxu3  ;;  %v675_v25 = vadd.f32 %v618_v21, %v558_v17  ;;  %v1757_v17 = vpack.c.b16 %v1756_v2, %v1756_v2  ;;  %v1809_v21 = vpack.c.b16 %v1808_v15, %v1808_v15  ;;  %v2582_v2 = vld [vmem:[%s2653_s3] ss:$0 sm:$0xff] }
  0xde   : > { %2247 = vmatmul.msk.bf16.vlgmr.msra.gmra.mxu0 %vm319_vm0, %v1646_v8  ;;  %v1841_v8 = vpack.c.b16 %v1840_v54, %v1840_v54 }
  0xdf   : > { %1862 = vmatpush.bf16.xpose.msra.mxu0 %v2519_v16  ;;  %v683_v14 = vadd.f32 %v2489_v30, %v675_v25  ;;  %2242 = vmatmul.msk.bf16.vlgmr.msrb.gmra.mxu1 %vm319_vm0, %v1493_v19  ;;  %v1783_v19 = vpack.c.b16 %v1782_v9, %v1782_v9  ;;  %v1761_v24 = vshll.u32 %v1757_v17, 16  ;;  %v1813_v29 = vshll.u32 %v1809_v21, 16 }
  0xe0   : > { %2243 = vmatmul.msk.bf16.vlgmr.msrb.gmra.mxu2 %vm319_vm0, %v1519_v23  ;;  %1775 = vmatpush.bf16.xpose.msrb.mxu1 %v2492_v36  ;;  %v1845_v18 = vshll.u32 %v1841_v8, 16  ;;  %v1759_v31 = vshrl.u32 %v1757_v17, 16 }
  0xe1   : > { %vm687_vm6 = vcmp.ge.f32.partialorder %v683_v14, 0.0  ;;  %v691_v32 = vmul.f32 0.2, %v683_v14  ;;  %1801 = vmatpush.bf16.xpose.msrb.mxu2 %v2492_v36  ;;  %v1787_v26 = vshll.u32 %v1783_v19, 16  ;;  %v1785_v34 = vshrl.u32 %v1783_v19, 16 }
  0xe2   : > { %2244 = vmatmul.msk.bf16.vlgmr.msrb.gmra.mxu3 %vm319_vm0, %v1545_v0  ;;  %v1843_v0 = vshrl.u32 %v1841_v8, 16  ;;  %v1815_v39 = vrot.slane %v1813_v29, 1 }
  0xe3   : > { %v740_v33 = vpop.f32.mrf.mxu0  ;;  %v695_v4 = vsel %vm687_vm6, %v683_v14, %v691_v32  ;;  %v644_v22 = vpop.f32.mrf.mxu2  ;;  %1827 = vmatpush.bf16.xpose.msrb.mxu3 %v2492_v36  ;;  %v1847_v14 = vrot.slane %v1845_v18, 1  ;;  %v1763_v32 = vrot.slane %v1761_v24, 1 }
  0xe4   : > { %v699_v43 = vpack.c.bf16 %v695_v4, %v695_v4  ;;  %v676_v44 = vadd.f32 %v644_v22, %v559_v35  ;;  %v620_v45 = vpop.f32.mrf.mxu1  ;;  %v1789_v35 = vrot.slane %v1787_v26, 1  ;;  %v1835_v4 = vld [vmem:[#allocation2 + $0x10] sm:$0x7]  ;;  %v1811_v22 = vshrl.u32 %v1809_v21, 16  ;;  %v1951_v21 = vld [vmem:[#allocation2 + $0xc] sm:$0x6] }
  0xe5   : > { %v670_v46 = vpop.f32.mrf.mxu3  ;;  %v1848_v33 = vor.u32 %v1847_v14, %v1843_v0  ;;  %v1764_v41 = vor.u32 %v1763_v32, %v1759_v31  ;;  %v1895_v45 = vunpack.c.l.b16 %v1835_v4  ;;  %v1952_v0 = vld [vmem:[#allocation2 + $0x10] sm:$0x6]  ;;  %v1980_v29 = vunpack.c.l.b16 %v1951_v21  ;;  %v1953_v31 = vld [vmem:[#allocation2 + $0x14] sm:$0x6] }
  0xe6   : > { %v684_v27 = vadd.f32 %v2489_v30, %v676_v44  ;;  %v677_v48 = vadd.f32 %v670_v46, %v560_v42  ;;  %704 = vst.msk [vmem:[%s2502_s6 + $0x2] sm:$0x3] %vm702_vm5, %v699_v43  ;;  %v1836_v42 = vld [vmem:[#allocation2 + $0x14] sm:$0x7]  ;;  %v1790_v44 = vor.u32 %v1789_v35, %v1785_v34  ;;  %v1816_v6 = vor.u32 %v1815_v39, %v1811_v22 }
  0xe7   : > { %v1896_v50 = vpack.c.b16 %v1895_v45, %v1895_v45 }
  0xe8   : > { %vm688_vm7 = vcmp.ge.f32.partialorder %v684_v27, 0.0  ;;  %v692_v36 = vmul.f32 0.2, %v684_v27  ;;  %v685_v53 = vadd.f32 %v2489_v30, %v677_v48 }
  0xe9   : > { %v1900_v58 = vshll.u32 %v1896_v50, 16 }
  0xea   : > { %v696_v59 = vsel %vm688_vm7, %v684_v27, %v692_v36  ;;  %vm689_vm8 = vcmp.ge.f32.partialorder %v685_v53, 0.0  ;;  %v693_v60 = vmul.f32 0.2, %v685_v53  ;;  %v1921_v27 = vunpack.c.l.b16 %v1836_v42 }
  0xeb   : > { %v2541_v56 = vpop.f32.mrf.mxu0  ;;  %v700_v62 = vpack.c.bf16 %v696_v59, %v696_v59  ;;  %v646_v63 = vpop.f32.mrf.mxu2  ;;  %vm1626_vm7 = vcmask 189568  }
  0xec   : > { %v697_v30 = vsel %vm689_vm8, %v685_v53, %v693_v60  ;;  %v2546_v5 = vpop.f32.mrf.mxu1  ;;  %v1922_v52 = vpack.c.b16 %v1921_v27, %v1921_v27  ;;  %v828_v54 = vadd.f32 %v2541_v56, %v2516_v12  ;;  %vm2103_vm8 = vcmask 255168  }
  0xed   : > { %v701_v10 = vpack.c.bf16 %v697_v30, %v697_v30  ;;  %v672_v11 = vpop.f32.mrf.mxu3  ;;  %705 = vst.msk [vmem:[%s2502_s6 + $0x4] sm:$0x3] %vm702_vm5, %v700_v62  ;;  %v1898_v30 = vshrl.u32 %v1896_v50, 16 }
  0xee   : > { %2251 = vmatmul.msk.bf16.vlgmr.msrb.gmra.mxu0 %vm319_vm0, %v1735_v49  ;;  %v1957_v49 = vunpack.c.l.b16 %v1950_v47  ;;  %v1926_v60 = vshll.u32 %v1922_v52, 16  ;;  %v1924_v12 = vshrl.u32 %v1922_v52, 16 }
  0xef   : > { %1973 = vmatpush.bf16.xpose.msrb.mxu0 %v2544_v61  ;;  %2248 = vmatmul.msk.bf16.vlgmr.msra.gmra.mxu1 %vm319_vm0, %v1669_v1  ;;  %706 = vst.msk [vmem:[%s2502_s6 + $0x6] sm:$0x3] %vm702_vm5, %v701_v10 }
  0xf0   : > { %2249 = vmatmul.msk.bf16.vlgmr.msra.gmra.mxu2 %vm319_vm0, %v1689_v7  ;;  %1888 = vmatpush.bf16.xpose.msra.mxu1 %v2519_v16  ;;  %v1958_v57 = vpack.c.b16 %v1957_v49, %v1957_v49  ;;  %v1928_v56 = vrot.slane %v1926_v60, 1 }
  0xf1   : > { %1914 = vmatpush.bf16.xpose.msra.mxu2 %v2519_v16 }
  0xf2   : > { %2250 = vmatmul.msk.bf16.vlgmr.msra.gmra.mxu3 %vm319_vm0, %v1709_v13  ;;  %v1959_v3 = vrot.slane %v1958_v57, 1  ;;  %v1929_v19 = vor.u32 %v1928_v56, %v1924_v12 }
  0xf3   : > { %v829_v20 = vpop.f32.mrf.mxu0  ;;  %v2559_v23 = vpop.f32.mrf.mxu2  ;;  %1940 = vmatpush.bf16.xpose.msra.mxu3 %v2519_v16  ;;  %v1869_v16 = vunpack.c.l.b16 %v1834_v37  ;;  %v2020_v37 = vunpack.c.l.b16 %v1953_v31 }
  0xf4   : > { %v760_v25 = vpop.f32.mrf.mxu1 }
  0xf5   : > { %v2562_v28 = vpop.f32.mrf.mxu3  ;;  %v1870_v48 = vpack.c.b16 %v1869_v16, %v1869_v16 }
  0xf7   : > { %v1874_v53 = vshll.u32 %v1870_v48, 16  ;;  %v1872_v62 = vshrl.u32 %v1870_v48, 16 }
  0xf9   : > { %v1876_v63 = vrot.slane %v1874_v53, 1 }
  0xfb   : > { %v940_v38 = vpop.f32.mrf.mxu0  ;;  %v780_v40 = vpop.f32.mrf.mxu2  ;;  %v1877_v10 = vor.u32 %v1876_v63, %v1872_v62 }
  0xfc   : > { %v2564_v43 = vpop.f32.mrf.mxu1  ;;  %v1022_v1 = vadd.f32 %v940_v38, %v828_v54  ;;  %v1981_v38 = vpack.c.b16 %v1980_v29, %v1980_v29  ;;  %v2021_v40 = vpack.c.b16 %v2020_v37, %v2020_v37 }
  0xfd   : > { %v800_v46 = vpop.f32.mrf.mxu3  ;;  %v854_v22 = vadd.f32 %v2564_v43, %v2546_v5 }
  0xfe   : > { %2256 = vmatmul.msk.bf16.vlgmr.msra.gmra.mxu0 %vm319_vm0, %v1848_v33  ;;  %v2000_v33 = vunpack.c.l.b16 %v1952_v0  ;;  %v1982_v42 = vrot.slane %v1981_v38, 1 }
  0xff   : > { %2252 = vmatmul.msk.bf16.vlgmr.msrb.gmra.mxu1 %vm319_vm0, %v1764_v41 }
 0x100   : > { %2253 = vmatmul.msk.bf16.vlgmr.msrb.gmra.mxu2 %vm319_vm0, %v1790_v44  ;;  %1993 = vmatpush.bf16.xpose.msrb.mxu1 %v2544_v61  ;;  %v2001_v4 = vpack.c.b16 %v2000_v33, %v2000_v33 }
 0x101   : > { %2013 = vmatpush.bf16.xpose.msrb.mxu2 %v2544_v61 }
 0x102   : > { %2254 = vmatmul.msk.bf16.vlgmr.msrb.gmra.mxu3 %vm319_vm0, %v1816_v6  ;;  %v2002_v45 = vrot.slane %v2001_v4, 1  ;;  %v2022_v6 = vrot.slane %v2021_v40, 1 }
 0x103   : > { %v942_v51 = vpop.f32.mrf.mxu0  ;;  %v2572_v36 = vpop.f32.mrf.mxu2  ;;  %2033 = vmatpush.bf16.xpose.msrb.mxu3 %v2544_v61  ;;  %v1902_v61 = vrot.slane %v1900_v58, 1 }
 0x104   : > { %v855_v55 = vpop.f32.mrf.mxu1  ;;  %v880_v48 = vadd.f32 %v2572_v36, %v2559_v23 }
 0x105   : > { %v2577_v59 = vpop.f32.mrf.mxu3  ;;  %v1903_v15 = vor.u32 %v1902_v61, %v1898_v30 }
 0x106   : > { %v906_v49 = vadd.f32 %v2577_v59, %v2562_v28 }
 0x10b   : > { %v1051_v7 = vpop.f32.mrf.mxu0  ;;  %v881_v9 = vpop.f32.mrf.mxu2 }
 0x10c   : > { %v1115_v8 = vadd.f32 %v1051_v7, %v1022_v1  ;;  %v966_v13 = vpop.f32.mrf.mxu1 }
 0x10d   : > { %v907_v17 = vpop.f32.mrf.mxu3  ;;  %v1023_v41 = vadd.f32 %v966_v13, %v854_v22 }
 0x10e   : > { %v1123_v11 = vadd.f32 %v2582_v2, %v1115_v8  ;;  %2261 = vmatmul.msk.bf16.vlgmr.msrb.gmra.mxu0 %vm319_vm0, %v1959_v3 }
 0x10f   : > { %2257 = vmatmul.msk.bf16.vlgmr.msra.gmra.mxu1 %vm319_vm0, %v1877_v10 }
 0x110   : > { %vm1127_vm9 = vcmp.ge.f32.partialorder %v1123_v11, 0.0  ;;  %v1131_v18 = vmul.f32 0.2, %v1123_v11  ;;  %2258 = vmatmul.msk.bf16.vlgmr.msra.gmra.mxu2 %vm319_vm0, %v1903_v15 }
 0x112   : > { %v1135_v20 = vsel %vm1127_vm9, %v1123_v11, %v1131_v18  ;;  %2259 = vmatmul.msk.bf16.vlgmr.msra.gmra.mxu3 %vm319_vm0, %v1929_v19 }
 0x113   : > { %v1053_v24 = vpop.f32.mrf.mxu0  ;;  %v1139_v25 = vpack.c.bf16 %v1135_v20, %v1135_v20  ;;  %v992_v14 = vpop.f32.mrf.mxu2 }
 0x114   : > { %v968_v32 = vpop.f32.mrf.mxu1  ;;  %v1024_v50 = vadd.f32 %v992_v14, %v880_v48 }
 0x115   : > { %v1147_v26 = vrot.slane %v1139_v25, 2  ;;  %v1018_v34 = vpop.f32.mrf.mxu3  ;;  %v2284_v32 = vld [vmem:[%s2653_s3] ss:$0 sm:$0xff] }
 0x116   : > { %v1025_v53 = vadd.f32 %v1018_v34, %v906_v49 }
 0x117   : > { %v1154_v35 = vsel %vm1151_vm10, %v1139_v25, %v1147_v26 }
 0x118   : > { %1168 = vrot.lane.b32.xlu0 %v1154_v35, %s2295_s12 }
 0x11b   : > { %v1222_v39 = vpop.f32.mrf.mxu0  ;;  %v994_v16 = vpop.f32.mrf.mxu2 }
 0x11c   : > { %v1071_v44 = vpop.f32.mrf.mxu1 }
 0x11d   : > { %v1020_v46 = vpop.f32.mrf.mxu3  ;;  %v1116_v47 = vadd.f32 %v1071_v44, %v1023_v41 }
 0x11f   : > { %v1124_v27 = vadd.f32 %v2582_v2, %v1116_v47  ;;  %2262 = vmatmul.msk.bf16.vlgmr.msrb.gmra.mxu1 %vm319_vm0, %v1982_v42 }
 0x120   : > { %2263 = vmatmul.msk.bf16.vlgmr.msrb.gmra.mxu2 %vm319_vm0, %v2002_v45 }
 0x121   : > { %vm1128_vm11 = vcmp.ge.f32.partialorder %v1124_v27, 0.0  ;;  %v1132_v5 = vmul.f32 0.2, %v1124_v27 }
 0x122   : > { %2264 = vmatmul.msk.bf16.vlgmr.msrb.gmra.mxu3 %vm319_vm0, %v2022_v6 }
 0x123   : > { %v1224_v43 = vpop.f32.mrf.mxu0  ;;  %v1091_v51 = vpop.f32.mrf.mxu2  ;;  %v1136_v52 = vsel %vm1128_vm11, %v1124_v27, %v1132_v5 }
 0x124   : > { %v1117_v54 = vadd.f32 %v1091_v51, %v1024_v50  ;;  %v1073_v55 = vpop.f32.mrf.mxu1  ;;  %v1140_v57 = vpack.c.bf16 %v1136_v52, %v1136_v52 }
 0x125   : > { %v1111_v58 = vpop.f32.mrf.mxu3 }
 0x126   : > { %v1125_v23 = vadd.f32 %v2582_v2, %v1117_v54  ;;  %v1118_v36 = vadd.f32 %v1111_v58, %v1025_v53  ;;  %v1148_v60 = vrot.slane %v1140_v57, 2 }
 0x128   : > { %vm1129_vm12 = vcmp.ge.f32.partialorder %v1125_v23, 0.0  ;;  %v1133_v62 = vmul.f32 0.2, %v1125_v23  ;;  %v1126_v63 = vadd.f32 %v2582_v2, %v1118_v36  ;;  %v1158_v28 = vsel %vm1151_vm10, %v1140_v57, %v1148_v60 }
 0x129   : > { %1170 = vrot.lane.b32.xlu0 %v1158_v28, %s2295_s12 }
 0x12a   : > { %vm1130_vm13 = vcmp.ge.f32.partialorder %v1126_v63, 0.0  ;;  %v1134_v1 = vmul.f32 0.2, %v1126_v63  ;;  %v1137_v3 = vsel %vm1129_vm12, %v1125_v23, %v1133_v62 }
 0x12b   : > { %v1319_v59 = vpop.f32.mrf.mxu0  ;;  %v1093_v30 = vpop.f32.mrf.mxu2  ;;  %v1141_v61 = vpack.c.bf16 %v1137_v3, %v1137_v3 }
 0x12c   : > { %v1248_v7 = vpop.f32.mrf.mxu1  ;;  %v1138_v8 = vsel %vm1130_vm13, %v1126_v63, %v1134_v1  ;;  %v1320_v14 = vadd.f32 %v1319_v59, %v1222_v39 }
 0x12d   : > { %v1113_v12 = vpop.f32.mrf.mxu3  ;;  %v1149_v56 = vrot.slane %v1141_v61, 2  ;;  %v1142_v10 = vpack.c.bf16 %v1138_v8, %v1138_v8 }
 0x12f   : > { %v1162_v9 = vsel %vm1151_vm10, %v1141_v61, %v1149_v56  ;;  %v1150_v13 = vrot.slane %v1142_v10, 2 }
 0x130   : > { %1172 = vrot.lane.b32.xlu1 %v1162_v9, %s2295_s12 }
 0x131   : > { %v1166_v18 = vsel %vm1151_vm10, %v1142_v10, %v1150_v13 }
 0x133   : > { %v1321_v2 = vpop.f32.mrf.mxu0  ;;  %v1274_v11 = vpop.f32.mrf.mxu2 }
 0x134   : > { %v1250_v15 = vpop.f32.mrf.mxu1 }
 0x135   : > { %v1300_v17 = vpop.f32.mrf.mxu3 }
 0x138   : > { %1174 = vrot.lane.b32.xlu1 %v1166_v18, %s2295_s12 }
 0x13b   : > { %v1393_v19 = vpop.f32.mrf.mxu0  ;;  %v1276_v20 = vpop.f32.mrf.mxu2 }
 0x13c   : > { %v1335_v21 = vpop.f32.mrf.mxu1  ;;  %v1445_v31 = vadd.f32 %v1393_v19, %v1320_v14 }
 0x13d   : > { %v1302_v24 = vpop.f32.mrf.mxu3  ;;  %v1336_v47 = vadd.f32 %v1335_v21, %v1248_v7 }
 0x143   : > { %v1395_v25 = vpop.f32.mrf.mxu0  ;;  %v1351_v0 = vpop.f32.mrf.mxu2 }
 0x144   : > { %v1337_v26 = vpop.f32.mrf.mxu1  ;;  %v1352_v51 = vadd.f32 %v1351_v0, %v1274_v11 }
 0x145   : > { %v1367_v29 = vpop.f32.mrf.mxu3 }
 0x146   : > { %v1368_v54 = vadd.f32 %v1367_v29, %v1300_v17 }
 0x14b   : > { %v1480_v33 = vpop.f32.mrf.mxu0  ;;  %v1353_v35 = vpop.f32.mrf.mxu2 }
 0x14c   : > { %v1562_v34 = vadd.f32 %v1480_v33, %v1445_v31  ;;  %v1409_v38 = vpop.f32.mrf.mxu1 }
 0x14d   : > { %v1369_v4 = vpop.f32.mrf.mxu3  ;;  %v1446_v27 = vadd.f32 %v1409_v38, %v1336_v47 }
 0x14e   : > { %v1570_v37 = vadd.f32 %v2284_v32, %v1562_v34  ;;  %v2285_v4 = vld [vmem:[%s2653_s3] ss:$0 sm:$0xff] }
 0x150   : > { %vm1574_vm14 = vcmp.ge.f32.partialorder %v1570_v37, 0.0  ;;  %v1578_v22 = vmul.f32 0.2, %v1570_v37 }
 0x152   : > { %v1582_v40 = vsel %vm1574_vm14, %v1570_v37, %v1578_v22 }
 0x153   : > { %v1482_v41 = vpop.f32.mrf.mxu0  ;;  %v1586_v16 = vpack.c.bf16 %v1582_v40, %v1582_v40  ;;  %v1425_v42 = vpop.f32.mrf.mxu2 }
 0x154   : > { %v1411_v44 = vpop.f32.mrf.mxu1  ;;  %v1447_v55 = vadd.f32 %v1425_v42, %v1352_v51 }
 0x155   : > { %v1594_v39 = vrot.slane %v1586_v16, 2  ;;  %v1441_v45 = vpop.f32.mrf.mxu3 }
 0x156   : > { %v1448_v23 = vadd.f32 %v1441_v45, %v1368_v54 }
 0x157   : > { %v1600_v46 = vsel %vm1151_vm10, %v1586_v16, %v1594_v39 }
 0x158   : > { %1614 = vrot.lane.b32.xlu2 %v1600_v46, %s2296_s16 }
 0x15b   : > { %v1662_v6 = vpop.f32.mrf.mxu0  ;;  %v1427_v48 = vpop.f32.mrf.mxu2 }
 0x15c   : > { %v1506_v5 = vpop.f32.mrf.mxu1 }
 0x15d   : > { %v1443_v43 = vpop.f32.mrf.mxu3  ;;  %v1563_v49 = vadd.f32 %v1506_v5, %v1446_v27 }
 0x15f   : > { %v1571_v50 = vadd.f32 %v2284_v32, %v1563_v49 }
 0x161   : > { %vm1575_vm15 = vcmp.ge.f32.partialorder %v1571_v50, 0.0  ;;  %v1579_v52 = vmul.f32 0.2, %v1571_v50 }
 0x163   : > { %v1664_v53 = vpop.f32.mrf.mxu0  ;;  %v1532_v57 = vpop.f32.mrf.mxu2  ;;  %v1583_v58 = vsel %vm1575_vm15, %v1571_v50, %v1579_v52 }
 0x164   : > { %v1564_v36 = vadd.f32 %v1532_v57, %v1447_v55  ;;  %v1508_v60 = vpop.f32.mrf.mxu1  ;;  %v1587_v62 = vpack.c.bf16 %v1583_v58, %v1583_v58 }
 0x165   : > { %v1558_v63 = vpop.f32.mrf.mxu3 }
 0x166   : > { %v1572_v28 = vadd.f32 %v2284_v32, %v1564_v36  ;;  %v1565_v59 = vadd.f32 %v1558_v63, %v1448_v23  ;;  %v1595_v1 = vrot.slane %v1587_v62, 2 }
 0x168   : > { %vm1576_vm0 = vcmp.ge.f32.partialorder %v1572_v28, 0.0  ;;  %v1580_v3 = vmul.f32 0.2, %v1572_v28  ;;  %v1573_v30 = vadd.f32 %v2284_v32, %v1565_v59  ;;  %v1604_v61 = vsel %vm1151_vm10, %v1587_v62, %v1595_v1 }
 0x169   : > { %1616 = vrot.lane.b32.xlu2 %v1604_v61, %s2296_s16 }
 0x16a   : > { %vm1577_vm1 = vcmp.ge.f32.partialorder %v1573_v30, 0.0  ;;  %v1581_v8 = vmul.f32 0.2, %v1573_v30  ;;  %v1584_v12 = vsel %vm1576_vm0, %v1572_v28, %v1580_v3 }
 0x16b   : > { %v1751_v7 = vpop.f32.mrf.mxu0  ;;  %v1534_v56 = vpop.f32.mrf.mxu2  ;;  %v1588_v9 = vpack.c.bf16 %v1584_v12, %v1584_v12 }
 0x16c   : > { %v1682_v10 = vpop.f32.mrf.mxu1  ;;  %v1585_v2 = vsel %vm1577_vm1, %v1573_v30, %v1581_v8  ;;  %v1752_v33 = vadd.f32 %v1751_v7, %v1662_v6 }
 0x16d   : > { %v1560_v11 = vpop.f32.mrf.mxu3  ;;  %v1589_v13 = vpack.c.bf16 %v1585_v2, %v1585_v2  ;;  %v1596_v15 = vrot.slane %v1588_v9, 2 }
 0x16f   : > { %v1597_v17 = vrot.slane %v1589_v13, 2  ;;  %v1608_v18 = vsel %vm1151_vm10, %v1588_v9, %v1596_v15 }
 0x170   : > { %1618 = vrot.lane.b32.xlu0 %v1608_v18, %s2296_s16 }
 0x171   : > { %v1612_v19 = vsel %vm1151_vm10, %v1589_v13, %v1597_v17 }
 0x172   : > { %1620 = vrot.lane.b32.xlu1 %v1612_v19, %s2296_s16 }
 0x173   : > { %v1753_v20 = vpop.f32.mrf.mxu0  ;;  %v1702_v21 = vpop.f32.mrf.mxu2 }
 0x174   : > { %v1684_v24 = vpop.f32.mrf.mxu1 }
 0x175   : > { %v1722_v25 = vpop.f32.mrf.mxu3 }
 0x17b   : > { %v1864_v0 = vpop.f32.mrf.mxu0  ;;  %v1704_v14 = vpop.f32.mrf.mxu2 }
 0x17c   : > { %v1777_v26 = vpop.f32.mrf.mxu1  ;;  %v1946_v37 = vadd.f32 %v1864_v0, %v1752_v33 }
 0x17d   : > { %v1724_v29 = vpop.f32.mrf.mxu3  ;;  %v1778_v49 = vadd.f32 %v1777_v26, %v1682_v10 }
 0x183   : > { %v1866_v31 = vpop.f32.mrf.mxu0  ;;  %v1803_v32 = vpop.f32.mrf.mxu2 }
 0x184   : > { %v1779_v34 = vpop.f32.mrf.mxu1  ;;  %v1804_v58 = vadd.f32 %v1803_v32, %v1702_v21 }
 0x185   : > { %v1829_v35 = vpop.f32.mrf.mxu3 }
 0x186   : > { %v1830_v36 = vadd.f32 %v1829_v35, %v1722_v25 }
 0x18a   : > { %v1169_v38 = vpop.permute.xlu0 %1168 }
 0x18b   : > { %1181 = vst.msk [vmem:[%s2502_s6] sm:$0x3] %vm1180_vm2, %v1169_v38  ;;  %v1975_v22 = vpop.f32.mrf.mxu0  ;;  %v1805_v41 = vpop.f32.mrf.mxu2 }
 0x18c   : > { %v2039_v40 = vadd.f32 %v1975_v22, %v1946_v37  ;;  %v1890_v42 = vpop.f32.mrf.mxu1 }
 0x18d   : > { %v1831_v39 = vpop.f32.mrf.mxu3  ;;  %v1947_v50 = vadd.f32 %v1890_v42, %v1778_v49 }
 0x18e   : > { %v2047_v16 = vadd.f32 %v2285_v4, %v2039_v40 }
 0x190   : > { %vm2051_vm3 = vcmp.ge.f32.partialorder %v2047_v16, 0.0  ;;  %v2055_v44 = vmul.f32 0.2, %v2047_v16 }
 0x192   : > { %v2059_v45 = vsel %vm2051_vm3, %v2047_v16, %v2055_v44 }
 0x193   : > { %v2063_v46 = vpack.c.bf16 %v2059_v45, %v2059_v45  ;;  %v1977_v47 = vpop.f32.mrf.mxu0  ;;  %v1916_v6 = vpop.f32.mrf.mxu2 }
 0x194   : > { %v1892_v48 = vpop.f32.mrf.mxu1  ;;  %v1948_v60 = vadd.f32 %v1916_v6, %v1804_v58 }
 0x195   : > { %v2071_v27 = vrot.slane %v2063_v46, 2  ;;  %v1942_v5 = vpop.f32.mrf.mxu3 }
 0x196   : > { %v1949_v59 = vadd.f32 %v1942_v5, %v1830_v36 }
 0x197   : > { %v2077_v43 = vsel %vm1151_vm10, %v2063_v46, %v2071_v27 }
 0x198   : > { %2091 = vrot.lane.b32.xlu2 %v2077_v43, %s2297_s19 }
 0x19b   : > { %v1918_v51 = vpop.f32.mrf.mxu2  ;;  %v1171_v52 = vpop.permute.xlu0 %1170 }
 0x19c   : > { %1182 = vst.msk [vmem:[%s2502_s6 + $0x2] sm:$0x3] %vm1180_vm2, %v1171_v52  ;;  %v1995_v53 = vpop.f32.mrf.mxu1 }
 0x19d   : > { %v1944_v54 = vpop.f32.mrf.mxu3  ;;  %v2040_v55 = vadd.f32 %v1995_v53, %v1947_v50 }
 0x19f   : > { %v2048_v57 = vadd.f32 %v2285_v4, %v2040_v55 }
 0x1a1   : > { %vm2052_vm4 = vcmp.ge.f32.partialorder %v2048_v57, 0.0  ;;  %v2056_v23 = vmul.f32 0.2, %v2048_v57 }
 0x1a2   : > { %v1173_v62 = vpop.permute.xlu1 %1172 }
 0x1a3   : > { %1183 = vst.msk [vmem:[%s2502_s6 + $0x4] sm:$0x3] %vm1180_vm2, %v1173_v62  ;;  %v2015_v63 = vpop.f32.mrf.mxu2  ;;  %v2060_v28 = vsel %vm2052_vm4, %v2048_v57, %v2056_v23 }
 0x1a4   : > { %v2041_v1 = vadd.f32 %v2015_v63, %v1948_v60  ;;  %v1997_v3 = vpop.f32.mrf.mxu1  ;;  %v2064_v30 = vpack.c.bf16 %v2060_v28, %v2060_v28 }
 0x1a5   : > { %v2035_v61 = vpop.f32.mrf.mxu3 }
 0x1a6   : > { %v2049_v7 = vadd.f32 %v2285_v4, %v2041_v1  ;;  %v2042_v8 = vadd.f32 %v2035_v61, %v1949_v59  ;;  %v2072_v12 = vrot.slane %v2064_v30, 2 }
 0x1a8   : > { %vm2053_vm5 = vcmp.ge.f32.partialorder %v2049_v7, 0.0  ;;  %v2057_v56 = vmul.f32 0.2, %v2049_v7  ;;  %v2050_v9 = vadd.f32 %v2285_v4, %v2042_v8  ;;  %v2081_v10 = vsel %vm1151_vm10, %v2064_v30, %v2072_v12 }
 0x1a9   : > { %2093 = vrot.lane.b32.xlu0 %v2081_v10, %s2297_s19 }
 0x1aa   : > { %vm2054_vm6 = vcmp.ge.f32.partialorder %v2050_v9, 0.0  ;;  %v2058_v2 = vmul.f32 0.2, %v2050_v9  ;;  %v1175_v11 = vpop.permute.xlu1 %1174  ;;  %v2061_v13 = vsel %vm2053_vm5, %v2049_v7, %v2057_v56 }
 0x1ab   : > { %1184 = vst.msk [vmem:[%s2502_s6 + $0x6] sm:$0x3] %vm1180_vm2, %v1175_v11  ;;  %v2017_v15 = vpop.f32.mrf.mxu2  ;;  %v2065_v17 = vpack.c.bf16 %v2061_v13, %v2061_v13 }
 0x1ac   : > { %v2062_v18 = vsel %vm2054_vm6, %v2050_v9, %v2058_v2 }
 0x1ad   : > { %v2073_v19 = vrot.slane %v2065_v17, 2  ;;  %v2066_v20 = vpack.c.bf16 %v2062_v18, %v2062_v18  ;;  %v2037_v21 = vpop.f32.mrf.mxu3 }
 0x1af   : > { %v2085_v24 = vsel %vm1151_vm10, %v2065_v17, %v2073_v19  ;;  %v2074_v25 = vrot.slane %v2066_v20, 2 }
 0x1b0   : > { %2095 = vrot.lane.b32.xlu1 %v2085_v24, %s2297_s19 }
 0x1b1   : > { %v2089_v14 = vsel %vm1151_vm10, %v2066_v20, %v2074_v25 }
 0x1b2   : > { %v1615_v0 = vpop.permute.xlu2 %1614  ;;  %2097 = vrot.lane.b32.xlu2 %v2089_v14, %s2297_s19 }
 0x1b3   : > { %1627 = vst.msk [vmem:[%s2502_s6] sm:$0x3] %vm1626_vm7, %v1615_v0 }
 0x1c3   : > { %v1617_v26 = vpop.permute.xlu2 %1616 }
 0x1c4   : > { %1628 = vst.msk [vmem:[%s2502_s6 + $0x2] sm:$0x3] %vm1626_vm7, %v1617_v26 }
 0x1e2   : > { %v1619_v29 = vpop.permute.xlu0 %1618 }
 0x1e3   : > { %1629 = vst.msk [vmem:[%s2502_s6 + $0x4] sm:$0x3] %vm1626_vm7, %v1619_v29 }
 0x1e4   : > { %v1621_v31 = vpop.permute.xlu1 %1620 }
 0x1e5   : > { %1630 = vst.msk [vmem:[%s2502_s6 + $0x6] sm:$0x3] %vm1626_vm7, %v1621_v31 }
 0x1f2   : > { %v2092_v32 = vpop.permute.xlu2 %2091 }
 0x1f3   : > { %2104 = vst.msk [vmem:[%s2502_s6] sm:$0x3] %vm2103_vm8, %v2092_v32 }
 0x20c   : > { %v2098_v33 = vpop.permute.xlu2 %2097 }
 0x20d   : > { %2107 = vst.msk [vmem:[%s2502_s6 + $0x6] sm:$0x3] %vm2103_vm8, %v2098_v33 }
 0x21b   : > { %v2094_v34 = vpop.permute.xlu0 %2093 }
 0x21c   : > { %2105 = vst.msk [vmem:[%s2502_s6 + $0x2] sm:$0x3] %vm2103_vm8, %v2094_v34 }
 0x222   : > { %v2096_v35 = vpop.permute.xlu1 %2095 }
 0x223   : > { %2106 = vst.msk [vmem:[%s2502_s6 + $0x4] sm:$0x3] %vm2103_vm8, %v2096_v35 }
 0x224 PF: > { %s14_s15 = sadd.s32 1, %s2292_s15  }
 0x225   : > { %p11_p4 = scmp.ge.s32.totalorder %s14_s15, 4  }
 0x227   :  { %13 = sbr.rel (!%p11_p4) target bundleno = 1 (0x1), region = 86 }

// kernel: _lambda_.9
= control target key start
LH: loop header
LB: loop body
LE: loop exit
PB: predicated region body
PF: predicated region fallthrough
CT: control target
= control target key end

     0   :  { %s4906_s15 = smov 0   ;;  %s5721_s0 = inlined_call_operand.vmem [shape: bf16[2,8,8,8], index: 0, kind: input, shape index: {}]   ;;  %s5722_s1 = inlined_call_operand.vmem [shape: bf16[2,8,8,8], index: 1, kind: input, shape index: {}]   ;;  %s5723_s2 = inlined_call_operand.vmem [shape: bf16[4,4,4,8], index: 2, kind: input, shape index: {}]   ;;  %s5724_s3 = inlined_call_operand.vmem [shape: f32[1,1,4], index: 3, kind: input, shape index: {}]   ;;  %s5725_s4 = inlined_call_operand.vmem [shape: bf16[2,8,8,16], index: 4, kind: output, shape index: {}]  }
   0x1 LB: > { %s4176_s16 = sadd.s32 4294967295, %s4875_s15   ;;  %p4180_p0 = scmp.ge.s32.totalorder %s4875_s15, 1  ;;  %s4875_s15 = sphi %s4906_s15, %s14_s15  }
   0x2   : > { %p172_p1 = scmp.lt.s32.totalorder %s4875_s15, 3 }
   0x4   : > { %p173_p2 = pnand %p4180_p0, %p172_p1 }
   0x5   : > { %p203_p3 = scmp.lt.s32.totalorder (!%p173_p2), %s4176_s16, 1  ;;  %s4878_s6 = smov (!%p173_p2), 4  }
   0x6   : > { %176 = sbr.rel (%p173_p2) target bundleno = 804 (0x324), region = 36  ;;  %s4880_s20 = smov (!%p173_p2), 12  }
   0xb   : > { %v4187_v0 = vld [vmem:[%s5723_s2 + $0x2] sm:$0x3]  ;;  %vm463_vm0 = vcmask 64512   ;;  %vm219_vm1 = vcmask 60416   ;;  %vm221_vm2 = vcmask 57344   ;;  %v4877_v2 = vmov 0  }
   0xc   : > { %v468_v1 = vsel %vm463_vm0, %v4187_v0, 0  ;;  %220 = vst.msk [vmem:[#allocation2] sm:$0xf] %vm219_vm1, %v4877_v2  ;;  %s5731_s16 = smov (!%p203_p3, %s4176_s16), 1  ;;  %vm371_vm3 = vsmask.f32 7938 }
   0xd   : > { %477 = vmatpush.bf16.xpose.msra.mxu0 %v468_v1  ;;  %222 = vst.msk [vmem:[#allocation2 + $0x4] sm:$0x1] %vm221_vm2, %v4877_v2  ;;  %505 = vmatpush.bf16.xpose.msra.mxu1 %v468_v1  ;;  %s4928_s19 = sshll.u32 %s5731_s16, 5  ;;  %vm377_vm4 = vsmask.f32 256  ;;  %vm4975_vm5 = vmand %vm219_vm1, %vm371_vm3  ;;  %vm1256_vm8 = vcmask 27648  }
   0xe   : > { %223 = vst.msk [vmem:[#allocation2 + $0x8] sm:$0xf] %vm219_vm1, %v4877_v2  ;;  %533 = vmatpush.bf16.xpose.msra.mxu2 %v468_v1  ;;  %561 = vmatpush.bf16.xpose.msra.mxu3 %v468_v1  ;;  %s4936_s22 = scalar_lea.vmem %s5721_s0, %s4928_s19  ;;  %s4942_s25 = scalar_lea.vmem %s5722_s1, %s4928_s19  ;;  %vm4983_vm6 = vmand %vm221_vm2, %vm377_vm4 }
   0xf   : > { %224 = vst.msk [vmem:[#allocation2 + $0xc] sm:$0x1] %vm221_vm2, %v4877_v2  ;;  %v4816_v3 = vld [vmem:[%s4936_s22] sm:$0xff]   ;;  %v4847_v5 = vld [vmem:[%s4936_s22 + $0x8] sm:$0xff]   ;;  %v4848_v12 = vld [vmem:[%s4936_s22 + $0x10] sm:$0xff]   ;;  %s4879_s16 = smov 8  }
  0x10   : > { %225 = vst.msk [vmem:[#allocation2 + $0x10] sm:$0xf] %vm219_vm1, %v4877_v2  ;;  %v4832_v4 = vld [vmem:[%s4942_s25] sm:$0xff]   ;;  %v4817_v7 = vunpack.c.l.bf16 %v4816_v3  ;;  %v4818_v9 = vunpack.c.h.bf16 %v4816_v3  ;;  %v4850_v11 = vld [vmem:[%s4942_s25 + $0x8] sm:$0xff]   ;;  %v4821_v14 = vunpack.c.l.bf16 %v4847_v5  ;;  %v4822_v15 = vunpack.c.h.bf16 %v4847_v5  ;;  %v4851_v18 = vld [vmem:[%s4942_s25 + $0x10] sm:$0xff]  }
  0x11   : > { %226 = vst.msk [vmem:[#allocation2 + $0x14] sm:$0x1] %vm221_vm2, %v4877_v2  ;;  %v4833_v8 = vunpack.c.l.bf16 %v4832_v4  ;;  %v4834_v10 = vunpack.c.h.bf16 %v4832_v4  ;;  %v4837_v16 = vunpack.c.l.bf16 %v4850_v11  ;;  %v4838_v17 = vunpack.c.h.bf16 %v4850_v11  ;;  %v4969_v45 = vld [vmem:[%s4936_s22 + $0x18] sm:$0xff]   ;;  %v432_v3 = vld [vmem:[%s5723_s2] sm:$0x3]  ;;  %s5228_s22 = scalar_lea.vmem %s5725_s4, %s4928_s19 }
  0x12   : > { %227 = vst.msk [vmem:[#allocation2 + $0x18] sm:$0xf] %vm219_vm1, %v4877_v2  ;;  %v4825_v22 = vunpack.c.l.bf16 %v4848_v12  ;;  %v4841_v25 = vunpack.c.l.bf16 %v4851_v18  ;;  %v4826_v26 = vunpack.c.h.bf16 %v4848_v12  ;;  %v4842_v34 = vunpack.c.h.bf16 %v4851_v18  ;;  %v4991_v62 = vld [vmem:[%s4942_s25 + $0x18] sm:$0xff]  }
  0x13   : > { %v4190_v6 = vld [vmem:[#allocation2] sm:$0xf]  ;;  %228 = vst.msk [vmem:[#allocation2 + $0x1c] sm:$0x1] %vm221_vm2, %v4877_v2  ;;  %v273_v20 = vadd.f32 %v4833_v8, %v4817_v7  ;;  %v274_v21 = vadd.f32 %v4834_v10, %v4818_v9  ;;  %v275_v23 = vadd.f32 %v4837_v16, %v4821_v14  ;;  %v276_v24 = vadd.f32 %v4838_v17, %v4822_v15 }
  0x14   : > { %v4719_v13 = vld [vmem:[#allocation2] sm:$0x10]  ;;  %229 = vst.msk [vmem:[#allocation2 + $0x20] sm:$0xf] %vm219_vm1, %v4877_v2  ;;  %v277_v33 = vadd.f32 %v4841_v25, %v4825_v22  ;;  %v278_v56 = vadd.f32 %v4842_v34, %v4826_v26  ;;  %v4829_v9 = vunpack.c.l.bf16 %v4969_v45  ;;  %v5012_v14 = vsel %vm463_vm0, %v432_v3, 0 }
  0x15   : > { %589 = vmatpush.bf16.xpose.msrb.mxu0 %v468_v1  ;;  %617 = vmatpush.bf16.xpose.msrb.mxu1 %v468_v1  ;;  %v4191_v19 = vor.u32 %v4719_v13, %v4190_v6  ;;  %230 = vst.msk [vmem:[#allocation2 + $0x24] sm:$0x1] %vm221_vm2, %v4877_v2  ;;  %v281_v29 = vpack.c.bf16 %v273_v20, %v273_v20  ;;  %v373_v39 = vld [vmem:[#allocation2 + $0x8] sm:$0xf] }
  0x16   : > { %645 = vmatpush.bf16.xpose.msrb.mxu2 %v468_v1  ;;  %673 = vmatpush.bf16.xpose.msrb.mxu3 %v468_v1  ;;  %231 = vst.msk [vmem:[#allocation2 + $0x28] sm:$0xf] %vm219_vm1, %v4877_v2  ;;  %v282_v30 = vpack.c.bf16 %v274_v21, %v274_v21  ;;  %v283_v31 = vpack.c.bf16 %v275_v23, %v275_v23  ;;  %v379_v40 = vld [vmem:[#allocation2 + $0xc] sm:$0x1] }
  0x17   : > { %v457_v27 = vshrl.u32 %v4191_v19, 16  ;;  %v459_v28 = vshll.u32 %v4191_v19, 16  ;;  %232 = vst.msk [vmem:[#allocation2 + $0x2c] sm:$0x1] %vm221_vm2, %v4877_v2  ;;  %v284_v32 = vpack.c.bf16 %v276_v24, %v276_v24  ;;  %v290_v36 = vshrl.u32 %v281_v29, 16 }
  0x18   : > { %233 = vst.msk [vmem:[#allocation2 + $0x30] sm:$0xf] %vm219_vm1, %v4877_v2  ;;  %v293_v37 = vshll.u32 %v281_v29, 16  ;;  %v298_v38 = vshrl.u32 %v282_v30, 16  ;;  %v301_v41 = vshll.u32 %v282_v30, 16  ;;  %v306_v42 = vshrl.u32 %v283_v31, 16 }
  0x19   : > { %v461_v35 = vrot.slane %v459_v28, 1  ;;  %234 = vst.msk [vmem:[#allocation2 + $0x34] sm:$0x1] %vm221_vm2, %v4877_v2  ;;  %v309_v43 = vshll.u32 %v283_v31, 16  ;;  %v314_v44 = vshrl.u32 %v284_v32, 16  ;;  %v292_v47 = vrot.slane %v290_v36, 7 }
  0x1a   : > { %235 = vst.msk [vmem:[#allocation2 + $0x38] sm:$0xf] %vm219_vm1, %v4877_v2  ;;  %v300_v49 = vrot.slane %v298_v38, 7  ;;  %v382_v50 = vld [vmem:[#allocation2 + $0x10] sm:$0xf]  ;;  %v308_v53 = vrot.slane %v306_v42, 7  ;;  %v285_v55 = vpack.c.bf16 %v277_v33, %v277_v33  ;;  %v286_v17 = vpack.c.bf16 %v278_v56, %v278_v56 }
  0x1b   : > { %v462_v46 = vor.u32 %v461_v35, %v457_v27  ;;  %236 = vst.msk [vmem:[#allocation2 + $0x3c] sm:$0x1] %vm221_vm2, %v4877_v2  ;;  %v385_v52 = vld [vmem:[#allocation2 + $0x14] sm:$0x1]  ;;  %v316_v54 = vrot.slane %v314_v44, 7  ;;  %v295_v57 = vor.u32 %v293_v37, %v292_v47  ;;  %v296_v58 = vrot.slane %v292_v47, 4 }
  0x1c   : > { %237 = vst.msk [vmem:[#allocation2 + $0x40] sm:$0xf] %vm219_vm1, %v4877_v2  ;;  %v303_v59 = vor.u32 %v301_v41, %v300_v49  ;;  %v304_v60 = vrot.slane %v300_v49, 4  ;;  %v388_v61 = vld [vmem:[#allocation2 + $0x18] sm:$0xf]  ;;  %v311_v63 = vor.u32 %v309_v43, %v308_v53  ;;  %v312_v0 = vrot.slane %v308_v53, 4 }
  0x1d   : > { %4192 = vmatmul.msk.bf16.vlgmr.msra.gmra.mxu0 %vm463_vm0, %v462_v46  ;;  %238 = vst.msk [vmem:[#allocation2 + $0x44] sm:$0x1] %vm221_vm2, %v4877_v2  ;;  %v317_v1 = vshll.u32 %v284_v32, 16  ;;  %v374_v4 = vsel %vm4975_vm5, %v295_v57, %v373_v39  ;;  %v380_v5 = vsel %vm4983_vm6, %v296_v58, %v379_v40  ;;  %v391_v7 = vld [vmem:[#allocation2 + $0x1c] sm:$0x1]  ;;  %v320_v12 = vrot.slane %v316_v54, 4 }
  0x1e   : > { %239 = vst.msk [vmem:[#allocation2 + $0x48] sm:$0xf] %vm219_vm1, %v4877_v2  ;;  %v383_v6 = vsel %vm4975_vm5, %v303_v59, %v382_v50  ;;  %v394_v8 = vld [vmem:[#allocation2 + $0x20] sm:$0xf]  ;;  %v386_v10 = vsel %vm4983_vm6, %v304_v60, %v385_v52  ;;  %v397_v13 = vld [vmem:[#allocation2 + $0x24] sm:$0x1]  ;;  %v392_v18 = vsel %vm4983_vm6, %v312_v0, %v391_v7  ;;  %692 = vmatpush.bf16.xpose.msra.mxu0 %v5012_v14  ;;  %v4845_v19 = vunpack.c.l.bf16 %v4991_v62 }
  0x1f   : > { %240 = vst.msk [vmem:[#allocation2 + $0x4c] sm:$0x1] %vm221_vm2, %v4877_v2  ;;  %v389_v2 = vsel %vm4975_vm5, %v311_v63, %v388_v61  ;;  %v319_v11 = vor.u32 %v317_v1, %v316_v54  ;;  %v322_v15 = vshrl.u32 %v285_v55, 16  ;;  %v325_v16 = vshll.u32 %v285_v55, 16  ;;  %v400_v25 = vld [vmem:[#allocation2 + $0x28] sm:$0xf] }
  0x20   : > { %375 = vst [vmem:[#allocation2 + $0x8] sm:$0xf] %v374_v4  ;;  %v330_v22 = vshrl.u32 %v286_v17, 16  ;;  %v333_v23 = vshll.u32 %v286_v17, 16  ;;  %v398_v24 = vsel %vm4983_vm6, %v320_v12, %v397_v13  ;;  %v403_v26 = vld [vmem:[#allocation2 + $0x2c] sm:$0x1]  ;;  %v279_v27 = vadd.f32 %v4845_v19, %v4829_v9 }
  0x21   : > { %381 = vst [vmem:[#allocation2 + $0xc] sm:$0x1] %v380_v5  ;;  %v395_v20 = vsel %vm4975_vm5, %v319_v11, %v394_v8  ;;  %v324_v21 = vrot.slane %v322_v15, 7  ;;  %v406_v31 = vld [vmem:[#allocation2 + $0x30] sm:$0xf] }
  0x22   : > { %384 = vst [vmem:[#allocation2 + $0x10] sm:$0xf] %v383_v6  ;;  %v332_v30 = vrot.slane %v330_v22, 7  ;;  %v409_v32 = vld [vmem:[#allocation2 + $0x34] sm:$0x1]  ;;  %v287_v33 = vpack.c.bf16 %v279_v27, %v279_v27 }
  0x23   : > { %387 = vst [vmem:[#allocation2 + $0x14] sm:$0x1] %v386_v10  ;;  %v327_v28 = vor.u32 %v325_v16, %v324_v21  ;;  %v328_v29 = vrot.slane %v324_v21, 4  ;;  %v412_v47 = vld [vmem:[#allocation2 + $0x38] sm:$0xf] }
  0x24   : > { %390 = vst [vmem:[#allocation2 + $0x18] sm:$0xf] %v389_v2  ;;  %v335_v37 = vor.u32 %v333_v23, %v332_v30  ;;  %v336_v38 = vrot.slane %v332_v30, 4  ;;  %v338_v40 = vshrl.u32 %v287_v33, 16  ;;  %v341_v41 = vshll.u32 %v287_v33, 16 }
  0x25   : > { %393 = vst [vmem:[#allocation2 + $0x1c] sm:$0x1] %v392_v18  ;;  %v401_v35 = vsel %vm4975_vm5, %v327_v28, %v400_v25  ;;  %v404_v36 = vsel %vm4983_vm6, %v328_v29, %v403_v26  ;;  %v415_v49 = vld [vmem:[#allocation2 + $0x3c] sm:$0x1] }
  0x26   : > { %396 = vst [vmem:[#allocation2 + $0x20] sm:$0xf] %v395_v20  ;;  %v407_v44 = vsel %vm4975_vm5, %v335_v37, %v406_v31  ;;  %v410_v46 = vsel %vm4983_vm6, %v336_v38, %v409_v32  ;;  %v340_v52 = vrot.slane %v338_v40, 7  ;;  %v424_v40 = vld [vmem:[#allocation2] sm:$0xf] }
  0x27   : > { %v4195_v34 = vld [vmem:[#allocation2 + $0x8] sm:$0xf]  ;;  %399 = vst [vmem:[#allocation2 + $0x24] sm:$0x1] %v398_v24 }
  0x28   : > { %v4720_v39 = vld [vmem:[#allocation2 + $0x8] sm:$0x10]  ;;  %402 = vst [vmem:[#allocation2 + $0x28] sm:$0xf] %v401_v35  ;;  %v343_v58 = vor.u32 %v341_v41, %v340_v52  ;;  %v344_v59 = vrot.slane %v340_v52, 4 }
  0x29   : > { %v4196_v42 = vor.u32 %v4720_v39, %v4195_v34  ;;  %v4200_v43 = vld [vmem:[#allocation2 + $0x10] sm:$0xf]  ;;  %405 = vst [vmem:[#allocation2 + $0x2c] sm:$0x1] %v404_v36  ;;  %v4236_v39 = vld [vmem:[%s5723_s2 + $0x4] sm:$0x3] }
  0x2a   : > { %v4721_v50 = vld [vmem:[#allocation2 + $0x10] sm:$0x10]  ;;  %408 = vst [vmem:[#allocation2 + $0x30] sm:$0xf] %v407_v44  ;;  %v413_v4 = vsel %vm4975_vm5, %v343_v58, %v412_v47  ;;  %v416_v5 = vsel %vm4983_vm6, %v344_v59, %v415_v49  ;;  %v824_v41 = vsel %vm463_vm0, %v4236_v39, 0  ;;  %v4846_v47 = vunpack.c.h.bf16 %v4991_v62 }
  0x2b   : > { %v489_v53 = vshrl.u32 %v4196_v42, 16  ;;  %v491_v54 = vshll.u32 %v4196_v42, 16  ;;  %v4201_v55 = vor.u32 %v4721_v50, %v4200_v43  ;;  %v4205_v56 = vld [vmem:[#allocation2 + $0x18] sm:$0xf]  ;;  %411 = vst [vmem:[#allocation2 + $0x34] sm:$0x1] %v410_v46  ;;  %v4830_v46 = vunpack.c.h.bf16 %v4969_v45 }
  0x2c   : > { %v4722_v57 = vld [vmem:[#allocation2 + $0x18] sm:$0x10]  ;;  %414 = vst [vmem:[#allocation2 + $0x38] sm:$0xf] %v413_v4  ;;  %v425_v42 = vld [vmem:[#allocation2 + $0x8] sm:$0xf] }
  0x2d   : > { %v493_v60 = vrot.slane %v491_v54, 1  ;;  %v517_v61 = vshrl.u32 %v4201_v55, 16  ;;  %v519_v63 = vshll.u32 %v4201_v55, 16  ;;  %v4206_v0 = vor.u32 %v4722_v57, %v4205_v56  ;;  %v4210_v1 = vld [vmem:[#allocation2 + $0x20] sm:$0xf] }
  0x2e   : > { %v4723_v3 = vld [vmem:[#allocation2 + $0x20] sm:$0x10]  ;;  %417 = vst [vmem:[#allocation2 + $0x3c] sm:$0x1] %v416_v5  ;;  %v426_v43 = vld [vmem:[#allocation2 + $0x10] sm:$0xf]  ;;  %v280_v49 = vadd.f32 %v4846_v47, %v4830_v46 }
  0x2f   : > { %v494_v6 = vor.u32 %v493_v60, %v489_v53  ;;  %v521_v7 = vrot.slane %v519_v63, 1  ;;  %v545_v8 = vshrl.u32 %v4206_v0, 16  ;;  %v547_v9 = vshll.u32 %v4206_v0, 16  ;;  %v4215_v10 = vld [vmem:[#allocation2 + $0x28] sm:$0xf] }
  0x30   : > { %v4211_v2 = vor.u32 %v4723_v3, %v4210_v1  ;;  %v4724_v11 = vld [vmem:[#allocation2 + $0x28] sm:$0x10]  ;;  %v427_v44 = vld [vmem:[#allocation2 + $0x18] sm:$0xf]  ;;  %v288_v50 = vpack.c.bf16 %v280_v49, %v280_v49  ;;  %v429_v56 = vld [vmem:[#allocation2 + $0x28] sm:$0xf] }
  0x31   : > { %4197 = vmatmul.msk.bf16.vlgmr.msra.gmra.mxu1 %vm463_vm0, %v494_v6  ;;  %v522_v12 = vor.u32 %v521_v7, %v517_v61  ;;  %v549_v13 = vrot.slane %v547_v9, 1  ;;  %v4216_v15 = vor.u32 %v4724_v11, %v4215_v10  ;;  %v4220_v16 = vld [vmem:[#allocation2 + $0x30] sm:$0xf]  ;;  %v418_v57 = vld [vmem:[#allocation2 + $0x40] sm:$0xf] }
  0x32   : > { %v573_v17 = vshrl.u32 %v4211_v2, 16  ;;  %v575_v18 = vshll.u32 %v4211_v2, 16  ;;  %v4725_v19 = vld [vmem:[#allocation2 + $0x30] sm:$0x10]  ;;  %708 = vmatpush.bf16.xpose.msra.mxu1 %v5012_v14  ;;  %v346_v52 = vshrl.u32 %v288_v50, 16  ;;  %v349_v54 = vshll.u32 %v288_v50, 16 }
  0x33   : > { %4202 = vmatmul.msk.bf16.vlgmr.msra.gmra.mxu2 %vm463_vm0, %v522_v12  ;;  %v550_v20 = vor.u32 %v549_v13, %v545_v8  ;;  %v4221_v21 = vor.u32 %v4725_v19, %v4220_v16  ;;  %v603_v23 = vshll.u32 %v4216_v15, 16  ;;  %v4225_v26 = vld [vmem:[#allocation2 + $0x38] sm:$0xf]  ;;  %v601_v28 = vshrl.u32 %v4216_v15, 16  ;;  %v430_v62 = vld [vmem:[#allocation2 + $0x30] sm:$0xf] }
  0x34   : > { %v577_v22 = vrot.slane %v575_v18, 1  ;;  %724 = vmatpush.bf16.xpose.msra.mxu2 %v5012_v14  ;;  %v348_v53 = vrot.slane %v346_v52, 7  ;;  %v431_v58 = vld [vmem:[#allocation2 + $0x38] sm:$0xf]  ;;  %v4245_v59 = vld [vmem:[%s5723_s2 + $0x6] sm:$0x3] }
  0x35   : > { %4207 = vmatmul.msk.bf16.vlgmr.msra.gmra.mxu3 %vm463_vm0, %v550_v20  ;;  %v631_v25 = vshll.u32 %v4221_v21, 16  ;;  %v4726_v27 = vld [vmem:[#allocation2 + $0x38] sm:$0x10]  ;;  %v605_v29 = vrot.slane %v603_v23, 1  ;;  %v629_v31 = vshrl.u32 %v4221_v21, 16  ;;  %v993_v48 = vsel %vm463_vm0, %v4245_v59, 0 }
  0x36   : > { %v578_v24 = vor.u32 %v577_v22, %v573_v17  ;;  %740 = vmatpush.bf16.xpose.msra.mxu3 %v5012_v14  ;;  %v4226_v30 = vor.u32 %v4726_v27, %v4225_v26  ;;  %v351_v55 = vor.u32 %v349_v54, %v348_v53  ;;  %v810_v60 = vld [vmem:[#allocation2 + $0x8] sm:$0xf]  ;;  %v811_v61 = vld [vmem:[#allocation2 + $0x10] sm:$0xf]  ;;  %v812_v63 = vld [vmem:[#allocation2 + $0x18] sm:$0xf] }
  0x37   : > { %v633_v32 = vrot.slane %v631_v25, 1  ;;  %v606_v34 = vor.u32 %v605_v29, %v601_v28  ;;  %v813_v0 = vld [vmem:[#allocation2 + $0x20] sm:$0xf]  ;;  %v352_v1 = vrot.slane %v348_v53, 4  ;;  %v814_v3 = vld [vmem:[#allocation2 + $0x28] sm:$0xf] }
  0x38   : > { %4212 = vmatmul.msk.bf16.vlgmr.msrb.gmra.mxu0 %vm463_vm0, %v578_v24  ;;  %v659_v33 = vshll.u32 %v4226_v30, 16  ;;  %v657_v35 = vshrl.u32 %v4226_v30, 16  ;;  %v419_v45 = vsel %vm4975_vm5, %v351_v55, %v418_v57  ;;  %v4248_v4 = vld [vmem:[#allocation2 + $0x8] sm:$0xf]  ;;  %v4727_v5 = vld [vmem:[#allocation2 + $0x8] sm:$0x10] }
  0x39   : > { %756 = vmatpush.bf16.xpose.msrb.mxu0 %v5012_v14  ;;  %v634_v37 = vor.u32 %v633_v32, %v629_v31  ;;  %420 = vst [vmem:[#allocation2 + $0x40] sm:$0xf] %v419_v45  ;;  %v421_v6 = vld [vmem:[#allocation2 + $0x44] sm:$0x1]  ;;  %v4249_v8 = vor.u32 %v4727_v5, %v4248_v4  ;;  %v815_v10 = vld [vmem:[#allocation2 + $0x30] sm:$0xf] }
  0x3a   : > { %v661_v36 = vrot.slane %v659_v33, 1  ;;  %v422_v7 = vsel %vm4983_vm6, %v352_v1, %v421_v6  ;;  %v4253_v2 = vld [vmem:[#allocation2 + $0x10] sm:$0xf]  ;;  %v4728_v11 = vld [vmem:[#allocation2 + $0x10] sm:$0x10] }
  0x3b   : > { %423 = vst [vmem:[#allocation2 + $0x44] sm:$0x1] %v422_v7  ;;  %v985_v9 = vshll.u32 %v4249_v8, 16  ;;  %v816_v12 = vld [vmem:[#allocation2 + $0x38] sm:$0xf]  ;;  %v983_v13 = vshrl.u32 %v4249_v8, 16  ;;  %v4254_v18 = vor.u32 %v4728_v11, %v4253_v2 }
  0x3c   : > { %v662_v38 = vor.u32 %v661_v36, %v657_v35  ;;  %v4258_v16 = vld [vmem:[#allocation2 + $0x18] sm:$0xf]  ;;  %v4729_v17 = vld [vmem:[#allocation2 + $0x18] sm:$0x10]  ;;  %v4263_v51 = vld [vmem:[#allocation2 + $0x20] sm:$0xf] }
  0x3d   : > { %v987_v15 = vrot.slane %v985_v9, 1  ;;  %v4730_v20 = vld [vmem:[#allocation2 + $0x20] sm:$0x10]  ;;  %v4259_v21 = vor.u32 %v4729_v17, %v4258_v16  ;;  %v4287_v22 = vld [vmem:[%s5723_s2 + $0xa] sm:$0x3]  ;;  %v1016_v24 = vshll.u32 %v4254_v18, 16 }
  0x3e   : > { %v4264_v25 = vor.u32 %v4730_v20, %v4263_v51  ;;  %v4268_v26 = vld [vmem:[#allocation2 + $0x28] sm:$0xf]  ;;  %v4731_v27 = vld [vmem:[#allocation2 + $0x28] sm:$0x10]  ;;  %v1311_v28 = vsel %vm463_vm0, %v4287_v22, 0  ;;  %v1014_v31 = vshrl.u32 %v4254_v18, 16 }
  0x3f   : > { %v988_v23 = vor.u32 %v987_v15, %v983_v13  ;;  %v1044_v29 = vshll.u32 %v4259_v21, 16  ;;  %v4269_v30 = vor.u32 %v4731_v27, %v4268_v26  ;;  %v1018_v32 = vrot.slane %v1016_v24, 1  ;;  %v4278_v46 = vld [vmem:[#allocation2 + $0x38] sm:$0xf]  ;;  %v4733_v47 = vld [vmem:[#allocation2 + $0x38] sm:$0x10] }
  0x40   : > { %v817_v19 = vld [vmem:[#allocation2 + $0x40] sm:$0xf]  ;;  %v1072_v33 = vshll.u32 %v4264_v25, 16  ;;  %v4279_v53 = vor.u32 %v4733_v47, %v4278_v46  ;;  %v4286_v8 = vld [vmem:[%s5723_s2 + $0x8] sm:$0x3] }
  0x41   : > { %4217 = vmatmul.msk.bf16.vlgmr.msrb.gmra.mxu1 %vm463_vm0, %v606_v34  ;;  %v1042_v34 = vshrl.u32 %v4259_v21, 16  ;;  %v1046_v35 = vrot.slane %v1044_v29, 1  ;;  %v1100_v36 = vshll.u32 %v4269_v30, 16  ;;  %v4283_v50 = vld [vmem:[#allocation2 + $0x40] sm:$0xf]  ;;  %v5096_v11 = vsel %vm463_vm0, %v4286_v8, 0 }
  0x42   : > { %772 = vmatpush.bf16.xpose.msrb.mxu1 %v5012_v14  ;;  %v1074_v39 = vrot.slane %v1072_v33, 1  ;;  %v4734_v52 = vld [vmem:[#allocation2 + $0x40] sm:$0x10]  ;;  %v1156_v57 = vshll.u32 %v4279_v53, 16  ;;  %v4290_v1 = vld [vmem:[#allocation2] sm:$0xe] }
  0x43   : > { %4222 = vmatmul.msk.bf16.vlgmr.msrb.gmra.mxu2 %vm463_vm0, %v634_v37  ;;  %v1019_v37 = vor.u32 %v1018_v32, %v1014_v31  ;;  %v4744_v2 = vld [vmem:[#allocation2 + $0x8] sm:$0x10]  ;;  %v4745_v13 = vld [vmem:[#allocation2 + $0x10] sm:$0x10]  ;;  %v4305_v16 = vld [vmem:[#allocation2 + $0x18] sm:$0xe] }
  0x44   : > { %788 = vmatpush.bf16.xpose.msrb.mxu2 %v5012_v14  ;;  %v4746_v17 = vld [vmem:[#allocation2 + $0x18] sm:$0x10]  ;;  %v4310_v20 = vld [vmem:[#allocation2 + $0x20] sm:$0xe]  ;;  %v4747_v21 = vld [vmem:[#allocation2 + $0x20] sm:$0x10] }
  0x45   : > { %4227 = vmatmul.msk.bf16.vlgmr.msrb.gmra.mxu3 %vm463_vm0, %v662_v38  ;;  %v1070_v38 = vshrl.u32 %v4264_v25, 16  ;;  %v4306_v51 = vor.u32 %v4746_v17, %v4305_v16  ;;  %v4311_v24 = vor.u32 %v4747_v21, %v4310_v20  ;;  %v4735_v29 = vld [vmem:[#allocation2] sm:$0x10]  ;;  %v4315_v32 = vld [vmem:[#allocation2 + $0x28] sm:$0xe] }
  0x46   : > { %804 = vmatpush.bf16.xpose.msrb.mxu3 %v5012_v14  ;;  %v428_v14 = vld [vmem:[#allocation2 + $0x20] sm:$0xf]  ;;  %v4748_v33 = vld [vmem:[#allocation2 + $0x28] sm:$0x10] }
  0x47   : > { %v1375_v25 = vrot.slane %v4306_v51, 1  ;;  %v1397_v26 = vrot.slane %v4311_v24, 1  ;;  %v4355_v24 = vld [vmem:[#allocation2 + $0x28] sm:$0xf] }
  0x48   : > { %4228 = vmatmul.msk.bf16.vlgmr.msra.gmra.mxu0 %vm463_vm0, %v424_v40  ;;  %v4273_v40 = vld [vmem:[#allocation2 + $0x30] sm:$0xf] }
  0x49   : > { %833 = vmatpush.bf16.xpose.msra.mxu0 %v824_v41 }
  0x51   : > { %4229 = vmatmul.msk.bf16.vlgmr.msra.gmra.mxu1 %vm463_vm0, %v425_v42  ;;  %v1047_v42 = vor.u32 %v1046_v35, %v1042_v34  ;;  %v4320_v35 = vld [vmem:[#allocation2 + $0x30] sm:$0xe] }
  0x52   : > { %849 = vmatpush.bf16.xpose.msra.mxu1 %v824_v41 }
  0x53   : > { %4230 = vmatmul.msk.bf16.vlgmr.msra.gmra.mxu2 %vm463_vm0, %v426_v43  ;;  %v1098_v43 = vshrl.u32 %v4269_v30, 16 }
  0x54   : > { %865 = vmatpush.bf16.xpose.msra.mxu2 %v824_v41 }
  0x55   : > { %4231 = vmatmul.msk.bf16.vlgmr.msra.gmra.mxu3 %vm463_vm0, %v427_v44  ;;  %v1102_v44 = vrot.slane %v1100_v36, 1  ;;  %v4749_v36 = vld [vmem:[#allocation2 + $0x30] sm:$0x10] }
  0x56   : > { %881 = vmatpush.bf16.xpose.msra.mxu3 %v824_v41 }
  0x57   : > { %v1103_v54 = vor.u32 %v1102_v44, %v1098_v43 }
  0x58   : > { %4232 = vmatmul.msk.bf16.vlgmr.msrb.gmra.mxu0 %vm463_vm0, %v428_v14  ;;  %v1075_v14 = vor.u32 %v1074_v39, %v1070_v38  ;;  %v4316_v38 = vor.u32 %v4748_v33, %v4315_v32  ;;  %v4325_v39 = vld [vmem:[#allocation2 + $0x38] sm:$0xe]  ;;  %v4360_v32 = vld [vmem:[#allocation2 + $0x30] sm:$0xf]  ;;  %v4741_v33 = vld [vmem:[#allocation2 + $0x30] sm:$0x10] }
  0x59   : > { %897 = vmatpush.bf16.xpose.msrb.mxu0 %v824_v41 }
  0x5a   : > { %v1419_v44 = vrot.slane %v4316_v38, 1  ;;  %v4742_v38 = vld [vmem:[#allocation2 + $0x38] sm:$0x10] }
  0x61   : > { %4233 = vmatmul.msk.bf16.vlgmr.msrb.gmra.mxu1 %vm463_vm0, %v429_v56  ;;  %v4284_v56 = vor.u32 %v4734_v52, %v4283_v50  ;;  %v4736_v50 = vld [vmem:[#allocation2 + $0x8] sm:$0x10] }
  0x62   : > { %913 = vmatpush.bf16.xpose.msrb.mxu1 %v824_v41 }
  0x63   : > { %4234 = vmatmul.msk.bf16.vlgmr.msrb.gmra.mxu2 %vm463_vm0, %v430_v62 }
  0x64   : > { %929 = vmatpush.bf16.xpose.msrb.mxu2 %v824_v41 }
  0x65   : > { %4235 = vmatmul.msk.bf16.vlgmr.msrb.gmra.mxu3 %vm463_vm0, %v431_v58  ;;  %v1184_v58 = vshll.u32 %v4284_v56, 16 }
  0x66   : > { %945 = vmatpush.bf16.xpose.msrb.mxu3 %v824_v41  ;;  %v4732_v41 = vld [vmem:[#allocation2 + $0x30] sm:$0x10] }
  0x67   : > { %v4274_v49 = vor.u32 %v4732_v41, %v4273_v40  ;;  %v4750_v40 = vld [vmem:[#allocation2 + $0x38] sm:$0x10]  ;;  %v4321_v41 = vor.u32 %v4749_v36, %v4320_v35 }
  0x68   : > { %4237 = vmatmul.msk.bf16.vlgmr.msra.gmra.mxu0 %vm463_vm0, %v810_v60  ;;  %v1154_v60 = vshrl.u32 %v4279_v53, 16  ;;  %v4326_v46 = vor.u32 %v4750_v40, %v4325_v39  ;;  %v4361_v39 = vor.u32 %v4741_v33, %v4360_v32 }
  0x69   : > { %1002 = vmatpush.bf16.xpose.msra.mxu0 %v993_v48  ;;  %v1128_v55 = vshll.u32 %v4274_v49, 16  ;;  %v1126_v45 = vshrl.u32 %v4274_v49, 16  ;;  %v4335_v49 = vld [vmem:[#allocation2 + $0x8] sm:$0xf]  ;;  %v1441_v52 = vrot.slane %v4321_v41, 1 }
  0x6b   : > { %v1130_v62 = vrot.slane %v1128_v55, 1 }
  0x71   : > { %4238 = vmatmul.msk.bf16.vlgmr.msra.gmra.mxu1 %vm463_vm0, %v811_v61  ;;  %v1131_v61 = vor.u32 %v1130_v62, %v1126_v45  ;;  %v1463_v45 = vrot.slane %v4326_v46, 1  ;;  %v4336_v62 = vor.u32 %v4736_v50, %v4335_v49  ;;  %v4751_v46 = vld [vmem:[#allocation2 + $0x8] sm:$0x10]  ;;  %v1659_v50 = vshll.u32 %v4361_v39, 16 }
  0x72   : > { %1030 = vmatpush.bf16.xpose.msra.mxu1 %v993_v48 }
  0x73   : > { %4239 = vmatmul.msk.bf16.vlgmr.msra.gmra.mxu2 %vm463_vm0, %v812_v63  ;;  %v1182_v63 = vshrl.u32 %v4284_v56, 16  ;;  %v4340_v56 = vld [vmem:[#allocation2 + $0x10] sm:$0xf] }
  0x74   : > { %1058 = vmatpush.bf16.xpose.msra.mxu2 %v993_v48 }
  0x75   : > { %4240 = vmatmul.msk.bf16.vlgmr.msra.gmra.mxu3 %vm463_vm0, %v813_v0  ;;  %v1186_v0 = vrot.slane %v1184_v58, 1  ;;  %v4345_v58 = vld [vmem:[#allocation2 + $0x18] sm:$0xf] }
  0x76   : > { %1086 = vmatpush.bf16.xpose.msra.mxu3 %v993_v48 }
  0x77   : > { %v1187_v6 = vor.u32 %v1186_v0, %v1182_v63 }
  0x78   : > { %4241 = vmatmul.msk.bf16.vlgmr.msrb.gmra.mxu0 %vm463_vm0, %v814_v3  ;;  %v4743_v3 = vld [vmem:[#allocation2] sm:$0x10] }
  0x79   : > { %1114 = vmatpush.bf16.xpose.msrb.mxu0 %v993_v48  ;;  %v4291_v5 = vor.u32 %v4743_v3, %v4290_v1  ;;  %v1519_v1 = vshll.u32 %v4336_v62, 16 }
  0x7b   : > { %v1306_v9 = vrot.slane %v4291_v5, 1  ;;  %v4739_v5 = vld [vmem:[#allocation2 + $0x20] sm:$0x10] }
  0x81   : > { %4242 = vmatmul.msk.bf16.vlgmr.msrb.gmra.mxu1 %vm463_vm0, %v815_v10  ;;  %v4295_v10 = vld [vmem:[#allocation2 + $0x8] sm:$0xe] }
  0x82   : > { %1142 = vmatpush.bf16.xpose.msrb.mxu1 %v993_v48  ;;  %v4296_v15 = vor.u32 %v4744_v2, %v4295_v10 }
  0x83   : > { %4243 = vmatmul.msk.bf16.vlgmr.msrb.gmra.mxu2 %vm463_vm0, %v816_v12  ;;  %v4300_v12 = vld [vmem:[#allocation2 + $0x10] sm:$0xe] }
  0x84   : > { %1170 = vmatpush.bf16.xpose.msrb.mxu2 %v993_v48  ;;  %v4301_v18 = vor.u32 %v4745_v13, %v4300_v12  ;;  %v1517_v12 = vshrl.u32 %v4336_v62, 16  ;;  %v1521_v13 = vrot.slane %v1519_v1, 1 }
  0x85   : > { %4244 = vmatmul.msk.bf16.vlgmr.msrb.gmra.mxu3 %vm463_vm0, %v817_v19  ;;  %v1331_v19 = vrot.slane %v4296_v15, 1 }
  0x86   : > { %1198 = vmatpush.bf16.xpose.msrb.mxu3 %v993_v48  ;;  %v1158_v48 = vrot.slane %v1156_v57, 1  ;;  %v4737_v57 = vld [vmem:[#allocation2 + $0x10] sm:$0x10]  ;;  %v1522_v51 = vor.u32 %v1521_v13, %v1517_v12  ;;  %v4381_v12 = vld [vmem:[#allocation2 + $0x18] sm:$0xf] }
  0x87   : > { %v4753_v13 = vld [vmem:[#allocation2 + $0x18] sm:$0x10] }
  0x88   : > { %4250 = vmatmul.msk.bf16.vlgmr.msra.gmra.mxu0 %vm463_vm0, %v988_v23  ;;  %v1159_v4 = vor.u32 %v1158_v48, %v1154_v60  ;;  %v1353_v23 = vrot.slane %v4301_v18, 1  ;;  %v4738_v60 = vld [vmem:[#allocation2 + $0x18] sm:$0x10]  ;;  %v4341_v48 = vor.u32 %v4737_v57, %v4340_v56  ;;  %v1657_v57 = vshrl.u32 %v4361_v39, 16 }
  0x89   : > { %1320 = vmatpush.bf16.xpose.msra.mxu0 %v1311_v28  ;;  %v4346_v3 = vor.u32 %v4738_v60, %v4345_v58 }
  0x8a   : > { %v1545_v16 = vshrl.u32 %v4341_v48, 16 }
  0x8b   : > { %v1575_v15 = vshll.u32 %v4346_v3, 16 }
  0x8d   : > { %v1577_v20 = vrot.slane %v1575_v15, 1 }
  0x91   : > { %4255 = vmatmul.msk.bf16.vlgmr.msra.gmra.mxu1 %vm463_vm0, %v1019_v37 }
  0x92   : > { %1342 = vmatpush.bf16.xpose.msra.mxu1 %v1311_v28 }
  0x93   : > { %4260 = vmatmul.msk.bf16.vlgmr.msra.gmra.mxu2 %vm463_vm0, %v1047_v42 }
  0x94   : > { %1364 = vmatpush.bf16.xpose.msra.mxu2 %v1311_v28 }
  0x95   : > { %4265 = vmatmul.msk.bf16.vlgmr.msra.gmra.mxu3 %vm463_vm0, %v1075_v14 }
  0x96   : > { %1386 = vmatpush.bf16.xpose.msra.mxu3 %v1311_v28 }
  0x98   : > { %4270 = vmatmul.msk.bf16.vlgmr.msrb.gmra.mxu0 %vm463_vm0, %v1103_v54 }
  0x99   : > { %1408 = vmatpush.bf16.xpose.msrb.mxu0 %v1311_v28 }
  0x9a   : > { %v5087_v59 = vpop.f32.mrf.mxu0 }
  0xa1   : > { %4275 = vmatmul.msk.bf16.vlgmr.msrb.gmra.mxu1 %vm463_vm0, %v1131_v61  ;;  %v4368_v61 = vld [vmem:[%s5723_s2 + $0xc] sm:$0x3] }
  0xa2   : > { %v481_v7 = vpop.f32.mrf.mxu0  ;;  %1430 = vmatpush.bf16.xpose.msrb.mxu1 %v1311_v28  ;;  %v5132_v8 = vsel %vm463_vm0, %v4368_v61, 0 }
  0xa3   : > { %4280 = vmatmul.msk.bf16.vlgmr.msrb.gmra.mxu2 %vm463_vm0, %v1159_v4  ;;  %v4350_v4 = vld [vmem:[#allocation2 + $0x20] sm:$0xf] }
  0xa4   : > { %1452 = vmatpush.bf16.xpose.msrb.mxu2 %v1311_v28  ;;  %v4351_v2 = vor.u32 %v4739_v5, %v4350_v4  ;;  %v4752_v4 = vld [vmem:[#allocation2 + $0x10] sm:$0x10] }
  0xa5   : > { %4285 = vmatmul.msk.bf16.vlgmr.msrb.gmra.mxu3 %vm463_vm0, %v1187_v6 }
  0xa6   : > { %1474 = vmatpush.bf16.xpose.msrb.mxu3 %v1311_v28  ;;  %v4330_v28 = vld [vmem:[#allocation2] sm:$0xf]  ;;  %v1603_v18 = vshll.u32 %v4351_v2, 16 }
  0xa7   : > { %v4331_v37 = vor.u32 %v4735_v29, %v4330_v28  ;;  %v1601_v29 = vshrl.u32 %v4351_v2, 16 }
  0xa8   : > { %4292 = vmatmul.msk.bf16.vlgmr.msra.gmra.mxu0 %vm463_vm0, %v1306_v9  ;;  %v1547_v9 = vshll.u32 %v4341_v48, 16 }
  0xa9   : > { %1505 = vmatpush.bf16.xpose.msra.mxu0 %v5096_v11  ;;  %v1488_v42 = vshll.u32 %v4331_v37, 16  ;;  %v1486_v54 = vshrl.u32 %v4331_v37, 16  ;;  %v4365_v37 = vld [vmem:[#allocation2 + $0x38] sm:$0xf] }
  0xaa   : > { %v1549_v17 = vrot.slane %v1547_v9, 1 }
  0xab   : > { %v1490_v55 = vrot.slane %v1488_v42, 1 }
  0xad   : > { %v1491_v63 = vor.u32 %v1490_v55, %v1486_v54 }
  0xae   : > { %v5100_v22 = vpop.f32.mrf.mxu1 }
  0xb1   : > { %4297 = vmatmul.msk.bf16.vlgmr.msra.gmra.mxu1 %vm463_vm0, %v1331_v19 }
  0xb2   : > { %1533 = vmatpush.bf16.xpose.msra.mxu1 %v5096_v11 }
  0xb3   : > { %4302 = vmatmul.msk.bf16.vlgmr.msra.gmra.mxu2 %vm463_vm0, %v1353_v23 }
  0xb4   : > { %1561 = vmatpush.bf16.xpose.msra.mxu2 %v5096_v11 }
  0xb5   : > { %v5106_v27 = vpop.f32.mrf.mxu0  ;;  %4307 = vmatmul.msk.bf16.vlgmr.msra.gmra.mxu3 %vm463_vm0, %v1375_v25  ;;  %v4740_v25 = vld [vmem:[#allocation2 + $0x28] sm:$0x10] }
  0xb6   : > { %v5109_v30 = vpop.f32.mrf.mxu2  ;;  %v509_v31 = vpop.f32.mrf.mxu1  ;;  %1589 = vmatpush.bf16.xpose.msra.mxu3 %v5096_v11  ;;  %v4356_v36 = vor.u32 %v4740_v25, %v4355_v24  ;;  %v4391_v25 = vld [vmem:[#allocation2 + $0x28] sm:$0xf] }
  0xb7   : > { %v1605_v31 = vrot.slane %v1603_v18, 1  ;;  %v4754_v18 = vld [vmem:[#allocation2 + $0x20] sm:$0x10] }
  0xb8   : > { %4312 = vmatmul.msk.bf16.vlgmr.msrb.gmra.mxu0 %vm463_vm0, %v1397_v26  ;;  %v5113_v34 = vpop.f32.mrf.mxu3  ;;  %v1550_v26 = vor.u32 %v1549_v17, %v1545_v16  ;;  %v1631_v42 = vshll.u32 %v4356_v36, 16  ;;  %v1629_v54 = vshrl.u32 %v4356_v36, 16  ;;  %v4386_v17 = vld [vmem:[#allocation2 + $0x20] sm:$0xf] }
  0xb9   : > { %1617 = vmatpush.bf16.xpose.msrb.mxu0 %v5096_v11  ;;  %v1606_v40 = vor.u32 %v1605_v31, %v1601_v29  ;;  %v4387_v24 = vor.u32 %v4754_v18, %v4386_v17 }
  0xba   : > { %v1633_v55 = vrot.slane %v1631_v42, 1 }
  0xbc   : > { %v1634_v60 = vor.u32 %v1633_v55, %v1629_v54  ;;  %v4756_v54 = vld [vmem:[#allocation2 + $0x30] sm:$0x10] }
  0xbd   : > { %v593_v43 = vpop.f32.mrf.mxu0 }
  0xbe   : > { %v537_v47 = vpop.f32.mrf.mxu2  ;;  %v5116_v14 = vpop.f32.mrf.mxu1  ;;  %v4366_v43 = vor.u32 %v4742_v38, %v4365_v37  ;;  %v1820_v38 = vshll.u32 %v4387_v24, 16 }
  0xc0   : > { %v565_v53 = vpop.f32.mrf.mxu3  ;;  %v1687_v56 = vshll.u32 %v4366_v43, 16  ;;  %v1685_v48 = vshrl.u32 %v4366_v43, 16 }
  0xc1   : > { %4317 = vmatmul.msk.bf16.vlgmr.msrb.gmra.mxu1 %vm463_vm0, %v1419_v44  ;;  %v4371_v44 = vld [vmem:[#allocation2 + $0x8] sm:$0xf] }
  0xc2   : > { %1645 = vmatpush.bf16.xpose.msrb.mxu1 %v5096_v11  ;;  %v4372_v53 = vor.u32 %v4751_v46, %v4371_v44  ;;  %v1689_v61 = vrot.slane %v1687_v56, 1  ;;  %v1822_v46 = vrot.slane %v1820_v38, 1 }
  0xc3   : > { %4322 = vmatmul.msk.bf16.vlgmr.msrb.gmra.mxu2 %vm463_vm0, %v1441_v52 }
  0xc4   : > { %1673 = vmatpush.bf16.xpose.msrb.mxu2 %v5096_v11  ;;  %v1733_v62 = vshll.u32 %v4372_v53, 16  ;;  %v1731_v9 = vshrl.u32 %v4372_v53, 16  ;;  %v1690_v15 = vor.u32 %v1689_v61, %v1685_v48  ;;  %v4396_v53 = vld [vmem:[#allocation2 + $0x30] sm:$0xf]  ;;  %v4406_v61 = vld [vmem:[#allocation2 + $0x40] sm:$0xf] }
  0xc5   : > { %v5125_v0 = vpop.f32.mrf.mxu0  ;;  %4327 = vmatmul.msk.bf16.vlgmr.msrb.gmra.mxu3 %vm463_vm0, %v1463_v45  ;;  %v1661_v45 = vrot.slane %v1659_v50, 1  ;;  %v4397_v48 = vor.u32 %v4756_v54, %v4396_v53  ;;  %v4417_v53 = vld [vmem:[#allocation2 + $0x10] sm:$0xe]  ;;  %v4760_v54 = vld [vmem:[#allocation2 + $0x10] sm:$0x10] }
  0xc6   : > { %v5128_v6 = vpop.f32.mrf.mxu2  ;;  %v621_v7 = vpop.f32.mrf.mxu1  ;;  %1701 = vmatpush.bf16.xpose.msrb.mxu3 %v5096_v11  ;;  %v1573_v11 = vshrl.u32 %v4346_v3, 16  ;;  %v4376_v3 = vld [vmem:[#allocation2 + $0x10] sm:$0xf]  ;;  %v1735_v2 = vrot.slane %v1733_v62, 1  ;;  %v4401_v62 = vld [vmem:[#allocation2 + $0x38] sm:$0xf] }
  0xc7   : > { %v1662_v5 = vor.u32 %v1661_v45, %v1657_v57  ;;  %v4377_v16 = vor.u32 %v4752_v4, %v4376_v3 }
  0xc8   : > { %4332 = vmatmul.msk.bf16.vlgmr.msra.gmra.mxu0 %vm463_vm0, %v1491_v63  ;;  %v5135_v10 = vpop.f32.mrf.mxu3  ;;  %v1578_v35 = vor.u32 %v1577_v20, %v1573_v11  ;;  %v1736_v11 = vor.u32 %v1735_v2, %v1731_v9 }
  0xc9   : > { %1750 = vmatpush.bf16.xpose.msra.mxu0 %v5132_v8  ;;  %v1762_v36 = vshrl.u32 %v4377_v16, 16 }
  0xcd   : > { %v696_v19 = vpop.f32.mrf.mxu0 }
  0xce   : > { %v649_v21 = vpop.f32.mrf.mxu2  ;;  %v5138_v23 = vpop.f32.mrf.mxu1  ;;  %v4382_v19 = vor.u32 %v4753_v13, %v4381_v12 }
  0xcf   : > { %v1764_v21 = vshll.u32 %v4377_v16, 16  ;;  %v1874_v16 = vshrl.u32 %v4397_v48, 16 }
  0xd0   : > { %v677_v28 = vpop.f32.mrf.mxu3  ;;  %v1792_v32 = vshll.u32 %v4382_v19, 16  ;;  %v1790_v39 = vshrl.u32 %v4382_v19, 16 }
  0xd1   : > { %4337 = vmatmul.msk.bf16.vlgmr.msra.gmra.mxu1 %vm463_vm0, %v1522_v51  ;;  %v4409_v51 = vld [vmem:[%s5723_s2 + $0xe] sm:$0x3]  ;;  %v1766_v37 = vrot.slane %v1764_v21, 1 }
  0xd2   : > { %1778 = vmatpush.bf16.xpose.msra.mxu1 %v5132_v8  ;;  %v5170_v31 = vsel %vm463_vm0, %v4409_v51, 0 }
  0xd3   : > { %4342 = vmatmul.msk.bf16.vlgmr.msra.gmra.mxu2 %vm463_vm0, %v1550_v26  ;;  %v4755_v26 = vld [vmem:[#allocation2 + $0x28] sm:$0x10]  ;;  %v1767_v44 = vor.u32 %v1766_v37, %v1762_v36 }
  0xd4   : > { %1806 = vmatpush.bf16.xpose.msra.mxu2 %v5132_v8 }
  0xd5   : > { %v5144_v41 = vpop.f32.mrf.mxu0  ;;  %4347 = vmatmul.msk.bf16.vlgmr.msra.gmra.mxu3 %vm463_vm0, %v1578_v35  ;;  %v4392_v35 = vor.u32 %v4755_v26, %v4391_v25  ;;  %v4412_v26 = vld [vmem:[#allocation2 + $0x8] sm:$0xe] }
  0xd6   : > { %v5147_v47 = vpop.f32.mrf.mxu2  ;;  %v712_v49 = vpop.f32.mrf.mxu1  ;;  %1834 = vmatpush.bf16.xpose.msra.mxu3 %v5132_v8 }
  0xd7   : > { %v1848_v42 = vshll.u32 %v4392_v35, 16  ;;  %v1846_v57 = vshrl.u32 %v4392_v35, 16 }
  0xd8   : > { %4352 = vmatmul.msk.bf16.vlgmr.msrb.gmra.mxu0 %vm463_vm0, %v1606_v40  ;;  %v5151_v52 = vpop.f32.mrf.mxu3  ;;  %v1794_v40 = vrot.slane %v1792_v32, 1 }
  0xd9   : > { %1862 = vmatpush.bf16.xpose.msrb.mxu0 %v5132_v8  ;;  %v1850_v45 = vrot.slane %v1848_v42, 1  ;;  %v4451_v42 = vld [vmem:[%s5723_s2 + $0x12] sm:$0x3] }
  0xda   : > { %v1795_v55 = vor.u32 %v1794_v40, %v1790_v39  ;;  %v695_v40 = vadd.f32 %v5125_v0, %v5087_v59 }
  0xdb   : > { %v1851_v4 = vor.u32 %v1850_v45, %v1846_v57  ;;  %v4422_v57 = vld [vmem:[#allocation2 + $0x18] sm:$0xe]  ;;  %v4761_v45 = vld [vmem:[#allocation2 + $0x18] sm:$0x10] }
  0xdd   : > { %v760_v58 = vpop.f32.mrf.mxu0 }
  0xde   : > { %v728_v63 = vpop.f32.mrf.mxu2  ;;  %v5154_v1 = vpop.f32.mrf.mxu1  ;;  %v4757_v58 = vld [vmem:[#allocation2 + $0x38] sm:$0x10] }
  0xdf   : > { %v4758_v63 = vld [vmem:[#allocation2 + $0x40] sm:$0x10]  ;;  %v4402_v3 = vor.u32 %v4757_v58, %v4401_v62  ;;  %v4418_v62 = vor.u32 %v4760_v54, %v4417_v53  ;;  %v4427_v58 = vld [vmem:[#allocation2 + $0x20] sm:$0xe] }
  0xe0   : > { %v744_v7 = vpop.f32.mrf.mxu3  ;;  %v4407_v9 = vor.u32 %v4758_v63, %v4406_v61  ;;  %v4423_v61 = vor.u32 %v4761_v45, %v4422_v57  ;;  %v4447_v57 = vld [vmem:[#allocation2 + $0x40] sm:$0xe]  ;;  %v4766_v45 = vld [vmem:[#allocation2 + $0x40] sm:$0x10] }
  0xe1   : > { %4357 = vmatmul.msk.bf16.vlgmr.msrb.gmra.mxu1 %vm463_vm0, %v1634_v60  ;;  %v1876_v7 = vshll.u32 %v4397_v48, 16  ;;  %v1904_v13 = vshll.u32 %v4402_v3, 16  ;;  %v1902_v19 = vshrl.u32 %v4402_v3, 16  ;;  %v4762_v48 = vld [vmem:[#allocation2 + $0x20] sm:$0x10] }
  0xe2   : > { %1890 = vmatpush.bf16.xpose.msrb.mxu1 %v5132_v8  ;;  %v1932_v18 = vshll.u32 %v4407_v9, 16 }
  0xe3   : > { %4362 = vmatmul.msk.bf16.vlgmr.msrb.gmra.mxu2 %vm463_vm0, %v1662_v5  ;;  %v1878_v17 = vrot.slane %v1876_v7, 1  ;;  %v1906_v51 = vrot.slane %v1904_v13, 1  ;;  %v4432_v13 = vld [vmem:[#allocation2 + $0x28] sm:$0xe] }
  0xe4   : > { %1918 = vmatpush.bf16.xpose.msrb.mxu2 %v5132_v8  ;;  %v1934_v25 = vrot.slane %v1932_v18, 1 }
  0xe5   : > { %v5163_v20 = vpop.f32.mrf.mxu0  ;;  %4367 = vmatmul.msk.bf16.vlgmr.msrb.gmra.mxu3 %vm463_vm0, %v1690_v15  ;;  %v1879_v21 = vor.u32 %v1878_v17, %v1874_v16  ;;  %v1907_v36 = vor.u32 %v1906_v51, %v1902_v19  ;;  %v4763_v16 = vld [vmem:[#allocation2 + $0x28] sm:$0x10] }
  0xe6   : > { %v5166_v28 = vpop.f32.mrf.mxu2  ;;  %v776_v29 = vpop.f32.mrf.mxu1  ;;  %1946 = vmatpush.bf16.xpose.msrb.mxu3 %v5132_v8  ;;  %v1818_v8 = vshrl.u32 %v4387_v24, 16  ;;  %v1930_v24 = vshrl.u32 %v4407_v9, 16  ;;  %v2008_v9 = vrot.slane %v4418_v62, 1  ;;  %v4433_v51 = vor.u32 %v4763_v16, %v4432_v13  ;;  %v4768_v16 = vld [vmem:[#allocation2 + $0x10] sm:$0x10] }
  0xe7   : > { %v4759_v29 = vld [vmem:[#allocation2 + $0x8] sm:$0x10] }
  0xe8   : > { %4373 = vmatmul.msk.bf16.vlgmr.msra.gmra.mxu0 %vm463_vm0, %v1736_v11  ;;  %v5173_v33 = vpop.f32.mrf.mxu3  ;;  %v1823_v60 = vor.u32 %v1822_v46, %v1818_v8  ;;  %v4413_v38 = vor.u32 %v4759_v29, %v4412_v26  ;;  %v1935_v39 = vor.u32 %v1934_v25, %v1930_v24  ;;  %v727_v24 = vadd.f32 %v5147_v47, %v5109_v30  ;;  %v4437_v30 = vld [vmem:[#allocation2 + $0x30] sm:$0xe]  ;;  %v4764_v47 = vld [vmem:[#allocation2 + $0x30] sm:$0x10] }
  0xe9   : > { %1997 = vmatpush.bf16.xpose.msra.mxu0 %v5170_v31  ;;  %v2074_v29 = vrot.slane %v4433_v51, 1 }
  0xea   : > { %v1983_v8 = vrot.slane %v4413_v38, 1  ;;  %v4767_v38 = vld [vmem:[#allocation2 + $0x8] sm:$0x10] }
  0xed   : > { %v837_v43 = vpop.f32.mrf.mxu0 }
  0xee   : > { %v792_v49 = vpop.f32.mrf.mxu2  ;;  %v5176_v50 = vpop.f32.mrf.mxu1  ;;  %v951_v43 = vadd.f32 %v5163_v20, %v695_v40  ;;  %v5214_v20 = vsel %vm463_vm0, %v4451_v42, 0 }
  0xf0   : > { %v808_v56 = vpop.f32.mrf.mxu3 }
  0xf1   : > { %4378 = vmatmul.msk.bf16.vlgmr.msra.gmra.mxu1 %vm463_vm0, %v1767_v44  ;;  %v5206_v44 = vld [vmem:[%s5724_s3] ss:$0 sm:$0xff] }
  0xf2   : > { %2019 = vmatpush.bf16.xpose.msra.mxu1 %v5170_v31 }
  0xf3   : > { %4383 = vmatmul.msk.bf16.vlgmr.msra.gmra.mxu2 %vm463_vm0, %v1795_v55 }
  0xf4   : > { %2041 = vmatpush.bf16.xpose.msra.mxu2 %v5170_v31 }
  0xf5   : > { %v5182_v5 = vpop.f32.mrf.mxu0  ;;  %4388 = vmatmul.msk.bf16.vlgmr.msra.gmra.mxu3 %vm463_vm0, %v1823_v60 }
  0xf6   : > { %v5185_v2 = vpop.f32.mrf.mxu2  ;;  %v853_v12 = vpop.f32.mrf.mxu1  ;;  %2063 = vmatpush.bf16.xpose.msra.mxu3 %v5170_v31 }
  0xf7   : > { %v4428_v12 = vor.u32 %v4762_v48, %v4427_v58 }
  0xf8   : > { %4393 = vmatmul.msk.bf16.vlgmr.msrb.gmra.mxu0 %vm463_vm0, %v1851_v4  ;;  %v5189_v15 = vpop.f32.mrf.mxu3 }
  0xf9   : > { %2085 = vmatpush.bf16.xpose.msrb.mxu0 %v5170_v31 }
  0xfd   : > { %v901_v11 = vpop.f32.mrf.mxu0 }
  0xfe   : > { %v869_v32 = vpop.f32.mrf.mxu2  ;;  %v5192_v35 = vpop.f32.mrf.mxu1  ;;  %v2052_v11 = vrot.slane %v4428_v12, 1 }
  0xff   : > { %v4454_v32 = vld [vmem:[#allocation2 + $0x8] sm:$0xf] }
 0x100   : > { %v885_v37 = vpop.f32.mrf.mxu3  ;;  %v4455_v53 = vor.u32 %v4767_v38, %v4454_v32  ;;  %v4770_v32 = vld [vmem:[#allocation2 + $0x20] sm:$0x10]  ;;  %v4474_v38 = vld [vmem:[#allocation2 + $0x28] sm:$0xf] }
 0x101   : > { %4398 = vmatmul.msk.bf16.vlgmr.msrb.gmra.mxu1 %vm463_vm0, %v1879_v21  ;;  %v759_v21 = vadd.f32 %v5144_v41, %v5106_v27  ;;  %v953_v27 = vadd.f32 %v5185_v2, %v727_v24 }
 0x102   : > { %2107 = vmatpush.bf16.xpose.msrb.mxu1 %v5170_v31 }
 0x103   : > { %4403 = vmatmul.msk.bf16.vlgmr.msrb.gmra.mxu2 %vm463_vm0, %v1907_v36  ;;  %v955_v26 = vadd.f32 %v5182_v5, %v759_v21  ;;  %v743_v36 = vadd.f32 %v5151_v52, %v5113_v34  ;;  %v2284_v21 = vshrl.u32 %v4455_v53, 16 }
 0x104   : > { %2129 = vmatpush.bf16.xpose.msrb.mxu2 %v5170_v31 }
 0x105   : > { %v1004_v46 = vpop.f32.mrf.mxu0  ;;  %4408 = vmatmul.msk.bf16.vlgmr.msrb.gmra.mxu3 %vm463_vm0, %v1935_v39  ;;  %v954_v34 = vadd.f32 %v5189_v15, %v743_v36 }
 0x106   : > { %v1204_v59 = vadd.f32 %v1004_v46, %v951_v43  ;;  %v5210_v0 = vpop.f32.mrf.mxu2  ;;  %v917_v49 = vpop.f32.mrf.mxu1  ;;  %2151 = vmatpush.bf16.xpose.msrb.mxu3 %v5170_v31  ;;  %v711_v31 = vadd.f32 %v5138_v23, %v5100_v22  ;;  %v2030_v23 = vrot.slane %v4423_v61, 1  ;;  %v775_v43 = vadd.f32 %v5154_v1, %v5116_v14 }
 0x107   : > { %v4438_v46 = vor.u32 %v4764_v47, %v4437_v30  ;;  %v4765_v49 = vld [vmem:[#allocation2 + $0x38] sm:$0x10]  ;;  %v2286_v61 = vshll.u32 %v4455_v53, 16 }
 0x108   : > { %v1216_v55 = vadd.f32 %v5206_v44, %v1204_v59  ;;  %4414 = vmatmul.msk.bf16.vlgmr.msra.gmra.mxu0 %vm463_vm0, %v1983_v8  ;;  %v5218_v56 = vpop.f32.mrf.mxu3  ;;  %v952_v3 = vadd.f32 %v5176_v50, %v711_v31  ;;  %v4442_v59 = vld [vmem:[#allocation2 + $0x38] sm:$0xe]  ;;  %v956_v14 = vadd.f32 %v5192_v35, %v775_v43  ;;  %v4448_v31 = vor.u32 %v4766_v45, %v4447_v57  ;;  %v4459_v35 = vld [vmem:[#allocation2 + $0x10] sm:$0xf] }
 0x109   : > { %2303 = vmatpush.bf16.xpose.msra.mxu0 %v5214_v20  ;;  %v4443_v58 = vor.u32 %v4765_v49, %v4442_v59  ;;  %v2096_v48 = vrot.slane %v4438_v46, 1  ;;  %v2288_v24 = vrot.slane %v2286_v61, 1 }
 0x10a   : > { %vm1224_vm7 = vcmp.ge.f32.partialorder %v1216_v55, 0.0  ;;  %v1232_v60 = vmul.f32 0.2, %v1216_v55 }
 0x10b   : > { %v2289_v30 = vor.u32 %v2288_v24, %v2284_v21 }
 0x10c   : > { %v1240_v63 = vsel %vm1224_vm7, %v1216_v55, %v1232_v60 }
 0x10d   : > { %v1248_v4 = vpack.c.bf16 %v1240_v63, %v1240_v63  ;;  %v1006_v7 = vpop.f32.mrf.mxu0 }
 0x10e   : > { %v933_v17 = vpop.f32.mrf.mxu2  ;;  %v1032_v18 = vpop.f32.mrf.mxu1 }
 0x10f   : > { %v1205_v22 = vadd.f32 %v1032_v18, %v952_v3  ;;  %1257 = vst.msk [vmem:[%s5228_s22] sm:$0xf] %vm1256_vm8, %v1248_v4 }
 0x110   : > { %v949_v19 = vpop.f32.mrf.mxu3 }
 0x111   : > { %v1217_v50 = vadd.f32 %v5206_v44, %v1205_v22  ;;  %4419 = vmatmul.msk.bf16.vlgmr.msra.gmra.mxu1 %vm463_vm0, %v2008_v9  ;;  %v2118_v22 = vrot.slane %v4443_v58, 1  ;;  %v4769_v19 = vld [vmem:[#allocation2 + $0x18] sm:$0x10] }
 0x112   : > { %2331 = vmatpush.bf16.xpose.msra.mxu1 %v5214_v20 }
 0x113   : > { %vm1225_vm9 = vcmp.ge.f32.partialorder %v1217_v50, 0.0  ;;  %v1233_v25 = vmul.f32 0.2, %v1217_v50  ;;  %4424 = vmatmul.msk.bf16.vlgmr.msra.gmra.mxu2 %vm463_vm0, %v2030_v23  ;;  %v4464_v23 = vld [vmem:[#allocation2 + $0x18] sm:$0xf] }
 0x114   : > { %2359 = vmatpush.bf16.xpose.msra.mxu2 %v5214_v20  ;;  %v4465_v36 = vor.u32 %v4769_v19, %v4464_v23  ;;  %v4489_v23 = vld [vmem:[#allocation2 + $0x40] sm:$0xf]  ;;  %v4774_v19 = vld [vmem:[#allocation2 + $0x40] sm:$0x10] }
 0x115   : > { %v1241_v41 = vsel %vm1225_vm9, %v1217_v50, %v1233_v25  ;;  %v1116_v37 = vpop.f32.mrf.mxu0  ;;  %4429 = vmatmul.msk.bf16.vlgmr.msra.gmra.mxu3 %vm463_vm0, %v2052_v11  ;;  %v2140_v11 = vrot.slane %v4448_v31, 1  ;;  %v4490_v24 = vor.u32 %v4774_v19, %v4489_v23  ;;  %v2638_v23 = vld [vmem:[#allocation2 + $0x18] sm:$0xf]  ;;  %vm2241_vm9 = vcmask 60448  }
 0x116   : > { %v1249_v39 = vpack.c.bf16 %v1241_v41, %v1241_v41  ;;  %v1208_v40 = vadd.f32 %v1116_v37, %v955_v26  ;;  %v1060_v5 = vpop.f32.mrf.mxu2  ;;  %v1034_v42 = vpop.f32.mrf.mxu1  ;;  %2387 = vmatpush.bf16.xpose.msra.mxu3 %v5214_v20  ;;  %v4460_v26 = vor.u32 %v4768_v16, %v4459_v35  ;;  %v4450_v37 = vld [vmem:[%s5723_s2 + $0x10] sm:$0x3]  ;;  %v4484_v16 = vld [vmem:[#allocation2 + $0x38] sm:$0xf] }
 0x117   : > { %v1206_v52 = vadd.f32 %v1060_v5, %v953_v27  ;;  %v791_v27 = vadd.f32 %v5166_v28, %v5128_v6 }
 0x118   : > { %v1220_v2 = vadd.f32 %v5206_v44, %v1208_v40  ;;  %4434 = vmatmul.msk.bf16.vlgmr.msrb.gmra.mxu0 %vm463_vm0, %v2074_v29  ;;  %v1088_v8 = vpop.f32.mrf.mxu3  ;;  %1258 = vst.msk [vmem:[%s5228_s22 + $0x4] sm:$0xf] %vm1256_vm8, %v1249_v39  ;;  %v4469_v29 = vld [vmem:[#allocation2 + $0x20] sm:$0xf]  ;;  %v4771_v39 = vld [vmem:[#allocation2 + $0x28] sm:$0x10]  ;;  %v807_v40 = vadd.f32 %v5173_v33, %v5135_v10 }
 0x119   : > { %v1218_v54 = vadd.f32 %v5206_v44, %v1206_v52  ;;  %v1207_v55 = vadd.f32 %v1088_v8, %v954_v34  ;;  %2415 = vmatpush.bf16.xpose.msrb.mxu0 %v5214_v20  ;;  %v4470_v47 = vor.u32 %v4770_v32, %v4469_v29  ;;  %v957_v6 = vadd.f32 %v5210_v0, %v791_v27 }
 0x11a   : > { %vm1228_vm10 = vcmp.ge.f32.partialorder %v1220_v2, 0.0  ;;  %v1236_v1 = vmul.f32 0.2, %v1220_v2  ;;  %v2317_v42 = vshll.u32 %v4460_v26, 16  ;;  %v5282_v8 = vsel %vm463_vm0, %v4450_v37, 0 }
 0x11b   : > { %vm1226_vm11 = vcmp.ge.f32.partialorder %v1218_v54, 0.0  ;;  %v1234_v15 = vmul.f32 0.2, %v1218_v54  ;;  %v1219_v62 = vadd.f32 %v5206_v44, %v1207_v55  ;;  %v958_v10 = vadd.f32 %v5218_v56, %v807_v40 }
 0x11c   : > { %v1244_v60 = vsel %vm1228_vm10, %v1220_v2, %v1236_v1  ;;  %v2345_v2 = vshll.u32 %v4465_v36, 16  ;;  %v4475_v0 = vor.u32 %v4771_v39, %v4474_v38  ;;  %v2373_v59 = vshll.u32 %v4470_v47, 16 }
 0x11d   : > { %v1252_v63 = vpack.c.bf16 %v1244_v60, %v1244_v60  ;;  %v1242_v3 = vsel %vm1226_vm11, %v1218_v54, %v1234_v15  ;;  %vm1227_vm12 = vcmp.ge.f32.partialorder %v1219_v62, 0.0  ;;  %v1235_v4 = vmul.f32 0.2, %v1219_v62  ;;  %v1118_v7 = vpop.f32.mrf.mxu0 }
 0x11e   : > { %v1250_v9 = vpack.c.bf16 %v1242_v3, %v1242_v3  ;;  %v1062_v12 = vpop.f32.mrf.mxu2  ;;  %v1144_v13 = vpop.f32.mrf.mxu1  ;;  %v2315_v54 = vshrl.u32 %v4460_v26, 16  ;;  %v2319_v55 = vrot.slane %v2317_v42, 1  ;;  %v2347_v57 = vrot.slane %v2345_v2, 1  ;;  %v4479_v3 = vld [vmem:[#allocation2 + $0x30] sm:$0xf] }
 0x11f   : > { %v1243_v17 = vsel %vm1227_vm12, %v1219_v62, %v1235_v4  ;;  %v1209_v18 = vadd.f32 %v1144_v13, %v956_v14  ;;  %1261 = vst.msk [vmem:[%s5228_s22 + $0x10] sm:$0xf] %vm1256_vm8, %v1252_v63  ;;  %v2401_v14 = vshll.u32 %v4475_v0, 16  ;;  %v2371_v1 = vshrl.u32 %v4470_v47, 16  ;;  %v4772_v4 = vld [vmem:[#allocation2 + $0x30] sm:$0x10] }
 0x120   : > { %v1251_v51 = vpack.c.bf16 %v1243_v17, %v1243_v17  ;;  %v1090_v50 = vpop.f32.mrf.mxu3  ;;  %1259 = vst.msk [vmem:[%s5228_s22 + $0x8] sm:$0xf] %vm1256_vm8, %v1250_v9  ;;  %v2375_v15 = vrot.slane %v2373_v59, 1  ;;  %v2399_v12 = vshrl.u32 %v4475_v0, 16  ;;  %v4773_v17 = vld [vmem:[#allocation2 + $0x38] sm:$0x10] }
 0x121   : > { %v1221_v25 = vadd.f32 %v5206_v44, %v1209_v18  ;;  %4439 = vmatmul.msk.bf16.vlgmr.msrb.gmra.mxu1 %vm463_vm0, %v2096_v48  ;;  %v2320_v48 = vor.u32 %v2319_v55, %v2315_v54  ;;  %v2483_v39 = vshrl.u32 %v4490_v24, 16  ;;  %v2251_v55 = vld [vmem:[#allocation2 + $0x10] sm:$0xf] }
 0x122   : > { %2443 = vmatpush.bf16.xpose.msrb.mxu1 %v5214_v20  ;;  %1260 = vst.msk [vmem:[%s5228_s22 + $0xc] sm:$0xf] %vm1256_vm8, %v1251_v51  ;;  %v2376_v18 = vor.u32 %v2375_v15, %v2371_v1  ;;  %v4485_v51 = vor.u32 %v4773_v17, %v4484_v16 }
 0x123   : > { %vm1229_vm13 = vcmp.ge.f32.partialorder %v1221_v25, 0.0  ;;  %v1237_v41 = vmul.f32 0.2, %v1221_v25  ;;  %4444 = vmatmul.msk.bf16.vlgmr.msrb.gmra.mxu2 %vm463_vm0, %v2118_v22  ;;  %v4480_v22 = vor.u32 %v4772_v4, %v4479_v3  ;;  %v2256_v3 = vld [vmem:[#allocation2 + $0x38] sm:$0xf] }
 0x124   : > { %2471 = vmatpush.bf16.xpose.msrb.mxu2 %v5214_v20  ;;  %v2457_v29 = vshll.u32 %v4485_v51, 16  ;;  %v2455_v37 = vshrl.u32 %v4485_v51, 16  ;;  %v2257_v4 = vld [vmem:[#allocation2 + $0x40] sm:$0xf] }
 0x125   : > { %v1245_v28 = vsel %vm1229_vm13, %v1221_v25, %v1237_v41  ;;  %v5277_v5 = vpop.f32.mrf.mxu0  ;;  %4449 = vmatmul.msk.bf16.vlgmr.msrb.gmra.mxu3 %vm463_vm0, %v2140_v11  ;;  %v2429_v21 = vshll.u32 %v4480_v22, 16  ;;  %v2485_v41 = vshll.u32 %v4490_v24, 16  ;;  %v2639_v51 = vld [vmem:[#allocation2 + $0x20] sm:$0xf]  ;;  %v4775_v24 = vld [vmem:[#allocation2 + $0x10] sm:$0x10] }
 0x126   : > { %v1253_v43 = vpack.c.bf16 %v1245_v28, %v1245_v28  ;;  %v1172_v34 = vpop.f32.mrf.mxu2  ;;  %v1146_v52 = vpop.f32.mrf.mxu1  ;;  %2499 = vmatpush.bf16.xpose.msrb.mxu3 %v5214_v20  ;;  %v2343_v20 = vshrl.u32 %v4465_v36, 16  ;;  %v2427_v36 = vshrl.u32 %v4480_v22, 16 }
 0x127   : > { %v1210_v33 = vadd.f32 %v1172_v34, %v957_v6  ;;  %v2431_v27 = vrot.slane %v2429_v21, 1  ;;  %v2487_v40 = vrot.slane %v2485_v41, 1  ;;  %v4500_v52 = vld [vmem:[%s5723_s2 + $0x14] sm:$0x3]  ;;  %v4512_v21 = vld [vmem:[#allocation2 + $0x10] sm:$0xf] }
 0x128   : > { %4456 = vmatmul.msk.bf16.vlgmr.msra.gmra.mxu0 %vm463_vm0, %v2289_v30  ;;  %v1200_v46 = vpop.f32.mrf.mxu3  ;;  %1262 = vst.msk [vmem:[%s5228_s22 + $0x14] sm:$0xf] %vm1256_vm8, %v1253_v43  ;;  %v2348_v9 = vor.u32 %v2347_v57, %v2343_v20  ;;  %v2459_v30 = vrot.slane %v2457_v29, 1  ;;  %v2252_v57 = vld [vmem:[#allocation2 + $0x18] sm:$0xf] }
 0x129   : > { %v1222_v49 = vadd.f32 %v5206_v44, %v1210_v33  ;;  %v1211_v53 = vadd.f32 %v1200_v46, %v958_v10  ;;  %2518 = vmatpush.bf16.xpose.msra.mxu0 %v5282_v8  ;;  %v2432_v38 = vor.u32 %v2431_v27, %v2427_v36  ;;  %v2488_v34 = vor.u32 %v2487_v40, %v2483_v39  ;;  %v2250_v10 = vld [vmem:[#allocation2 + $0x8] sm:$0xf]  ;;  %v2641_v29 = vld [vmem:[#allocation2 + $0x30] sm:$0xf]  ;;  %v2642_v39 = vld [vmem:[#allocation2 + $0x38] sm:$0xf] }
 0x12a   : > { %v2460_v42 = vor.u32 %v2459_v30, %v2455_v37  ;;  %v2651_v46 = vsel %vm463_vm0, %v4500_v52, 0  ;;  %v4513_v27 = vor.u32 %v4775_v24, %v4512_v21  ;;  %v4517_v40 = vld [vmem:[#allocation2 + $0x18] sm:$0xf]  ;;  %v2643_v52 = vld [vmem:[#allocation2 + $0x40] sm:$0xf] }
 0x12b   : > { %vm1230_vm14 = vcmp.ge.f32.partialorder %v1222_v49, 0.0  ;;  %v1238_v45 = vmul.f32 0.2, %v1222_v49  ;;  %v1223_v56 = vadd.f32 %v5206_v44, %v1211_v53  ;;  %v2403_v44 = vrot.slane %v2401_v14, 1 }
 0x12c   : > { %v2812_v37 = vshll.u32 %v4513_v27, 16 }
 0x12d   : > { %v1246_v62 = vsel %vm1230_vm14, %v1222_v49, %v1238_v45  ;;  %vm1231_vm15 = vcmp.ge.f32.partialorder %v1223_v56, 0.0  ;;  %v1239_v58 = vmul.f32 0.2, %v1223_v56  ;;  %v1324_v60 = vpop.f32.mrf.mxu0  ;;  %v2404_v50 = vor.u32 %v2403_v44, %v2399_v12  ;;  %v2253_v45 = vld [vmem:[#allocation2 + $0x20] sm:$0xf] }
 0x12e   : > { %v1254_v31 = vpack.c.bf16 %v1246_v62, %v1246_v62  ;;  %v1174_v61 = vpop.f32.mrf.mxu2  ;;  %v5291_v63 = vpop.f32.mrf.mxu1  ;;  %v2637_v12 = vld [vmem:[#allocation2 + $0x10] sm:$0xf] }
 0x12f   : > { %v1247_v7 = vsel %vm1231_vm15, %v1223_v56, %v1239_v58  ;;  %v2254_v56 = vld [vmem:[#allocation2 + $0x28] sm:$0xf] }
 0x130   : > { %v1255_v13 = vpack.c.bf16 %v1247_v7, %v1247_v7  ;;  %v1202_v35 = vpop.f32.mrf.mxu3  ;;  %1263 = vst.msk [vmem:[%s5228_s22 + $0x18] sm:$0xf] %vm1256_vm8, %v1254_v31  ;;  %v2255_v31 = vld [vmem:[#allocation2 + $0x30] sm:$0xf]  ;;  %v4509_v7 = vld [vmem:[%s5723_s2 + $0x16] sm:$0x3] }
 0x131   : > { %4461 = vmatmul.msk.bf16.vlgmr.msra.gmra.mxu1 %vm463_vm0, %v2320_v48  ;;  %v2820_v35 = vsel %vm463_vm0, %v4509_v7, 0 }
 0x132   : > { %2534 = vmatpush.bf16.xpose.msra.mxu1 %v5282_v8  ;;  %1264 = vst.msk [vmem:[%s5228_s22 + $0x1c] sm:$0xf] %vm1256_vm8, %v1255_v13 }
 0x133   : > { %4466 = vmatmul.msk.bf16.vlgmr.msra.gmra.mxu2 %vm463_vm0, %v2348_v9 }
 0x134   : > { %2550 = vmatpush.bf16.xpose.msra.mxu2 %v5282_v8 }
 0x135   : > { %v5301_v11 = vpop.f32.mrf.mxu0  ;;  %4471 = vmatmul.msk.bf16.vlgmr.msra.gmra.mxu3 %vm463_vm0, %v2376_v18 }
 0x136   : > { %v5304_v25 = vpop.f32.mrf.mxu2  ;;  %v1346_v26 = vpop.f32.mrf.mxu1  ;;  %2566 = vmatpush.bf16.xpose.msra.mxu3 %v5282_v8 }
 0x138   : > { %4476 = vmatmul.msk.bf16.vlgmr.msrb.gmra.mxu0 %vm463_vm0, %v2404_v50  ;;  %v1388_v32 = vpop.f32.mrf.mxu3  ;;  %v2640_v50 = vld [vmem:[#allocation2 + $0x28] sm:$0xf] }
 0x139   : > { %2582 = vmatpush.bf16.xpose.msrb.mxu0 %v5282_v8 }
 0x13d   : > { %v1412_v47 = vpop.f32.mrf.mxu0 }
 0x13e   : > { %v1368_v6 = vpop.f32.mrf.mxu2  ;;  %v5309_v28 = vpop.f32.mrf.mxu1 }
 0x13f   : > { %v4776_v6 = vld [vmem:[#allocation2 + $0x18] sm:$0x10] }
 0x140   : > { %v1390_v43 = vpop.f32.mrf.mxu3 }
 0x141   : > { %4481 = vmatmul.msk.bf16.vlgmr.msrb.gmra.mxu1 %vm463_vm0, %v2432_v38  ;;  %v2814_v43 = vrot.slane %v2812_v37, 1 }
 0x142   : > { %2598 = vmatpush.bf16.xpose.msrb.mxu1 %v5282_v8 }
 0x143   : > { %4486 = vmatmul.msk.bf16.vlgmr.msrb.gmra.mxu2 %vm463_vm0, %v2460_v42  ;;  %v2810_v42 = vshrl.u32 %v4513_v27, 16 }
 0x144   : > { %2614 = vmatpush.bf16.xpose.msrb.mxu2 %v5282_v8 }
 0x145   : > { %v5318_v2 = vpop.f32.mrf.mxu0  ;;  %4491 = vmatmul.msk.bf16.vlgmr.msrb.gmra.mxu3 %vm463_vm0, %v2488_v34 }
 0x146   : > { %v5321_v33 = vpop.f32.mrf.mxu2  ;;  %v1434_v0 = vpop.f32.mrf.mxu1  ;;  %2630 = vmatpush.bf16.xpose.msrb.mxu3 %v5282_v8 }
 0x147   : > { %v4777_v0 = vld [vmem:[#allocation2 + $0x20] sm:$0x10] }
 0x148   : > { %4492 = vmatmul.msk.bf16.vlgmr.msra.gmra.mxu0 %vm463_vm0, %v2250_v10  ;;  %v5326_v59 = vpop.f32.mrf.mxu3  ;;  %v4522_v10 = vld [vmem:[#allocation2 + $0x20] sm:$0xf] }
 0x149   : > { %2660 = vmatpush.bf16.xpose.msra.mxu0 %v2651_v46 }
 0x14d   : > { %v1509_v49 = vpop.f32.mrf.mxu0 }
 0x14e   : > { %v1456_v53 = vpop.f32.mrf.mxu2  ;;  %v5328_v54 = vpop.f32.mrf.mxu1  ;;  %v1508_v49 = vadd.f32 %v5318_v2, %v5277_v5 }
 0x14f   : > { %v2644_v53 = vld [vmem:[#allocation2 + $0x48] sm:$0xf] }
 0x150   : > { %v1478_v20 = vpop.f32.mrf.mxu3 }
 0x151   : > { %4493 = vmatmul.msk.bf16.vlgmr.msra.gmra.mxu1 %vm463_vm0, %v2251_v55  ;;  %v4527_v55 = vld [vmem:[#allocation2 + $0x28] sm:$0xf]  ;;  %v4778_v20 = vld [vmem:[#allocation2 + $0x28] sm:$0x10] }
 0x152   : > { %2676 = vmatpush.bf16.xpose.msra.mxu1 %v2651_v46 }
 0x153   : > { %4494 = vmatmul.msk.bf16.vlgmr.msra.gmra.mxu2 %vm463_vm0, %v2252_v57  ;;  %v4523_v57 = vor.u32 %v4777_v0, %v4522_v10  ;;  %v4781_v0 = vld [vmem:[#allocation2 + $0x40] sm:$0x10] }
 0x154   : > { %2692 = vmatpush.bf16.xpose.msra.mxu2 %v2651_v46 }
 0x155   : > { %v5332_v8 = vpop.f32.mrf.mxu0  ;;  %4495 = vmatmul.msk.bf16.vlgmr.msra.gmra.mxu3 %vm463_vm0, %v2253_v45  ;;  %v4551_v45 = vld [vmem:[%s5723_s2 + $0x1a] sm:$0x3] }
 0x156   : > { %v5335_v14 = vpop.f32.mrf.mxu2  ;;  %v1537_v1 = vpop.f32.mrf.mxu1  ;;  %2708 = vmatpush.bf16.xpose.msra.mxu3 %v2651_v46  ;;  %v5384_v7 = vsel %vm463_vm0, %v4551_v45, 0 }
 0x157   : > { %v5378_v1 = vld [vmem:[%s5724_s3] ss:$0 sm:$0xff]  ;;  %v1564_v45 = vadd.f32 %v5335_v14, %v5304_v25 }
 0x158   : > { %4496 = vmatmul.msk.bf16.vlgmr.msrb.gmra.mxu0 %vm463_vm0, %v2254_v56  ;;  %v1591_v15 = vpop.f32.mrf.mxu3 }
 0x159   : > { %v5338_v62 = vadd.f32 %v1591_v15, %v1388_v32  ;;  %2724 = vmatpush.bf16.xpose.msrb.mxu0 %v2651_v46  ;;  %v2815_v15 = vor.u32 %v2814_v43, %v2810_v42  ;;  %v4537_v42 = vld [vmem:[#allocation2 + $0x38] sm:$0xf]  ;;  %v4780_v43 = vld [vmem:[#allocation2 + $0x38] sm:$0x10] }
 0x15d   : > { %v1621_v58 = vpop.f32.mrf.mxu0 }
 0x15e   : > { %v1565_v60 = vpop.f32.mrf.mxu2  ;;  %v5340_v48 = vpop.f32.mrf.mxu1  ;;  %v4528_v58 = vor.u32 %v4778_v20, %v4527_v55  ;;  %v1620_v55 = vadd.f32 %v5332_v8, %v5301_v11  ;;  %v4547_v20 = vld [vmem:[#allocation2 + $0x48] sm:$0xf] }
 0x15f   : > { %v4532_v60 = vld [vmem:[#allocation2 + $0x30] sm:$0xf] }
 0x160   : > { %v1593_v61 = vpop.f32.mrf.mxu3 }
 0x161   : > { %4497 = vmatmul.msk.bf16.vlgmr.msrb.gmra.mxu1 %vm463_vm0, %v2255_v31  ;;  %v4779_v31 = vld [vmem:[#allocation2 + $0x30] sm:$0x10] }
 0x162   : > { %2740 = vmatpush.bf16.xpose.msrb.mxu1 %v2651_v46 }
 0x163   : > { %4498 = vmatmul.msk.bf16.vlgmr.msrb.gmra.mxu2 %vm463_vm0, %v2256_v3 }
 0x164   : > { %2756 = vmatpush.bf16.xpose.msrb.mxu2 %v2651_v46 }
 0x165   : > { %v1752_v9 = vpop.f32.mrf.mxu0  ;;  %4499 = vmatmul.msk.bf16.vlgmr.msrb.gmra.mxu3 %vm463_vm0, %v2257_v4 }
 0x166   : > { %v5348_v44 = vpop.f32.mrf.mxu2  ;;  %v1649_v13 = vpop.f32.mrf.mxu1  ;;  %2772 = vmatpush.bf16.xpose.msrb.mxu3 %v2651_v46  ;;  %v4518_v46 = vor.u32 %v4776_v6, %v4517_v40  ;;  %v1952_v56 = vadd.f32 %v1752_v9, %v1508_v49  ;;  %v2871_v9 = vshll.u32 %v4523_v57, 16 }
 0x168   : > { %4501 = vmatmul.msk.bf16.vlgmr.msra.gmra.mxu0 %vm463_vm0, %v2637_v12  ;;  %v5352_v16 = vpop.f32.mrf.mxu3  ;;  %v2843_v2 = vshll.u32 %v4518_v46, 16  ;;  %v2873_v21 = vrot.slane %v2871_v9, 1 }
 0x169   : > { %2829 = vmatpush.bf16.xpose.msra.mxu0 %v2820_v35 }
 0x16d   : > { %v1754_v17 = vpop.f32.mrf.mxu0 }
 0x16e   : > { %v1677_v18 = vpop.f32.mrf.mxu2  ;;  %v5354_v22 = vpop.f32.mrf.mxu1  ;;  %v4533_v17 = vor.u32 %v4779_v31, %v4532_v60 }
 0x16f   : > { %v2841_v18 = vshrl.u32 %v4518_v46, 16 }
 0x170   : > { %v1705_v19 = vpop.f32.mrf.mxu3 }
 0x171   : > { %4502 = vmatmul.msk.bf16.vlgmr.msra.gmra.mxu1 %vm463_vm0, %v2638_v23  ;;  %v2845_v23 = vrot.slane %v2843_v2, 1  ;;  %v2899_v19 = vshll.u32 %v4528_v58, 16 }
 0x172   : > { %2857 = vmatpush.bf16.xpose.msra.mxu1 %v2820_v35 }
 0x173   : > { %4503 = vmatmul.msk.bf16.vlgmr.msra.gmra.mxu2 %vm463_vm0, %v2639_v51  ;;  %v1536_v51 = vadd.f32 %v5328_v54, %v5291_v63 }
 0x174   : > { %2885 = vmatpush.bf16.xpose.msra.mxu2 %v2820_v35 }
 0x175   : > { %v5358_v26 = vpop.f32.mrf.mxu0  ;;  %4504 = vmatmul.msk.bf16.vlgmr.msra.gmra.mxu3 %vm463_vm0, %v2640_v50  ;;  %v2869_v50 = vshrl.u32 %v4523_v57, 16  ;;  %v1953_v24 = vadd.f32 %v5354_v22, %v1536_v51  ;;  %v4542_v22 = vld [vmem:[#allocation2 + $0x40] sm:$0xf]  ;;  %v4782_v57 = vld [vmem:[#allocation2 + $0x48] sm:$0x10] }
 0x176   : > { %v5361_v32 = vpop.f32.mrf.mxu2  ;;  %v1782_v36 = vpop.f32.mrf.mxu1  ;;  %2913 = vmatpush.bf16.xpose.msra.mxu3 %v2820_v35  ;;  %v4548_v31 = vor.u32 %v4782_v57, %v4547_v20  ;;  %v1704_v57 = vadd.f32 %v5352_v16, %v5326_v59 }
 0x177   : > { %v2927_v36 = vshll.u32 %v4533_v17, 16  ;;  %v2874_v54 = vor.u32 %v2873_v21, %v2869_v50 }
 0x178   : > { %4505 = vmatmul.msk.bf16.vlgmr.msrb.gmra.mxu0 %vm463_vm0, %v2641_v29  ;;  %v5364_v41 = vpop.f32.mrf.mxu3 }
 0x179   : > { %2941 = vmatpush.bf16.xpose.msrb.mxu0 %v2820_v35  ;;  %v2929_v10 = vrot.slane %v2927_v36, 1 }
 0x17d   : > { %v1866_v30 = vpop.f32.mrf.mxu0 }
 0x17e   : > { %v1810_v47 = vpop.f32.mrf.mxu2  ;;  %v5366_v38 = vpop.f32.mrf.mxu1  ;;  %v2846_v30 = vor.u32 %v2845_v23, %v2841_v18 }
 0x17f   : > { %v2897_v47 = vshrl.u32 %v4528_v58, 16  ;;  %v1954_v58 = vadd.f32 %v5361_v32, %v1564_v45 }
 0x180   : > { %v1838_v34 = vpop.f32.mrf.mxu3 }
 0x181   : > { %4506 = vmatmul.msk.bf16.vlgmr.msrb.gmra.mxu1 %vm463_vm0, %v2642_v39  ;;  %v2901_v39 = vrot.slane %v2899_v19, 1 }
 0x182   : > { %2969 = vmatpush.bf16.xpose.msrb.mxu1 %v2820_v35 }
 0x183   : > { %4507 = vmatmul.msk.bf16.vlgmr.msrb.gmra.mxu2 %vm463_vm0, %v2643_v52  ;;  %v2925_v52 = vshrl.u32 %v4533_v17, 16  ;;  %v2902_v49 = vor.u32 %v2901_v39, %v2897_v47 }
 0x184   : > { %2997 = vmatpush.bf16.xpose.msrb.mxu2 %v2820_v35 }
 0x185   : > { %v1999_v5 = vpop.f32.mrf.mxu0  ;;  %4508 = vmatmul.msk.bf16.vlgmr.msrb.gmra.mxu3 %vm463_vm0, %v2644_v53  ;;  %v4538_v53 = vor.u32 %v4780_v43, %v4537_v42  ;;  %v2930_v2 = vor.u32 %v2929_v10, %v2925_v52  ;;  %v4554_v42 = vld [vmem:[#allocation2 + $0x8] sm:$0xe]  ;;  %v4791_v43 = vld [vmem:[#allocation2 + $0x8] sm:$0x10] }
 0x186   : > { %v2157_v61 = vadd.f32 %v1999_v5, %v1952_v56  ;;  %v5381_v3 = vpop.f32.mrf.mxu2  ;;  %v1894_v4 = vpop.f32.mrf.mxu1  ;;  %3025 = vmatpush.bf16.xpose.msrb.mxu3 %v2820_v35  ;;  %v1956_v5 = vadd.f32 %v5358_v26, %v1620_v55  ;;  %v1955_v26 = vadd.f32 %v5364_v41, %v5338_v62  ;;  %v1648_v62 = vadd.f32 %v5340_v48, %v5309_v28  ;;  %v4550_v55 = vld [vmem:[%s5723_s2 + $0x18] sm:$0x3] }
 0x187   : > { %v2955_v60 = vshll.u32 %v4538_v53, 16  ;;  %v2953_v18 = vshrl.u32 %v4538_v53, 16 }
 0x188   : > { %v2169_v12 = vadd.f32 %v5378_v1, %v2157_v61  ;;  %4514 = vmatmul.msk.bf16.vlgmr.msra.gmra.mxu0 %vm463_vm0, %v2815_v15  ;;  %v5388_v13 = vpop.f32.mrf.mxu3  ;;  %v4543_v15 = vor.u32 %v4781_v0, %v4542_v22  ;;  %v1957_v36 = vadd.f32 %v5366_v38, %v1648_v62  ;;  %v4555_v38 = vor.u32 %v4791_v43, %v4554_v42  ;;  %v4796_v42 = vld [vmem:[#allocation2 + $0x30] sm:$0x10] }
 0x189   : > { %3179 = vmatpush.bf16.xpose.msra.mxu0 %v5384_v7  ;;  %v2957_v51 = vrot.slane %v2955_v60, 1  ;;  %v1959_v59 = vadd.f32 %v5388_v13, %v1704_v57  ;;  %v4564_v60 = vld [vmem:[#allocation2 + $0x18] sm:$0xe] }
 0x18a   : > { %vm2177_vm1 = vcmp.ge.f32.partialorder %v2169_v12, 0.0  ;;  %v2185_v35 = vmul.f32 0.2, %v2169_v12  ;;  %v2981_v50 = vshrl.u32 %v4543_v15, 16  ;;  %v3165_v20 = vrot.slane %v4555_v38, 1 }
 0x18c   : > { %v2193_v29 = vsel %vm2177_vm1, %v2169_v12, %v2185_v35  ;;  %v2983_v12 = vshll.u32 %v4543_v15, 16  ;;  %v3011_v35 = vshll.u32 %v4548_v31, 16 }
 0x18d   : > { %v2001_v27 = vpop.f32.mrf.mxu0  ;;  %v2201_v37 = vpack.c.bf16 %v2193_v29, %v2193_v29 }
 0x18e   : > { %v1922_v40 = vpop.f32.mrf.mxu2  ;;  %v2021_v6 = vpop.f32.mrf.mxu1  ;;  %v2985_v29 = vrot.slane %v2983_v12, 1 }
 0x18f   : > { %2217 = vrot.lane.b32.xlu0 %v2201_v37, %s4878_s6  ;;  %v2158_v63 = vadd.f32 %v2021_v6, %v1953_v24  ;;  %v3009_v37 = vshrl.u32 %v4548_v31, 16  ;;  %v2958_v40 = vor.u32 %v2957_v51, %v2953_v18  ;;  %v3013_v6 = vrot.slane %v3011_v35, 1  ;;  %v4793_v31 = vld [vmem:[#allocation2 + $0x18] sm:$0x10]  ;;  %v4795_v51 = vld [vmem:[#allocation2 + $0x28] sm:$0x10] }
 0x190   : > { %v1950_v34 = vpop.f32.mrf.mxu3  ;;  %v2986_v52 = vor.u32 %v2985_v29, %v2981_v50 }
 0x191   : > { %v2170_v46 = vadd.f32 %v5378_v1, %v2158_v63  ;;  %4519 = vmatmul.msk.bf16.vlgmr.msra.gmra.mxu1 %vm463_vm0, %v2846_v30  ;;  %v3014_v0 = vor.u32 %v3013_v6, %v3009_v37  ;;  %v4579_v6 = vld [vmem:[#allocation2 + $0x30] sm:$0xe] }
 0x192   : > { %3201 = vmatpush.bf16.xpose.msra.mxu1 %v5384_v7 }
 0x193   : > { %v2186_v56 = vmul.f32 0.2, %v2170_v46  ;;  %4524 = vmatmul.msk.bf16.vlgmr.msra.gmra.mxu2 %vm463_vm0, %v2874_v54  ;;  %vm2178_vm2 = vcmp.ge.f32.partialorder %v2170_v46, 0.0 }
 0x194   : > { %3223 = vmatpush.bf16.xpose.msra.mxu2 %v5384_v7 }
 0x195   : > { %v2087_v11 = vpop.f32.mrf.mxu0  ;;  %4529 = vmatmul.msk.bf16.vlgmr.msra.gmra.mxu3 %vm463_vm0, %v2902_v49  ;;  %v2194_v8 = vsel %vm2178_vm2, %v2170_v46, %v2186_v56  ;;  %v1676_v46 = vadd.f32 %v5348_v44, %v5321_v33  ;;  %vm3115_vm2 = vcmask 93248  }
 0x196   : > { %v2161_v61 = vadd.f32 %v2087_v11, %v1956_v5  ;;  %v2043_v25 = vpop.f32.mrf.mxu2  ;;  %v2023_v14 = vpop.f32.mrf.mxu1  ;;  %v2202_v4 = vpack.c.bf16 %v2194_v8, %v2194_v8  ;;  %3245 = vmatpush.bf16.xpose.msra.mxu3 %v5384_v7  ;;  %v4792_v11 = vld [vmem:[#allocation2 + $0x10] sm:$0x10]  ;;  %v5439_v8 = vsel %vm463_vm0, %v4550_v55, 0  ;;  %v4599_v55 = vld [vmem:[#allocation2 + $0x10] sm:$0xf] }
 0x197   : > { %v2159_v9 = vadd.f32 %v2043_v25, %v1954_v58  ;;  %v1958_v45 = vadd.f32 %v5381_v3, %v1676_v46  ;;  %v4559_v58 = vld [vmem:[#allocation2 + $0x10] sm:$0xe] }
 0x198   : > { %v2173_v17 = vadd.f32 %v5378_v1, %v2161_v61  ;;  %4534 = vmatmul.msk.bf16.vlgmr.msrb.gmra.mxu0 %vm463_vm0, %v2930_v2  ;;  %v2065_v32 = vpop.f32.mrf.mxu3  ;;  %2219 = vrot.lane.b32.xlu0 %v2202_v4, %s4878_s6  ;;  %v4560_v14 = vor.u32 %v4792_v11, %v4559_v58  ;;  %v4794_v4 = vld [vmem:[#allocation2 + $0x20] sm:$0x10]  ;;  %v4609_v11 = vld [vmem:[#allocation2 + $0x20] sm:$0xf] }
 0x199   : > { %v2171_v23 = vadd.f32 %v5378_v1, %v2159_v9  ;;  %v2160_v19 = vadd.f32 %v2065_v32, %v1955_v26  ;;  %3267 = vmatpush.bf16.xpose.msrb.mxu0 %v5384_v7  ;;  %v4565_v9 = vor.u32 %v4793_v31, %v4564_v60 }
 0x19a   : > { %vm2181_vm3 = vcmp.ge.f32.partialorder %v2173_v17, 0.0  ;;  %v2189_v41 = vmul.f32 0.2, %v2173_v17 }
 0x19b   : > { %v2172_v21 = vadd.f32 %v5378_v1, %v2160_v19  ;;  %vm2179_vm4 = vcmp.ge.f32.partialorder %v2171_v23, 0.0  ;;  %v2187_v24 = vmul.f32 0.2, %v2171_v23  ;;  %v3190_v19 = vrot.slane %v4560_v14, 1  ;;  %v4614_v14 = vld [vmem:[#allocation2 + $0x28] sm:$0xf] }
 0x19c   : > { %v2197_v27 = vsel %vm2181_vm3, %v2173_v17, %v2189_v41  ;;  %v4574_v17 = vld [vmem:[#allocation2 + $0x28] sm:$0xe] }
 0x19d   : > { %v2089_v30 = vpop.f32.mrf.mxu0  ;;  %v2205_v47 = vpack.c.bf16 %v2197_v27, %v2197_v27  ;;  %v2195_v39 = vsel %vm2179_vm4, %v2171_v23, %v2187_v24  ;;  %v2188_v54 = vmul.f32 0.2, %v2172_v21  ;;  %vm2180_vm5 = vcmp.ge.f32.partialorder %v2172_v21, 0.0 }
 0x19e   : > { %v2045_v28 = vpop.f32.mrf.mxu2  ;;  %v2203_v48 = vpack.c.bf16 %v2195_v39, %v2195_v39  ;;  %v2109_v63 = vpop.f32.mrf.mxu1  ;;  %v4594_v30 = vld [vmem:[#allocation2 + $0x8] sm:$0xf] }
 0x19f   : > { %2225 = vrot.lane.b32.xlu2 %v2205_v47, %s4878_s6  ;;  %v2162_v34 = vadd.f32 %v2109_v63, %v1957_v36  ;;  %v2196_v53 = vsel %vm2180_vm5, %v2172_v21, %v2188_v54  ;;  %v3212_v21 = vrot.slane %v4565_v9, 1  ;;  %v4783_v47 = vld [vmem:[#allocation2 + $0x8] sm:$0x10]  ;;  %v4584_v28 = vld [vmem:[#allocation2 + $0x38] sm:$0xe]  ;;  %v4580_v54 = vor.u32 %v4796_v42, %v4579_v6 }
 0x1a0   : > { %v2067_v10 = vpop.f32.mrf.mxu3  ;;  %2221 = vrot.lane.b32.xlu1 %v2203_v48, %s4878_s6  ;;  %v2204_v15 = vpack.c.bf16 %v2196_v53, %v2196_v53  ;;  %v4797_v48 = vld [vmem:[#allocation2 + $0x38] sm:$0x10]  ;;  %v4595_v63 = vor.u32 %v4783_v47, %v4594_v30  ;;  %v4624_v6 = vld [vmem:[#allocation2 + $0x38] sm:$0xf] }
 0x1a1   : > { %v2174_v22 = vadd.f32 %v5378_v1, %v2162_v34  ;;  %4539 = vmatmul.msk.bf16.vlgmr.msrb.gmra.mxu1 %vm463_vm0, %v2958_v40  ;;  %v4589_v34 = vld [vmem:[#allocation2 + $0x40] sm:$0xe]  ;;  %v4585_v10 = vor.u32 %v4797_v48, %v4584_v28  ;;  %v4789_v42 = vld [vmem:[#allocation2 + $0x38] sm:$0x10] }
 0x1a2   : > { %3289 = vmatpush.bf16.xpose.msrb.mxu1 %v5384_v7  ;;  %v3347_v38 = vshll.u32 %v4595_v63, 16 }
 0x1a3   : > { %v2190_v49 = vmul.f32 0.2, %v2174_v22  ;;  %4544 = vmatmul.msk.bf16.vlgmr.msrb.gmra.mxu2 %vm463_vm0, %v2986_v52  ;;  %vm2182_vm6 = vcmp.ge.f32.partialorder %v2174_v22, 0.0  ;;  %v4798_v52 = vld [vmem:[#allocation2 + $0x40] sm:$0x10]  ;;  %v3300_v57 = vrot.slane %v4585_v10, 1 }
 0x1a4   : > { %3311 = vmatpush.bf16.xpose.msrb.mxu2 %v5384_v7  ;;  %v4590_v46 = vor.u32 %v4798_v52, %v4589_v34  ;;  %v4625_v34 = vor.u32 %v4789_v42, %v4624_v6 }
 0x1a5   : > { %v5434_v56 = vpop.f32.mrf.mxu0  ;;  %4549 = vmatmul.msk.bf16.vlgmr.msrb.gmra.mxu3 %vm463_vm0, %v3014_v0  ;;  %v2198_v33 = vsel %vm2182_vm6, %v2174_v22, %v2190_v49  ;;  %v3278_v0 = vrot.slane %v4580_v54, 1  ;;  %v4790_v54 = vld [vmem:[#allocation2 + $0x40] sm:$0x10] }
 0x1a6   : > { %v2131_v44 = vpop.f32.mrf.mxu2  ;;  %v2111_v5 = vpop.f32.mrf.mxu1  ;;  %v2206_v2 = vpack.c.bf16 %v2198_v33, %v2198_v33  ;;  %3333 = vmatpush.bf16.xpose.msrb.mxu3 %v5384_v7  ;;  %v4569_v7 = vld [vmem:[#allocation2 + $0x20] sm:$0xe]  ;;  %v3345_v33 = vshrl.u32 %v4595_v63, 16 }
 0x1a7   : > { %v2163_v16 = vadd.f32 %v2131_v44, %v1958_v45  ;;  %v4570_v12 = vor.u32 %v4794_v4, %v4569_v7  ;;  %v3349_v44 = vrot.slane %v3347_v38, 1  ;;  %v4785_v5 = vld [vmem:[#allocation2 + $0x18] sm:$0x10]  ;;  %v4787_v7 = vld [vmem:[#allocation2 + $0x28] sm:$0x10] }
 0x1a8   : > { %4556 = vmatmul.msk.bf16.vlgmr.msra.gmra.mxu0 %vm463_vm0, %v3165_v20  ;;  %v2153_v3 = vpop.f32.mrf.mxu3  ;;  %2223 = vrot.lane.b32.xlu1 %v2204_v15, %s4878_s6  ;;  %v4784_v20 = vld [vmem:[#allocation2 + $0x10] sm:$0x10]  ;;  %v4604_v15 = vld [vmem:[#allocation2 + $0x18] sm:$0xf]  ;;  %v4629_v63 = vld [vmem:[#allocation2 + $0x40] sm:$0xf] }
 0x1a9   : > { %v2175_v61 = vadd.f32 %v5378_v1, %v2163_v16  ;;  %v2164_v25 = vadd.f32 %v2153_v3, %v1959_v59  ;;  %2227 = vrot.lane.b32.xlu2 %v2206_v2, %s4878_s6  ;;  %3364 = vmatpush.bf16.xpose.msra.mxu0 %v5439_v8  ;;  %v3234_v36 = vrot.slane %v4570_v12, 1  ;;  %v3322_v2 = vrot.slane %v4590_v46, 1  ;;  %v4786_v59 = vld [vmem:[#allocation2 + $0x20] sm:$0x10]  ;;  %v4632_v3 = vld [vmem:[%s5723_s2 + $0x1c] sm:$0x3] }
 0x1aa   : > { %v4600_v58 = vor.u32 %v4784_v20, %v4599_v55  ;;  %v4605_v16 = vor.u32 %v4785_v5, %v4604_v15  ;;  %v3350_v60 = vor.u32 %v3349_v44, %v3345_v33  ;;  %v4799_v46 = vld [vmem:[#allocation2 + $0x10] sm:$0x10]  ;;  %v3518_v20 = vshll.u32 %v4625_v34, 16 }
 0x1ab   : > { %v2191_v26 = vmul.f32 0.2, %v2175_v61  ;;  %v2176_v13 = vadd.f32 %v5378_v1, %v2164_v25  ;;  %vm2183_vm7 = vcmp.ge.f32.partialorder %v2175_v61, 0.0  ;;  %v4575_v1 = vor.u32 %v4795_v51, %v4574_v17 }
 0x1ac   : > { %v4610_v25 = vor.u32 %v4786_v59, %v4609_v11  ;;  %v3406_v9 = vshll.u32 %v4605_v16, 16  ;;  %v4615_v17 = vor.u32 %v4787_v7, %v4614_v14  ;;  %v3516_v5 = vshrl.u32 %v4625_v34, 16  ;;  %v4800_v14 = vld [vmem:[#allocation2 + $0x18] sm:$0x10] }
 0x1ad   : > { %v2192_v32 = vmul.f32 0.2, %v2176_v13  ;;  %v2307_v18 = vpop.f32.mrf.mxu0  ;;  %vm2184_vm8 = vcmp.ge.f32.partialorder %v2176_v13, 0.0  ;;  %v2199_v23 = vsel %vm2183_vm7, %v2175_v61, %v2191_v26  ;;  %v3256_v27 = vrot.slane %v4575_v1, 1  ;;  %v4619_v1 = vld [vmem:[#allocation2 + $0x30] sm:$0xf] }
 0x1ae   : > { %v2133_v35 = vpop.f32.mrf.mxu2  ;;  %v5448_v62 = vpop.f32.mrf.mxu1  ;;  %v2207_v41 = vpack.c.bf16 %v2199_v23, %v2199_v23  ;;  %v3378_v61 = vshll.u32 %v4600_v58, 16  ;;  %v3434_v23 = vshll.u32 %v4610_v25, 16  ;;  %v3408_v51 = vrot.slane %v3406_v9, 1 }
 0x1af   : > { %v2200_v50 = vsel %vm2184_vm8, %v2176_v13, %v2192_v32  ;;  %v5482_v13 = vsel %vm463_vm0, %v4632_v3, 0  ;;  %v3376_v32 = vshrl.u32 %v4600_v58, 16  ;;  %v3462_v35 = vshll.u32 %v4615_v17, 16 }
 0x1b0   : > { %v2155_v24 = vpop.f32.mrf.mxu3  ;;  %v2208_v29 = vpack.c.bf16 %v2200_v50, %v2200_v50  ;;  %2229 = vrot.lane.b32.xlu0 %v2207_v41, %s4878_s6  ;;  %v3380_v18 = vrot.slane %v3378_v61, 1  ;;  %v3460_v47 = vshrl.u32 %v4615_v17, 16 }
 0x1b1   : > { %4561 = vmatmul.msk.bf16.vlgmr.msra.gmra.mxu1 %vm463_vm0, %v3190_v19  ;;  %v3404_v19 = vshrl.u32 %v4605_v16, 16 }
 0x1b2   : > { %2231 = vrot.lane.b32.xlu1 %v2208_v29, %s4878_s6  ;;  %3392 = vmatpush.bf16.xpose.msra.mxu1 %v5439_v8  ;;  %v3381_v50 = vor.u32 %v3380_v18, %v3376_v32  ;;  %v4645_v32 = vld [vmem:[#allocation2 + $0x20] sm:$0xf]  ;;  %v4801_v18 = vld [vmem:[#allocation2 + $0x20] sm:$0x10] }
 0x1b3   : > { %4566 = vmatmul.msk.bf16.vlgmr.msra.gmra.mxu2 %vm463_vm0, %v3212_v21  ;;  %v3436_v21 = vrot.slane %v3434_v23, 1 }
 0x1b4   : > { %3420 = vmatpush.bf16.xpose.msra.mxu2 %v5439_v8 }
 0x1b5   : > { %v5456_v37 = vpop.f32.mrf.mxu0  ;;  %4571 = vmatmul.msk.bf16.vlgmr.msra.gmra.mxu3 %vm463_vm0, %v3234_v36  ;;  %v4788_v36 = vld [vmem:[#allocation2 + $0x30] sm:$0x10] }
 0x1b6   : > { %v5459_v39 = vpop.f32.mrf.mxu2  ;;  %v2335_v40 = vpop.f32.mrf.mxu1  ;;  %3448 = vmatpush.bf16.xpose.msra.mxu3 %v5439_v8  ;;  %v4620_v48 = vor.u32 %v4788_v36, %v4619_v1  ;;  %v4655_v36 = vld [vmem:[#allocation2 + $0x30] sm:$0xf] }
 0x1b7   : > { %v3464_v40 = vrot.slane %v3462_v35, 1  ;;  %v4802_v35 = vld [vmem:[#allocation2 + $0x28] sm:$0x10] }
 0x1b8   : > { %4576 = vmatmul.msk.bf16.vlgmr.msrb.gmra.mxu0 %vm463_vm0, %v3256_v27  ;;  %v5463_v43 = vpop.f32.mrf.mxu3  ;;  %v3409_v27 = vor.u32 %v3408_v51, %v3404_v19  ;;  %v3490_v38 = vshll.u32 %v4620_v48, 16  ;;  %v3488_v33 = vshrl.u32 %v4620_v48, 16  ;;  %v4650_v51 = vld [vmem:[#allocation2 + $0x28] sm:$0xf] }
 0x1b9   : > { %3476 = vmatpush.bf16.xpose.msrb.mxu0 %v5439_v8  ;;  %v3465_v52 = vor.u32 %v3464_v40, %v3460_v47  ;;  %v4651_v1 = vor.u32 %v4802_v35, %v4650_v51 }
 0x1ba   : > { %v3492_v44 = vrot.slane %v3490_v38, 1 }
 0x1bc   : > { %v3493_v59 = vor.u32 %v3492_v44, %v3488_v33  ;;  %v4804_v33 = vld [vmem:[#allocation2 + $0x38] sm:$0x10] }
 0x1bd   : > { %v2419_v22 = vpop.f32.mrf.mxu0 }
 0x1be   : > { %v2363_v49 = vpop.f32.mrf.mxu2  ;;  %v5466_v53 = vpop.f32.mrf.mxu1  ;;  %v4630_v22 = vor.u32 %v4790_v54, %v4629_v63  ;;  %v3679_v54 = vshll.u32 %v4651_v1, 16 }
 0x1c0   : > { %v2391_v45 = vpop.f32.mrf.mxu3  ;;  %v3546_v15 = vshll.u32 %v4630_v22, 16  ;;  %v3544_v16 = vshrl.u32 %v4630_v22, 16 }
 0x1c1   : > { %4581 = vmatmul.msk.bf16.vlgmr.msrb.gmra.mxu1 %vm463_vm0, %v3278_v0  ;;  %v4635_v0 = vld [vmem:[#allocation2 + $0x10] sm:$0xf] }
 0x1c2   : > { %3504 = vmatpush.bf16.xpose.msrb.mxu1 %v5439_v8  ;;  %v4636_v45 = vor.u32 %v4799_v46, %v4635_v0  ;;  %v3548_v3 = vrot.slane %v3546_v15, 1  ;;  %v3681_v46 = vrot.slane %v3679_v54, 1 }
 0x1c3   : > { %4586 = vmatmul.msk.bf16.vlgmr.msrb.gmra.mxu2 %vm463_vm0, %v3300_v57 }
 0x1c4   : > { %3532 = vmatpush.bf16.xpose.msrb.mxu2 %v5439_v8  ;;  %v3592_v58 = vshll.u32 %v4636_v45, 16  ;;  %v3590_v9 = vshrl.u32 %v4636_v45, 16  ;;  %v3549_v23 = vor.u32 %v3548_v3, %v3544_v16  ;;  %v4660_v45 = vld [vmem:[#allocation2 + $0x38] sm:$0xf]  ;;  %v4670_v3 = vld [vmem:[#allocation2 + $0x48] sm:$0xf] }
 0x1c5   : > { %v5475_v31 = vpop.f32.mrf.mxu0  ;;  %4591 = vmatmul.msk.bf16.vlgmr.msrb.gmra.mxu3 %vm463_vm0, %v3322_v2  ;;  %v3520_v2 = vrot.slane %v3518_v20, 1  ;;  %v4661_v16 = vor.u32 %v4804_v33, %v4660_v45 }
 0x1c6   : > { %v5478_v4 = vpop.f32.mrf.mxu2  ;;  %v2447_v26 = vpop.f32.mrf.mxu1  ;;  %3560 = vmatpush.bf16.xpose.msrb.mxu3 %v5439_v8  ;;  %v3432_v8 = vshrl.u32 %v4610_v25, 16  ;;  %v4640_v25 = vld [vmem:[#allocation2 + $0x18] sm:$0xf]  ;;  %v3594_v17 = vrot.slane %v3592_v58, 1  ;;  %v4665_v58 = vld [vmem:[#allocation2 + $0x40] sm:$0xf] }
 0x1c7   : > { %v3521_v7 = vor.u32 %v3520_v2, %v3516_v5  ;;  %v4641_v19 = vor.u32 %v4800_v14, %v4640_v25  ;;  %v3733_v51 = vshrl.u32 %v4661_v16, 16 }
 0x1c8   : > { %4596 = vmatmul.msk.bf16.vlgmr.msra.gmra.mxu0 %vm463_vm0, %v3350_v60  ;;  %v5485_v12 = vpop.f32.mrf.mxu3  ;;  %v3437_v28 = vor.u32 %v3436_v21, %v3432_v8  ;;  %v3595_v8 = vor.u32 %v3594_v17, %v3590_v9 }
 0x1c9   : > { %3609 = vmatpush.bf16.xpose.msra.mxu0 %v5482_v13  ;;  %v3621_v48 = vshrl.u32 %v4641_v19, 16 }
 0x1cd   : > { %v2522_v41 = vpop.f32.mrf.mxu0 }
 0x1ce   : > { %v2475_v24 = vpop.f32.mrf.mxu2  ;;  %v5488_v29 = vpop.f32.mrf.mxu1  ;;  %v4646_v41 = vor.u32 %v4801_v18, %v4645_v32 }
 0x1cf   : > { %v3623_v24 = vshll.u32 %v4641_v19, 16 }
 0x1d0   : > { %v2503_v30 = vpop.f32.mrf.mxu3  ;;  %v3651_v6 = vshll.u32 %v4646_v41, 16  ;;  %v3649_v34 = vshrl.u32 %v4646_v41, 16 }
 0x1d1   : > { %4601 = vmatmul.msk.bf16.vlgmr.msra.gmra.mxu1 %vm463_vm0, %v3381_v50  ;;  %v4673_v50 = vld [vmem:[%s5723_s2 + $0x1e] sm:$0x3]  ;;  %v3625_v63 = vrot.slane %v3623_v24, 1 }
 0x1d2   : > { %3637 = vmatpush.bf16.xpose.msra.mxu1 %v5482_v13  ;;  %v5520_v40 = vsel %vm463_vm0, %v4673_v50, 0 }
 0x1d3   : > { %4606 = vmatmul.msk.bf16.vlgmr.msra.gmra.mxu2 %vm463_vm0, %v3409_v27  ;;  %v4803_v27 = vld [vmem:[#allocation2 + $0x30] sm:$0x10]  ;;  %v3626_v0 = vor.u32 %v3625_v63, %v3621_v48 }
 0x1d4   : > { %3665 = vmatpush.bf16.xpose.msra.mxu2 %v5482_v13 }
 0x1d5   : > { %v5494_v10 = vpop.f32.mrf.mxu0  ;;  %4611 = vmatmul.msk.bf16.vlgmr.msra.gmra.mxu3 %vm463_vm0, %v3437_v28  ;;  %v4656_v28 = vor.u32 %v4803_v27, %v4655_v36 }
 0x1d6   : > { %v5497_v49 = vpop.f32.mrf.mxu2  ;;  %v2538_v55 = vpop.f32.mrf.mxu1  ;;  %3693 = vmatpush.bf16.xpose.msra.mxu3 %v5482_v13 }
 0x1d7   : > { %v3707_v38 = vshll.u32 %v4656_v28, 16  ;;  %v3705_v5 = vshrl.u32 %v4656_v28, 16 }
 0x1d8   : > { %4616 = vmatmul.msk.bf16.vlgmr.msrb.gmra.mxu0 %vm463_vm0, %v3465_v52  ;;  %v5501_v57 = vpop.f32.mrf.mxu3  ;;  %v3653_v52 = vrot.slane %v3651_v6, 1  ;;  %v4807_v6 = vld [vmem:[#allocation2 + $0x10] sm:$0x10] }
 0x1d9   : > { %3721 = vmatpush.bf16.xpose.msrb.mxu0 %v5482_v13  ;;  %v3709_v2 = vrot.slane %v3707_v38, 1 }
 0x1da   : > { %v3654_v44 = vor.u32 %v3653_v52, %v3649_v34 }
 0x1db   : > { %v3710_v14 = vor.u32 %v3709_v2, %v3705_v5  ;;  %v4686_v2 = vld [vmem:[#allocation2 + $0x20] sm:$0xe] }
 0x1dd   : > { %v2586_v11 = vpop.f32.mrf.mxu0 }
 0x1de   : > { %v2554_v60 = vpop.f32.mrf.mxu2  ;;  %v5504_v61 = vpop.f32.mrf.mxu1  ;;  %v4805_v11 = vld [vmem:[#allocation2 + $0x40] sm:$0x10] }
 0x1df   : > { %v4806_v60 = vld [vmem:[#allocation2 + $0x48] sm:$0x10]  ;;  %v4666_v25 = vor.u32 %v4805_v11, %v4665_v58  ;;  %v4809_v58 = vld [vmem:[#allocation2 + $0x20] sm:$0x10] }
 0x1e0   : > { %v2570_v26 = vpop.f32.mrf.mxu3  ;;  %v4671_v9 = vor.u32 %v4806_v60, %v4670_v3  ;;  %v4810_v60 = vld [vmem:[#allocation2 + $0x28] sm:$0x10] }
 0x1e1   : > { %4621 = vmatmul.msk.bf16.vlgmr.msrb.gmra.mxu1 %vm463_vm0, %v3493_v59  ;;  %v3735_v26 = vshll.u32 %v4661_v16, 16  ;;  %v3763_v18 = vshll.u32 %v4666_v25, 16  ;;  %v3761_v50 = vshrl.u32 %v4666_v25, 16  ;;  %v2537_v25 = vadd.f32 %v5488_v29, %v5448_v62 }
 0x1e2   : > { %3749 = vmatpush.bf16.xpose.msrb.mxu1 %v5482_v13  ;;  %v3791_v41 = vshll.u32 %v4671_v9, 16  ;;  %v3789_v36 = vshrl.u32 %v4671_v9, 16 }
 0x1e3   : > { %4626 = vmatmul.msk.bf16.vlgmr.msrb.gmra.mxu2 %vm463_vm0, %v3521_v7  ;;  %v3737_v35 = vrot.slane %v3735_v26, 1 }
 0x1e4   : > { %3777 = vmatpush.bf16.xpose.msrb.mxu2 %v5482_v13  ;;  %v3793_v27 = vrot.slane %v3791_v41, 1 }
 0x1e5   : > { %v5513_v21 = vpop.f32.mrf.mxu0  ;;  %4631 = vmatmul.msk.bf16.vlgmr.msrb.gmra.mxu3 %vm463_vm0, %v3549_v23 }
 0x1e6   : > { %v5516_v30 = vpop.f32.mrf.mxu2  ;;  %v2602_v47 = vpop.f32.mrf.mxu1  ;;  %3805 = vmatpush.bf16.xpose.msrb.mxu3 %v5482_v13  ;;  %v3677_v13 = vshrl.u32 %v4651_v1, 16  ;;  %v3738_v1 = vor.u32 %v3737_v35, %v3733_v51  ;;  %v3794_v38 = vor.u32 %v3793_v27, %v3789_v36  ;;  %v4696_v51 = vld [vmem:[#allocation2 + $0x30] sm:$0xe]  ;;  %v4811_v35 = vld [vmem:[#allocation2 + $0x30] sm:$0x10]  ;;  %v2585_v36 = vadd.f32 %v5494_v10, %v5456_v37 }
 0x1e7   : > { %v4676_v47 = vld [vmem:[#allocation2 + $0x10] sm:$0xe] }
 0x1e8   : > { %4637 = vmatmul.msk.bf16.vlgmr.msra.gmra.mxu0 %vm463_vm0, %v3595_v8  ;;  %v5523_v42 = vpop.f32.mrf.mxu3  ;;  %v3682_v59 = vor.u32 %v3681_v46, %v3677_v13  ;;  %v3765_v8 = vrot.slane %v3763_v18, 1  ;;  %v4677_v34 = vor.u32 %v4807_v6, %v4676_v47  ;;  %v5557_v46 = vld [vmem:[%s5724_s3] ss:$0 sm:$0xff]  ;;  %v2553_v47 = vadd.f32 %v5497_v49, %v5459_v39 }
 0x1e9   : > { %3856 = vmatpush.bf16.xpose.msra.mxu0 %v5520_v40 }
 0x1ea   : > { %v3766_v63 = vor.u32 %v3765_v8, %v3761_v50 }
 0x1ed   : > { %v2664_v22 = vpop.f32.mrf.mxu0 }
 0x1ee   : > { %v2618_v55 = vpop.f32.mrf.mxu2  ;;  %v5526_v20 = vpop.f32.mrf.mxu1  ;;  %v2521_v22 = vadd.f32 %v5475_v31, %v5434_v56 }
 0x1ef   : > { %v3842_v55 = vrot.slane %v4677_v34, 1  ;;  %v2779_v26 = vadd.f32 %v5526_v20, %v2537_v25 }
 0x1f0   : > { %v2634_v15 = vpop.f32.mrf.mxu3  ;;  %v2778_v13 = vadd.f32 %v5513_v21, %v2521_v22  ;;  %v4808_v21 = vld [vmem:[#allocation2 + $0x18] sm:$0x10]  ;;  %v4701_v22 = vld [vmem:[#allocation2 + $0x38] sm:$0xe] }
 0x1f1   : > { %4642 = vmatmul.msk.bf16.vlgmr.msra.gmra.mxu1 %vm463_vm0, %v3626_v0 }
 0x1f2   : > { %3878 = vmatpush.bf16.xpose.msra.mxu1 %v5520_v40 }
 0x1f3   : > { %4647 = vmatmul.msk.bf16.vlgmr.msra.gmra.mxu2 %vm463_vm0, %v3654_v44  ;;  %v4681_v44 = vld [vmem:[#allocation2 + $0x18] sm:$0xe] }
 0x1f4   : > { %3900 = vmatpush.bf16.xpose.msra.mxu2 %v5520_v40  ;;  %v4682_v11 = vor.u32 %v4808_v21, %v4681_v44  ;;  %v4711_v44 = vld [vmem:[#allocation2 + $0x48] sm:$0xe]  ;;  %v4814_v21 = vld [vmem:[#allocation2 + $0x48] sm:$0x10] }
 0x1f5   : > { %v5532_v7 = vpop.f32.mrf.mxu0  ;;  %4652 = vmatmul.msk.bf16.vlgmr.msra.gmra.mxu3 %vm463_vm0, %v3682_v59  ;;  %v4691_v59 = vld [vmem:[#allocation2 + $0x28] sm:$0xe] }
 0x1f6   : > { %v5535_v17 = vpop.f32.mrf.mxu2  ;;  %v2680_v32 = vpop.f32.mrf.mxu1  ;;  %3922 = vmatpush.bf16.xpose.msra.mxu3 %v5520_v40  ;;  %v3867_v18 = vrot.slane %v4682_v11, 1 }
 0x1f7   : > { %v2780_v34 = vadd.f32 %v5535_v17, %v2553_v47  ;;  %v4813_v17 = vld [vmem:[#allocation2 + $0x40] sm:$0x10] }
 0x1f8   : > { %4657 = vmatmul.msk.bf16.vlgmr.msrb.gmra.mxu0 %vm463_vm0, %v3710_v14  ;;  %v5539_v23 = vpop.f32.mrf.mxu3 }
 0x1f9   : > { %v2226_v19 = vpop.permute.xlu2 %2225  ;;  %3944 = vmatpush.bf16.xpose.msrb.mxu0 %v5520_v40 }
 0x1fa   : > { %2246 = vst.msk [vmem:[%s5228_s22 + $0x10] sm:$0xf] %vm2241_vm9, %v2226_v19  ;;  %v4692_v19 = vor.u32 %v4810_v60, %v4691_v59  ;;  %v4712_v60 = vor.u32 %v4814_v21, %v4711_v44 }
 0x1fc   : > { %v3911_v20 = vrot.slane %v4692_v19, 1 }
 0x1fd   : > { %v2728_v24 = vpop.f32.mrf.mxu0 }
 0x1fe   : > { %v2696_v28 = vpop.f32.mrf.mxu2  ;;  %v5544_v48 = vpop.f32.mrf.mxu1  ;;  %v4697_v24 = vor.u32 %v4811_v35, %v4696_v51 }
 0x1ff   : > { %v2782_v28 = vadd.f32 %v5532_v7, %v2585_v36 }
 0x200   : > { %v2712_v54 = vpop.f32.mrf.mxu3 }
 0x201   : > { %v2218_v52 = vpop.permute.xlu0 %2217  ;;  %4662 = vmatmul.msk.bf16.vlgmr.msrb.gmra.mxu1 %vm463_vm0, %v3738_v1  ;;  %v2569_v54 = vadd.f32 %v5501_v57, %v5463_v43  ;;  %v4706_v57 = vld [vmem:[#allocation2 + $0x40] sm:$0xe] }
 0x202   : > { %2242 = vst.msk [vmem:[%s5228_s22] sm:$0xf] %vm2241_vm9, %v2218_v52  ;;  %3966 = vmatpush.bf16.xpose.msrb.mxu1 %v5520_v40  ;;  %v4707_v59 = vor.u32 %v4813_v17, %v4706_v57 }
 0x203   : > { %4667 = vmatmul.msk.bf16.vlgmr.msrb.gmra.mxu2 %vm463_vm0, %v3766_v63  ;;  %v2228_v0 = vpop.permute.xlu2 %2227  ;;  %v3933_v63 = vrot.slane %v4697_v24, 1 }
 0x204   : > { %2247 = vst.msk [vmem:[%s5228_s22 + $0x14] sm:$0xf] %vm2241_vm9, %v2228_v0  ;;  %3988 = vmatpush.bf16.xpose.msrb.mxu2 %v5520_v40  ;;  %v4812_v0 = vld [vmem:[#allocation2 + $0x38] sm:$0x10]  ;;  %v3977_v51 = vrot.slane %v4707_v59, 1 }
 0x205   : > { %v2831_v56 = vpop.f32.mrf.mxu0  ;;  %4672 = vmatmul.msk.bf16.vlgmr.msrb.gmra.mxu3 %vm463_vm0, %v3794_v38 }
 0x206   : > { %v3031_v31 = vadd.f32 %v2831_v56, %v2778_v13  ;;  %v5563_v45 = vpop.f32.mrf.mxu2  ;;  %v2744_v33 = vpop.f32.mrf.mxu1  ;;  %4010 = vmatpush.bf16.xpose.msrb.mxu3 %v5520_v40  ;;  %v4687_v40 = vor.u32 %v4809_v58, %v4686_v2  ;;  %v2781_v13 = vadd.f32 %v5539_v23, %v2569_v54  ;;  %v2601_v23 = vadd.f32 %v5504_v61, %v5466_v53 }
 0x207   : > { %v4702_v33 = vor.u32 %v4812_v0, %v4701_v22 }
 0x208   : > { %v3043_v15 = vadd.f32 %v5557_v46, %v3031_v31  ;;  %4678 = vmatmul.msk.bf16.vlgmr.msra.gmra.mxu0 %vm463_vm0, %v3842_v55  ;;  %v5568_v5 = vpop.f32.mrf.mxu3  ;;  %v3889_v62 = vrot.slane %v4687_v40, 1 }
 0x20a   : > { %v3059_v16 = vmul.f32 0.2, %v3043_v15  ;;  %vm3051_vm10 = vcmp.ge.f32.partialorder %v3043_v15, 0.0  ;;  %v2220_v3 = vpop.permute.xlu0 %2219 }
 0x20b   : > { %2243 = vst.msk [vmem:[%s5228_s22 + $0x4] sm:$0xf] %vm2241_vm9, %v2220_v3 }
 0x20c   : > { %v3067_v14 = vsel %vm3051_vm10, %v3043_v15, %v3059_v16  ;;  %v2783_v16 = vadd.f32 %v5544_v48, %v2601_v23 }
 0x20d   : > { %v2833_v9 = vpop.f32.mrf.mxu0  ;;  %v3075_v32 = vpack.c.bf16 %v3067_v14, %v3067_v14 }
 0x20e   : > { %v2760_v41 = vpop.f32.mrf.mxu2  ;;  %v2859_v50 = vpop.f32.mrf.mxu1 }
 0x20f   : > { %3091 = vrot.lane.b32.xlu2 %v3075_v32, %s4879_s16  ;;  %v3032_v8 = vadd.f32 %v2859_v50, %v2779_v26  ;;  %v3955_v26 = vrot.slane %v4702_v33, 1  ;;  %v3999_v50 = vrot.slane %v4712_v60, 1 }
 0x210   : > { %v2776_v29 = vpop.f32.mrf.mxu3 }
 0x211   : > { %v3044_v1 = vadd.f32 %v5557_v46, %v3032_v8  ;;  %4683 = vmatmul.msk.bf16.vlgmr.msra.gmra.mxu1 %vm463_vm0, %v3867_v18 }
 0x212   : > { %v2222_v27 = vpop.permute.xlu1 %2221 }
 0x213   : > { %v3060_v6 = vmul.f32 0.2, %v3044_v1  ;;  %2244 = vst.msk [vmem:[%s5228_s22 + $0x8] sm:$0xf] %vm2241_vm9, %v2222_v27  ;;  %4688 = vmatmul.msk.bf16.vlgmr.msra.gmra.mxu2 %vm463_vm0, %v3889_v62  ;;  %vm3052_vm11 = vcmp.ge.f32.partialorder %v3044_v1, 0.0  ;;  %v2617_v62 = vadd.f32 %v5516_v30, %v5478_v4 }
 0x215   : > { %v2943_v52 = vpop.f32.mrf.mxu0  ;;  %4693 = vmatmul.msk.bf16.vlgmr.msra.gmra.mxu3 %vm463_vm0, %v3911_v20  ;;  %v3068_v37 = vsel %vm3052_vm11, %v3044_v1, %v3060_v6  ;;  %v2633_v1 = vadd.f32 %v5523_v42, %v5485_v12  ;;  %v2784_v20 = vadd.f32 %v5563_v45, %v2617_v62  ;;  %vm4100_vm11 = vcmask 126048  }
 0x216   : > { %v3035_v10 = vadd.f32 %v2943_v52, %v2782_v28  ;;  %v2887_v39 = vpop.f32.mrf.mxu2  ;;  %v2861_v49 = vpop.f32.mrf.mxu1  ;;  %v3076_v38 = vpack.c.bf16 %v3068_v37, %v3068_v37 }
 0x217   : > { %v3033_v55 = vadd.f32 %v2887_v39, %v2780_v34  ;;  %v2785_v6 = vadd.f32 %v5568_v5, %v2633_v1 }
 0x218   : > { %v3047_v7 = vadd.f32 %v5557_v46, %v3035_v10  ;;  %4698 = vmatmul.msk.bf16.vlgmr.msrb.gmra.mxu0 %vm463_vm0, %v3933_v63  ;;  %v2915_v43 = vpop.f32.mrf.mxu3  ;;  %3093 = vrot.lane.b32.xlu0 %v3076_v38, %s4879_s16 }
 0x219   : > { %v3045_v56 = vadd.f32 %v5557_v46, %v3033_v55  ;;  %v3034_v31 = vadd.f32 %v2915_v43, %v2781_v13 }
 0x21a   : > { %v3063_v15 = vmul.f32 0.2, %v3047_v7  ;;  %v2224_v2 = vpop.permute.xlu1 %2223  ;;  %vm3055_vm12 = vcmp.ge.f32.partialorder %v3047_v7, 0.0 }
 0x21b   : > { %v3061_v58 = vmul.f32 0.2, %v3045_v56  ;;  %v3046_v11 = vadd.f32 %v5557_v46, %v3034_v31  ;;  %2245 = vst.msk [vmem:[%s5228_s22 + $0xc] sm:$0xf] %vm2241_vm9, %v2224_v2  ;;  %vm3053_vm13 = vcmp.ge.f32.partialorder %v3045_v56, 0.0 }
 0x21c   : > { %v3071_v3 = vsel %vm3055_vm12, %v3047_v7, %v3063_v15 }
 0x21d   : > { %v3062_v25 = vmul.f32 0.2, %v3046_v11  ;;  %v2945_v40 = vpop.f32.mrf.mxu0  ;;  %v3069_v14 = vsel %vm3053_vm13, %v3045_v56, %v3061_v58  ;;  %vm3054_vm14 = vcmp.ge.f32.partialorder %v3046_v11, 0.0  ;;  %v3079_v32 = vpack.c.bf16 %v3071_v3, %v3071_v3 }
 0x21e   : > { %v2889_v53 = vpop.f32.mrf.mxu2  ;;  %v3077_v61 = vpack.c.bf16 %v3069_v14, %v3069_v14  ;;  %v2971_v9 = vpop.f32.mrf.mxu1 }
 0x21f   : > { %v3036_v18 = vadd.f32 %v2971_v9, %v2783_v16  ;;  %v3070_v19 = vsel %vm3054_vm14, %v3046_v11, %v3062_v25 }
 0x220   : > { %v2917_v35 = vpop.f32.mrf.mxu3  ;;  %3095 = vrot.lane.b32.xlu1 %v3077_v61, %s4879_s16  ;;  %v3078_v41 = vpack.c.bf16 %v3070_v19, %v3070_v19  ;;  %3099 = vrot.lane.b32.xlu0 %v3079_v32, %s4879_s16 }
 0x221   : > { %v3048_v48 = vadd.f32 %v5557_v46, %v3036_v18  ;;  %4703 = vmatmul.msk.bf16.vlgmr.msrb.gmra.mxu1 %vm463_vm0, %v3955_v26 }
 0x222   : > { %3097 = vrot.lane.b32.xlu2 %v3078_v41, %s4879_s16  ;;  %v2230_v8 = vpop.permute.xlu0 %2229 }
 0x223   : > { %v3064_v29 = vmul.f32 0.2, %v3048_v48  ;;  %2248 = vst.msk [vmem:[%s5228_s22 + $0x18] sm:$0xf] %vm2241_vm9, %v2230_v8  ;;  %4708 = vmatmul.msk.bf16.vlgmr.msrb.gmra.mxu2 %vm463_vm0, %v3977_v51  ;;  %vm3056_vm15 = vcmp.ge.f32.partialorder %v3048_v48, 0.0 }
 0x224   : > { %v2232_v24 = vpop.permute.xlu1 %2231 }
 0x225   : > { %v5614_v36 = vpop.f32.mrf.mxu0  ;;  %2249 = vst.msk [vmem:[%s5228_s22 + $0x1c] sm:$0xf] %vm2241_vm9, %v2232_v24  ;;  %4713 = vmatmul.msk.bf16.vlgmr.msrb.gmra.mxu3 %vm463_vm0, %v3999_v50  ;;  %v3072_v27 = vsel %vm3056_vm15, %v3048_v48, %v3064_v29 }
 0x226   : > { %v2999_v4 = vpop.f32.mrf.mxu2  ;;  %v2973_v30 = vpop.f32.mrf.mxu1  ;;  %v3080_v47 = vpack.c.bf16 %v3072_v27, %v3072_v27 }
 0x227   : > { %v3037_v28 = vadd.f32 %v2999_v4, %v2784_v20  ;;  %v5655_v4 = vld [vmem:[%s5724_s3] ss:$0 sm:$0xff] }
 0x228   : > { %v3027_v63 = vpop.f32.mrf.mxu3  ;;  %3101 = vrot.lane.b32.xlu1 %v3080_v47, %s4879_s16 }
 0x229   : > { %v3049_v12 = vadd.f32 %v5557_v46, %v3037_v28  ;;  %v3038_v42 = vadd.f32 %v3027_v63, %v2785_v6 }
 0x22b   : > { %v3065_v45 = vmul.f32 0.2, %v3049_v12  ;;  %v3050_v54 = vadd.f32 %v5557_v46, %v3038_v42  ;;  %vm3057_vm1 = vcmp.ge.f32.partialorder %v3049_v12, 0.0 }
 0x22d   : > { %v3066_v34 = vmul.f32 0.2, %v3050_v54  ;;  %v3183_v52 = vpop.f32.mrf.mxu0  ;;  %v3073_v37 = vsel %vm3057_vm1, %v3049_v12, %v3065_v45  ;;  %vm3058_vm0 = vcmp.ge.f32.partialorder %v3050_v54, 0.0 }
 0x22e   : > { %v3001_v10 = vpop.f32.mrf.mxu2  ;;  %v5623_v39 = vpop.f32.mrf.mxu1  ;;  %v3081_v49 = vpack.c.bf16 %v3073_v37, %v3073_v37 }
 0x22f   : > { %v3074_v5 = vsel %vm3058_vm0, %v3050_v54, %v3066_v34 }
 0x230   : > { %v3029_v38 = vpop.f32.mrf.mxu3  ;;  %3103 = vrot.lane.b32.xlu2 %v3081_v49, %s4879_s16  ;;  %v3082_v22 = vpack.c.bf16 %v3074_v5, %v3074_v5 }
 0x232   : > { %3105 = vrot.lane.b32.xlu0 %v3082_v22, %s4879_s16 }
 0x235   : > { %v5627_v0 = vpop.f32.mrf.mxu0 }
 0x236   : > { %v5629_v13 = vpop.f32.mrf.mxu2  ;;  %v3205_v46 = vpop.f32.mrf.mxu1 }
 0x238   : > { %v5631_v55 = vpop.f32.mrf.mxu3 }
 0x23d   : > { %v3271_v7 = vpop.f32.mrf.mxu0 }
 0x23e   : > { %v3227_v43 = vpop.f32.mrf.mxu2  ;;  %v5633_v57 = vpop.f32.mrf.mxu1 }
 0x240   : > { %v3249_v17 = vpop.f32.mrf.mxu3 }
 0x245   : > { %v3366_v56 = vpop.f32.mrf.mxu0 }
 0x246   : > { %v5635_v31 = vpop.f32.mrf.mxu2  ;;  %v3293_v33 = vpop.f32.mrf.mxu1  ;;  %v3367_v20 = vadd.f32 %v3366_v56, %v5614_v36 }
 0x248   : > { %v5637_v44 = vpop.f32.mrf.mxu3 }
 0x24d   : > { %v3368_v21 = vpop.f32.mrf.mxu0 }
 0x24e   : > { %v3315_v23 = vpop.f32.mrf.mxu2  ;;  %v3394_v15 = vpop.f32.mrf.mxu1 }
 0x24f   : > { %v3395_v54 = vadd.f32 %v3394_v15, %v5623_v39 }
 0x250   : > { %v3337_v2 = vpop.f32.mrf.mxu3 }
 0x255   : > { %v3478_v58 = vpop.f32.mrf.mxu0 }
 0x256   : > { %v3422_v11 = vpop.f32.mrf.mxu2  ;;  %v3396_v59 = vpop.f32.mrf.mxu1  ;;  %v3479_v39 = vadd.f32 %v3478_v58, %v5627_v0 }
 0x257   : > { %v3423_v17 = vadd.f32 %v3422_v11, %v5629_v13 }
 0x258   : > { %v3450_v16 = vpop.f32.mrf.mxu3 }
 0x259   : > { %v3451_v21 = vadd.f32 %v3450_v16, %v5631_v55 }
 0x25d   : > { %v3480_v3 = vpop.f32.mrf.mxu0 }
 0x25e   : > { %v3424_v60 = vpop.f32.mrf.mxu2  ;;  %v5639_v25 = vpop.f32.mrf.mxu1 }
 0x25f   : > { %v3507_v16 = vadd.f32 %v5639_v25, %v5633_v57 }
 0x260   : > { %v3452_v40 = vpop.f32.mrf.mxu3 }
 0x265   : > { %v3611_v14 = vpop.f32.mrf.mxu0 }
 0x266   : > { %v5641_v26 = vpop.f32.mrf.mxu2  ;;  %v3508_v53 = vpop.f32.mrf.mxu1  ;;  %v3811_v27 = vadd.f32 %v3611_v14, %v3367_v20 }
 0x268   : > { %v5643_v61 = vpop.f32.mrf.mxu3 }
 0x269   : > { %v3092_v9 = vpop.permute.xlu2 %3091 }
 0x26a   : > { %3116 = vst.msk [vmem:[%s5228_s22] sm:$0xf] %vm3115_vm2, %v3092_v9 }
 0x26d   : > { %v3613_v32 = vpop.f32.mrf.mxu0 }
 0x26e   : > { %v3536_v18 = vpop.f32.mrf.mxu2  ;;  %v3639_v19 = vpop.f32.mrf.mxu1 }
 0x26f   : > { %v3812_v52 = vadd.f32 %v3639_v19, %v3395_v54 }
 0x270   : > { %v3564_v51 = vpop.f32.mrf.mxu3 }
 0x275   : > { %v3723_v35 = vpop.f32.mrf.mxu0 }
 0x276   : > { %v3667_v41 = vpop.f32.mrf.mxu2  ;;  %v3641_v48 = vpop.f32.mrf.mxu1  ;;  %v3815_v33 = vadd.f32 %v3723_v35, %v3479_v39 }
 0x277   : > { %v3813_v23 = vadd.f32 %v3667_v41, %v3423_v17 }
 0x278   : > { %v3695_v50 = vpop.f32.mrf.mxu3 }
 0x279   : > { %v3814_v60 = vadd.f32 %v3695_v50, %v3451_v21 }
 0x27c   : > { %v3098_v8 = vpop.permute.xlu2 %3097 }
 0x27d   : > { %v3725_v62 = vpop.f32.mrf.mxu0  ;;  %3119 = vst.msk [vmem:[%s5228_s22 + $0xc] sm:$0xf] %vm3115_vm2, %v3098_v8 }
 0x27e   : > { %v3669_v29 = vpop.f32.mrf.mxu2  ;;  %v5649_v24 = vpop.f32.mrf.mxu1 }
 0x27f   : > { %v3816_v51 = vadd.f32 %v5649_v24, %v3507_v16  ;;  %v3535_v24 = vadd.f32 %v5641_v26, %v5635_v31 }
 0x280   : > { %v3697_v1 = vpop.f32.mrf.mxu3 }
 0x285   : > { %v3858_v30 = vpop.f32.mrf.mxu0 }
 0x286   : > { %v4016_v47 = vadd.f32 %v3858_v30, %v3811_v27  ;;  %v5657_v6 = vpop.f32.mrf.mxu2  ;;  %v3753_v28 = vpop.f32.mrf.mxu1 }
 0x287   : > { %v3563_v28 = vadd.f32 %v5643_v61, %v5637_v44 }
 0x288   : > { %v4028_v63 = vadd.f32 %v5655_v4, %v4016_v47  ;;  %v5660_v12 = vpop.f32.mrf.mxu3 }
 0x28a   : > { %v4044_v42 = vmul.f32 0.2, %v4028_v63  ;;  %vm4036_vm3 = vcmp.ge.f32.partialorder %v4028_v63, 0.0  ;;  %v3104_v45 = vpop.permute.xlu2 %3103  ;;  %v3094_v36 = vpop.permute.xlu0 %3093 }
 0x28b   : > { %3122 = vst.msk [vmem:[%s5228_s22 + $0x18] sm:$0xf] %vm3115_vm2, %v3104_v45 }
 0x28c   : > { %v4052_v34 = vsel %vm4036_vm3, %v4028_v63, %v4044_v42  ;;  %3117 = vst.msk [vmem:[%s5228_s22 + $0x4] sm:$0xf] %vm3115_vm2, %v3094_v36  ;;  %v3817_v63 = vadd.f32 %v5657_v6, %v3535_v24 }
 0x28d   : > { %v3860_v37 = vpop.f32.mrf.mxu0  ;;  %v4060_v10 = vpack.c.bf16 %v4052_v34, %v4052_v34  ;;  %v3818_v34 = vadd.f32 %v5660_v12, %v3563_v28 }
 0x28e   : > { %v3781_v49 = vpop.f32.mrf.mxu2  ;;  %v3880_v5 = vpop.f32.mrf.mxu1 }
 0x28f   : > { %4076 = vrot.lane.b32.xlu1 %v4060_v10, %s4880_s20  ;;  %v4017_v38 = vadd.f32 %v3880_v5, %v3812_v52 }
 0x290   : > { %v3809_v22 = vpop.f32.mrf.mxu3 }
 0x291   : > { %v4029_v46 = vadd.f32 %v5655_v4, %v4017_v38 }
 0x292   : > { %v3096_v7 = vpop.permute.xlu1 %3095  ;;  %v3100_v43 = vpop.permute.xlu0 %3099 }
 0x293   : > { %v4045_v56 = vmul.f32 0.2, %v4029_v46  ;;  %3118 = vst.msk [vmem:[%s5228_s22 + $0x8] sm:$0xf] %vm3115_vm2, %v3096_v7  ;;  %vm4037_vm4 = vcmp.ge.f32.partialorder %v4029_v46, 0.0 }
 0x294   : > { %3120 = vst.msk [vmem:[%s5228_s22 + $0x10] sm:$0xf] %vm3115_vm2, %v3100_v43 }
 0x295   : > { %v3946_v15 = vpop.f32.mrf.mxu0  ;;  %v4053_v2 = vsel %vm4037_vm4, %v4029_v46, %v4045_v56 }
 0x296   : > { %v4020_v59 = vadd.f32 %v3946_v15, %v3815_v33  ;;  %v3902_v3 = vpop.f32.mrf.mxu2  ;;  %v3882_v0 = vpop.f32.mrf.mxu1  ;;  %v4061_v58 = vpack.c.bf16 %v4053_v2, %v4053_v2 }
 0x297   : > { %v4018_v40 = vadd.f32 %v3902_v3, %v3813_v23 }
 0x298   : > { %v4032_v13 = vadd.f32 %v5655_v4, %v4020_v59  ;;  %v3924_v11 = vpop.f32.mrf.mxu3  ;;  %4078 = vrot.lane.b32.xlu2 %v4061_v58, %s4880_s20 }
 0x299   : > { %v4030_v14 = vadd.f32 %v5655_v4, %v4018_v40  ;;  %v4019_v53 = vadd.f32 %v3924_v11, %v3814_v60 }
 0x29a   : > { %v4048_v9 = vmul.f32 0.2, %v4032_v13  ;;  %v3102_v55 = vpop.permute.xlu1 %3101  ;;  %vm4040_vm5 = vcmp.ge.f32.partialorder %v4032_v13, 0.0 }
 0x29b   : > { %v4046_v32 = vmul.f32 0.2, %v4030_v14  ;;  %v4031_v18 = vadd.f32 %v5655_v4, %v4019_v53  ;;  %3121 = vst.msk [vmem:[%s5228_s22 + $0x14] sm:$0xf] %vm3115_vm2, %v3102_v55  ;;  %vm4038_vm6 = vcmp.ge.f32.partialorder %v4030_v14, 0.0 }
 0x29c   : > { %v4056_v19 = vsel %vm4040_vm5, %v4032_v13, %v4048_v9 }
 0x29d   : > { %v4047_v35 = vmul.f32 0.2, %v4031_v18  ;;  %vm4039_vm7 = vcmp.ge.f32.partialorder %v4031_v18, 0.0  ;;  %v4054_v41 = vsel %vm4038_vm6, %v4030_v14, %v4046_v32  ;;  %v3948_v48 = vpop.f32.mrf.mxu0  ;;  %v4064_v29 = vpack.c.bf16 %v4056_v19, %v4056_v19 }
 0x29e   : > { %v3904_v50 = vpop.f32.mrf.mxu2  ;;  %v3968_v8 = vpop.f32.mrf.mxu1  ;;  %v4062_v62 = vpack.c.bf16 %v4054_v41, %v4054_v41 }
 0x29f   : > { %v4021_v1 = vadd.f32 %v3968_v8, %v3816_v51  ;;  %v4055_v57 = vsel %vm4039_vm7, %v4031_v18, %v4047_v35 }
 0x2a0   : > { %v3926_v25 = vpop.f32.mrf.mxu3  ;;  %v4063_v20 = vpack.c.bf16 %v4055_v57, %v4055_v57  ;;  %4080 = vrot.lane.b32.xlu0 %v4062_v62, %s4880_s20  ;;  %4084 = vrot.lane.b32.xlu2 %v4064_v29, %s4880_s20 }
 0x2a1   : > { %v4033_v27 = vadd.f32 %v5655_v4, %v4021_v1 }
 0x2a2   : > { %4082 = vrot.lane.b32.xlu1 %v4063_v20, %s4880_s20 }
 0x2a3   : > { %v4049_v30 = vmul.f32 0.2, %v4033_v27  ;;  %vm4041_vm8 = vcmp.ge.f32.partialorder %v4033_v27, 0.0 }
 0x2a4   : > { %v3106_v47 = vpop.permute.xlu0 %3105 }
 0x2a5   : > { %3123 = vst.msk [vmem:[%s5228_s22 + $0x1c] sm:$0xf] %vm3115_vm2, %v3106_v47  ;;  %v4057_v42 = vsel %vm4041_vm8, %v4033_v27, %v4049_v30 }
 0x2a6   : > { %v3990_v45 = vpop.f32.mrf.mxu2  ;;  %v3970_v36 = vpop.f32.mrf.mxu1  ;;  %v4065_v54 = vpack.c.bf16 %v4057_v42, %v4057_v42 }
 0x2a7   : > { %v4022_v52 = vadd.f32 %v3990_v45, %v3817_v63 }
 0x2a8   : > { %v4012_v37 = vpop.f32.mrf.mxu3  ;;  %4086 = vrot.lane.b32.xlu0 %v4065_v54, %s4880_s20 }
 0x2a9   : > { %v4034_v31 = vadd.f32 %v5655_v4, %v4022_v52  ;;  %v4023_v26 = vadd.f32 %v4012_v37, %v3818_v34 }
 0x2ab   : > { %v4050_v10 = vmul.f32 0.2, %v4034_v31  ;;  %v4035_v44 = vadd.f32 %v5655_v4, %v4023_v26  ;;  %vm4042_vm9 = vcmp.ge.f32.partialorder %v4034_v31, 0.0 }
 0x2ad   : > { %v4051_v61 = vmul.f32 0.2, %v4035_v44  ;;  %v4058_v6 = vsel %vm4042_vm9, %v4034_v31, %v4050_v10  ;;  %vm4043_vm10 = vcmp.ge.f32.partialorder %v4035_v44, 0.0 }
 0x2ae   : > { %v3992_v49 = vpop.f32.mrf.mxu2  ;;  %v4066_v12 = vpack.c.bf16 %v4058_v6, %v4058_v6 }
 0x2af   : > { %v4059_v5 = vsel %vm4043_vm10, %v4035_v44, %v4051_v61 }
 0x2b0   : > { %4088 = vrot.lane.b32.xlu1 %v4066_v12, %s4880_s20  ;;  %v4067_v38 = vpack.c.bf16 %v4059_v5, %v4059_v5  ;;  %v4014_v22 = vpop.f32.mrf.mxu3 }
 0x2b2   : > { %4090 = vrot.lane.b32.xlu2 %v4067_v38, %s4880_s20 }
 0x2f2   : > { %v4079_v4 = vpop.permute.xlu2 %4078 }
 0x2f3   : > { %4102 = vst.msk [vmem:[%s5228_s22 + $0x4] sm:$0xf] %vm4100_vm11, %v4079_v4 }
 0x2fa   : > { %v4085_v46 = vpop.permute.xlu2 %4084 }
 0x2fb   : > { %4105 = vst.msk [vmem:[%s5228_s22 + $0x10] sm:$0xf] %vm4100_vm11, %v4085_v46 }
 0x301   : > { %v4077_v39 = vpop.permute.xlu1 %4076 }
 0x302   : > { %4101 = vst.msk [vmem:[%s5228_s22] sm:$0xf] %vm4100_vm11, %v4077_v39 }
 0x30c   : > { %v4091_v7 = vpop.permute.xlu2 %4090 }
 0x30d   : > { %4108 = vst.msk [vmem:[%s5228_s22 + $0x1c] sm:$0xf] %vm4100_vm11, %v4091_v7 }
 0x312   : > { %v4081_v43 = vpop.permute.xlu0 %4080 }
 0x313   : > { %4103 = vst.msk [vmem:[%s5228_s22 + $0x8] sm:$0xf] %vm4100_vm11, %v4081_v43 }
 0x314   : > { %v4083_v17 = vpop.permute.xlu1 %4082 }
 0x315   : > { %4104 = vst.msk [vmem:[%s5228_s22 + $0xc] sm:$0xf] %vm4100_vm11, %v4083_v17 }
 0x31a   : > { %v4087_v56 = vpop.permute.xlu0 %4086 }
 0x31b   : > { %4106 = vst.msk [vmem:[%s5228_s22 + $0x14] sm:$0xf] %vm4100_vm11, %v4087_v56 }
 0x322   : > { %v4089_v33 = vpop.permute.xlu1 %4088 }
 0x323   : > { %4107 = vst.msk [vmem:[%s5228_s22 + $0x18] sm:$0xf] %vm4100_vm11, %v4089_v33 }
 0x324 PF: > { %s14_s15 = sadd.s32 1, %s4875_s15  }
 0x325   : > { %p11_p4 = scmp.ge.s32.totalorder %s14_s15, 4  }
 0x327   :  { %13 = sbr.rel (!%p11_p4) target bundleno = 1 (0x1), region = 86 }

</bundles_post_ra>
